<compile_context>
chip_gen: v7x
topology: tpu7x:2x2x1
jax: 0.10.0
libtpu: 0.0.40
codegen_flags: <defaults>
</compile_context>

<pallas_src>
import functools
import math

import jax
import jax.numpy as jnp
from jax.experimental import pallas as pl
from jax.experimental.pallas import tpu as pltpu


# --------------------------- VMEM budget helpers ---------------------------

def _vmem_capacity_bytes():
    try:
        cap = int(pltpu.get_tpu_info().vmem_capacity_bytes)
    except Exception:
        cap = 64 * 1024 * 1024  # conservative (v7x physical)
    return max(16 * 1024 * 1024, min(cap, 128 * 1024 * 1024))


_VMEM_CAP = _vmem_capacity_bytes()
_VMEM_LIMIT = int(_VMEM_CAP * 3 // 4)          # scoped VMEM limit per kernel
_TILE_BUDGET = _VMEM_LIMIT // 2                # working-set budget per kernel


def _lane_tile(dim, cap):
    """Largest 128-multiple <= cap that divides dim, else the full dim."""
    for c in (2048, 1024, 512, 256, 128):
        if c <= cap and c <= dim and dim % c == 0:
            return c
    return dim


def _sublane_tile(dim, cap):
    """Largest 8-multiple <= cap that divides dim, else the full dim."""
    for c in (1024, 512, 256, 128, 64, 32, 16, 8):
        if c <= cap and c <= dim and dim % c == 0:
            return c
    return dim


def _pick_matmul_tiles(M, K, N, has_residual, budget):
    """(tm, tn, tk) — shrink until the double-buffered working set fits."""
    def ws(tm, tn, tk):
        db = 2
        b = db * (tm * tk * 2 + tk * tn * 2 + tn * 4 + tm * tn * 2)
        if has_residual:
            b += db * tm * tn * 2
        b += tm * tn * 4  # f32 accumulator scratch (single buffer)
        return b

    tm = tn = tk = None
    for cap in (512, 256, 128, 64, 32, 16, 8):
        tm = _sublane_tile(M, cap)
        tn = _lane_tile(N, max(cap, 128))
        tk = _lane_tile(K, max(2 * cap, 128))
        if ws(tm, tn, tk) <= budget:
            return tm, tn, tk
    return tm, tn, tk


def _pick_row_tile(M, H, in_bytes, out_bytes, budget):
    tm = None
    for cap in (1024, 512, 256, 128, 64, 32, 16, 8):
        tm = _sublane_tile(M, cap)
        ws = 2 * tm * H * (in_bytes + out_bytes) + 2 * 2 * H * 4
        if ws <= budget:
            return tm
    return tm


def _pick_kv_tile(T, GH, S, d, kv_itemsize, budget):
    fixed = (2 * GH * S * d * 2      # q (bf16, double buffered)
             + 2 * GH * S * d * 2    # out (bf16, double buffered)
             + GH * S * d * 4        # acc scratch
             + 2 * GH * S * 4)       # m, l scratch
    def ws(tkv):
        per = 2 * (GH * d * tkv * kv_itemsize + GH * tkv * d * kv_itemsize
                   + tkv * 4 + tkv * 4)
        return fixed + per
    for c in (2048, 1024, 512, 256, 128):
        if c <= T and T % c == 0 and ws(c) <= budget:
            return c
    # TODO(synk): pad T to a multiple of 128 (and mask) so awkward kv lengths
    # never force a full-extent kv tile.
    return T


# ----------------------------- Pallas kernels -----------------------------

def _matmul_bias_kernel(x_ref, w_ref, b_ref, *rest, activation, has_residual):
    if has_residual:
        res_ref, o_ref, acc_ref = rest
    else:
        res_ref = None
        o_ref, acc_ref = rest

    @pl.when(pl.program_id(2) == 0)
    def _():
        acc_ref[...] = jnp.zeros_like(acc_ref)

    x = x_ref[...]
    w = w_ref[...]
    if x.dtype != jnp.bfloat16:
        x = x.astype(jnp.bfloat16)
    if w.dtype != jnp.bfloat16:
        w = w.astype(jnp.bfloat16)
    acc_ref[...] += jnp.dot(x, w, preferred_element_type=jnp.float32)

    @pl.when(pl.program_id(2) == pl.num_programs(2) - 1)
    def _():
        acc = acc_ref[...] + b_ref[...].astype(jnp.float32)
        if activation == "gelu":
            # Bloom tanh-approx GELU (f32 math).
            acc = 0.5 * acc * (1.0 + jnp.tanh(
                0.79788456 * acc * (1.0 + 0.044715 * acc * acc)))
        if has_residual:
            acc = acc + res_ref[...].astype(jnp.float32)
        o_ref[...] = acc.astype(o_ref.dtype)


def matmul_bias(x, w, b, residual=None, activation="none",
                out_dtype=jnp.bfloat16):
    """x: [M, K] bf16, w: [K, N] bf16, b: [N] f32 -> [M, N] bf16.

    Tiled over (M, N, K); K innermost (reduction) with an f32 VMEM
    accumulator. Bias / GELU / residual are fused into the epilogue.
    """
    M, K = x.shape
    K2, N = w.shape
    assert K == K2
    has_res = residual is not None
    tm, tn, tk = _pick_matmul_tiles(M, K, N, has_res, _TILE_BUDGET)
    grid = (M // tm, N // tn, K // tk)

    in_specs = [
        pl.BlockSpec((tm, tk), lambda i, j, k: (i, k)),
        pl.BlockSpec((tk, tn), lambda i, j, k: (k, j)),
        pl.BlockSpec((1, tn), lambda i, j, k: (0, j)),
    ]
    args = [x, w, b.reshape(1, N)]
    if has_res:
        in_specs.append(pl.BlockSpec((tm, tn), lambda i, j, k: (i, j)))
        args.append(residual)

    return pl.pallas_call(
        functools.partial(_matmul_bias_kernel, activation=activation,
                          has_residual=has_res),
        out_shape=jax.ShapeDtypeStruct((M, N), out_dtype),
        grid=grid,
        in_specs=in_specs,
        out_specs=pl.BlockSpec((tm, tn), lambda i, j, k: (i, j)),
        scratch_shapes=[pltpu.VMEM((tm, tn), jnp.float32)],
        compiler_params=pltpu.CompilerParams(
            dimension_semantics=("parallel", "parallel", "arbitrary"),
            vmem_limit_bytes=_VMEM_LIMIT),
    )(*args)


def _layernorm_kernel(x_ref, g_ref, b_ref, o_ref, *, eps):
    x = x_ref[...].astype(jnp.float32)
    mean = jnp.mean(x, axis=-1, keepdims=True)
    var = jnp.mean(jnp.square(x - mean), axis=-1, keepdims=True)
    y = (x - mean) * jax.lax.rsqrt(var + eps)
    o_ref[...] = (y * g_ref[...] + b_ref[...]).astype(o_ref.dtype)


def layernorm(x, g, b, eps=1e-5, out_dtype=jnp.bfloat16):
    """x: [M, H] (any float), g/b: [H] f32 — row-tiled, bf16 output."""
    M, H = x.shape
    tm = _pick_row_tile(M, H, x.dtype.itemsize,
                        jnp.dtype(out_dtype).itemsize, _TILE_BUDGET)
    return pl.pallas_call(
        functools.partial(_layernorm_kernel, eps=eps),
        out_shape=jax.ShapeDtypeStruct((M, H), out_dtype),
        grid=(M // tm,),
        in_specs=[
            pl.BlockSpec((tm, H), lambda i: (i, 0)),
            pl.BlockSpec((1, H), lambda i: (0, 0)),
            pl.BlockSpec((1, H), lambda i: (0, 0)),
        ],
        out_specs=pl.BlockSpec((tm, H), lambda i: (i, 0)),
        compiler_params=pltpu.CompilerParams(
            dimension_semantics=("parallel",),
            vmem_limit_bytes=_VMEM_LIMIT),
    )(x, g.reshape(1, H), b.reshape(1, H))


def _flash_attention_kernel(q_ref, k_ref, v_ref, slopes_ref, am_ref, ar_ref,
                            o_ref, m_sc, l_sc, acc_sc, *, scale, past, tkv):
    """One (batch, head-group) tile, streaming one kv block per grid step."""
    t = pl.program_id(2)
    G, S, d = q_ref.shape

    @pl.when(t == 0)
    def _():
        m_sc[...] = jnp.full_like(m_sc, -1e30)
        l_sc[...] = jnp.zeros_like(l_sc)
        acc_sc[...] = jnp.zeros_like(acc_sc)

    q = q_ref[...]
    k = k_ref[...]
    v = v_ref[...]
    if q.dtype != jnp.bfloat16:
        q = q.astype(jnp.bfloat16)
    if k.dtype != jnp.bfloat16:
        k = k.astype(jnp.bfloat16)
    if v.dtype != jnp.bfloat16:
        v = v.astype(jnp.bfloat16)

    # scores = scale * q @ k   (K already in Bloom cache layout [G, d, TKV])
    s = jnp.einsum("gqd,gdk->gqk", q, k,
                   preferred_element_type=jnp.float32) * scale   # [G, S, TKV]

    # ALiBi bias built in-kernel (HF Bloom: slope[h] * key_position).
    slopes = slopes_ref[...]                       # [G, 1] f32
    ar = ar_ref[0]                                 # [1, TKV] f32
    s = s + slopes[:, :, None] * ar[None, :, :]

    # causal + padding mask built in-kernel from tiny inputs.
    q_pos = jax.lax.broadcasted_iota(jnp.int32, (S, tkv), 0) + past
    k_pos = jax.lax.broadcasted_iota(jnp.int32, (S, tkv), 1) + t * tkv
    am = am_ref[0]                                 # [1, TKV] int32
    allowed = (k_pos <= q_pos) & (am > 0)          # [S, TKV]
    s = jnp.where(allowed[None, :, :], s, -1e9)

    # Online softmax update.
    m_prev = m_sc[...]
    m_new = jnp.maximum(m_prev, jnp.max(s, axis=-1, keepdims=True))
    alpha = jnp.exp(m_prev - m_new)
    p = jnp.exp(s - m_new)
    l_sc[...] = alpha * l_sc[...] + jnp.sum(p, axis=-1, keepdims=True)
    acc_sc[...] = alpha * acc_sc[...] + jnp.einsum(
        "gqk,gkd->gqd", p.astype(jnp.bfloat16), v,
        preferred_element_type=jnp.float32)
    m_sc[...] = m_new

    @pl.when(t == pl.num_programs(2) - 1)
    def _():
        o_ref[...] = (acc_sc[...] *
                      pl.reciprocal(l_sc[...], approx=True)).astype(o_ref.dtype)


def attention(q, k, v, slopes, am3, arange3, scale, past, nh):
    """q: [BH, S, d], k: [BH, d, T], v: [BH, T, d] -> [BH, S, d] (bf16).

    slopes: [nh, 1] f32; am3: [B, 1, T] int32; arange3: [B, 1, T] f32.
    Grid = (batch, head-groups, kv-blocks); kv axis is the online-softmax
    reduction ("arbitrary"), batch and heads are "parallel".
    """
    BH, S, d = q.shape
    T = k.shape[2]
    B = BH // nh
    GH = 8 if nh % 8 == 0 else nh          # heads per grid step
    HG = nh // GH                          # head groups
    TKV = _pick_kv_tile(T, GH, S, d, k.dtype.itemsize, _TILE_BUDGET)
    grid = (B, HG, T // TKV)

    return pl.pallas_call(
        functools.partial(_flash_attention_kernel, scale=scale, past=past,
                          tkv=TKV),
        out_shape=jax.ShapeDtypeStruct((BH, S, d), jnp.bfloat16),
        grid=grid,
        in_specs=[
            pl.BlockSpec((GH, S, d), lambda b, h, t: (b * HG + h, 0, 0)),
            pl.BlockSpec((GH, d, TKV), lambda b, h, t: (b * HG + h, 0, t)),
            pl.BlockSpec((GH, TKV, d), lambda b, h, t: (b * HG + h, t, 0)),
            pl.BlockSpec((GH, 1), lambda b, h, t: (h, 0)),
            pl.BlockSpec((1, 1, TKV), lambda b, h, t: (b, 0, t)),
            pl.BlockSpec((1, 1, TKV), lambda b, h, t: (b, 0, t)),
        ],
        out_specs=pl.BlockSpec((GH, S, d), lambda b, h, t: (b * HG + h, 0, 0)),
        scratch_shapes=[
            pltpu.VMEM((GH, S, 1), jnp.float32),   # m
            pltpu.VMEM((GH, S, 1), jnp.float32),   # l
            pltpu.VMEM((GH, S, d), jnp.float32),   # acc
        ],
        compiler_params=pltpu.CompilerParams(
            dimension_semantics=("parallel", "parallel", "arbitrary"),
            vmem_limit_bytes=_VMEM_LIMIT),
    )(q, k, v, slopes, am3, arange3)


def _lm_head_kernel(x_ref, w_ref, o_ref):
    # x: [B, H] bf16, w (wte tile): [tv, H] bf16; transposed contraction.
    x = x_ref[...]
    w = w_ref[...]
    if x.dtype != jnp.bfloat16:
        x = x.astype(jnp.bfloat16)
    if w.dtype != jnp.bfloat16:
        w = w.astype(jnp.bfloat16)
    o_ref[...] = jax.lax.dot_general(x, w, (((1,), (1,)), ((), ())),
                                     preferred_element_type=jnp.float32)


def lm_head(x, wte):
    """x: [B, H] bf16, wte: [vocab, H] bf16 -> logits [B, vocab] f32."""
    B, H = x.shape
    V = wte.shape[0]
    tv = V
    for c in (1024, 512, 256, 128):
        if c <= V and V % c == 0:
            ws = 2 * (c * H * wte.dtype.itemsize + B * H * x.dtype.itemsize
                      + B * c * 4)
            if ws <= _TILE_BUDGET:
                tv = c
                break
    return pl.pallas_call(
        _lm_head_kernel,
        out_shape=jax.ShapeDtypeStruct((B, V), jnp.float32),
        grid=(V // tv,),
        in_specs=[
            pl.BlockSpec((B, H), lambda j: (0, 0)),
            pl.BlockSpec((tv, H), lambda j: (j, 0)),
        ],
        out_specs=pl.BlockSpec((B, tv), lambda j: (0, j)),
        compiler_params=pltpu.CompilerParams(
            dimension_semantics=("parallel",),
            vmem_limit_bytes=_VMEM_LIMIT),
    )(x, wte)


# ------------------------------- model glue --------------------------------

def alibi_slopes(n_head):
    closest = 2 ** math.floor(math.log2(n_head))
    base = 2.0 ** (-(2.0 ** -(math.log2(closest) - 3)))
    slopes = [base ** (i + 1) for i in range(closest)]
    if closest != n_head:
        extra_base = 2.0 ** (-(2.0 ** -(math.log2(2 * closest) - 3)))
        num_rem = min(closest, n_head - closest)
        slopes += [extra_base ** (2 * i + 1) for i in range(num_rem)]
    return jnp.asarray(slopes, dtype=jnp.float32)


def bloom_forward(params, input_ids, attention_mask, kv_caches, cfg):
    B, S = input_ids.shape
    H, nh, L = cfg["hidden"], cfg["n_head"], cfg["n_layer"]
    d = H // nh
    past = kv_caches[0].shape[2]
    total = past + S

    # Embedding lookup (gather, bf16 wte) + embedding layernorm.
    hidden = jnp.take(params["wte"], input_ids, axis=0)            # [B,S,H] bf16
    hidden = layernorm(hidden.reshape(B * S, H),
                       params["ln_emb_g"], params["ln_emb_b"])     # [B*S,H] bf16

    # Tiny per-(batch,key) inputs for the in-kernel ALiBi / mask construction.
    slopes = alibi_slopes(nh).reshape(nh, 1)                       # [nh, 1]
    am_f = attention_mask.astype(jnp.float32)                      # [B, total]
    arange = (jnp.cumsum(am_f, axis=-1) - 1.0) * am_f              # [B, total]
    am3 = attention_mask.astype(jnp.int32).reshape(B, 1, total)
    arange3 = arange.reshape(B, 1, total)

    scale = 1.0 / math.sqrt(d)
    new_caches = []
    for li in range(L):
        lp = params["layers"][li]

        # ---- self attention block ----
        residual = hidden                                          # [B*S,H] bf16
        ln1 = layernorm(residual, lp["ln1_g"], lp["ln1_b"])
        fused = matmul_bias(ln1, lp["w_qkv"], lp["b_qkv"])         # [B*S,3H] bf16
        fused = fused.reshape(B, S, nh, 3, d)
        q = fused[..., 0, :].transpose(0, 2, 1, 3).reshape(B * nh, S, d)
        k_new = fused[..., 1, :].transpose(0, 2, 3, 1).reshape(B * nh, d, S)
        v_new = fused[..., 2, :].transpose(0, 2, 1, 3).reshape(B * nh, S, d)

        # TODO(synk): replace the full-cache concat with an aliased in-place
        # writeback (input_output_aliases on a preallocated cache buffer) to
        # avoid the O(T) copy per layer; kept here because the wrapper must
        # return growing HF-style caches.
        k_full = jnp.concatenate([kv_caches[2 * li], k_new], axis=2)      # [BH,d,T]
        v_full = jnp.concatenate([kv_caches[2 * li + 1], v_new], axis=1)  # [BH,T,d]
        new_caches.extend([k_full, v_full])

        ctx = attention(q, k_full, v_full, slopes, am3, arange3,
                        scale, past, nh)
        ctx = ctx.reshape(B, nh, S, d).transpose(0, 2, 1, 3).reshape(B * S, H)
        # dense projection with residual add fused in the matmul epilogue
        hidden = matmul_bias(ctx, lp["w_dense"], lp["b_dense"],
                             residual=residual)

        # ---- MLP block ----
        residual2 = hidden
        ln2 = layernorm(residual2, lp["ln2_g"], lp["ln2_b"])
        h4 = matmul_bias(ln2, lp["w_fc1"], lp["b_fc1"], activation="gelu")
        hidden = matmul_bias(h4, lp["w_fc2"], lp["b_fc2"], residual=residual2)

    # Final layernorm, last-token slice, tied LM head (bf16 wte, no bias).
    hidden = layernorm(hidden, params["lnf_g"], params["lnf_b"])
    last = hidden.reshape(B, S, H)[:, -1, :]                       # [B, H] bf16
    logits = lm_head(last, params["wte"]).reshape(B, 1, -1)        # [B,1,vocab] f32

    # TODO(synk): args.add_topk_warper path (torch.topk) omitted — the
    # reference wrapper only enables it behind a flag; assumed False here.
    return (logits, *new_caches)


def init_params(key, vocab, H, nh, L):
    keys = jax.random.split(key, 2 + 4 * L)
    ki = iter(keys)

    def w_bf16(k, shape):
        return (jax.random.normal(k, shape, jnp.float32) * 0.02).astype(
            jnp.bfloat16)

    params = {
        # wte stored bf16: used for the embedding gather and the LM head.
        "wte": w_bf16(next(ki), (vocab, H)),
        "ln_emb_g": jnp.ones((H,), jnp.float32),
        "ln_emb_b": jnp.zeros((H,), jnp.float32),
        "lnf_g": jnp.ones((H,), jnp.float32),
        "lnf_b": jnp.zeros((H,), jnp.float32),
        "layers": [],
    }
    next(ki)  # spare key (keeps splitting deterministic)
    for _ in range(L):
        params["layers"].append({
            "ln1_g": jnp.ones((H,), jnp.float32),
            "ln1_b": jnp.zeros((H,), jnp.float32),
            "w_qkv": w_bf16(next(ki), (H, 3 * H)),
            "b_qkv": jnp.zeros((3 * H,), jnp.float32),
            "w_dense": w_bf16(next(ki), (H, H)),
            "b_dense": jnp.zeros((H,), jnp.float32),
            "ln2_g": jnp.ones((H,), jnp.float32),
            "ln2_b": jnp.zeros((H,), jnp.float32),
            "w_fc1": w_bf16(next(ki), (H, 4 * H)),
            "b_fc1": jnp.zeros((4 * H,), jnp.float32),
            "w_fc2": w_bf16(next(ki), (4 * H, H)),
            "b_fc2": jnp.zeros((H,), jnp.float32),
        })
    return params


if __name__ == "__main__":
    # Small, Bloom-consistent config (head_dim = 128 like real Bloom).
    vocab, H, nh, L = 256, 512, 4, 2
    d = H // nh
    B, S, past = 2, 4, 4
    cfg = {"hidden": H, "n_head": nh, "n_layer": L}

    root = jax.random.PRNGKey(0)
    kp, kid, kkv = jax.random.split(root, 3)
    params = init_params(kp, vocab, H, nh, L)

    input_ids = jax.random.randint(kid, (B, S), 0, vocab, dtype=jnp.int32)
    attention_mask = jnp.ones((B, past + S), dtype=jnp.int32)

    kv_caches = []
    kvkeys = jax.random.split(kkv, 2 * L)
    for li in range(L):
        kv_caches.append(
            (jax.random.normal(kvkeys[2 * li], (B * nh, d, past),
                               jnp.float32) * 0.1).astype(jnp.bfloat16))
        kv_caches.append(
            (jax.random.normal(kvkeys[2 * li + 1], (B * nh, past, d),
                               jnp.float32) * 0.1).astype(jnp.bfloat16))

    fwd = jax.jit(lambda p, ids, am, kv: bloom_forward(p, ids, am, kv, cfg))
    outputs = fwd(params, input_ids, attention_mask, kv_caches)
    outputs = jax.block_until_ready(outputs)

    lm_logits = outputs[0]
    assert lm_logits.shape == (B, 1, vocab)
    assert len(outputs) == 1 + 2 * L
    assert outputs[1].shape == (B * nh, d, past + S)   # key cache out
    assert outputs[2].shape == (B * nh, past + S, d)   # value cache out
    assert bool(jnp.all(jnp.isfinite(lm_logits)))
    print("KERNEL_OK")
</pallas_src>

<mosaic_0001>
module attributes {stable_mosaic.version = 11 : i64} {
  func.func @_layernorm_kernel(%arg0: i32, %arg1: memref<8x512xbf16, #tpu.memory_space<vmem>>, %arg2: memref<1x512xf32, #tpu.memory_space<vmem>>, %arg3: memref<1x512xf32, #tpu.memory_space<vmem>>, %arg4: memref<8x512xbf16, #tpu.memory_space<vmem>>) attributes {dimension_semantics = [#tpu.dimension_semantics<parallel>], iteration_bounds = array<i64: 1>, scalar_prefetch = 0 : i64, scratch_operands = 0 : i64, tpu.core_type = #tpu.core_type<tc>, window_params = [{transform_indices = @transform_0, window_bounds = array<i64: 8, 512>}, {pipeline_mode = #tpu.pipeline_mode<synchronous>, transform_indices = @transform_1, window_bounds = array<i64: 1, 512>}, {pipeline_mode = #tpu.pipeline_mode<synchronous>, transform_indices = @transform_2, window_bounds = array<i64: 1, 512>}, {transform_indices = @transform_3, window_bounds = array<i64: 8, 512>}]} {
    %c0 = arith.constant 0 : index
    %c0_0 = arith.constant 0 : index
    %0 = vector.load %arg1[%c0, %c0_0] : memref<8x512xbf16, #tpu.memory_space<vmem>>, vector<8x512xbf16>
    %1 = arith.extf %0 : vector<8x512xbf16> to vector<8x512xf32>
    %cst = arith.constant dense<0.000000e+00> : vector<8xf32>
    %2 = vector.multi_reduction <add>, %1, %cst [1] : vector<8x512xf32> to vector<8xf32>
    %3 = vector.shape_cast %2 : vector<8xf32> to vector<8x1xf32>
    %cst_1 = arith.constant 5.120000e+02 : f32
    %4 = vector.broadcast %cst_1 : f32 to vector<8x1xf32>
    %5 = arith.divf %3, %4 : vector<8x1xf32>
    %6 = vector.broadcast %5 : vector<8x1xf32> to vector<8x512xf32>
    %7 = arith.subf %1, %6 : vector<8x512xf32>
    %8 = arith.mulf %7, %7 : vector<8x512xf32>
    %cst_2 = arith.constant dense<0.000000e+00> : vector<8xf32>
    %9 = vector.multi_reduction <add>, %8, %cst_2 [1] : vector<8x512xf32> to vector<8xf32>
    %10 = vector.shape_cast %9 : vector<8xf32> to vector<8x1xf32>
    %cst_3 = arith.constant 5.120000e+02 : f32
    %11 = vector.broadcast %cst_3 : f32 to vector<8x1xf32>
    %12 = arith.divf %10, %11 : vector<8x1xf32>
    %13 = vector.broadcast %5 : vector<8x1xf32> to vector<8x512xf32>
    %14 = arith.subf %1, %13 : vector<8x512xf32>
    %cst_4 = arith.constant 9.99999974E-6 : f32
    %15 = vector.broadcast %cst_4 : f32 to vector<8x1xf32>
    %16 = arith.addf %12, %15 : vector<8x1xf32>
    %17 = math.rsqrt %16 : vector<8x1xf32>
    %18 = vector.broadcast %17 : vector<8x1xf32> to vector<8x512xf32>
    %19 = arith.mulf %14, %18 : vector<8x512xf32>
    %c0_5 = arith.constant 0 : index
    %c0_6 = arith.constant 0 : index
    %20 = vector.load %arg2[%c0_5, %c0_6] : memref<1x512xf32, #tpu.memory_space<vmem>>, vector<1x512xf32>
    %21 = vector.broadcast %20 : vector<1x512xf32> to vector<8x512xf32>
    %22 = arith.mulf %19, %21 : vector<8x512xf32>
    %c0_7 = arith.constant 0 : index
    %c0_8 = arith.constant 0 : index
    %23 = vector.load %arg3[%c0_7, %c0_8] : memref<1x512xf32, #tpu.memory_space<vmem>>, vector<1x512xf32>
    %24 = vector.broadcast %23 : vector<1x512xf32> to vector<8x512xf32>
    %25 = arith.addf %22, %24 : vector<8x512xf32>
    %26 = arith.truncf %25 : vector<8x512xf32> to vector<8x512xbf16>
    %c0_9 = arith.constant 0 : index
    %c0_10 = arith.constant 0 : index
    %27 = vector.load %arg4[%c0_9, %c0_10] : memref<8x512xbf16, #tpu.memory_space<vmem>>, vector<8x512xbf16>
    tpu.vector_store %arg4[%c0_9, %c0_10], %26 {strides = array<i32>} : memref<8x512xbf16, #tpu.memory_space<vmem>>, vector<8x512xbf16>,
    return
  }
  func.func @transform_0(%arg0: i32) -> (i32, i32) {
    %c0_i32 = arith.constant 0 : i32
    %c0_i32_0 = arith.constant 0 : i32
    return %arg0, %c0_i32 : i32, i32
  }
  func.func @transform_1(%arg0: i32) -> (i32, i32) {
    %c0_i32 = arith.constant 0 : i32
    %c0_i32_0 = arith.constant 0 : i32
    %c0_i32_1 = arith.constant 0 : i32
    return %c0_i32, %c0_i32_0 : i32, i32
  }
  func.func @transform_2(%arg0: i32) -> (i32, i32) {
    %c0_i32 = arith.constant 0 : i32
    %c0_i32_0 = arith.constant 0 : i32
    %c0_i32_1 = arith.constant 0 : i32
    return %c0_i32, %c0_i32_0 : i32, i32
  }
  func.func @transform_3(%arg0: i32) -> (i32, i32) {
    %c0_i32 = arith.constant 0 : i32
    %c0_i32_0 = arith.constant 0 : i32
    return %arg0, %c0_i32 : i32, i32
  }
}

module attributes {stable_mosaic.version = 11 : i64} {
  func.func @_matmul_bias_kernel(%arg0: i32, %arg1: i32, %arg2: i32, %arg3: memref<8x512xbf16, #tpu.memory_space<vmem>>, %arg4: memref<512x512xbf16, #tpu.memory_space<vmem>>, %arg5: memref<1x512xf32, #tpu.memory_space<vmem>>, %arg6: memref<8x512xbf16, #tpu.memory_space<vmem>>, %arg7: memref<8x512xf32, #tpu.memory_space<vmem>>) attributes {dimension_semantics = [#tpu.dimension_semantics<parallel>, #tpu.dimension_semantics<parallel>, #tpu.dimension_semantics<arbitrary>], iteration_bounds = array<i64: 1, 3, 1>, scalar_prefetch = 0 : i64, scratch_operands = 1 : i64, tpu.core_type = #tpu.core_type<tc>, window_params = [{transform_indices = @transform_0, window_bounds = array<i64: 8, 512>}, {transform_indices = @transform_1, window_bounds = array<i64: 512, 512>}, {transform_indices = @transform_2, window_bounds = array<i64: 1, 512>}, {transform_indices = @transform_3, window_bounds = array<i64: 8, 512>}]} {
    %c0_i32 = arith.constant 0 : i32
    %0 = arith.cmpi eq, %arg2, %c0_i32 : i32
    %1 = arith.extui %0 : i1 to i32
    %c0_i32_0 = arith.constant 0 : i32
    %2 = arith.cmpi ne, %1, %c0_i32_0 : i32
    scf.if %2 {
      %cst_10 = arith.constant 0.000000e+00 : f32
      %12 = vector.broadcast %cst_10 : f32 to vector<8x512xf32>
      %c0_11 = arith.constant 0 : index
      %c0_12 = arith.constant 0 : index
      %13 = vector.load %arg7[%c0_11, %c0_12] : memref<8x512xf32, #tpu.memory_space<vmem>>, vector<8x512xf32>
      tpu.vector_store %arg7[%c0_11, %c0_12], %12 {strides = array<i32>} : memref<8x512xf32, #tpu.memory_space<vmem>>, vector<8x512xf32>,
    } else {
    }
    %c0 = arith.constant 0 : index
    %c0_1 = arith.constant 0 : index
    %3 = vector.load %arg3[%c0, %c0_1] : memref<8x512xbf16, #tpu.memory_space<vmem>>, vector<8x512xbf16>
    %c0_2 = arith.constant 0 : index
    %c0_3 = arith.constant 0 : index
    %4 = vector.load %arg4[%c0_2, %c0_3] : memref<512x512xbf16, #tpu.memory_space<vmem>>, vector<512x512xbf16>
    %c0_4 = arith.constant 0 : index
    %c0_5 = arith.constant 0 : index
    %5 = vector.load %arg7[%c0_4, %c0_5] : memref<8x512xf32, #tpu.memory_space<vmem>>, vector<8x512xf32>
    %cst = arith.constant dense<0.000000e+00> : vector<8x512xf32>
    %6 = tpu.matmul %3, %4, %cst {dimension_numbers = #tpu.dot_dimension_numbers<[1], [0], [0], [1], [0, 0, 1, 1], [], []>} : vector<8x512xbf16>, vector<512x512xbf16>, vector<8x512xf32> -> vector<8x512xf32>
    %7 = arith.addf %5, %6 : vector<8x512xf32>
    %c0_6 = arith.constant 0 : index
    %c0_7 = arith.constant 0 : index
    %8 = vector.load %arg7[%c0_6, %c0_7] : memref<8x512xf32, #tpu.memory_space<vmem>>, vector<8x512xf32>
    tpu.vector_store %arg7[%c0_6, %c0_7], %7 {strides = array<i32>} : memref<8x512xf32, #tpu.memory_space<vmem>>, vector<8x512xf32>,
    %c0_i32_8 = arith.constant 0 : i32
    %9 = arith.cmpi eq, %arg2, %c0_i32_8 : i32
    %10 = arith.extui %9 : i1 to i32
    %c0_i32_9 = arith.constant 0 : i32
    %11 = arith.cmpi ne, %10, %c0_i32_9 : i32
    scf.if %11 {
      %c0_10 = arith.constant 0 : index
      %c0_11 = arith.constant 0 : index
      %12 = vector.load %arg7[%c0_10, %c0_11] : memref<8x512xf32, #tpu.memory_space<vmem>>, vector<8x512xf32>
      %c0_12 = arith.constant 0 : index
      %c0_13 = arith.constant 0 : index
      %13 = vector.load %arg5[%c0_12, %c0_13] : memref<1x512xf32, #tpu.memory_space<vmem>>, vector<1x512xf32>
      %14 = vector.broadcast %13 : vector<1x512xf32> to vector<8x512xf32>
      %15 = arith.addf %12, %14 : vector<8x512xf32>
      %16 = arith.truncf %15 : vector<8x512xf32> to vector<8x512xbf16>
      %c0_14 = arith.constant 0 : index
      %c0_15 = arith.constant 0 : index
      %17 = vector.load %arg6[%c0_14, %c0_15] : memref<8x512xbf16, #tpu.memory_space<vmem>>, vector<8x512xbf16>
      tpu.vector_store %arg6[%c0_14, %c0_15], %16 {strides = array<i32>} : memref<8x512xbf16, #tpu.memory_space<vmem>>, vector<8x512xbf16>,
    } else {
    }
    return
  }
  func.func @transform_0(%arg0: i32, %arg1: i32, %arg2: i32) -> (i32, i32) {
    %c0_i32 = arith.constant 0 : i32
    return %arg0, %arg2 : i32, i32
  }
  func.func @transform_1(%arg0: i32, %arg1: i32, %arg2: i32) -> (i32, i32) {
    %c0_i32 = arith.constant 0 : i32
    return %arg2, %arg1 : i32, i32
  }
  func.func @transform_2(%arg0: i32, %arg1: i32, %arg2: i32) -> (i32, i32) {
    %c0_i32 = arith.constant 0 : i32
    %c0_i32_0 = arith.constant 0 : i32
    return %c0_i32, %arg1 : i32, i32
  }
  func.func @transform_3(%arg0: i32, %arg1: i32, %arg2: i32) -> (i32, i32) {
    %c0_i32 = arith.constant 0 : i32
    return %arg0, %arg1 : i32, i32
  }
}

module attributes {stable_mosaic.version = 11 : i64} {
  func.func @_flash_attention_kernel(%arg0: i32, %arg1: i32, %arg2: i32, %arg3: memref<4x4x128xbf16, #tpu.memory_space<vmem>>, %arg4: memref<4x128x8xbf16, #tpu.memory_space<vmem>>, %arg5: memref<4x8x128xbf16, #tpu.memory_space<vmem>>, %arg6: memref<4x1xf32, #tpu.memory_space<vmem>>, %arg7: memref<1x1x8xi32, #tpu.memory_space<vmem>>, %arg8: memref<1x1x8xf32, #tpu.memory_space<vmem>>, %arg9: memref<4x4x128xbf16, #tpu.memory_space<vmem>>, %arg10: memref<4x4x1xf32, #tpu.memory_space<vmem>>, %arg11: memref<4x4x1xf32, #tpu.memory_space<vmem>>, %arg12: memref<4x4x128xf32, #tpu.memory_space<vmem>>) attributes {dimension_semantics = [#tpu.dimension_semantics<parallel>, #tpu.dimension_semantics<parallel>, #tpu.dimension_semantics<arbitrary>], iteration_bounds = array<i64: 2, 1, 1>, scalar_prefetch = 0 : i64, scratch_operands = 3 : i64, tpu.core_type = #tpu.core_type<tc>, window_params = [{transform_indices = @transform_0, window_bounds = array<i64: 4, 4, 128>}, {transform_indices = @transform_1, window_bounds = array<i64: 4, 128, 8>}, {transform_indices = @transform_2, window_bounds = array<i64: 4, 8, 128>}, {transform_indices = @transform_3, window_bounds = array<i64: 4, 1>}, {transform_indices = @transform_4, window_bounds = array<i64: 1, 1, 8>}, {transform_indices = @transform_5, window_bounds = array<i64: 1, 1, 8>}, {transform_indices = @transform_6, window_bounds = array<i64: 4, 4, 128>}]} {
    %c0_i32 = arith.constant 0 : i32
    %0 = arith.cmpi eq, %arg2, %c0_i32 : i32
    %1 = arith.extui %0 : i1 to i32
    %c0_i32_0 = arith.constant 0 : i32
    %2 = arith.cmpi ne, %1, %c0_i32_0 : i32
    scf.if %2 {
      %cst_43 = arith.constant -1.000000e+30 : f32
      %64 = vector.broadcast %cst_43 : f32 to vector<4x4x1xf32>
      %c0_44 = arith.constant 0 : index
      %c0_45 = arith.constant 0 : index
      %c0_46 = arith.constant 0 : index
      %65 = vector.load %arg10[%c0_44, %c0_45, %c0_46] : memref<4x4x1xf32, #tpu.memory_space<vmem>>, vector<4x4x1xf32>
      tpu.vector_store %arg10[%c0_44, %c0_45, %c0_46], %64 {strides = array<i32>} : memref<4x4x1xf32, #tpu.memory_space<vmem>>, vector<4x4x1xf32>,
      %cst_47 = arith.constant 0.000000e+00 : f32
      %66 = vector.broadcast %cst_47 : f32 to vector<4x4x1xf32>
      %c0_48 = arith.constant 0 : index
      %c0_49 = arith.constant 0 : index
      %c0_50 = arith.constant 0 : index
      %67 = vector.load %arg11[%c0_48, %c0_49, %c0_50] : memref<4x4x1xf32, #tpu.memory_space<vmem>>, vector<4x4x1xf32>
      tpu.vector_store %arg11[%c0_48, %c0_49, %c0_50], %66 {strides = array<i32>} : memref<4x4x1xf32, #tpu.memory_space<vmem>>, vector<4x4x1xf32>,
      %cst_51 = arith.constant 0.000000e+00 : f32
      %68 = vector.broadcast %cst_51 : f32 to vector<4x4x128xf32>
      %c0_52 = arith.constant 0 : index
      %c0_53 = arith.constant 0 : index
      %c0_54 = arith.constant 0 : index
      %69 = vector.load %arg12[%c0_52, %c0_53, %c0_54] : memref<4x4x128xf32, #tpu.memory_space<vmem>>, vector<4x4x128xf32>
      tpu.vector_store %arg12[%c0_52, %c0_53, %c0_54], %68 {strides = array<i32>} : memref<4x4x128xf32, #tpu.memory_space<vmem>>, vector<4x4x128xf32>,
    } else {
    }
    %c0 = arith.constant 0 : index
    %c0_1 = arith.constant 0 : index
    %c0_2 = arith.constant 0 : index
    %3 = vector.load %arg3[%c0, %c0_1, %c0_2] : memref<4x4x128xbf16, #tpu.memory_space<vmem>>, vector<4x4x128xbf16>
    %c0_3 = arith.constant 0 : index
    %c0_4 = arith.constant 0 : index
    %c0_5 = arith.constant 0 : index
    %4 = vector.load %arg4[%c0_3, %c0_4, %c0_5] : memref<4x128x8xbf16, #tpu.memory_space<vmem>>, vector<4x128x8xbf16>
    %c0_6 = arith.constant 0 : index
    %c0_7 = arith.constant 0 : index
    %c0_8 = arith.constant 0 : index
    %5 = vector.load %arg5[%c0_6, %c0_7, %c0_8] : memref<4x8x128xbf16, #tpu.memory_space<vmem>>, vector<4x8x128xbf16>
    "tpu.trace_start"() <{level = 10 : i32, message = "gqd,gdk->gqk"}> : () -> ()
    %cst = arith.constant dense<0.000000e+00> : vector<4x4x8xf32>
    %6 = tpu.matmul %3, %4, %cst {dimension_numbers = #tpu.dot_dimension_numbers<[2], [1], [1], [2], [0, 0, 0, 1, 1, 2], [0], [0]>} : vector<4x4x128xbf16>, vector<4x128x8xbf16>, vector<4x4x8xf32> -> vector<4x4x8xf32>
    "tpu.trace_stop"() : () -> ()
    %cst_9 = arith.constant 0.0883883461 : f32
    %7 = vector.broadcast %cst_9 : f32 to vector<4x4x8xf32>
    %8 = arith.mulf %6, %7 : vector<4x4x8xf32>
    %c0_10 = arith.constant 0 : index
    %c0_11 = arith.constant 0 : index
    %9 = vector.load %arg6[%c0_10, %c0_11] : memref<4x1xf32, #tpu.memory_space<vmem>>, vector<4x1xf32>
    %c0_12 = arith.constant 0 : index
    %c0_13 = arith.constant 0 : index
    %c0_14 = arith.constant 0 : index
    %10 = vector.load %arg8[%c0_12, %c0_13, %c0_14] : memref<1x1x8xf32, #tpu.memory_space<vmem>>, vector<1x1x8xf32>
    %11 = vector.shape_cast %10 : vector<1x1x8xf32> to vector<1x8xf32>
    %12 = vector.shape_cast %9 : vector<4x1xf32> to vector<4x1x1xf32>
    %13 = vector.shape_cast %11 : vector<1x8xf32> to vector<1x1x8xf32>
    %14 = vector.broadcast %12 : vector<4x1x1xf32> to vector<4x1x8xf32>
    %15 = vector.broadcast %13 : vector<1x1x8xf32> to vector<4x1x8xf32>
    %16 = arith.mulf %14, %15 : vector<4x1x8xf32>
    %17 = vector.broadcast %16 : vector<4x1x8xf32> to vector<4x4x8xf32>
    %18 = arith.addf %8, %17 : vector<4x4x8xf32>
    %19 = tpu.iota {dimensions = array<i32: 0>} : vector<4x8xi32>
    %c4_i32 = arith.constant 4 : i32
    %20 = vector.broadcast %c4_i32 : i32 to vector<4x8xi32>
    %21 = arith.addi %19, %20 : vector<4x8xi32>
    %22 = tpu.iota {dimensions = array<i32: 1>} : vector<4x8xi32>
    %c8_i32 = arith.constant 8 : i32
    %23 = arith.muli %arg2, %c8_i32 : i32
    %24 = vector.broadcast %23 : i32 to vector<4x8xi32>
    %25 = arith.addi %22, %24 : vector<4x8xi32>
    %c0_15 = arith.constant 0 : index
    %c0_16 = arith.constant 0 : index
    %c0_17 = arith.constant 0 : index
    %26 = vector.load %arg7[%c0_15, %c0_16, %c0_17] : memref<1x1x8xi32, #tpu.memory_space<vmem>>, vector<1x1x8xi32>
    %27 = vector.shape_cast %26 : vector<1x1x8xi32> to vector<1x8xi32>
    %28 = arith.cmpi sle, %25, %21 : vector<4x8xi32>
    %c0_i32_18 = arith.constant 0 : i32
    %29 = vector.broadcast %c0_i32_18 : i32 to vector<1x8xi32>
    %30 = arith.cmpi sgt, %27, %29 : vector<1x8xi32>
    %31 = vector.broadcast %30 : vector<1x8xi1> to vector<4x8xi1>
    %32 = arith.andi %28, %31 : vector<4x8xi1>
    %33 = vector.shape_cast %32 : vector<4x8xi1> to vector<1x4x8xi1>
    %cst_19 = arith.constant -1.000000e+09 : f32
    %34 = vector.shape_cast %33 : vector<1x4x8xi1> to vector<1x4x8xi1>
    %35 = vector.broadcast %34 : vector<1x4x8xi1> to vector<4x4x8xi1>
    %36 = vector.broadcast %cst_19 : f32 to vector<4x4x8xf32>
    %37 = arith.select %35, %18, %36 : vector<4x4x8xi1>, vector<4x4x8xf32>
    %c0_20 = arith.constant 0 : index
    %c0_21 = arith.constant 0 : index
    %c0_22 = arith.constant 0 : index
    %38 = vector.load %arg10[%c0_20, %c0_21, %c0_22] : memref<4x4x1xf32, #tpu.memory_space<vmem>>, vector<4x4x1xf32>
    %cst_23 = arith.constant dense<0xFF800000> : vector<4x4xf32>
    %39 = vector.multi_reduction <maximumf>, %37, %cst_23 [2] : vector<4x4x8xf32> to vector<4x4xf32>
    %40 = vector.shape_cast %39 : vector<4x4xf32> to vector<4x4x1xf32>
    %41 = arith.maximumf %38, %40 : vector<4x4x1xf32>
    %42 = arith.subf %38, %41 : vector<4x4x1xf32>
    %43 = math.exp %42 : vector<4x4x1xf32>
    %44 = vector.broadcast %41 : vector<4x4x1xf32> to vector<4x4x8xf32>
    %45 = arith.subf %37, %44 : vector<4x4x8xf32>
    %46 = math.exp %45 : vector<4x4x8xf32>
    %c0_24 = arith.constant 0 : index
    %c0_25 = arith.constant 0 : index
    %c0_26 = arith.constant 0 : index
    %47 = vector.load %arg11[%c0_24, %c0_25, %c0_26] : memref<4x4x1xf32, #tpu.memory_space<vmem>>, vector<4x4x1xf32>
    %48 = arith.mulf %43, %47 : vector<4x4x1xf32>
    %cst_27 = arith.constant dense<0.000000e+00> : vector<4x4xf32>
    %49 = vector.multi_reduction <add>, %46, %cst_27 [2] : vector<4x4x8xf32> to vector<4x4xf32>
    %50 = vector.shape_cast %49 : vector<4x4xf32> to vector<4x4x1xf32>
    %51 = arith.addf %48, %50 : vector<4x4x1xf32>
    %c0_28 = arith.constant 0 : index
    %c0_29 = arith.constant 0 : index
    %c0_30 = arith.constant 0 : index
    %52 = vector.load %arg11[%c0_28, %c0_29, %c0_30] : memref<4x4x1xf32, #tpu.memory_space<vmem>>, vector<4x4x1xf32>
    tpu.vector_store %arg11[%c0_28, %c0_29, %c0_30], %51 {strides = array<i32>} : memref<4x4x1xf32, #tpu.memory_space<vmem>>, vector<4x4x1xf32>,
    %c0_31 = arith.constant 0 : index
    %c0_32 = arith.constant 0 : index
    %c0_33 = arith.constant 0 : index
    %53 = vector.load %arg12[%c0_31, %c0_32, %c0_33] : memref<4x4x128xf32, #tpu.memory_space<vmem>>, vector<4x4x128xf32>
    %54 = vector.broadcast %43 : vector<4x4x1xf32> to vector<4x4x128xf32>
    %55 = arith.mulf %54, %53 : vector<4x4x128xf32>
    %56 = arith.truncf %46 : vector<4x4x8xf32> to vector<4x4x8xbf16>
    "tpu.trace_start"() <{level = 10 : i32, message = "gqk,gkd->gqd"}> : () -> ()
    %cst_34 = arith.constant dense<0.000000e+00> : vector<4x4x128xf32>
    %57 = tpu.matmul %56, %5, %cst_34 {dimension_numbers = #tpu.dot_dimension_numbers<[2], [1], [1], [2], [0, 0, 0, 1, 1, 2], [0], [0]>} : vector<4x4x8xbf16>, vector<4x8x128xbf16>, vector<4x4x128xf32> -> vector<4x4x128xf32>
    "tpu.trace_stop"() : () -> ()
    %58 = arith.addf %55, %57 : vector<4x4x128xf32>
    %c0_35 = arith.constant 0 : index
    %c0_36 = arith.constant 0 : index
    %c0_37 = arith.constant 0 : index
    %59 = vector.load %arg12[%c0_35, %c0_36, %c0_37] : memref<4x4x128xf32, #tpu.memory_space<vmem>>, vector<4x4x128xf32>
    tpu.vector_store %arg12[%c0_35, %c0_36, %c0_37], %58 {strides = array<i32>} : memref<4x4x128xf32, #tpu.memory_space<vmem>>, vector<4x4x128xf32>,
    %c0_38 = arith.constant 0 : index
    %c0_39 = arith.constant 0 : index
    %c0_40 = arith.constant 0 : index
    %60 = vector.load %arg10[%c0_38, %c0_39, %c0_40] : memref<4x4x1xf32, #tpu.memory_space<vmem>>, vector<4x4x1xf32>
    tpu.vector_store %arg10[%c0_38, %c0_39, %c0_40], %41 {strides = array<i32>} : memref<4x4x1xf32, #tpu.memory_space<vmem>>, vector<4x4x1xf32>,
    %c0_i32_41 = arith.constant 0 : i32
    %61 = arith.cmpi eq, %arg2, %c0_i32_41 : i32
    %62 = arith.extui %61 : i1 to i32
    %c0_i32_42 = arith.constant 0 : i32
    %63 = arith.cmpi ne, %62, %c0_i32_42 : i32
    scf.if %63 {
      %c0_43 = arith.constant 0 : index
      %c0_44 = arith.constant 0 : index
      %c0_45 = arith.constant 0 : index
      %64 = vector.load %arg12[%c0_43, %c0_44, %c0_45] : memref<4x4x128xf32, #tpu.memory_space<vmem>>, vector<4x4x128xf32>
      %c0_46 = arith.constant 0 : index
      %c0_47 = arith.constant 0 : index
      %c0_48 = arith.constant 0 : index
      %65 = vector.load %arg11[%c0_46, %c0_47, %c0_48] : memref<4x4x1xf32, #tpu.memory_space<vmem>>, vector<4x4x1xf32>
      %66 = tpu.reciprocal %65 {approx = true} : vector<4x4x1xf32> -> vector<4x4x1xf32>
      %67 = vector.broadcast %66 : vector<4x4x1xf32> to vector<4x4x128xf32>
      %68 = arith.mulf %64, %67 : vector<4x4x128xf32>
      %69 = arith.truncf %68 : vector<4x4x128xf32> to vector<4x4x128xbf16>
      %c0_49 = arith.constant 0 : index
      %c0_50 = arith.constant 0 : index
      %c0_51 = arith.constant 0 : index
      %70 = vector.load %arg9[%c0_49, %c0_50, %c0_51] : memref<4x4x128xbf16, #tpu.memory_space<vmem>>, vector<4x4x128xbf16>
      tpu.vector_store %arg9[%c0_49, %c0_50, %c0_51], %69 {strides = array<i32>} : memref<4x4x128xbf16, #tpu.memory_space<vmem>>, vector<4x4x128xbf16>,
    } else {
    }
    return
  }
  func.func @transform_0(%arg0: i32, %arg1: i32, %arg2: i32) -> (i32, i32, i32) {
    %c1_i32 = arith.constant 1 : i32
    %0 = arith.muli %arg0, %c1_i32 : i32
    %1 = arith.addi %0, %arg1 : i32
    %c0_i32 = arith.constant 0 : i32
    %c0_i32_0 = arith.constant 0 : i32
    %c0_i32_1 = arith.constant 0 : i32
    return %1, %c0_i32, %c0_i32_0 : i32, i32, i32
  }
  func.func @transform_1(%arg0: i32, %arg1: i32, %arg2: i32) -> (i32, i32, i32) {
    %c1_i32 = arith.constant 1 : i32
    %0 = arith.muli %arg0, %c1_i32 : i32
    %1 = arith.addi %0, %arg1 : i32
    %c0_i32 = arith.constant 0 : i32
    %c0_i32_0 = arith.constant 0 : i32
    return %1, %c0_i32, %arg2 : i32, i32, i32
  }
  func.func @transform_2(%arg0: i32, %arg1: i32, %arg2: i32) -> (i32, i32, i32) {
    %c1_i32 = arith.constant 1 : i32
    %0 = arith.muli %arg0, %c1_i32 : i32
    %1 = arith.addi %0, %arg1 : i32
    %c0_i32 = arith.constant 0 : i32
    %c0_i32_0 = arith.constant 0 : i32
    return %1, %arg2, %c0_i32 : i32, i32, i32
  }
  func.func @transform_3(%arg0: i32, %arg1: i32, %arg2: i32) -> (i32, i32) {
    %c0_i32 = arith.constant 0 : i32
    %c0_i32_0 = arith.constant 0 : i32
    return %arg1, %c0_i32 : i32, i32
  }
  func.func @transform_4(%arg0: i32, %arg1: i32, %arg2: i32) -> (i32, i32, i32) {
    %c0_i32 = arith.constant 0 : i32
    %c0_i32_0 = arith.constant 0 : i32
    return %arg0, %c0_i32, %arg2 : i32, i32, i32
  }
  func.func @transform_5(%arg0: i32, %arg1: i32, %arg2: i32) -> (i32, i32, i32) {
    %c0_i32 = arith.constant 0 : i32
    %c0_i32_0 = arith.constant 0 : i32
    return %arg0, %c0_i32, %arg2 : i32, i32, i32
  }
  func.func @transform_6(%arg0: i32, %arg1: i32, %arg2: i32) -> (i32, i32, i32) {
    %c1_i32 = arith.constant 1 : i32
    %0 = arith.muli %arg0, %c1_i32 : i32
    %1 = arith.addi %0, %arg1 : i32
    %c0_i32 = arith.constant 0 : i32
    %c0_i32_0 = arith.constant 0 : i32
    %c0_i32_1 = arith.constant 0 : i32
    return %1, %c0_i32, %c0_i32_0 : i32, i32, i32
  }
}

module attributes {stable_mosaic.version = 11 : i64} {
  func.func @_layernorm_kernel(%arg0: i32, %arg1: memref<8x512xbf16, #tpu.memory_space<vmem>>, %arg2: memref<1x512xf32, #tpu.memory_space<vmem>>, %arg3: memref<1x512xf32, #tpu.memory_space<vmem>>, %arg4: memref<8x512xbf16, #tpu.memory_space<vmem>>) attributes {dimension_semantics = [#tpu.dimension_semantics<parallel>], iteration_bounds = array<i64: 1>, scalar_prefetch = 0 : i64, scratch_operands = 0 : i64, tpu.core_type = #tpu.core_type<tc>, window_params = [{transform_indices = @transform_0, window_bounds = array<i64: 8, 512>}, {pipeline_mode = #tpu.pipeline_mode<synchronous>, transform_indices = @transform_1, window_bounds = array<i64: 1, 512>}, {pipeline_mode = #tpu.pipeline_mode<synchronous>, transform_indices = @transform_2, window_bounds = array<i64: 1, 512>}, {transform_indices = @transform_3, window_bounds = array<i64: 8, 512>}]} {
    %c0 = arith.constant 0 : index
    %c0_0 = arith.constant 0 : index
    %0 = vector.load %arg1[%c0, %c0_0] : memref<8x512xbf16, #tpu.memory_space<vmem>>, vector<8x512xbf16>
    %1 = arith.extf %0 : vector<8x512xbf16> to vector<8x512xf32>
    %cst = arith.constant dense<0.000000e+00> : vector<8xf32>
    %2 = vector.multi_reduction <add>, %1, %cst [1] : vector<8x512xf32> to vector<8xf32>
    %3 = vector.shape_cast %2 : vector<8xf32> to vector<8x1xf32>
    %cst_1 = arith.constant 5.120000e+02 : f32
    %4 = vector.broadcast %cst_1 : f32 to vector<8x1xf32>
    %5 = arith.divf %3, %4 : vector<8x1xf32>
    %6 = vector.broadcast %5 : vector<8x1xf32> to vector<8x512xf32>
    %7 = arith.subf %1, %6 : vector<8x512xf32>
    %8 = arith.mulf %7, %7 : vector<8x512xf32>
    %cst_2 = arith.constant dense<0.000000e+00> : vector<8xf32>
    %9 = vector.multi_reduction <add>, %8, %cst_2 [1] : vector<8x512xf32> to vector<8xf32>
    %10 = vector.shape_cast %9 : vector<8xf32> to vector<8x1xf32>
    %cst_3 = arith.constant 5.120000e+02 : f32
    %11 = vector.broadcast %cst_3 : f32 to vector<8x1xf32>
    %12 = arith.divf %10, %11 : vector<8x1xf32>
    %13 = vector.broadcast %5 : vector<8x1xf32> to vector<8x512xf32>
    %14 = arith.subf %1, %13 : vector<8x512xf32>
    %cst_4 = arith.constant 9.99999974E-6 : f32
    %15 = vector.broadcast %cst_4 : f32 to vector<8x1xf32>
    %16 = arith.addf %12, %15 : vector<8x1xf32>
    %17 = math.rsqrt %16 : vector<8x1xf32>
    %18 = vector.broadcast %17 : vector<8x1xf32> to vector<8x512xf32>
    %19 = arith.mulf %14, %18 : vector<8x512xf32>
    %c0_5 = arith.constant 0 : index
    %c0_6 = arith.constant 0 : index
    %20 = vector.load %arg2[%c0_5, %c0_6] : memref<1x512xf32, #tpu.memory_space<vmem>>, vector<1x512xf32>
    %21 = vector.broadcast %20 : vector<1x512xf32> to vector<8x512xf32>
    %22 = arith.mulf %19, %21 : vector<8x512xf32>
    %c0_7 = arith.constant 0 : index
    %c0_8 = arith.constant 0 : index
    %23 = vector.load %arg3[%c0_7, %c0_8] : memref<1x512xf32, #tpu.memory_space<vmem>>, vector<1x512xf32>
    %24 = vector.broadcast %23 : vector<1x512xf32> to vector<8x512xf32>
    %25 = arith.addf %22, %24 : vector<8x512xf32>
    %26 = arith.truncf %25 : vector<8x512xf32> to vector<8x512xbf16>
    %c0_9 = arith.constant 0 : index
    %c0_10 = arith.constant 0 : index
    %27 = vector.load %arg4[%c0_9, %c0_10] : memref<8x512xbf16, #tpu.memory_space<vmem>>, vector<8x512xbf16>
    tpu.vector_store %arg4[%c0_9, %c0_10], %26 {strides = array<i32>} : memref<8x512xbf16, #tpu.memory_space<vmem>>, vector<8x512xbf16>,
    return
  }
  func.func @transform_0(%arg0: i32) -> (i32, i32) {
    %c0_i32 = arith.constant 0 : i32
    %c0_i32_0 = arith.constant 0 : i32
    return %arg0, %c0_i32 : i32, i32
  }
  func.func @transform_1(%arg0: i32) -> (i32, i32) {
    %c0_i32 = arith.constant 0 : i32
    %c0_i32_0 = arith.constant 0 : i32
    %c0_i32_1 = arith.constant 0 : i32
    return %c0_i32, %c0_i32_0 : i32, i32
  }
  func.func @transform_2(%arg0: i32) -> (i32, i32) {
    %c0_i32 = arith.constant 0 : i32
    %c0_i32_0 = arith.constant 0 : i32
    %c0_i32_1 = arith.constant 0 : i32
    return %c0_i32, %c0_i32_0 : i32, i32
  }
  func.func @transform_3(%arg0: i32) -> (i32, i32) {
    %c0_i32 = arith.constant 0 : i32
    %c0_i32_0 = arith.constant 0 : i32
    return %arg0, %c0_i32 : i32, i32
  }
}

module attributes {stable_mosaic.version = 11 : i64} {
  func.func @_matmul_bias_kernel(%arg0: i32, %arg1: i32, %arg2: i32, %arg3: memref<8x512xbf16, #tpu.memory_space<vmem>>, %arg4: memref<512x512xbf16, #tpu.memory_space<vmem>>, %arg5: memref<1x512xf32, #tpu.memory_space<vmem>>, %arg6: memref<8x512xbf16, #tpu.memory_space<vmem>>, %arg7: memref<8x512xbf16, #tpu.memory_space<vmem>>, %arg8: memref<8x512xf32, #tpu.memory_space<vmem>>) attributes {dimension_semantics = [#tpu.dimension_semantics<parallel>, #tpu.dimension_semantics<parallel>, #tpu.dimension_semantics<arbitrary>], iteration_bounds = array<i64: 1, 1, 1>, scalar_prefetch = 0 : i64, scratch_operands = 1 : i64, tpu.core_type = #tpu.core_type<tc>, window_params = [{transform_indices = @transform_0, window_bounds = array<i64: 8, 512>}, {transform_indices = @transform_1, window_bounds = array<i64: 512, 512>}, {transform_indices = @transform_2, window_bounds = array<i64: 1, 512>}, {transform_indices = @transform_3, window_bounds = array<i64: 8, 512>}, {transform_indices = @transform_4, window_bounds = array<i64: 8, 512>}]} {
    %c0_i32 = arith.constant 0 : i32
    %0 = arith.cmpi eq, %arg2, %c0_i32 : i32
    %1 = arith.extui %0 : i1 to i32
    %c0_i32_0 = arith.constant 0 : i32
    %2 = arith.cmpi ne, %1, %c0_i32_0 : i32
    scf.if %2 {
      %cst_10 = arith.constant 0.000000e+00 : f32
      %12 = vector.broadcast %cst_10 : f32 to vector<8x512xf32>
      %c0_11 = arith.constant 0 : index
      %c0_12 = arith.constant 0 : index
      %13 = vector.load %arg8[%c0_11, %c0_12] : memref<8x512xf32, #tpu.memory_space<vmem>>, vector<8x512xf32>
      tpu.vector_store %arg8[%c0_11, %c0_12], %12 {strides = array<i32>} : memref<8x512xf32, #tpu.memory_space<vmem>>, vector<8x512xf32>,
    } else {
    }
    %c0 = arith.constant 0 : index
    %c0_1 = arith.constant 0 : index
    %3 = vector.load %arg3[%c0, %c0_1] : memref<8x512xbf16, #tpu.memory_space<vmem>>, vector<8x512xbf16>
    %c0_2 = arith.constant 0 : index
    %c0_3 = arith.constant 0 : index
    %4 = vector.load %arg4[%c0_2, %c0_3] : memref<512x512xbf16, #tpu.memory_space<vmem>>, vector<512x512xbf16>
    %c0_4 = arith.constant 0 : index
    %c0_5 = arith.constant 0 : index
    %5 = vector.load %arg8[%c0_4, %c0_5] : memref<8x512xf32, #tpu.memory_space<vmem>>, vector<8x512xf32>
    %cst = arith.constant dense<0.000000e+00> : vector<8x512xf32>
    %6 = tpu.matmul %3, %4, %cst {dimension_numbers = #tpu.dot_dimension_numbers<[1], [0], [0], [1], [0, 0, 1, 1], [], []>} : vector<8x512xbf16>, vector<512x512xbf16>, vector<8x512xf32> -> vector<8x512xf32>
    %7 = arith.addf %5, %6 : vector<8x512xf32>
    %c0_6 = arith.constant 0 : index
    %c0_7 = arith.constant 0 : index
    %8 = vector.load %arg8[%c0_6, %c0_7] : memref<8x512xf32, #tpu.memory_space<vmem>>, vector<8x512xf32>
    tpu.vector_store %arg8[%c0_6, %c0_7], %7 {strides = array<i32>} : memref<8x512xf32, #tpu.memory_space<vmem>>, vector<8x512xf32>,
    %c0_i32_8 = arith.constant 0 : i32
    %9 = arith.cmpi eq, %arg2, %c0_i32_8 : i32
    %10 = arith.extui %9 : i1 to i32
    %c0_i32_9 = arith.constant 0 : i32
    %11 = arith.cmpi ne, %10, %c0_i32_9 : i32
    scf.if %11 {
      %c0_10 = arith.constant 0 : index
      %c0_11 = arith.constant 0 : index
      %12 = vector.load %arg8[%c0_10, %c0_11] : memref<8x512xf32, #tpu.memory_space<vmem>>, vector<8x512xf32>
      %c0_12 = arith.constant 0 : index
      %c0_13 = arith.constant 0 : index
      %13 = vector.load %arg5[%c0_12, %c0_13] : memref<1x512xf32, #tpu.memory_space<vmem>>, vector<1x512xf32>
      %14 = vector.broadcast %13 : vector<1x512xf32> to vector<8x512xf32>
      %15 = arith.addf %12, %14 : vector<8x512xf32>
      %c0_14 = arith.constant 0 : index
      %c0_15 = arith.constant 0 : index
      %16 = vector.load %arg6[%c0_14, %c0_15] : memref<8x512xbf16, #tpu.memory_space<vmem>>, vector<8x512xbf16>
      %17 = arith.extf %16 : vector<8x512xbf16> to vector<8x512xf32>
      %18 = arith.addf %15, %17 : vector<8x512xf32>
      %19 = arith.truncf %18 : vector<8x512xf32> to vector<8x512xbf16>
      %c0_16 = arith.constant 0 : index
      %c0_17 = arith.constant 0 : index
      %20 = vector.load %arg7[%c0_16, %c0_17] : memref<8x512xbf16, #tpu.memory_space<vmem>>, vector<8x512xbf16>
      tpu.vector_store %arg7[%c0_16, %c0_17], %19 {strides = array<i32>} : memref<8x512xbf16, #tpu.memory_space<vmem>>, vector<8x512xbf16>,
    } else {
    }
    return
  }
  func.func @transform_0(%arg0: i32, %arg1: i32, %arg2: i32) -> (i32, i32) {
    %c0_i32 = arith.constant 0 : i32
    return %arg0, %arg2 : i32, i32
  }
  func.func @transform_1(%arg0: i32, %arg1: i32, %arg2: i32) -> (i32, i32) {
    %c0_i32 = arith.constant 0 : i32
    return %arg2, %arg1 : i32, i32
  }
  func.func @transform_2(%arg0: i32, %arg1: i32, %arg2: i32) -> (i32, i32) {
    %c0_i32 = arith.constant 0 : i32
    %c0_i32_0 = arith.constant 0 : i32
    return %c0_i32, %arg1 : i32, i32
  }
  func.func @transform_3(%arg0: i32, %arg1: i32, %arg2: i32) -> (i32, i32) {
    %c0_i32 = arith.constant 0 : i32
    return %arg0, %arg1 : i32, i32
  }
  func.func @transform_4(%arg0: i32, %arg1: i32, %arg2: i32) -> (i32, i32) {
    %c0_i32 = arith.constant 0 : i32
    return %arg0, %arg1 : i32, i32
  }
}

module attributes {stable_mosaic.version = 11 : i64} {
  func.func @_matmul_bias_kernel(%arg0: i32, %arg1: i32, %arg2: i32, %arg3: memref<8x512xbf16, #tpu.memory_space<vmem>>, %arg4: memref<512x512xbf16, #tpu.memory_space<vmem>>, %arg5: memref<1x512xf32, #tpu.memory_space<vmem>>, %arg6: memref<8x512xbf16, #tpu.memory_space<vmem>>, %arg7: memref<8x512xf32, #tpu.memory_space<vmem>>) attributes {dimension_semantics = [#tpu.dimension_semantics<parallel>, #tpu.dimension_semantics<parallel>, #tpu.dimension_semantics<arbitrary>], iteration_bounds = array<i64: 1, 4, 1>, scalar_prefetch = 0 : i64, scratch_operands = 1 : i64, tpu.core_type = #tpu.core_type<tc>, window_params = [{transform_indices = @transform_0, window_bounds = array<i64: 8, 512>}, {transform_indices = @transform_1, window_bounds = array<i64: 512, 512>}, {transform_indices = @transform_2, window_bounds = array<i64: 1, 512>}, {transform_indices = @transform_3, window_bounds = array<i64: 8, 512>}]} {
    %c0_i32 = arith.constant 0 : i32
    %0 = arith.cmpi eq, %arg2, %c0_i32 : i32
    %1 = arith.extui %0 : i1 to i32
    %c0_i32_0 = arith.constant 0 : i32
    %2 = arith.cmpi ne, %1, %c0_i32_0 : i32
    scf.if %2 {
      %cst_10 = arith.constant 0.000000e+00 : f32
      %12 = vector.broadcast %cst_10 : f32 to vector<8x512xf32>
      %c0_11 = arith.constant 0 : index
      %c0_12 = arith.constant 0 : index
      %13 = vector.load %arg7[%c0_11, %c0_12] : memref<8x512xf32, #tpu.memory_space<vmem>>, vector<8x512xf32>
      tpu.vector_store %arg7[%c0_11, %c0_12], %12 {strides = array<i32>} : memref<8x512xf32, #tpu.memory_space<vmem>>, vector<8x512xf32>,
    } else {
    }
    %c0 = arith.constant 0 : index
    %c0_1 = arith.constant 0 : index
    %3 = vector.load %arg3[%c0, %c0_1] : memref<8x512xbf16, #tpu.memory_space<vmem>>, vector<8x512xbf16>
    %c0_2 = arith.constant 0 : index
    %c0_3 = arith.constant 0 : index
    %4 = vector.load %arg4[%c0_2, %c0_3] : memref<512x512xbf16, #tpu.memory_space<vmem>>, vector<512x512xbf16>
    %c0_4 = arith.constant 0 : index
    %c0_5 = arith.constant 0 : index
    %5 = vector.load %arg7[%c0_4, %c0_5] : memref<8x512xf32, #tpu.memory_space<vmem>>, vector<8x512xf32>
    %cst = arith.constant dense<0.000000e+00> : vector<8x512xf32>
    %6 = tpu.matmul %3, %4, %cst {dimension_numbers = #tpu.dot_dimension_numbers<[1], [0], [0], [1], [0, 0, 1, 1], [], []>} : vector<8x512xbf16>, vector<512x512xbf16>, vector<8x512xf32> -> vector<8x512xf32>
    %7 = arith.addf %5, %6 : vector<8x512xf32>
    %c0_6 = arith.constant 0 : index
    %c0_7 = arith.constant 0 : index
    %8 = vector.load %arg7[%c0_6, %c0_7] : memref<8x512xf32, #tpu.memory_space<vmem>>, vector<8x512xf32>
    tpu.vector_store %arg7[%c0_6, %c0_7], %7 {strides = array<i32>} : memref<8x512xf32, #tpu.memory_space<vmem>>, vector<8x512xf32>,
    %c0_i32_8 = arith.constant 0 : i32
    %9 = arith.cmpi eq, %arg2, %c0_i32_8 : i32
    %10 = arith.extui %9 : i1 to i32
    %c0_i32_9 = arith.constant 0 : i32
    %11 = arith.cmpi ne, %10, %c0_i32_9 : i32
    scf.if %11 {
      %c0_10 = arith.constant 0 : index
      %c0_11 = arith.constant 0 : index
      %12 = vector.load %arg7[%c0_10, %c0_11] : memref<8x512xf32, #tpu.memory_space<vmem>>, vector<8x512xf32>
      %c0_12 = arith.constant 0 : index
      %c0_13 = arith.constant 0 : index
      %13 = vector.load %arg5[%c0_12, %c0_13] : memref<1x512xf32, #tpu.memory_space<vmem>>, vector<1x512xf32>
      %14 = vector.broadcast %13 : vector<1x512xf32> to vector<8x512xf32>
      %15 = arith.addf %12, %14 : vector<8x512xf32>
      %cst_14 = arith.constant 5.000000e-01 : f32
      %16 = vector.broadcast %cst_14 : f32 to vector<8x512xf32>
      %17 = arith.mulf %16, %15 : vector<8x512xf32>
      %cst_15 = arith.constant 0.797884583 : f32
      %18 = vector.broadcast %cst_15 : f32 to vector<8x512xf32>
      %19 = arith.mulf %18, %15 : vector<8x512xf32>
      %cst_16 = arith.constant 4.471500e-02 : f32
      %20 = vector.broadcast %cst_16 : f32 to vector<8x512xf32>
      %21 = arith.mulf %20, %15 : vector<8x512xf32>
      %22 = arith.mulf %21, %15 : vector<8x512xf32>
      %cst_17 = arith.constant 1.000000e+00 : f32
      %23 = vector.broadcast %cst_17 : f32 to vector<8x512xf32>
      %24 = arith.addf %23, %22 : vector<8x512xf32>
      %25 = arith.mulf %19, %24 : vector<8x512xf32>
      %26 = math.tanh %25 : vector<8x512xf32>
      %cst_18 = arith.constant 1.000000e+00 : f32
      %27 = vector.broadcast %cst_18 : f32 to vector<8x512xf32>
      %28 = arith.addf %27, %26 : vector<8x512xf32>
      %29 = arith.mulf %17, %28 : vector<8x512xf32>
      %30 = arith.truncf %29 : vector<8x512xf32> to vector<8x512xbf16>
      %c0_19 = arith.constant 0 : index
      %c0_20 = arith.constant 0 : index
      %31 = vector.load %arg6[%c0_19, %c0_20] : memref<8x512xbf16, #tpu.memory_space<vmem>>, vector<8x512xbf16>
      tpu.vector_store %arg6[%c0_19, %c0_20], %30 {strides = array<i32>} : memref<8x512xbf16, #tpu.memory_space<vmem>>, vector<8x512xbf16>,
    } else {
    }
    return
  }
  func.func @transform_0(%arg0: i32, %arg1: i32, %arg2: i32) -> (i32, i32) {
    %c0_i32 = arith.constant 0 : i32
    return %arg0, %arg2 : i32, i32
  }
  func.func @transform_1(%arg0: i32, %arg1: i32, %arg2: i32) -> (i32, i32) {
    %c0_i32 = arith.constant 0 : i32
    return %arg2, %arg1 : i32, i32
  }
  func.func @transform_2(%arg0: i32, %arg1: i32, %arg2: i32) -> (i32, i32) {
    %c0_i32 = arith.constant 0 : i32
    %c0_i32_0 = arith.constant 0 : i32
    return %c0_i32, %arg1 : i32, i32
  }
  func.func @transform_3(%arg0: i32, %arg1: i32, %arg2: i32) -> (i32, i32) {
    %c0_i32 = arith.constant 0 : i32
    return %arg0, %arg1 : i32, i32
  }
}

module attributes {stable_mosaic.version = 11 : i64} {
  func.func @_matmul_bias_kernel(%arg0: i32, %arg1: i32, %arg2: i32, %arg3: memref<8x1024xbf16, #tpu.memory_space<vmem>>, %arg4: memref<1024x512xbf16, #tpu.memory_space<vmem>>, %arg5: memref<1x512xf32, #tpu.memory_space<vmem>>, %arg6: memref<8x512xbf16, #tpu.memory_space<vmem>>, %arg7: memref<8x512xbf16, #tpu.memory_space<vmem>>, %arg8: memref<8x512xf32, #tpu.memory_space<vmem>>) attributes {dimension_semantics = [#tpu.dimension_semantics<parallel>, #tpu.dimension_semantics<parallel>, #tpu.dimension_semantics<arbitrary>], iteration_bounds = array<i64: 1, 1, 2>, scalar_prefetch = 0 : i64, scratch_operands = 1 : i64, tpu.core_type = #tpu.core_type<tc>, window_params = [{transform_indices = @transform_0, window_bounds = array<i64: 8, 1024>}, {transform_indices = @transform_1, window_bounds = array<i64: 1024, 512>}, {transform_indices = @transform_2, window_bounds = array<i64: 1, 512>}, {transform_indices = @transform_3, window_bounds = array<i64: 8, 512>}, {transform_indices = @transform_4, window_bounds = array<i64: 8, 512>}]} {
    %c0_i32 = arith.constant 0 : i32
    %0 = arith.cmpi eq, %arg2, %c0_i32 : i32
    %1 = arith.extui %0 : i1 to i32
    %c0_i32_0 = arith.constant 0 : i32
    %2 = arith.cmpi ne, %1, %c0_i32_0 : i32
    scf.if %2 {
      %cst_9 = arith.constant 0.000000e+00 : f32
      %12 = vector.broadcast %cst_9 : f32 to vector<8x512xf32>
      %c0_10 = arith.constant 0 : index
      %c0_11 = arith.constant 0 : index
      %13 = vector.load %arg8[%c0_10, %c0_11] : memref<8x512xf32, #tpu.memory_space<vmem>>, vector<8x512xf32>
      tpu.vector_store %arg8[%c0_10, %c0_11], %12 {strides = array<i32>} : memref<8x512xf32, #tpu.memory_space<vmem>>, vector<8x512xf32>,
    } else {
    }
    %c0 = arith.constant 0 : index
    %c0_1 = arith.constant 0 : index
    %3 = vector.load %arg3[%c0, %c0_1] : memref<8x1024xbf16, #tpu.memory_space<vmem>>, vector<8x1024xbf16>
    %c0_2 = arith.constant 0 : index
    %c0_3 = arith.constant 0 : index
    %4 = vector.load %arg4[%c0_2, %c0_3] : memref<1024x512xbf16, #tpu.memory_space<vmem>>, vector<1024x512xbf16>
    %c0_4 = arith.constant 0 : index
    %c0_5 = arith.constant 0 : index
    %5 = vector.load %arg8[%c0_4, %c0_5] : memref<8x512xf32, #tpu.memory_space<vmem>>, vector<8x512xf32>
    %cst = arith.constant dense<0.000000e+00> : vector<8x512xf32>
    %6 = tpu.matmul %3, %4, %cst {dimension_numbers = #tpu.dot_dimension_numbers<[1], [0], [0], [1], [0, 0, 1, 1], [], []>} : vector<8x1024xbf16>, vector<1024x512xbf16>, vector<8x512xf32> -> vector<8x512xf32>
    %7 = arith.addf %5, %6 : vector<8x512xf32>
    %c0_6 = arith.constant 0 : index
    %c0_7 = arith.constant 0 : index
    %8 = vector.load %arg8[%c0_6, %c0_7] : memref<8x512xf32, #tpu.memory_space<vmem>>, vector<8x512xf32>
    tpu.vector_store %arg8[%c0_6, %c0_7], %7 {strides = array<i32>} : memref<8x512xf32, #tpu.memory_space<vmem>>, vector<8x512xf32>,
    %c1_i32 = arith.constant 1 : i32
    %9 = arith.cmpi eq, %arg2, %c1_i32 : i32
    %10 = arith.extui %9 : i1 to i32
    %c0_i32_8 = arith.constant 0 : i32
    %11 = arith.cmpi ne, %10, %c0_i32_8 : i32
    scf.if %11 {
      %c0_9 = arith.constant 0 : index
      %c0_10 = arith.constant 0 : index
      %12 = vector.load %arg8[%c0_9, %c0_10] : memref<8x512xf32, #tpu.memory_space<vmem>>, vector<8x512xf32>
      %c0_11 = arith.constant 0 : index
      %c0_12 = arith.constant 0 : index
      %13 = vector.load %arg5[%c0_11, %c0_12] : memref<1x512xf32, #tpu.memory_space<vmem>>, vector<1x512xf32>
      %14 = vector.broadcast %13 : vector<1x512xf32> to vector<8x512xf32>
      %15 = arith.addf %12, %14 : vector<8x512xf32>
      %c0_13 = arith.constant 0 : index
      %c0_14 = arith.constant 0 : index
      %16 = vector.load %arg6[%c0_13, %c0_14] : memref<8x512xbf16, #tpu.memory_space<vmem>>, vector<8x512xbf16>
      %17 = arith.extf %16 : vector<8x512xbf16> to vector<8x512xf32>
      %18 = arith.addf %15, %17 : vector<8x512xf32>
      %19 = arith.truncf %18 : vector<8x512xf32> to vector<8x512xbf16>
      %c0_15 = arith.constant 0 : index
      %c0_16 = arith.constant 0 : index
      %20 = vector.load %arg7[%c0_15, %c0_16] : memref<8x512xbf16, #tpu.memory_space<vmem>>, vector<8x512xbf16>
      tpu.vector_store %arg7[%c0_15, %c0_16], %19 {strides = array<i32>} : memref<8x512xbf16, #tpu.memory_space<vmem>>, vector<8x512xbf16>,
    } else {
    }
    return
  }
  func.func @transform_0(%arg0: i32, %arg1: i32, %arg2: i32) -> (i32, i32) {
    %c0_i32 = arith.constant 0 : i32
    return %arg0, %arg2 : i32, i32
  }
  func.func @transform_1(%arg0: i32, %arg1: i32, %arg2: i32) -> (i32, i32) {
    %c0_i32 = arith.constant 0 : i32
    return %arg2, %arg1 : i32, i32
  }
  func.func @transform_2(%arg0: i32, %arg1: i32, %arg2: i32) -> (i32, i32) {
    %c0_i32 = arith.constant 0 : i32
    %c0_i32_0 = arith.constant 0 : i32
    return %c0_i32, %arg1 : i32, i32
  }
  func.func @transform_3(%arg0: i32, %arg1: i32, %arg2: i32) -> (i32, i32) {
    %c0_i32 = arith.constant 0 : i32
    return %arg0, %arg1 : i32, i32
  }
  func.func @transform_4(%arg0: i32, %arg1: i32, %arg2: i32) -> (i32, i32) {
    %c0_i32 = arith.constant 0 : i32
    return %arg0, %arg1 : i32, i32
  }
}

module attributes {stable_mosaic.version = 11 : i64} {
  func.func @_matmul_bias_kernel(%arg0: i32, %arg1: i32, %arg2: i32, %arg3: memref<8x512xbf16, #tpu.memory_space<vmem>>, %arg4: memref<512x512xbf16, #tpu.memory_space<vmem>>, %arg5: memref<1x512xf32, #tpu.memory_space<vmem>>, %arg6: memref<8x512xbf16, #tpu.memory_space<vmem>>, %arg7: memref<8x512xf32, #tpu.memory_space<vmem>>) attributes {dimension_semantics = [#tpu.dimension_semantics<parallel>, #tpu.dimension_semantics<parallel>, #tpu.dimension_semantics<arbitrary>], iteration_bounds = array<i64: 1, 3, 1>, scalar_prefetch = 0 : i64, scratch_operands = 1 : i64, tpu.core_type = #tpu.core_type<tc>, window_params = [{transform_indices = @transform_0, window_bounds = array<i64: 8, 512>}, {transform_indices = @transform_1, window_bounds = array<i64: 512, 512>}, {transform_indices = @transform_2, window_bounds = array<i64: 1, 512>}, {transform_indices = @transform_3, window_bounds = array<i64: 8, 512>}]} {
    %c0_i32 = arith.constant 0 : i32
    %0 = arith.cmpi eq, %arg2, %c0_i32 : i32
    %1 = arith.extui %0 : i1 to i32
    %c0_i32_0 = arith.constant 0 : i32
    %2 = arith.cmpi ne, %1, %c0_i32_0 : i32
    scf.if %2 {
      %cst_10 = arith.constant 0.000000e+00 : f32
      %12 = vector.broadcast %cst_10 : f32 to vector<8x512xf32>
      %c0_11 = arith.constant 0 : index
      %c0_12 = arith.constant 0 : index
      %13 = vector.load %arg7[%c0_11, %c0_12] : memref<8x512xf32, #tpu.memory_space<vmem>>, vector<8x512xf32>
      tpu.vector_store %arg7[%c0_11, %c0_12], %12 {strides = array<i32>} : memref<8x512xf32, #tpu.memory_space<vmem>>, vector<8x512xf32>,
    } else {
    }
    %c0 = arith.constant 0 : index
    %c0_1 = arith.constant 0 : index
    %3 = vector.load %arg3[%c0, %c0_1] : memref<8x512xbf16, #tpu.memory_space<vmem>>, vector<8x512xbf16>
    %c0_2 = arith.constant 0 : index
    %c0_3 = arith.constant 0 : index
    %4 = vector.load %arg4[%c0_2, %c0_3] : memref<512x512xbf16, #tpu.memory_space<vmem>>, vector<512x512xbf16>
    %c0_4 = arith.constant 0 : index
    %c0_5 = arith.constant 0 : index
    %5 = vector.load %arg7[%c0_4, %c0_5] : memref<8x512xf32, #tpu.memory_space<vmem>>, vector<8x512xf32>
    %cst = arith.constant dense<0.000000e+00> : vector<8x512xf32>
    %6 = tpu.matmul %3, %4, %cst {dimension_numbers = #tpu.dot_dimension_numbers<[1], [0], [0], [1], [0, 0, 1, 1], [], []>} : vector<8x512xbf16>, vector<512x512xbf16>, vector<8x512xf32> -> vector<8x512xf32>
    %7 = arith.addf %5, %6 : vector<8x512xf32>
    %c0_6 = arith.constant 0 : index
    %c0_7 = arith.constant 0 : index
    %8 = vector.load %arg7[%c0_6, %c0_7] : memref<8x512xf32, #tpu.memory_space<vmem>>, vector<8x512xf32>
    tpu.vector_store %arg7[%c0_6, %c0_7], %7 {strides = array<i32>} : memref<8x512xf32, #tpu.memory_space<vmem>>, vector<8x512xf32>,
    %c0_i32_8 = arith.constant 0 : i32
    %9 = arith.cmpi eq, %arg2, %c0_i32_8 : i32
    %10 = arith.extui %9 : i1 to i32
    %c0_i32_9 = arith.constant 0 : i32
    %11 = arith.cmpi ne, %10, %c0_i32_9 : i32
    scf.if %11 {
      %c0_10 = arith.constant 0 : index
      %c0_11 = arith.constant 0 : index
      %12 = vector.load %arg7[%c0_10, %c0_11] : memref<8x512xf32, #tpu.memory_space<vmem>>, vector<8x512xf32>
      %c0_12 = arith.constant 0 : index
      %c0_13 = arith.constant 0 : index
      %13 = vector.load %arg5[%c0_12, %c0_13] : memref<1x512xf32, #tpu.memory_space<vmem>>, vector<1x512xf32>
      %14 = vector.broadcast %13 : vector<1x512xf32> to vector<8x512xf32>
      %15 = arith.addf %12, %14 : vector<8x512xf32>
      %16 = arith.truncf %15 : vector<8x512xf32> to vector<8x512xbf16>
      %c0_14 = arith.constant 0 : index
      %c0_15 = arith.constant 0 : index
      %17 = vector.load %arg6[%c0_14, %c0_15] : memref<8x512xbf16, #tpu.memory_space<vmem>>, vector<8x512xbf16>
      tpu.vector_store %arg6[%c0_14, %c0_15], %16 {strides = array<i32>} : memref<8x512xbf16, #tpu.memory_space<vmem>>, vector<8x512xbf16>,
    } else {
    }
    return
  }
  func.func @transform_0(%arg0: i32, %arg1: i32, %arg2: i32) -> (i32, i32) {
    %c0_i32 = arith.constant 0 : i32
    return %arg0, %arg2 : i32, i32
  }
  func.func @transform_1(%arg0: i32, %arg1: i32, %arg2: i32) -> (i32, i32) {
    %c0_i32 = arith.constant 0 : i32
    return %arg2, %arg1 : i32, i32
  }
  func.func @transform_2(%arg0: i32, %arg1: i32, %arg2: i32) -> (i32, i32) {
    %c0_i32 = arith.constant 0 : i32
    %c0_i32_0 = arith.constant 0 : i32
    return %c0_i32, %arg1 : i32, i32
  }
  func.func @transform_3(%arg0: i32, %arg1: i32, %arg2: i32) -> (i32, i32) {
    %c0_i32 = arith.constant 0 : i32
    return %arg0, %arg1 : i32, i32
  }
}

module attributes {stable_mosaic.version = 11 : i64} {
  func.func @_lm_head_kernel(%arg0: i32, %arg1: memref<2x512xbf16, #tpu.memory_space<vmem>>, %arg2: memref<256x512xbf16, #tpu.memory_space<vmem>>, %arg3: memref<2x256xf32, #tpu.memory_space<vmem>>) attributes {dimension_semantics = [#tpu.dimension_semantics<parallel>], iteration_bounds = array<i64: 1>, scalar_prefetch = 0 : i64, scratch_operands = 0 : i64, tpu.core_type = #tpu.core_type<tc>, window_params = [{pipeline_mode = #tpu.pipeline_mode<synchronous>, transform_indices = @transform_0, window_bounds = array<i64: 2, 512>}, {transform_indices = @transform_1, window_bounds = array<i64: 256, 512>}, {transform_indices = @transform_2, window_bounds = array<i64: 2, 256>}]} {
    %c0 = arith.constant 0 : index
    %c0_0 = arith.constant 0 : index
    %0 = vector.load %arg1[%c0, %c0_0] : memref<2x512xbf16, #tpu.memory_space<vmem>>, vector<2x512xbf16>
    %c0_1 = arith.constant 0 : index
    %c0_2 = arith.constant 0 : index
    %1 = vector.load %arg2[%c0_1, %c0_2] : memref<256x512xbf16, #tpu.memory_space<vmem>>, vector<256x512xbf16>
    %cst = arith.constant dense<0.000000e+00> : vector<2x256xf32>
    %2 = tpu.matmul %0, %1, %cst {dimension_numbers = #tpu.dot_dimension_numbers<[1], [1], [0], [0], [0, 0, 1, 0], [], []>} : vector<2x512xbf16>, vector<256x512xbf16>, vector<2x256xf32> -> vector<2x256xf32>
    %c0_3 = arith.constant 0 : index
    %c0_4 = arith.constant 0 : index
    %3 = vector.load %arg3[%c0_3, %c0_4] : memref<2x256xf32, #tpu.memory_space<vmem>>, vector<2x256xf32>
    tpu.vector_store %arg3[%c0_3, %c0_4], %2 {strides = array<i32>} : memref<2x256xf32, #tpu.memory_space<vmem>>, vector<2x256xf32>,
    return
  }
  func.func @transform_0(%arg0: i32) -> (i32, i32) {
    %c0_i32 = arith.constant 0 : i32
    %c0_i32_0 = arith.constant 0 : i32
    %c0_i32_1 = arith.constant 0 : i32
    return %c0_i32, %c0_i32_0 : i32, i32
  }
  func.func @transform_1(%arg0: i32) -> (i32, i32) {
    %c0_i32 = arith.constant 0 : i32
    %c0_i32_0 = arith.constant 0 : i32
    return %arg0, %c0_i32 : i32, i32
  }
  func.func @transform_2(%arg0: i32) -> (i32, i32) {
    %c0_i32 = arith.constant 0 : i32
    %c0_i32_0 = arith.constant 0 : i32
    return %c0_i32, %arg0 : i32, i32
  }
}

</mosaic_0001>

<bundles_post_ra>
// kernel: _lambda_.17
= control target key start
LH: loop header
LB: loop body
LE: loop exit
PB: predicated region body
PF: predicated region fallthrough
CT: control target
= control target key end

     0   :  { %8 = vsyncpa [#allocation3], 0  ;;  %s261_s0 = inlined_call_operand.vmem [shape: bf16[8,512], index: 0, kind: input, shape index: {}]   ;;  %s262_s1 = inlined_call_operand.hbm [shape: f32[1,512], index: 1, kind: input, shape index: {}]   ;;  %s263_s2 = inlined_call_operand.hbm [shape: f32[1,512], index: 2, kind: input, shape index: {}]   ;;  %s264_s3 = inlined_call_operand.vmem [shape: bf16[8,512], index: 3, kind: output, shape index: {}]  }
   0x1   :  { %9 = vsyncpa [#allocation5], 0  ;;  %s203_s12 = smov [#allocation2]   ;;  %s204_s14 = smov [#allocation4]  }
   0x2   :  { %s18_s13 = sshll.u32 %s203_s12, 4  ;;  %s28_s15 = sshll.u32 %s204_s14, 4  ;;  %s19_s13 = int_to_ptr.vmem [resolvable:$true] %s18_s13  ;;  %s29_s15 = int_to_ptr.vmem [resolvable:$true] %s28_s15 }
   0x3   :  { %s155_s18 = scalar_lea.hbm %s262_s1, 64 }
   0x4   :  { %p156_p0 = scmp.ne.s32.totalorder %s262_s1, %s155_s18  ;;  %p159_p1 = scmp.lt.u32.totalorder %s155_s18, %s262_s1 }
   0x6   :  { %p161_p2 = pnand %p159_p1, %p156_p0 }
   0x8   :  { %164 = shalt.err (!%p161_p2)
}
   0x9   :  { %s165_s23 = scalar_lea.vmem %s19_s13, 64  ;;  %p170_p4 = scmp.lt.s32.totalorder %s19_s13, %s19_s13 }
   0xa   :  { %p166_p3 = scmp.ne.s32.totalorder %s19_s13, %s165_s23  ;;  %p171_p5 = scmp.lt.s32.totalorder %s165_s23, %s165_s23 }
   0xc   :  { %p172_p6 = por %p171_p5, %p170_p4 }
   0xe   :  { %p173_p7 = pnand %p172_p6, %p166_p3 }
  0x10   :  { %176 = shalt.err (!%p173_p7)
}
  0x11   :  { %21 = dma.hbm_to_vmem [thread:$0]  %s262_s1, 64, %s19_s13, [#allocation3]  }
  0x12   :  { %s177_s28 = scalar_lea.hbm %s263_s2, 64 }
  0x13   :  { %p178_p8 = scmp.ne.s32.totalorder %s263_s2, %s177_s28  ;;  %p181_p9 = scmp.lt.u32.totalorder %s177_s28, %s263_s2 }
  0x15   :  { %p183_p10 = pnand %p181_p9, %p178_p8 }
  0x17   :  { %186 = shalt.err (!%p183_p10)
}
  0x18   :  { %s187_s6 = scalar_lea.vmem %s29_s15, 64  ;;  %p192_p12 = scmp.lt.s32.totalorder %s29_s15, %s29_s15 }
  0x19   :  { %p188_p11 = scmp.ne.s32.totalorder %s29_s15, %s187_s6  ;;  %p193_p13 = scmp.lt.s32.totalorder %s187_s6, %s187_s6 }
  0x1b   :  { %p194_p0 = por %p193_p13, %p192_p12 }
  0x1d   :  { %p195_p1 = pnand %p194_p0, %p188_p11 }
  0x1f   :  { %198 = shalt.err (!%p195_p1)
}
  0x20   :  { %31 = dma.hbm_to_vmem [thread:$0]  %s263_s2, 64, %s29_s15, [#allocation5]  }
  0x21   :  { %199 = dma.done.wait [#allocation3], 64  }
  0x22   :  { %200 = vsyncadd [#allocation3], 4294967232 }
  0x23   :  { %201 = dma.done.wait [#allocation5], 64  }
  0x24   :  { %202 = vsyncadd [#allocation5], 4294967232  ;;  %v38_v0 = vld [vmem:[%s261_s0] sm:$0xff]  ;;  %v39_v1 = vld [vmem:[%s261_s0 + $0x8] sm:$0xff]  ;;  %v73_v24 = vlaneseq }
  0x25   :  { %v40_v2 = vunpack.c.l.bf16 %v38_v0  ;;  %v41_v3 = vunpack.c.h.bf16 %v38_v0  ;;  %v42_v4 = vunpack.c.l.bf16 %v39_v1  ;;  %v43_v5 = vunpack.c.h.bf16 %v39_v1  ;;  %v71_v31 = vld [vmem:[#allocation2] sm:$0xf]  ;;  %v97_v32 = vld [vmem:[#allocation4] sm:$0xf] }
  0x26   :  { %v74_v26 = vshrl.u32 %v73_v24, 7 }
  0x27   :  { %v44_v6 = vadd.f32 %v41_v3, %v40_v2 }
  0x28   :  { %v75_v27 = vsub.s32 0, %v74_v26  ;;  %v79_v28 = vsub.s32 1, %v74_v26  ;;  %v83_v29 = vsub.s32 2, %v74_v26  ;;  %v87_v30 = vsub.s32 3, %v74_v26 }
  0x29   :  { %v45_v7 = vadd.f32 %v44_v6, %v42_v4 }
  0x2a   :  { %v76_v33 = vrot.slane %v71_v31, %v75_v27  ;;  %v80_v34 = vrot.slane %v71_v31, %v79_v28  ;;  %v84_v35 = vrot.slane %v71_v31, %v83_v29  ;;  %v88_v36 = vrot.slane %v71_v31, %v87_v30 }
  0x2b   :  { %v46_v8 = vadd.f32 %v45_v7, %v43_v5  ;;  %v102_v38 = vrot.slane %v97_v32, %v75_v27  ;;  %v106_v39 = vrot.slane %v97_v32, %v79_v28  ;;  %v110_v40 = vrot.slane %v97_v32, %v83_v29 }
  0x2c   :  { %v114_v41 = vrot.slane %v97_v32, %v87_v30 }
  0x2d   :  { %47 = vadd.xlane.f32.xlu0 %v46_v8 }
  0xba   :  { %v48_v9 = vpop.xlane.xlu0 %47 }
  0xbb   :  { %v50_v10 = vmul.f32 0.001953125, %v48_v9 }
  0xbd   :  { %v51_v11 = vsub.f32 %v40_v2, %v50_v10  ;;  %v52_v12 = vsub.f32 %v41_v3, %v50_v10  ;;  %v53_v13 = vsub.f32 %v42_v4, %v50_v10  ;;  %v54_v14 = vsub.f32 %v43_v5, %v50_v10 }
  0xbf   :  { %v55_v15 = vmul.f32 %v51_v11, %v51_v11  ;;  %v56_v16 = vmul.f32 %v52_v12, %v52_v12  ;;  %v57_v17 = vmul.f32 %v53_v13, %v53_v13  ;;  %v58_v19 = vmul.f32 %v54_v14, %v54_v14 }
  0xc1   :  { %v59_v18 = vadd.f32 %v56_v16, %v55_v15 }
  0xc3   :  { %v60_v20 = vadd.f32 %v59_v18, %v57_v17 }
  0xc5   :  { %v61_v21 = vadd.f32 %v60_v20, %v58_v19 }
  0xc7   :  { %62 = vadd.xlane.f32.xlu0 %v61_v21 }
 0x154   :  { %v63_v22 = vpop.xlane.xlu0 %62 }
 0x155   :  { %v64_v23 = vmul.f32 0.001953125, %v63_v22 }
 0x157   :  { %v65_v25 = vadd.f32 1e-05, %v64_v23 }
 0x159   :  { %153 = vrsqrt.f32 %v65_v25 }
 0x163   :  { %v154_v37 = vpop.eup %153 }
 0x164   :  { %v67_v42 = vmul.f32 %v154_v37, %v51_v11  ;;  %v68_v43 = vmul.f32 %v154_v37, %v52_v12  ;;  %v69_v44 = vmul.f32 %v154_v37, %v53_v13  ;;  %v70_v45 = vmul.f32 %v154_v37, %v54_v14 }
 0x166   :  { %v93_v46 = vmul.f32 %v76_v33, %v67_v42  ;;  %v94_v47 = vmul.f32 %v80_v34, %v68_v43  ;;  %v95_v48 = vmul.f32 %v84_v35, %v69_v44  ;;  %v96_v49 = vmul.f32 %v88_v36, %v70_v45 }
 0x168   :  { %v119_v50 = vadd.f32 %v102_v38, %v93_v46  ;;  %v120_v51 = vadd.f32 %v106_v39, %v94_v47  ;;  %v121_v52 = vadd.f32 %v110_v40, %v95_v48  ;;  %v122_v53 = vadd.f32 %v114_v41, %v96_v49 }
 0x16a   :  { %v149_v54 = vpack.c.bf16 %v120_v51, %v119_v50  ;;  %v150_v55 = vpack.c.bf16 %v122_v53, %v121_v52 }
 0x16c   :  { %139 = vst [vmem:[%s264_s3] sm:$0xff] %v149_v54  ;;  %140 = vst [vmem:[%s264_s3 + $0x8] sm:$0xff] %v150_v55 }
 0x16d   :  { %145 = vsyncpa [#allocation3], 1 }
 0x16e   :  { %146 = vsyncpa [#allocation5], 1 }

// kernel: _lambda_.19
= control target key start
LH: loop header
LB: loop body
LE: loop exit
PB: predicated region body
PF: predicated region fallthrough
CT: control target
= control target key end

     0   :  { %8 = vsyncpa [#allocation4], 0  ;;  %s2218_s0 = inlined_call_operand.vmem [shape: bf16[8,512], index: 0, kind: input, shape index: {}]   ;;  %s2219_s1 = inlined_call_operand.hbm [shape: bf16[512,1536], index: 1, kind: input, shape index: {}]   ;;  %s2220_s2 = inlined_call_operand.vmem [shape: f32[1,1536], index: 2, kind: input, shape index: {}]   ;;  %s2221_s3 = inlined_call_operand.vmem [shape: bf16[8,1536], index: 3, kind: output, shape index: {}]  }
   0x1   :  { %10 = vsyncpa [#allocation4 + $0x1], 0  ;;  %s1942_s12 = smov 0   ;;  %s1944_s13 = smov 0  }
   0x2   :  { %s1946_s14 = smov 0   ;;  %s1948_s15 = smov 0  }
   0x3   :  { %s1950_s16 = smov 0   ;;  %s1952_s17 = smov 0  }
   0x4 LB: > { %s1430_s18 = sadd.s32 4294967295, %s1916_s17   ;;  %s31_s19 = sadd.s32 1, %s1912_s16  ;;  %s1916_s17 = sphi %s1952_s17, %s16_s17   ;;  %s1912_s16 = sphi %s1950_s16, %s2230_s16   ;;  %s1908_s15 = sphi %s1948_s15, %s2229_s15   ;;  %s1904_s14 = sphi %s1946_s14, %s2228_s14   ;;  %s1900_s13 = sphi %s1944_s13, %s2227_s13   ;;  %s1896_s12 = sphi %s1942_s12, %s2226_s12  }
   0x5   : > { %p33_p0 = scmp.ge.s32.totalorder %s31_s19, 3  ;;  %s72_s20 = sadd.s32 1, %s1904_s14 }
   0x6   : > { %p79_p1 = scmp.ne.s32.totalorder %s1904_s14, %s1900_s13  ;;  %p80_p2 = scmp.eq.s32.totalorder %s1916_s17, 0 }
   0x7   : > { %s2232_s19 = smov (%p33_p0, %s31_s19), 0  ;;  %p85_p4 = scmp.ne.s32.totalorder %s1900_s13, %s1896_s12 }
   0x8   : > { %p1978_p3 = por %p80_p2, %p79_p1  ;;  %s68_s22 = ssub.s32 %s1912_s16, %s2232_s19 }
   0x9   : > { %p86_p5 = scmp.eq.s32.totalorder %s1430_s18, 0  ;;  %p70_p6 = scmp.eq.s32.totalorder %s68_s22, 0 }
   0xa   : > { %p1588_p8 = scmp.lt.s32.totalorder %s1916_s17, 3  ;;  %s176_s25 = sand.u32 1, %s1904_s14  }
   0xb   : > { %p1985_p7 = por %p86_p5, %p85_p4  ;;  %s1579_s26 = sshll.u32 %s1912_s16, 8 }
   0xc   : > { %s1991_s24 = scalar_select %p70_p6, %s1904_s14, %s72_s20  }
   0xd   : > { %s1435_s27 = sshll.u32 %s176_s25, 10  ;;  %s1998_s30 = scalar_lea.hbm %s2219_s1, %s1579_s26 }
   0xe   : > { %s180_s4 = scalar_lea.vmem [#allocation3], %s1435_s27  ;;  %p2002_p9 = pnand %p1588_p8, %p1978_p3 }
   0xf   : > { %s190_s5 = sshll.u32 %s180_s4, 4  ;;  %s2009_s7 = scalar_lea.sflag [#allocation4], %s176_s25  ;;  %s2006_s5 = int_to_ptr.vmem [resolvable:$true] %s190_s5 }
  0x10   : > { %s1836_s8 = scalar_lea.hbm %s1998_s30, 16384  ;;  %p1838_p12 = pneg %p2002_p9 }
  0x11   : > { %p1837_p11 = scmp.ne.s32.totalorder %s1998_s30, %s1836_s8  ;;  %s1841_s11 = scalar_lea.hbm %s2219_s1, 49152 }
  0x12   : > { %p1842_p1 = scmp.lt.u32.totalorder %s1998_s30, %s2219_s1  ;;  %p1843_p2 = scmp.lt.u32.totalorder %s1841_s11, %s1836_s8 }
  0x13   : > { %p1839_p13 = pnand %p1838_p12, %p1837_p11  ;;  %p1845_p4 = scmp.lt.u32.totalorder %s1836_s8, %s1998_s30 }
  0x14   : > { %p1844_p3 = por %p1843_p2, %p1842_p1 }
  0x15   : > { %p1840_p0 = pneg %p1839_p13 }
  0x16   : > { %p1846_p5 = por %p1845_p4, %p1844_p3 }
  0x18   : > { %p1847_p6 = pnand %p1846_p5, %p1840_p0 }
  0x1a   : > { %1850 = shalt.err (!%p1847_p6)
}
  0x1b   : > { %s1851_s20 = scalar_lea.vmem %s2006_s5, 16384  ;;  %s1918_s21 = smov [#allocation3]  }
  0x1c   : > { %p1852_p8 = scmp.ne.s32.totalorder %s2006_s5, %s1851_s20  ;;  %s1856_s22 = sshll.u32 %s1918_s21, 4  ;;  %s1857_s22 = int_to_ptr.vmem [resolvable:$false] %s1856_s22 }
  0x1d   : > { %s1858_s25 = scalar_lea.vmem %s1857_s22, 32768  ;;  %p1859_p10 = scmp.lt.s32.totalorder %s2006_s5, %s1857_s22 }
  0x1e   : > { %p1854_p11 = pnand %p1852_p8, %p1838_p12  ;;  %p1860_p1 = scmp.lt.s32.totalorder %s1858_s25, %s1851_s20 }
  0x20   : > { %p1855_p13 = pneg %p1854_p11  ;;  %p1861_p2 = por %p1860_p1, %p1859_p10 }
  0x22   : > { %p1862_p3 = pnand %p1861_p2, %p1855_p13 }
  0x24   : > { %1865 = shalt.err (!%p1862_p3)
}
  0x25   : > { %s1919_s26 = smov 768   ;;  %s1920_s27 = smov 256  }
  0x26   : > { %s1921_s28 = smov 16   ;;  %p206_p12 = scmp.lt.s32.totalorder %s1916_s17, 4 }
  0x27   : > { %1587 = dma.hbm_to_vmem [thread:$0]  (!%p2002_p9), %s1998_s30, 16384, %s2006_s5, %s2009_s7, %s1919_s26, %s1920_s27, %s1921_s28  }
  0x28   : > { %p2225_p0 = scmp.ge.s32.totalorder %s1916_s17, 1 }
  0x2a   : > { %p207_p4 = pnand %p2225_p0, %p206_p12 }
  0x2b   : > { %s212_s29 = sand.u32 (!%p207_p4), 1, %s1900_s13  }
  0x2c   : > { %210 = sbr.rel (%p207_p4) target bundleno = 402 (0x192), region = 32  ;;  %s1439_s4 = sshll.u32 (!%p207_p4), %s212_s29, 10 }
  0x2d   : > { %s213_s8 = scalar_lea.sflag (!%p207_p4), [#allocation4], %s212_s29  ;;  %s2041_s9 = scalar_lea.vmem (!%p207_p4), [#allocation3], %s1439_s4 }
  0x33   : > { %1891 = dma.done.wait (%p1985_p7), %s213_s8, 16384  }
  0x34   : > { %1893 = vsyncadd (%p1985_p7), %s213_s8, 4294950912  ;;  %v1640_v0 = vld [vmem:[%s2041_s9 + $0x4] ss:$16 sps:$4 sm:$0xff]   ;;  %v1644_v2 = vld [vmem:[%s2041_s9] ss:$16 sps:$4 sm:$0xff]   ;;  %s1440_s7 = sshll.u32 %s1908_s15, 2 }
  0x35   : > { %v1642_v1 = vld [vmem:[%s2041_s9 + $0x204] ss:$16 sps:$4 sm:$0xff]   ;;  %1079 = vmatprep.subr.bf16.mxu0 %v1640_v0  ;;  %v1645_v3 = vld [vmem:[%s2041_s9 + $0x200] ss:$16 sps:$4 sm:$0xff]   ;;  %v292_v48 = vld [vmem:[%s2218_s0 + $0x8] sm:$0xff]  ;;  %p269_p7 = scmp.lt.s32.totalorder %s1440_s7, 11 }
  0x36   : > { %1120 = vmatprep.subr.bf16.mxu1 %v1642_v1  ;;  %v1646_v4 = vld [vmem:[%s2041_s9 + $0x24] ss:$16 sps:$4 sm:$0xff]   ;;  %1080 = vmatpush1.bf16.msra.mxu0 %v1644_v2  ;;  %v1650_v6 = vld [vmem:[%s2041_s9 + $0x20] ss:$16 sps:$4 sm:$0xff]   ;;  %v1446_v51 = vcombine.high %v292_v48, %v292_v48 }
  0x37   : > { %1121 = vmatpush1.bf16.msra.mxu1 %v1645_v3  ;;  %v1648_v5 = vld [vmem:[%s2041_s9 + $0x224] ss:$16 sps:$4 sm:$0xff]   ;;  %1081 = vmatprep.subr.bf16.mxu0 %v1646_v4  ;;  %v1651_v7 = vld [vmem:[%s2041_s9 + $0x220] ss:$16 sps:$4 sm:$0xff]   ;;  %v1742_v4 = vld [vmem:[%s2041_s9 + $0xc] ss:$16 sps:$4 sm:$0xff]  }
  0x38   : > { %1122 = vmatprep.subr.bf16.mxu1 %v1648_v5  ;;  %v1652_v8 = vld [vmem:[%s2041_s9 + $0x44] ss:$16 sps:$4 sm:$0xff]   ;;  %v1656_v10 = vld [vmem:[%s2041_s9 + $0x40] ss:$16 sps:$4 sm:$0xff]   ;;  %1152 = vmatprep.mubr.bf16.mxu1 %v1446_v51  ;;  %v1745_v5 = vld [vmem:[%s2041_s9 + $0x20c] ss:$16 sps:$4 sm:$0xff]  }
  0x39   : > { %v1654_v9 = vld [vmem:[%s2041_s9 + $0x244] ss:$16 sps:$4 sm:$0xff]   ;;  %v1657_v11 = vld [vmem:[%s2041_s9 + $0x240] ss:$16 sps:$4 sm:$0xff]   ;;  %s2234_s7 = smov (!%p269_p7, %s1440_s7), 11 }
  0x3a   : > { %1082 = vmatpush1.bf16.msra.mxu0 %v1650_v6  ;;  %v1658_v12 = vld [vmem:[%s2041_s9 + $0x64] ss:$16 sps:$4 sm:$0xff]   ;;  %v1662_v14 = vld [vmem:[%s2041_s9 + $0x60] ss:$16 sps:$4 sm:$0xff]   ;;  %s271_s12 = scalar_lea.vmem %s2220_s2, %s2234_s7  ;;  %s1442_s15 = sshll.u32 %s2234_s7, 2 }
  0x3b   : > { %1123 = vmatpush1.bf16.msra.mxu1 %v1651_v7  ;;  %1083 = vmatprep.subr.bf16.mxu0 %v1652_v8  ;;  %v1660_v13 = vld [vmem:[%s2041_s9 + $0x264] ss:$16 sps:$4 sm:$0xff]   ;;  %v1663_v15 = vld [vmem:[%s2041_s9 + $0x260] ss:$16 sps:$4 sm:$0xff]   ;;  %v2124_v7 = vcombine.low %v292_v48, %v292_v48  ;;  %v1740_v8 = vld [vmem:[%s2041_s9 + $0x8] ss:$16 sps:$4 sm:$0xff]   ;;  %s281_s21 = scalar_lea.vmem %s2221_s3, %s1442_s15 }
  0x3c   : > { %1124 = vmatprep.subr.bf16.mxu1 %v1654_v9  ;;  %v1664_v16 = vld [vmem:[%s2041_s9 + $0x84] ss:$16 sps:$4 sm:$0xff]   ;;  %v1668_v18 = vld [vmem:[%s2041_s9 + $0x80] ss:$16 sps:$4 sm:$0xff]   ;;  %v1743_v9 = vld [vmem:[%s2041_s9 + $0x208] ss:$16 sps:$4 sm:$0xff]  }
  0x3d   : > { %v1666_v17 = vld [vmem:[%s2041_s9 + $0x284] ss:$16 sps:$4 sm:$0xff]   ;;  %v1669_v19 = vld [vmem:[%s2041_s9 + $0x280] ss:$16 sps:$4 sm:$0xff]   ;;  %v1800_v48 = vld [vmem:[%s2041_s9 + $0x148] ss:$16 sps:$4 sm:$0xff]  }
  0x3e   : > { %1084 = vmatpush1.bf16.msra.mxu0 %v1656_v10  ;;  %v1670_v20 = vld [vmem:[%s2041_s9 + $0xa4] ss:$16 sps:$4 sm:$0xff]   ;;  %v1674_v22 = vld [vmem:[%s2041_s9 + $0xa0] ss:$16 sps:$4 sm:$0xff]   ;;  %v1748_v10 = vld [vmem:[%s2041_s9 + $0x2c] ss:$16 sps:$4 sm:$0xff]  }
  0x3f   : > { %1125 = vmatpush1.bf16.msra.mxu1 %v1657_v11  ;;  %1085 = vmatprep.subr.bf16.mxu0 %v1658_v12  ;;  %v1672_v21 = vld [vmem:[%s2041_s9 + $0x2a4] ss:$16 sps:$4 sm:$0xff]   ;;  %v1675_v23 = vld [vmem:[%s2041_s9 + $0x2a0] ss:$16 sps:$4 sm:$0xff]   ;;  %v1751_v11 = vld [vmem:[%s2041_s9 + $0x22c] ss:$16 sps:$4 sm:$0xff]  }
  0x40   : > { %1126 = vmatprep.subr.bf16.mxu1 %v1660_v13  ;;  %v1676_v24 = vld [vmem:[%s2041_s9 + $0xc4] ss:$16 sps:$4 sm:$0xff]   ;;  %v1680_v26 = vld [vmem:[%s2041_s9 + $0xc0] ss:$16 sps:$4 sm:$0xff]   ;;  %v1746_v12 = vld [vmem:[%s2041_s9 + $0x28] ss:$16 sps:$4 sm:$0xff]  }
  0x41   : > { %v1678_v25 = vld [vmem:[%s2041_s9 + $0x2c4] ss:$16 sps:$4 sm:$0xff]   ;;  %v1681_v27 = vld [vmem:[%s2041_s9 + $0x2c0] ss:$16 sps:$4 sm:$0xff]   ;;  %v1749_v13 = vld [vmem:[%s2041_s9 + $0x228] ss:$16 sps:$4 sm:$0xff]  }
  0x42   : > { %1086 = vmatpush1.bf16.msra.mxu0 %v1662_v14  ;;  %v1682_v28 = vld [vmem:[%s2041_s9 + $0xe4] ss:$16 sps:$4 sm:$0xff]   ;;  %v1686_v30 = vld [vmem:[%s2041_s9 + $0xe0] ss:$16 sps:$4 sm:$0xff]   ;;  %v1754_v14 = vld [vmem:[%s2041_s9 + $0x4c] ss:$16 sps:$4 sm:$0xff]  }
  0x43   : > { %1127 = vmatpush1.bf16.msra.mxu1 %v1663_v15  ;;  %1087 = vmatprep.subr.bf16.mxu0 %v1664_v16  ;;  %v1684_v29 = vld [vmem:[%s2041_s9 + $0x2e4] ss:$16 sps:$4 sm:$0xff]   ;;  %v1687_v31 = vld [vmem:[%s2041_s9 + $0x2e0] ss:$16 sps:$4 sm:$0xff]   ;;  %v1757_v15 = vld [vmem:[%s2041_s9 + $0x24c] ss:$16 sps:$4 sm:$0xff]  }
  0x44   : > { %1128 = vmatprep.subr.bf16.mxu1 %v1666_v17  ;;  %v1688_v32 = vld [vmem:[%s2041_s9 + $0x104] ss:$16 sps:$4 sm:$0xff]   ;;  %v1692_v34 = vld [vmem:[%s2041_s9 + $0x100] ss:$16 sps:$4 sm:$0xff]   ;;  %v1752_v16 = vld [vmem:[%s2041_s9 + $0x48] ss:$16 sps:$4 sm:$0xff]  }
  0x45   : > { %v1690_v33 = vld [vmem:[%s2041_s9 + $0x304] ss:$16 sps:$4 sm:$0xff]   ;;  %v1693_v35 = vld [vmem:[%s2041_s9 + $0x300] ss:$16 sps:$4 sm:$0xff]   ;;  %v1755_v17 = vld [vmem:[%s2041_s9 + $0x248] ss:$16 sps:$4 sm:$0xff]  }
  0x46   : > { %1088 = vmatpush1.bf16.msra.mxu0 %v1668_v18  ;;  %v1694_v36 = vld [vmem:[%s2041_s9 + $0x124] ss:$16 sps:$4 sm:$0xff]   ;;  %v1698_v38 = vld [vmem:[%s2041_s9 + $0x120] ss:$16 sps:$4 sm:$0xff]   ;;  %v1760_v18 = vld [vmem:[%s2041_s9 + $0x6c] ss:$16 sps:$4 sm:$0xff]  }
  0x47   : > { %1129 = vmatpush1.bf16.msra.mxu1 %v1669_v19  ;;  %1089 = vmatprep.subr.bf16.mxu0 %v1670_v20  ;;  %v1696_v37 = vld [vmem:[%s2041_s9 + $0x324] ss:$16 sps:$4 sm:$0xff]   ;;  %v1699_v39 = vld [vmem:[%s2041_s9 + $0x320] ss:$16 sps:$4 sm:$0xff]   ;;  %v1763_v19 = vld [vmem:[%s2041_s9 + $0x26c] ss:$16 sps:$4 sm:$0xff]  }
  0x48   : > { %1130 = vmatprep.subr.bf16.mxu1 %v1672_v21  ;;  %v1700_v40 = vld [vmem:[%s2041_s9 + $0x144] ss:$16 sps:$4 sm:$0xff]   ;;  %v1704_v42 = vld [vmem:[%s2041_s9 + $0x140] ss:$16 sps:$4 sm:$0xff]   ;;  %v1758_v20 = vld [vmem:[%s2041_s9 + $0x68] ss:$16 sps:$4 sm:$0xff]  }
  0x49   : > { %v1702_v41 = vld [vmem:[%s2041_s9 + $0x344] ss:$16 sps:$4 sm:$0xff]   ;;  %v1705_v43 = vld [vmem:[%s2041_s9 + $0x340] ss:$16 sps:$4 sm:$0xff]   ;;  %v1761_v21 = vld [vmem:[%s2041_s9 + $0x268] ss:$16 sps:$4 sm:$0xff]  }
  0x4a   : > { %1090 = vmatpush1.bf16.msra.mxu0 %v1674_v22  ;;  %v1706_v44 = vld [vmem:[%s2041_s9 + $0x164] ss:$16 sps:$4 sm:$0xff]   ;;  %v1710_v49 = vld [vmem:[%s2041_s9 + $0x160] ss:$16 sps:$4 sm:$0xff]   ;;  %v1766_v22 = vld [vmem:[%s2041_s9 + $0x8c] ss:$16 sps:$4 sm:$0xff]  }
  0x4b   : > { %1131 = vmatpush1.bf16.msra.mxu1 %v1675_v23  ;;  %1091 = vmatprep.subr.bf16.mxu0 %v1676_v24  ;;  %v1708_v45 = vld [vmem:[%s2041_s9 + $0x364] ss:$16 sps:$4 sm:$0xff]   ;;  %v1711_v50 = vld [vmem:[%s2041_s9 + $0x360] ss:$16 sps:$4 sm:$0xff]   ;;  %v1769_v23 = vld [vmem:[%s2041_s9 + $0x28c] ss:$16 sps:$4 sm:$0xff]  }
  0x4c   : > { %1132 = vmatprep.subr.bf16.mxu1 %v1678_v25  ;;  %v291_v46 = vld [vmem:[%s2218_s0] sm:$0xff]  ;;  %v1764_v24 = vld [vmem:[%s2041_s9 + $0x88] ss:$16 sps:$4 sm:$0xff]  }
  0x4d   : > { %v2096_v47 = vcombine.high %v291_v46, %v291_v46  ;;  %v1712_v52 = vld [vmem:[%s2041_s9 + $0x184] ss:$16 sps:$4 sm:$0xff]   ;;  %v1716_v54 = vld [vmem:[%s2041_s9 + $0x180] ss:$16 sps:$4 sm:$0xff]   ;;  %v2122_v6 = vcombine.low %v291_v46, %v291_v46  ;;  %v1767_v25 = vld [vmem:[%s2041_s9 + $0x288] ss:$16 sps:$4 sm:$0xff]  }
  0x4e   : > { %1092 = vmatpush1.bf16.msra.mxu0 %v1680_v26  ;;  %v1714_v53 = vld [vmem:[%s2041_s9 + $0x384] ss:$16 sps:$4 sm:$0xff]   ;;  %v1717_v55 = vld [vmem:[%s2041_s9 + $0x380] ss:$16 sps:$4 sm:$0xff]   ;;  %v1772_v26 = vld [vmem:[%s2041_s9 + $0xac] ss:$16 sps:$4 sm:$0xff]  }
  0x4f   : > { %1133 = vmatpush1.bf16.msra.mxu1 %v1681_v27  ;;  %1093 = vmatprep.subr.bf16.mxu0 %v1682_v28  ;;  %v1718_v56 = vld [vmem:[%s2041_s9 + $0x1a4] ss:$16 sps:$4 sm:$0xff]   ;;  %v1722_v58 = vld [vmem:[%s2041_s9 + $0x1a0] ss:$16 sps:$4 sm:$0xff]   ;;  %v1775_v27 = vld [vmem:[%s2041_s9 + $0x2ac] ss:$16 sps:$4 sm:$0xff]  }
  0x50   : > { %1134 = vmatprep.subr.bf16.mxu1 %v1684_v29  ;;  %1111 = vmatprep.mubr.bf16.mxu0 %v2096_v47  ;;  %v1720_v57 = vld [vmem:[%s2041_s9 + $0x3a4] ss:$16 sps:$4 sm:$0xff]   ;;  %v1723_v59 = vld [vmem:[%s2041_s9 + $0x3a0] ss:$16 sps:$4 sm:$0xff]   ;;  %v1770_v28 = vld [vmem:[%s2041_s9 + $0xa8] ss:$16 sps:$4 sm:$0xff]  }
  0x51   : > { %v1724_v60 = vld [vmem:[%s2041_s9 + $0x1c4] ss:$16 sps:$4 sm:$0xff]   ;;  %v1728_v62 = vld [vmem:[%s2041_s9 + $0x1c0] ss:$16 sps:$4 sm:$0xff]   ;;  %v1773_v29 = vld [vmem:[%s2041_s9 + $0x2a8] ss:$16 sps:$4 sm:$0xff]  }
  0x52   : > { %1094 = vmatpush1.bf16.msra.mxu0 %v1686_v30  ;;  %v1726_v61 = vld [vmem:[%s2041_s9 + $0x3c4] ss:$16 sps:$4 sm:$0xff]   ;;  %v1729_v63 = vld [vmem:[%s2041_s9 + $0x3c0] ss:$16 sps:$4 sm:$0xff]   ;;  %v1778_v30 = vld [vmem:[%s2041_s9 + $0xcc] ss:$16 sps:$4 sm:$0xff]  }
  0x53   : > { %1135 = vmatpush1.bf16.msra.mxu1 %v1687_v31  ;;  %1095 = vmatprep.subr.bf16.mxu0 %v1688_v32  ;;  %v1730_v0 = vld [vmem:[%s2041_s9 + $0x1e4] ss:$16 sps:$4 sm:$0xff]   ;;  %v1734_v2 = vld [vmem:[%s2041_s9 + $0x1e0] ss:$16 sps:$4 sm:$0xff]   ;;  %v1781_v31 = vld [vmem:[%s2041_s9 + $0x2cc] ss:$16 sps:$4 sm:$0xff]  }
  0x54   : > { %1136 = vmatprep.subr.bf16.mxu1 %v1690_v33  ;;  %v1732_v1 = vld [vmem:[%s2041_s9 + $0x3e4] ss:$16 sps:$4 sm:$0xff]   ;;  %v1735_v3 = vld [vmem:[%s2041_s9 + $0x3e0] ss:$16 sps:$4 sm:$0xff]   ;;  %v1776_v32 = vld [vmem:[%s2041_s9 + $0xc8] ss:$16 sps:$4 sm:$0xff]  }
  0x55   : > { %v1779_v33 = vld [vmem:[%s2041_s9 + $0x2c8] ss:$16 sps:$4 sm:$0xff]   ;;  %v1802_v46 = vld [vmem:[%s2041_s9 + $0x14c] ss:$16 sps:$4 sm:$0xff]  }
  0x56   : > { %1096 = vmatpush1.bf16.msra.mxu0 %v1692_v34  ;;  %v1784_v34 = vld [vmem:[%s2041_s9 + $0xec] ss:$16 sps:$4 sm:$0xff]  }
  0x57   : > { %1137 = vmatpush1.bf16.msra.mxu1 %v1693_v35  ;;  %1097 = vmatprep.subr.bf16.mxu0 %v1694_v36  ;;  %v1787_v35 = vld [vmem:[%s2041_s9 + $0x2ec] ss:$16 sps:$4 sm:$0xff]   ;;  %v1782_v36 = vld [vmem:[%s2041_s9 + $0xe8] ss:$16 sps:$4 sm:$0xff]  }
  0x58   : > { %1138 = vmatprep.subr.bf16.mxu1 %v1696_v37  ;;  %v1785_v37 = vld [vmem:[%s2041_s9 + $0x2e8] ss:$16 sps:$4 sm:$0xff]  }
  0x5a   : > { %1098 = vmatpush1.bf16.msra.mxu0 %v1698_v38  ;;  %v1790_v38 = vld [vmem:[%s2041_s9 + $0x10c] ss:$16 sps:$4 sm:$0xff]  }
  0x5b   : > { %1139 = vmatpush1.bf16.msra.mxu1 %v1699_v39  ;;  %1099 = vmatprep.subr.bf16.mxu0 %v1700_v40  ;;  %v1793_v39 = vld [vmem:[%s2041_s9 + $0x30c] ss:$16 sps:$4 sm:$0xff]   ;;  %v1788_v40 = vld [vmem:[%s2041_s9 + $0x108] ss:$16 sps:$4 sm:$0xff]  }
  0x5c   : > { %1140 = vmatprep.subr.bf16.mxu1 %v1702_v41  ;;  %v1791_v41 = vld [vmem:[%s2041_s9 + $0x308] ss:$16 sps:$4 sm:$0xff]  }
  0x5e   : > { %1100 = vmatpush1.bf16.msra.mxu0 %v1704_v42  ;;  %v1796_v42 = vld [vmem:[%s2041_s9 + $0x12c] ss:$16 sps:$4 sm:$0xff]  }
  0x5f   : > { %1141 = vmatpush1.bf16.msra.mxu1 %v1705_v43  ;;  %1101 = vmatprep.subr.bf16.mxu0 %v1706_v44  ;;  %v1799_v43 = vld [vmem:[%s2041_s9 + $0x32c] ss:$16 sps:$4 sm:$0xff]   ;;  %v1794_v44 = vld [vmem:[%s2041_s9 + $0x128] ss:$16 sps:$4 sm:$0xff]  }
  0x60   : > { %1142 = vmatprep.subr.bf16.mxu1 %v1708_v45  ;;  %v1797_v45 = vld [vmem:[%s2041_s9 + $0x328] ss:$16 sps:$4 sm:$0xff]  }
  0x62   : > { %1102 = vmatpush1.bf16.msra.mxu0 %v1710_v49  ;;  %v1803_v49 = vld [vmem:[%s2041_s9 + $0x348] ss:$16 sps:$4 sm:$0xff]  }
  0x63   : > { %1143 = vmatpush1.bf16.msra.mxu1 %v1711_v50  ;;  %1103 = vmatprep.subr.bf16.mxu0 %v1712_v52  ;;  %v1808_v50 = vld [vmem:[%s2041_s9 + $0x16c] ss:$16 sps:$4 sm:$0xff]   ;;  %v1806_v52 = vld [vmem:[%s2041_s9 + $0x168] ss:$16 sps:$4 sm:$0xff]  }
  0x64   : > { %1144 = vmatprep.subr.bf16.mxu1 %v1714_v53  ;;  %v1809_v53 = vld [vmem:[%s2041_s9 + $0x368] ss:$16 sps:$4 sm:$0xff]  }
  0x66   : > { %1104 = vmatpush1.bf16.msra.mxu0 %v1716_v54  ;;  %v1814_v54 = vld [vmem:[%s2041_s9 + $0x18c] ss:$16 sps:$4 sm:$0xff]  }
  0x67   : > { %1145 = vmatpush1.bf16.msra.mxu1 %v1717_v55  ;;  %1105 = vmatprep.subr.bf16.mxu0 %v1718_v56  ;;  %v1817_v55 = vld [vmem:[%s2041_s9 + $0x38c] ss:$16 sps:$4 sm:$0xff]   ;;  %v1812_v56 = vld [vmem:[%s2041_s9 + $0x188] ss:$16 sps:$4 sm:$0xff]  }
  0x68   : > { %1146 = vmatprep.subr.bf16.mxu1 %v1720_v57  ;;  %v1815_v57 = vld [vmem:[%s2041_s9 + $0x388] ss:$16 sps:$4 sm:$0xff]  }
  0x6a   : > { %1106 = vmatpush1.bf16.msra.mxu0 %v1722_v58  ;;  %v1820_v58 = vld [vmem:[%s2041_s9 + $0x1ac] ss:$16 sps:$4 sm:$0xff]  }
  0x6b   : > { %1147 = vmatpush1.bf16.msra.mxu1 %v1723_v59  ;;  %1107 = vmatprep.subr.bf16.mxu0 %v1724_v60  ;;  %v1823_v59 = vld [vmem:[%s2041_s9 + $0x3ac] ss:$16 sps:$4 sm:$0xff]   ;;  %v1818_v60 = vld [vmem:[%s2041_s9 + $0x1a8] ss:$16 sps:$4 sm:$0xff]  }
  0x6c   : > { %1148 = vmatprep.subr.bf16.mxu1 %v1726_v61  ;;  %v1821_v61 = vld [vmem:[%s2041_s9 + $0x3a8] ss:$16 sps:$4 sm:$0xff]  }
  0x6e   : > { %1108 = vmatpush1.bf16.msra.mxu0 %v1728_v62  ;;  %v1826_v62 = vld [vmem:[%s2041_s9 + $0x1cc] ss:$16 sps:$4 sm:$0xff]  }
  0x6f   : > { %1149 = vmatpush1.bf16.msra.mxu1 %v1729_v63  ;;  %1109 = vmatprep.subr.bf16.mxu0 %v1730_v0  ;;  %v1829_v63 = vld [vmem:[%s2041_s9 + $0x3cc] ss:$16 sps:$4 sm:$0xff]   ;;  %v1824_v0 = vld [vmem:[%s2041_s9 + $0x1c8] ss:$16 sps:$4 sm:$0xff]  }
  0x70   : > { %1150 = vmatprep.subr.bf16.mxu1 %v1732_v1  ;;  %v1827_v1 = vld [vmem:[%s2041_s9 + $0x3c8] ss:$16 sps:$4 sm:$0xff]  }
  0x72   : > { %1110 = vmatpush1.bf16.msra.mxu0 %v1734_v2  ;;  %v1832_v2 = vld [vmem:[%s2041_s9 + $0x1ec] ss:$16 sps:$4 sm:$0xff]  }
  0x73   : > { %1151 = vmatpush1.bf16.msra.mxu1 %v1735_v3  ;;  %1161 = vmatprep.subr.bf16.mxu0 %v1742_v4  ;;  %v1835_v3 = vld [vmem:[%s2041_s9 + $0x3ec] ss:$16 sps:$4 sm:$0xff]   ;;  %v1830_v4 = vld [vmem:[%s2041_s9 + $0x1e8] ss:$16 sps:$4 sm:$0xff]  }
  0x74   : > { %1202 = vmatprep.subr.bf16.mxu1 %v1745_v5  ;;  %v1833_v5 = vld [vmem:[%s2041_s9 + $0x3e8] ss:$16 sps:$4 sm:$0xff]  }
  0x75   : > { %1112 = vmatmul.mubr.bf16.vlgmr.msra.gmra.mrb[0].mxu0 %v2122_v6 }
  0x76   : > { %1153 = vmatmul.mubr.bf16.vlgmr.msra.gmra.mrb[0].mxu1 %v2124_v7  ;;  %1162 = vmatpush1.bf16.msra.mxu0 %v1740_v8  ;;  %v1260_v8 = vlaneseq }
  0x77   : > { %1203 = vmatpush1.bf16.msra.mxu1 %v1743_v9  ;;  %1163 = vmatprep.subr.bf16.mxu0 %v1748_v10 }
  0x78   : > { %1204 = vmatprep.subr.bf16.mxu1 %v1751_v11  ;;  %1193 = vmatprep.mubr.bf16.mxu0 %v2096_v47  ;;  %v1805_v47 = vld [vmem:[%s2041_s9 + $0x34c] ss:$16 sps:$4 sm:$0xff]   ;;  %v1261_v9 = vshrl.u32 %v1260_v8, 7  ;;  %v1258_v11 = vld [vmem:[%s271_s12] sm:$0xf] }
  0x79   : > { %1234 = vmatprep.mubr.bf16.mxu1 %v1446_v51  ;;  %v1811_v51 = vld [vmem:[%s2041_s9 + $0x36c] ss:$16 sps:$4 sm:$0xff]  }
  0x7a   : > { %1164 = vmatpush1.bf16.msra.mxu0 %v1746_v12  ;;  %v1270_v10 = vsub.s32 2, %v1261_v9  ;;  %v1274_v12 = vsub.s32 3, %v1261_v9 }
  0x7b   : > { %1205 = vmatpush1.bf16.msra.mxu1 %v1749_v13  ;;  %1165 = vmatprep.subr.bf16.mxu0 %v1754_v14 }
  0x7c   : > { %1206 = vmatprep.subr.bf16.mxu1 %v1757_v15  ;;  %v1271_v13 = vrot.slane %v1258_v11, %v1270_v10  ;;  %v1275_v14 = vrot.slane %v1258_v11, %v1274_v12  ;;  %v1262_v15 = vsub.s32 0, %v1261_v9 }
  0x7e   : > { %1166 = vmatpush1.bf16.msra.mxu0 %v1752_v16  ;;  %v1266_v16 = vsub.s32 1, %v1261_v9 }
  0x7f   : > { %1207 = vmatpush1.bf16.msra.mxu1 %v1755_v17  ;;  %1167 = vmatprep.subr.bf16.mxu0 %v1760_v18  ;;  %v1263_v17 = vrot.slane %v1258_v11, %v1262_v15 }
  0x80   : > { %1208 = vmatprep.subr.bf16.mxu1 %v1763_v19 }
  0x82   : > { %1168 = vmatpush1.bf16.msra.mxu0 %v1758_v20 }
  0x83   : > { %1209 = vmatpush1.bf16.msra.mxu1 %v1761_v21  ;;  %1169 = vmatprep.subr.bf16.mxu0 %v1766_v22 }
  0x84   : > { %1210 = vmatprep.subr.bf16.mxu1 %v1769_v23 }
  0x86   : > { %1170 = vmatpush1.bf16.msra.mxu0 %v1764_v24 }
  0x87   : > { %1211 = vmatpush1.bf16.msra.mxu1 %v1767_v25  ;;  %1171 = vmatprep.subr.bf16.mxu0 %v1772_v26 }
  0x88   : > { %1212 = vmatprep.subr.bf16.mxu1 %v1775_v27 }
  0x8a   : > { %1172 = vmatpush1.bf16.msra.mxu0 %v1770_v28 }
  0x8b   : > { %1213 = vmatpush1.bf16.msra.mxu1 %v1773_v29  ;;  %1173 = vmatprep.subr.bf16.mxu0 %v1778_v30 }
  0x8c   : > { %1214 = vmatprep.subr.bf16.mxu1 %v1781_v31 }
  0x8e   : > { %1174 = vmatpush1.bf16.msra.mxu0 %v1776_v32 }
  0x8f   : > { %1215 = vmatpush1.bf16.msra.mxu1 %v1779_v33  ;;  %1175 = vmatprep.subr.bf16.mxu0 %v1784_v34 }
  0x90   : > { %1216 = vmatprep.subr.bf16.mxu1 %v1787_v35 }
  0x92   : > { %1176 = vmatpush1.bf16.msra.mxu0 %v1782_v36 }
  0x93   : > { %1217 = vmatpush1.bf16.msra.mxu1 %v1785_v37  ;;  %1177 = vmatprep.subr.bf16.mxu0 %v1790_v38 }
  0x94   : > { %1218 = vmatprep.subr.bf16.mxu1 %v1793_v39 }
  0x96   : > { %1178 = vmatpush1.bf16.msra.mxu0 %v1788_v40 }
  0x97   : > { %1219 = vmatpush1.bf16.msra.mxu1 %v1791_v41  ;;  %1179 = vmatprep.subr.bf16.mxu0 %v1796_v42 }
  0x98   : > { %1220 = vmatprep.subr.bf16.mxu1 %v1799_v43 }
  0x9a   : > { %1180 = vmatpush1.bf16.msra.mxu0 %v1794_v44 }
  0x9b   : > { %1221 = vmatpush1.bf16.msra.mxu1 %v1797_v45  ;;  %1181 = vmatprep.subr.bf16.mxu0 %v1802_v46 }
  0x9c   : > { %1222 = vmatprep.subr.bf16.mxu1 %v1805_v47 }
  0x9e   : > { %1182 = vmatpush1.bf16.msra.mxu0 %v1800_v48 }
  0x9f   : > { %1223 = vmatpush1.bf16.msra.mxu1 %v1803_v49  ;;  %1183 = vmatprep.subr.bf16.mxu0 %v1808_v50 }
  0xa0   : > { %1224 = vmatprep.subr.bf16.mxu1 %v1811_v51 }
  0xa2   : > { %1184 = vmatpush1.bf16.msra.mxu0 %v1806_v52 }
  0xa3   : > { %1225 = vmatpush1.bf16.msra.mxu1 %v1809_v53  ;;  %1185 = vmatprep.subr.bf16.mxu0 %v1814_v54 }
  0xa4   : > { %1226 = vmatprep.subr.bf16.mxu1 %v1817_v55 }
  0xa6   : > { %1186 = vmatpush1.bf16.msra.mxu0 %v1812_v56 }
  0xa7   : > { %1227 = vmatpush1.bf16.msra.mxu1 %v1815_v57  ;;  %1187 = vmatprep.subr.bf16.mxu0 %v1820_v58 }
  0xa8   : > { %1228 = vmatprep.subr.bf16.mxu1 %v1823_v59 }
  0xaa   : > { %1188 = vmatpush1.bf16.msra.mxu0 %v1818_v60 }
  0xab   : > { %1229 = vmatpush1.bf16.msra.mxu1 %v1821_v61  ;;  %1189 = vmatprep.subr.bf16.mxu0 %v1826_v62 }
  0xac   : > { %1230 = vmatprep.subr.bf16.mxu1 %v1829_v63 }
  0xae   : > { %1190 = vmatpush1.bf16.msra.mxu0 %v1824_v0 }
  0xaf   : > { %1231 = vmatpush1.bf16.msra.mxu1 %v1827_v1  ;;  %1191 = vmatprep.subr.bf16.mxu0 %v1832_v2 }
  0xb0   : > { %1232 = vmatprep.subr.bf16.mxu1 %v1835_v3 }
  0xb2   : > { %1192 = vmatpush1.bf16.msra.mxu0 %v1830_v4 }
  0xb3   : > { %1233 = vmatpush1.bf16.msra.mxu1 %v1833_v5 }
  0xb5   : > { %1194 = vmatmul.mubr.bf16.vlgmr.msra.gmra.mrb[4].mxu0 %v2122_v6 }
  0xb6   : > { %1235 = vmatmul.mubr.bf16.vlgmr.msra.gmra.mrb[4].mxu1 %v2124_v7  ;;  %v1267_v7 = vrot.slane %v1258_v11, %v1266_v16 }
 0x148   : > { %v1113_v6 = vpop.f32.mrb[0].mxu0 }
 0x149   : > { %v1154_v18 = vpop.f32.mrb[0].mxu1  ;;  %v1115_v20 = vpop.f32.mrb[1].mxu0 }
 0x14a   : > { %v1155_v19 = vadd.f32 %v1154_v18, %v1113_v6  ;;  %v1156_v21 = vpop.f32.mrb[1].mxu1  ;;  %v1117_v23 = vpop.f32.mrb[2].mxu0 }
 0x14b   : > { %v1157_v22 = vadd.f32 %v1156_v21, %v1115_v20  ;;  %v1158_v24 = vpop.f32.mrb[2].mxu1  ;;  %v1118_v26 = vpop.f32.mrb[3].mxu0 }
 0x14c   : > { %v1280_v25 = vadd.f32 %v1263_v17, %v1155_v19  ;;  %v1159_v27 = vpop.f32.mrb[3].mxu1 }
 0x14d   : > { %v1281_v28 = vadd.f32 %v1267_v7, %v1157_v22 }
 0x14f   : > { %v1580_v29 = vpack.c.bf16 %v1281_v28, %v1280_v25 }
 0x151   : > { %1300 = vst [vmem:[%s281_s21] sm:$0xff] %v1580_v29 }
 0x188   : > { %v1195_v30 = vpop.f32.mrb[4].mxu0 }
 0x189   : > { %v1236_v31 = vpop.f32.mrb[4].mxu1  ;;  %v1197_v33 = vpop.f32.mrb[5].mxu0 }
 0x18a   : > { %v1237_v32 = vadd.f32 %v1236_v31, %v1195_v30  ;;  %v1238_v34 = vpop.f32.mrb[5].mxu1  ;;  %v1199_v36 = vpop.f32.mrb[6].mxu0 }
 0x18b   : > { %v1239_v35 = vadd.f32 %v1238_v34, %v1197_v33  ;;  %v1240_v37 = vpop.f32.mrb[6].mxu1  ;;  %v1200_v39 = vpop.f32.mrb[7].mxu0 }
 0x18c   : > { %v1282_v38 = vadd.f32 %v1271_v13, %v1237_v32  ;;  %v1241_v40 = vpop.f32.mrb[7].mxu1 }
 0x18d   : > { %v1283_v41 = vadd.f32 %v1275_v14, %v1239_v35 }
 0x18f   : > { %v1581_v42 = vpack.c.bf16 %v1283_v41, %v1282_v38 }
 0x191   : > { %1301 = vst [vmem:[%s281_s21 + $0x8] sm:$0xff] %v1581_v42 }
 0x192 PF: > { %s16_s17 = sadd.s32 1, %s1916_s17   ;;  %s2226_s12 = smov %s1900_s13 }
 0x193   : > { %p13_p9 = scmp.ge.s32.totalorder %s16_s17, 5   ;;  %s2227_s13 = smov %s1904_s14 }
 0x194   : > { %s2228_s14 = smov %s1991_s24  ;;  %s2229_s15 = smov %s1912_s16 }
 0x195   : > { %s2230_s16 = smov %s2232_s19  ;;  %15 = sbr.rel (!%p13_p9) target bundleno = 4 (0x4), region = 86 }
 0x19c   :  { %1332 = vsyncpa [#allocation4], 1 }
 0x19d   :  { %1334 = vsyncpa [#allocation4 + $0x1], 1 }

// kernel: _lambda_.22
= control target key start
LH: loop header
LB: loop body
LE: loop exit
PB: predicated region body
PF: predicated region fallthrough
CT: control target
= control target key end

     0   :  { %v49_v24 = vlaneseq  ;;  %s165_s0 = inlined_call_operand.vmem [shape: bf16[8,512], index: 0, kind: input, shape index: {}]   ;;  %s166_s1 = inlined_call_operand.vmem [shape: f32[1,512], index: 1, kind: input, shape index: {}]   ;;  %s167_s2 = inlined_call_operand.vmem [shape: f32[1,512], index: 2, kind: input, shape index: {}]   ;;  %s168_s3 = inlined_call_operand.vmem [shape: bf16[8,512], index: 3, kind: output, shape index: {}]  }
   0x1   :  { %v14_v0 = vld [vmem:[%s165_s0] sm:$0xff]  ;;  %v15_v1 = vld [vmem:[%s165_s0 + $0x8] sm:$0xff] }
   0x2   :  { %v16_v2 = vunpack.c.l.bf16 %v14_v0  ;;  %v17_v3 = vunpack.c.h.bf16 %v14_v0  ;;  %v18_v4 = vunpack.c.l.bf16 %v15_v1  ;;  %v19_v5 = vunpack.c.h.bf16 %v15_v1  ;;  %v47_v31 = vld [vmem:[%s166_s1] sm:$0xf] }
   0x3   :  { %v50_v26 = vshrl.u32 %v49_v24, 7  ;;  %v73_v32 = vld [vmem:[%s167_s2] sm:$0xf] }
   0x4   :  { %v20_v6 = vadd.f32 %v17_v3, %v16_v2 }
   0x5   :  { %v51_v27 = vsub.s32 0, %v50_v26  ;;  %v55_v28 = vsub.s32 1, %v50_v26  ;;  %v59_v29 = vsub.s32 2, %v50_v26  ;;  %v63_v30 = vsub.s32 3, %v50_v26 }
   0x6   :  { %v21_v7 = vadd.f32 %v20_v6, %v18_v4 }
   0x7   :  { %v52_v33 = vrot.slane %v47_v31, %v51_v27  ;;  %v56_v34 = vrot.slane %v47_v31, %v55_v28  ;;  %v60_v35 = vrot.slane %v47_v31, %v59_v29  ;;  %v64_v36 = vrot.slane %v47_v31, %v63_v30 }
   0x8   :  { %v22_v8 = vadd.f32 %v21_v7, %v19_v5  ;;  %v78_v38 = vrot.slane %v73_v32, %v51_v27  ;;  %v82_v39 = vrot.slane %v73_v32, %v55_v28  ;;  %v86_v40 = vrot.slane %v73_v32, %v59_v29 }
   0x9   :  { %v90_v41 = vrot.slane %v73_v32, %v63_v30 }
   0xa   :  { %23 = vadd.xlane.f32.xlu0 %v22_v8 }
  0x97   :  { %v24_v9 = vpop.xlane.xlu0 %23 }
  0x98   :  { %v26_v10 = vmul.f32 0.001953125, %v24_v9 }
  0x9a   :  { %v27_v11 = vsub.f32 %v16_v2, %v26_v10  ;;  %v28_v12 = vsub.f32 %v17_v3, %v26_v10  ;;  %v29_v13 = vsub.f32 %v18_v4, %v26_v10  ;;  %v30_v14 = vsub.f32 %v19_v5, %v26_v10 }
  0x9c   :  { %v31_v15 = vmul.f32 %v27_v11, %v27_v11  ;;  %v32_v16 = vmul.f32 %v28_v12, %v28_v12  ;;  %v33_v17 = vmul.f32 %v29_v13, %v29_v13  ;;  %v34_v19 = vmul.f32 %v30_v14, %v30_v14 }
  0x9e   :  { %v35_v18 = vadd.f32 %v32_v16, %v31_v15 }
  0xa0   :  { %v36_v20 = vadd.f32 %v35_v18, %v33_v17 }
  0xa2   :  { %v37_v21 = vadd.f32 %v36_v20, %v34_v19 }
  0xa4   :  { %38 = vadd.xlane.f32.xlu0 %v37_v21 }
 0x131   :  { %v39_v22 = vpop.xlane.xlu0 %38 }
 0x132   :  { %v40_v23 = vmul.f32 0.001953125, %v39_v22 }
 0x134   :  { %v41_v25 = vadd.f32 1e-05, %v40_v23 }
 0x136   :  { %125 = vrsqrt.f32 %v41_v25 }
 0x140   :  { %v126_v37 = vpop.eup %125 }
 0x141   :  { %v43_v42 = vmul.f32 %v126_v37, %v27_v11  ;;  %v44_v43 = vmul.f32 %v126_v37, %v28_v12  ;;  %v45_v44 = vmul.f32 %v126_v37, %v29_v13  ;;  %v46_v45 = vmul.f32 %v126_v37, %v30_v14 }
 0x143   :  { %v69_v46 = vmul.f32 %v52_v33, %v43_v42  ;;  %v70_v47 = vmul.f32 %v56_v34, %v44_v43  ;;  %v71_v48 = vmul.f32 %v60_v35, %v45_v44  ;;  %v72_v49 = vmul.f32 %v64_v36, %v46_v45 }
 0x145   :  { %v95_v50 = vadd.f32 %v78_v38, %v69_v46  ;;  %v96_v51 = vadd.f32 %v82_v39, %v70_v47  ;;  %v97_v52 = vadd.f32 %v86_v40, %v71_v48  ;;  %v98_v53 = vadd.f32 %v90_v41, %v72_v49 }
 0x147   :  { %v123_v54 = vpack.c.bf16 %v96_v51, %v95_v50  ;;  %v124_v55 = vpack.c.bf16 %v98_v53, %v97_v52 }
 0x149   :  { %115 = vst [vmem:[%s168_s3] sm:$0xff] %v123_v54  ;;  %116 = vst [vmem:[%s168_s3 + $0x8] sm:$0xff] %v124_v55 }

// kernel: _lambda_.20
= control target key start
LH: loop header
LB: loop body
LE: loop exit
PB: predicated region body
PF: predicated region fallthrough
CT: control target
= control target key end

     0   :  { %s1865_s21 = smov 0   ;;  %s1867_s22 = smov 0   ;;  %s2109_s0 = inlined_call_operand.vmem [shape: bf16[8,4,128], index: 0, kind: input, shape index: {}]   ;;  %s2110_s1 = inlined_call_operand.vmem [shape: bf16[8,128,8], index: 1, kind: input, shape index: {}]   ;;  %s2111_s2 = inlined_call_operand.vmem [shape: bf16[8,8,128], index: 2, kind: input, shape index: {}]   ;;  %s2112_s3 = inlined_call_operand.vmem [shape: f32[4,1], index: 3, kind: input, shape index: {}]   ;;  %s2113_s4 = inlined_call_operand.vmem [shape: s32[2,1,8], index: 4, kind: input, shape index: {}]   ;;  %s2114_s5 = inlined_call_operand.vmem [shape: f32[2,1,8], index: 5, kind: input, shape index: {}]   ;;  %s2115_s6 = inlined_call_operand.vmem [shape: bf16[8,4,128], index: 6, kind: output, shape index: {}]  }
   0x1   :  { %s1869_s23 = smov 0  }
   0x2 LB: > { %s35_s24 = sadd.s32 1, %s1819_s22  ;;  %p1516_p0 = scmp.ge.s32.totalorder %s1823_s23, 1  ;;  %s1823_s23 = sphi %s1869_s23, %s16_s23   ;;  %s1819_s22 = sphi %s1867_s22, %s2119_s22   ;;  %s1815_s21 = sphi %s1865_s21, %s2118_s21  }
   0x3   : > { %p37_p1 = scmp.ge.s32.totalorder %s35_s24, 2  ;;  %p314_p2 = scmp.lt.s32.totalorder %s1823_s23, 3 }
   0x5   : > { %s2121_s24 = smov (%p37_p1, %s35_s24), 0  ;;  %p315_p3 = pnand %p1516_p0, %p314_p2 }
   0x6   : > { %s1517_s25 = sshll.u32 (!%p315_p3), %s1815_s21, 2  ;;  %v896_v0 = vlaneseq (!%p315_p3)  ;;  %v1825_v1 = vmov (!%p315_p3), 0.0   ;;  %vm1826_vm0 = vmmov (!%p315_p3), 0   ;;  %v1827_v2 = vmov (!%p315_p3), 0   ;;  %p416_p5 = scmp.lt.s32.totalorder (!%p315_p3), %s1815_s21, 1 }
   0x7   : > { %318 = sbr.rel (%p315_p3) target bundleno = 887 (0x377), region = 44  ;;  %1610 = vmatprep.subr.bf16.mxu0 (!%p315_p3), %v1825_v1  ;;  %450 = vst [vmem:[#allocation4] sm:$0xf] (!%p315_p3), %v1825_v1  ;;  %451 = vst [vmem:[#allocation4 + $0x4] sm:$0xf] (!%p315_p3), %v1825_v1  ;;  %1630 = vmatprep.subr.bf16.mxu1 (!%p315_p3), %v1825_v1  ;;  %p383_p4 = scmp.lt.s32.totalorder (!%p315_p3), %s1517_s25, 7 }
   0x8   : > { %452 = vst [vmem:[#allocation4 + $0x8] sm:$0xf] (!%p315_p3), %v1825_v1  ;;  %453 = vst [vmem:[#allocation4 + $0xc] sm:$0xf] (!%p315_p3), %v1825_v1  ;;  %1626 = vmatprep.mubr.msk.bf16.mxu0 (!%p315_p3), %vm1826_vm0, %v1825_v1  ;;  %1646 = vmatprep.mubr.msk.bf16.mxu1 (!%p315_p3), %vm1826_vm0, %v1825_v1  ;;  %v1900_v3 = vshrl.u32 (!%p315_p3), %v896_v0, 7  ;;  %vm441_vm1 = vcmask (!%p315_p3), 3072  }
   0x9   : > { %1743 = vset.pattern.permute.xlu0 (!%p315_p3), %v1827_v2  ;;  %v1828_v4 = vmov (!%p315_p3), 1966171168   ;;  %1744 = vset.pattern.permute.xlu1 (!%p315_p3), %v1827_v2  ;;  %v1558_v7 = vld.sshfl [vmem:[%s2112_s3] sm:$0x33 pattern:$0x75316420] (!%p315_p3) }
   0xa   : > { %v894_v5 = vunpack.c.l.s4 (!%p315_p3), %v1828_v4  ;;  %v892_v10 = vcombine.high (!%p315_p3), %v1558_v7, %v1558_v7  ;;  %v1829_v50 = vmov (!%p315_p3), -1e+30   ;;  %446 = vst.msk [vmem:[#allocation3] sm:$0xf] (!%p315_p3), %vm441_vm1, %v1825_v1  ;;  %447 = vst.msk [vmem:[#allocation3 + $0x4] sm:$0xf] (!%p315_p3), %vm441_vm1, %v1825_v1 }
   0xb   : > { %443 = vst.msk [vmem:[#allocation2 + $0x4] sm:$0xf] (!%p315_p3), %vm441_vm1, %v1829_v50  ;;  %442 = vst.msk [vmem:[#allocation2] sm:$0xf] (!%p315_p3), %vm441_vm1, %v1829_v50  ;;  %v915_v53 = vsub.s32 (!%p315_p3), 0, %v1900_v3  ;;  %v975_v61 = vadd.s32 (!%p315_p3), 4, %v1900_v3 }
   0xc   : > { %v895_v6 = vunpack.c.0.s8 (!%p315_p3), %v894_v5  ;;  %444 = vst.msk [vmem:[#allocation2 + $0x8] sm:$0xf] (!%p315_p3), %vm441_vm1, %v1829_v50  ;;  %445 = vst.msk [vmem:[#allocation2 + $0xc] sm:$0xf] (!%p315_p3), %vm441_vm1, %v1829_v50  ;;  %v977_v62 = vand.u32 (!%p315_p3), 127, %v896_v0  ;;  %vm1001_vm6 = vcmask (!%p315_p3), 60416  }
   0xd   : > { %448 = vst.msk [vmem:[#allocation3 + $0x8] sm:$0xf] (!%p315_p3), %vm441_vm1, %v1825_v1  ;;  %449 = vst.msk [vmem:[#allocation3 + $0xc] sm:$0xf] (!%p315_p3), %vm441_vm1, %v1825_v1  ;;  %vm1127_vm7 = vcmask (!%p315_p3), 1043456   ;;  %vm1123_vm8 = vcmask (!%p315_p3), 64512  }
   0xe   : > { %s2123_s25 = smov (!%p383_p4, %s1517_s25), 7  ;;  %v898_v9 = vsub.s32 %v895_v6, %v1900_v3  ;;  %s2125_s21 = smov (!%p416_p5, %s1815_s21), 1  ;;  %vm982_vm4 = vcmp.le.s32.totalorder %v977_v62, %v975_v61 }
   0xf   : > { %s1565_s26 = sshll.u32 %s2123_s25, 6  ;;  %s1518_s8 = sshll.u32 %s2123_s25, 1 }
  0x10   : > { %s1907_s29 = scalar_lea.vmem %s2110_s1, %s1565_s26  ;;  %v899_v13 = vrot.slane %v1558_v7, %v898_v9  ;;  %v906_v15 = vrot.slane %v892_v10, %v898_v9  ;;  %s1945_s11 = scalar_lea.vmem %s2109_s0, %s1518_s8 }
  0x11   : > { %v1745_v8 = vld [vmem:[%s1907_s29] sm:$0xff]   ;;  %v1747_v12 = vld [vmem:[%s1907_s29 + $0x8] sm:$0xff]   ;;  %v1749_v17 = vld [vmem:[%s1907_s29 + $0x10] sm:$0xff]   ;;  %s421_s14 = scalar_lea.vmem %s2113_s4, %s2125_s21  ;;  %s427_s17 = scalar_lea.vmem %s2114_s5, %s2125_s21 }
  0x12   : > { %v1746_v11 = vld [vmem:[%s1907_s29 + $0x40] sm:$0xff]   ;;  %1611 = vmatpush3.bf16.msra.mxu0 %v1745_v8  ;;  %v1748_v14 = vld [vmem:[%s1907_s29 + $0x48] sm:$0xff]   ;;  %910 = vperm.xlu0 %1743, %v899_v13   ;;  %v907_v16 = vcombine.high %v899_v13, %v899_v13  ;;  %v908_v18 = vcombine.high %v906_v15, %v906_v15  ;;  %v1750_v19 = vld [vmem:[%s1907_s29 + $0x50] sm:$0xff]   ;;  %s1523_s18 = sshll.u32 %s2123_s25, 2  ;;  %s433_s28 = scalar_lea.vmem %s2115_s6, %s1518_s8 }
  0x13   : > { %1631 = vmatpush3.bf16.msra.mxu1 %v1746_v11  ;;  %1612 = vmatprep.subr.bf16.mxu0 %v1825_v1  ;;  %v1751_v20 = vld [vmem:[%s1907_s29 + $0x18] sm:$0xff]   ;;  %v1753_v22 = vld [vmem:[%s1907_s29 + $0x20] sm:$0xff]   ;;  %v1755_v24 = vld [vmem:[%s1907_s29 + $0x28] sm:$0xff]   ;;  %s409_s21 = scalar_lea.vmem %s2111_s2, %s1523_s18 }
  0x14   : > { %1632 = vmatprep.subr.bf16.mxu1 %v1825_v1  ;;  %926 = vperm.xlu1 %1744, %v907_v16   ;;  %v1752_v21 = vld [vmem:[%s1907_s29 + $0x58] sm:$0xff]   ;;  %v1754_v23 = vld [vmem:[%s1907_s29 + $0x60] sm:$0xff]   ;;  %v1756_v25 = vld [vmem:[%s1907_s29 + $0x68] sm:$0xff]  }
  0x15   : > { %v1757_v26 = vld [vmem:[%s1907_s29 + $0x30] sm:$0xff]   ;;  %v1759_v28 = vld [vmem:[%s1907_s29 + $0x38] sm:$0xff]   ;;  %v454_v30 = vld [vmem:[%s1945_s11] sm:$0x3] }
  0x16   : > { %1613 = vmatpush3.bf16.msra.mxu0 %v1747_v12  ;;  %918 = vperm.xlu0 %1743, %v906_v15   ;;  %v1758_v27 = vld [vmem:[%s1907_s29 + $0x70] sm:$0xff]   ;;  %v1760_v29 = vld [vmem:[%s1907_s29 + $0x78] sm:$0xff]   ;;  %v455_v31 = vld [vmem:[%s1945_s11 + $0x2] sm:$0x3] }
  0x17   : > { %1633 = vmatpush3.bf16.msra.mxu1 %v1748_v14  ;;  %1614 = vmatprep.subr.bf16.mxu0 %v1825_v1  ;;  %v1761_v32 = vld [vmem:[%s1907_s29 + $0x80] sm:$0xff]   ;;  %v1763_v34 = vld [vmem:[%s1907_s29 + $0x88] sm:$0xff]   ;;  %v1765_v36 = vld [vmem:[%s1907_s29 + $0x90] sm:$0xff]  }
  0x18   : > { %1634 = vmatprep.subr.bf16.mxu1 %v1825_v1  ;;  %934 = vperm.xlu1 %1744, %v908_v18   ;;  %v1762_v33 = vld [vmem:[%s1907_s29 + $0xc0] sm:$0xff]   ;;  %v1764_v35 = vld [vmem:[%s1907_s29 + $0xc8] sm:$0xff]   ;;  %v1766_v37 = vld [vmem:[%s1907_s29 + $0xd0] sm:$0xff]  }
  0x19   : > { %v1767_v38 = vld [vmem:[%s1907_s29 + $0x98] sm:$0xff]   ;;  %v1769_v40 = vld [vmem:[%s1907_s29 + $0xa0] sm:$0xff]   ;;  %v1771_v42 = vld [vmem:[%s1907_s29 + $0xa8] sm:$0xff]  }
  0x1a   : > { %1615 = vmatpush3.bf16.msra.mxu0 %v1749_v17  ;;  %v1768_v39 = vld [vmem:[%s1907_s29 + $0xd8] sm:$0xff]   ;;  %v1770_v41 = vld [vmem:[%s1907_s29 + $0xe0] sm:$0xff]   ;;  %v1772_v43 = vld [vmem:[%s1907_s29 + $0xe8] sm:$0xff]  }
  0x1b   : > { %1635 = vmatpush3.bf16.msra.mxu1 %v1750_v19  ;;  %1616 = vmatprep.subr.bf16.mxu0 %v1825_v1  ;;  %v1773_v44 = vld [vmem:[%s1907_s29 + $0xb0] sm:$0xff]   ;;  %v1775_v46 = vld [vmem:[%s1907_s29 + $0xb8] sm:$0xff]   ;;  %v456_v48 = vld [vmem:[%s1945_s11 + $0x4] sm:$0x3] }
  0x1c   : > { %1636 = vmatprep.subr.bf16.mxu1 %v1825_v1  ;;  %v1774_v45 = vld [vmem:[%s1907_s29 + $0xf0] sm:$0xff]   ;;  %v1776_v47 = vld [vmem:[%s1907_s29 + $0xf8] sm:$0xff]   ;;  %v457_v49 = vld [vmem:[%s1945_s11 + $0x6] sm:$0x3] }
  0x1d   : > { %v981_v52 = vld [vmem:[%s421_s14] sm:$0x1] }
  0x1e   : > { %1617 = vmatpush3.bf16.msra.mxu0 %v1751_v20  ;;  %vm983_vm2 = vcmp.gt.s32.totalorder %v981_v52, 0  ;;  %v883_v57 = vld [vmem:[%s427_s17] sm:$0x1] }
  0x1f   : > { %1637 = vmatpush3.bf16.msra.mxu1 %v1752_v21  ;;  %1618 = vmatprep.subr.bf16.mxu0 %v1825_v1  ;;  %v984_v56 = vsel %vm983_vm2, 1, %v1827_v2  ;;  %v522_v52 = vld [vmem:[%s409_s21] sm:$0xf] }
  0x20   : > { %1638 = vmatprep.subr.bf16.mxu1 %v1825_v1  ;;  %v988_v59 = vrot.slane %v984_v56, %v915_v53  ;;  %v999_v56 = vld [vmem:[#allocation2 + $0x8] sm:$0xf] }
  0x22   : > { %1619 = vmatpush3.bf16.msra.mxu0 %v1753_v22  ;;  %vm989_vm3 = vcmp.eq.s32.totalorder %v988_v59, 1  ;;  %v1000_v59 = vld [vmem:[#allocation2 + $0xc] sm:$0xf] }
  0x23   : > { %1639 = vmatpush3.bf16.msra.mxu1 %v1754_v23  ;;  %1620 = vmatprep.subr.bf16.mxu0 %v1825_v1  ;;  %vm2021_vm5 = vmand %vm982_vm4, %vm989_vm3 }
  0x24   : > { %1640 = vmatprep.subr.bf16.mxu1 %v1825_v1 }
  0x26   : > { %1621 = vmatpush3.bf16.msra.mxu0 %v1755_v24 }
  0x27   : > { %1641 = vmatpush3.bf16.msra.mxu1 %v1756_v25  ;;  %1622 = vmatprep.subr.bf16.mxu0 %v1825_v1 }
  0x28   : > { %1642 = vmatprep.subr.bf16.mxu1 %v1825_v1 }
  0x2a   : > { %1623 = vmatpush3.bf16.msra.mxu0 %v1757_v26 }
  0x2b   : > { %1643 = vmatpush3.bf16.msra.mxu1 %v1758_v27  ;;  %1624 = vmatprep.subr.bf16.mxu0 %v1825_v1 }
  0x2c   : > { %1644 = vmatprep.subr.bf16.mxu1 %v1825_v1 }
  0x2e   : > { %1625 = vmatpush3.bf16.msra.mxu0 %v1759_v28 }
  0x2f   : > { %1645 = vmatpush3.bf16.msra.mxu1 %v1760_v29  ;;  %1650 = vmatprep.subr.bf16.mxu0 %v1825_v1 }
  0x30   : > { %1670 = vmatprep.subr.bf16.mxu1 %v1825_v1 }
  0x31   : > { %1627 = vmatmul.mubr.bf16.vlgmr.msra.gmra.mrb[0].mxu0 %v454_v30 }
  0x32   : > { %1647 = vmatmul.mubr.bf16.vlgmr.msra.gmra.mrb[0].mxu1 %v455_v31  ;;  %1651 = vmatpush3.bf16.msra.mxu0 %v1761_v32 }
  0x33   : > { %1671 = vmatpush3.bf16.msra.mxu1 %v1762_v33  ;;  %1652 = vmatprep.subr.bf16.mxu0 %v1825_v1 }
  0x34   : > { %1672 = vmatprep.subr.bf16.mxu1 %v1825_v1  ;;  %1666 = vmatprep.mubr.msk.bf16.mxu0 %vm1826_vm0, %v1825_v1 }
  0x35   : > { %1686 = vmatprep.mubr.msk.bf16.mxu1 %vm1826_vm0, %v1825_v1 }
  0x36   : > { %1653 = vmatpush3.bf16.msra.mxu0 %v1763_v34 }
  0x37   : > { %1673 = vmatpush3.bf16.msra.mxu1 %v1764_v35  ;;  %1654 = vmatprep.subr.bf16.mxu0 %v1825_v1 }
  0x38   : > { %1674 = vmatprep.subr.bf16.mxu1 %v1825_v1 }
  0x3a   : > { %1655 = vmatpush3.bf16.msra.mxu0 %v1765_v36 }
  0x3b   : > { %1675 = vmatpush3.bf16.msra.mxu1 %v1766_v37  ;;  %1656 = vmatprep.subr.bf16.mxu0 %v1825_v1 }
  0x3c   : > { %1676 = vmatprep.subr.bf16.mxu1 %v1825_v1 }
  0x3e   : > { %1657 = vmatpush3.bf16.msra.mxu0 %v1767_v38 }
  0x3f   : > { %1677 = vmatpush3.bf16.msra.mxu1 %v1768_v39  ;;  %1658 = vmatprep.subr.bf16.mxu0 %v1825_v1 }
  0x40   : > { %1678 = vmatprep.subr.bf16.mxu1 %v1825_v1 }
  0x42   : > { %1659 = vmatpush3.bf16.msra.mxu0 %v1769_v40 }
  0x43   : > { %1679 = vmatpush3.bf16.msra.mxu1 %v1770_v41  ;;  %1660 = vmatprep.subr.bf16.mxu0 %v1825_v1 }
  0x44   : > { %1680 = vmatprep.subr.bf16.mxu1 %v1825_v1 }
  0x46   : > { %1661 = vmatpush3.bf16.msra.mxu0 %v1771_v42 }
  0x47   : > { %1681 = vmatpush3.bf16.msra.mxu1 %v1772_v43  ;;  %1662 = vmatprep.subr.bf16.mxu0 %v1825_v1 }
  0x48   : > { %1682 = vmatprep.subr.bf16.mxu1 %v1825_v1 }
  0x4a   : > { %1663 = vmatpush3.bf16.msra.mxu0 %v1773_v44  ;;  %v997_v44 = vld [vmem:[#allocation2] sm:$0xf] }
  0x4b   : > { %1683 = vmatpush3.bf16.msra.mxu1 %v1774_v45  ;;  %1664 = vmatprep.subr.bf16.mxu0 %v1825_v1  ;;  %v2049_v45 = vld [vmem:[#allocation2 + $0x4] sm:$0xf] }
  0x4c   : > { %1684 = vmatprep.subr.bf16.mxu1 %v1825_v1 }
  0x4e   : > { %1665 = vmatpush3.bf16.msra.mxu0 %v1775_v46 }
  0x4f   : > { %1685 = vmatpush3.bf16.msra.mxu1 %v1776_v47  ;;  %1690 = vmatprep.subr.bf16.mxu0 %v1825_v1 }
  0x50   : > { %1696 = vmatprep.subr.bf16.mxu1 %v1825_v1 }
  0x51   : > { %1667 = vmatmul.mubr.bf16.vlgmr.msra.gmra.mrb[4].mxu0 %v456_v48 }
  0x52   : > { %1687 = vmatmul.mubr.bf16.vlgmr.msra.gmra.mrb[4].mxu1 %v457_v49  ;;  %1692 = vmatprep.mubr.msk.bf16.mxu0 %vm1826_vm0, %v1825_v1 }
  0x53   : > { %1698 = vmatprep.mubr.msk.bf16.mxu1 %vm1826_vm0, %v1825_v1 }
  0x91   : > { %v911_v51 = vpop.permute.xlu0 %910 }
  0x92   : > { %v916_v55 = vrot.slane %v911_v51, %v915_v53 }
  0x93   : > { %v927_v20 = vpop.permute.xlu1 %926 }
  0x94   : > { %v941_v60 = vmul.f32 %v916_v55, %v883_v57  ;;  %v932_v22 = vrot.slane %v927_v20, %v915_v53 }
  0x95   : > { %v919_v54 = vpop.permute.xlu0 %918 }
  0x96   : > { %v924_v58 = vrot.slane %v919_v54, %v915_v53  ;;  %v952_v4 = vrot.slane %v941_v60, %v915_v53  ;;  %v943_v24 = vmul.f32 %v932_v22, %v883_v57  ;;  %v1129_v54 = vsel %vm1127_vm7, %v522_v52, 0 }
  0x97   : > { %v935_v21 = vpop.permute.xlu1 %934  ;;  %1691 = vmatpush3.bf16.msra.mxu0 %v1129_v54 }
  0x98   : > { %v942_v63 = vmul.f32 %v924_v58, %v883_v57  ;;  %v940_v23 = vrot.slane %v935_v21, %v915_v53  ;;  %v960_v26 = vrot.slane %v943_v24, %v915_v53  ;;  %1702 = vmatprep.subr.bf16.mxu0 %v1825_v1 }
  0x9a   : > { %v956_v6 = vrot.slane %v942_v63, %v915_v53  ;;  %v944_v25 = vmul.f32 %v940_v23, %v883_v57 }
  0x9c   : > { %v964_v28 = vrot.slane %v944_v25, %v915_v53  ;;  %v523_v53 = vld [vmem:[%s409_s21 + $0x4] sm:$0xf] }
  0x9d   : > { %v1175_v55 = vsel %vm1127_vm7, %v523_v53, 0 }
  0x9e   : > { %1697 = vmatpush3.bf16.msra.mxu1 %v1175_v55 }
  0x9f   : > { %1708 = vmatprep.subr.bf16.mxu1 %v1825_v1 }
 0x104   : > { %v608_v5 = vpop.f32.mrb[0].mxu0 }
 0x105   : > { %v878_v7 = vmul.f32 0.088388346, %v608_v5  ;;  %v696_v8 = vpop.f32.mrb[0].mxu1  ;;  %v1628_v9 = vpop.f32.mrb[1].mxu0 }
 0x106   : > { %v879_v10 = vmul.f32 0.088388346, %v696_v8  ;;  %v611_v11 = vpop.f32.mrb[2].mxu0  ;;  %v1648_v2 = vpop.f32.mrb[1].mxu1 }
 0x107   : > { %v969_v13 = vadd.f32 %v952_v4, %v878_v7  ;;  %v1629_v3 = vpop.f32.mrb[3].mxu0  ;;  %v699_v14 = vpop.f32.mrb[2].mxu1  ;;  %v524_v4 = vld [vmem:[%s409_s21 + $0x8] sm:$0xf] }
 0x108   : > { %v970_v0 = vadd.f32 %v956_v6, %v879_v10  ;;  %v1649_v15 = vpop.f32.mrb[3].mxu1  ;;  %v1221_v5 = vsel %vm1127_vm7, %v524_v4, 0  ;;  %v525_v6 = vld [vmem:[%s409_s21 + $0xc] sm:$0xf] }
 0x109   : > { %v2027_v16 = vsel %vm2021_vm5, %v969_v13, -1e+09  ;;  %v1267_v7 = vsel %vm1127_vm7, %v525_v6, 0 }
 0x10a   : > { %v2031_v17 = vsel %vm2021_vm5, %v970_v0, -1e+09  ;;  %v1002_v18 = vsel %vm1001_vm6, %v2027_v16, -inf }
 0x10b   : > { %v1005_v19 = vsel %vm1001_vm6, %v2031_v17, -inf  ;;  %1003 = vmax.xlane.f32.xlu0 %v1002_v18 }
 0x10c   : > { %1006 = vmax.xlane.f32.xlu1 %v1005_v19 }
 0x124   : > { %v784_v27 = vpop.f32.mrb[4].mxu0 }
 0x125   : > { %v880_v29 = vmul.f32 0.088388346, %v784_v27  ;;  %v872_v30 = vpop.f32.mrb[4].mxu1  ;;  %v1668_v31 = vpop.f32.mrb[5].mxu0 }
 0x126   : > { %v881_v32 = vmul.f32 0.088388346, %v872_v30  ;;  %v787_v33 = vpop.f32.mrb[6].mxu0  ;;  %v1688_v34 = vpop.f32.mrb[5].mxu1 }
 0x127   : > { %v971_v35 = vadd.f32 %v960_v26, %v880_v29  ;;  %v1669_v36 = vpop.f32.mrb[7].mxu0  ;;  %v875_v37 = vpop.f32.mrb[6].mxu1 }
 0x128   : > { %v972_v38 = vadd.f32 %v964_v28, %v881_v32  ;;  %v1689_v39 = vpop.f32.mrb[7].mxu1  ;;  %v1062_v36 = vld [vmem:[#allocation3] sm:$0xf]  ;;  %v1063_v37 = vld [vmem:[#allocation3 + $0x4] sm:$0xf] }
 0x129   : > { %v2039_v40 = vsel %vm2021_vm5, %v971_v35, -1e+09 }
 0x12a   : > { %v1008_v41 = vsel %vm1001_vm6, %v2039_v40, -inf  ;;  %v2045_v42 = vsel %vm2021_vm5, %v972_v38, -1e+09 }
 0x12b   : > { %1009 = vmax.xlane.f32.xlu0 %v1008_v41  ;;  %v1011_v43 = vsel %vm1001_vm6, %v2045_v42, -inf }
 0x12f   : > { %1012 = vmax.xlane.f32.xlu0 %v1011_v43 }
 0x198   : > { %v1004_v46 = vpop.xlane.xlu0 %1003 }
 0x199   : > { %v1007_v47 = vpop.xlane.xlu1 %1006  ;;  %v1014_v48 = vmax.f32 %v997_v44, %v1004_v46 }
 0x19a   : > { %v2052_v49 = vmax.f32 %v2049_v45, %v1007_v47 }
 0x19b   : > { %v1018_v50 = vsub.f32 %v997_v44, %v1014_v48  ;;  %1317 = vst.msk [vmem:[#allocation2] sm:$0xf] %vm441_vm1, %v1014_v48  ;;  %1032 = vperm.xlu1 %1744, %v1014_v48   ;;  %v1064_v48 = vld [vmem:[#allocation3 + $0x8] sm:$0xf] }
 0x19c   : > { %v1019_v51 = vsub.f32 %v2049_v45, %v2052_v49  ;;  %1318 = vst.msk [vmem:[#allocation2 + $0x4] sm:$0xf] %vm441_vm1, %v2052_v49  ;;  %1037 = vperm.xlu0 %1743, %v2052_v49  }
 0x19e   : > { %v1024_v34 = vmul.f32 1.442695, %v1019_v51  ;;  %v1065_v51 = vld [vmem:[#allocation3 + $0xc] sm:$0xf] }
 0x1b8   : > { %v1010_v57 = vpop.xlane.xlu0 %1009 }
 0x1b9   : > { %v1016_v58 = vmax.f32 %v999_v56, %v1010_v57 }
 0x1bb   : > { %v1020_v60 = vsub.f32 %v999_v56, %v1016_v58  ;;  %1319 = vst.msk [vmem:[#allocation2 + $0x8] sm:$0xf] %vm441_vm1, %v1016_v58  ;;  %1042 = vperm.xlu1 %1744, %v1016_v58  }
 0x1bc   : > { %v1013_v61 = vpop.xlane.xlu0 %1012 }
 0x1bd   : > { %v1017_v62 = vmax.f32 %v1000_v59, %v1013_v61 }
 0x1bf   : > { %v1021_v63 = vsub.f32 %v1000_v59, %v1017_v62  ;;  %1320 = vst.msk [vmem:[#allocation2 + $0xc] sm:$0xf] %vm441_vm1, %v1017_v62  ;;  %1047 = vperm.xlu1 %1744, %v1017_v62   ;;  %v1092_v62 = vld [vmem:[#allocation4 + $0x4] sm:$0xf] }
 0x1c1   : > { %v1028_v19 = vmul.f32 1.442695, %v1021_v63 }
 0x21a   : > { %v1033_v8 = vpop.permute.xlu1 %1032 }
 0x21b   : > { %v1050_v9 = vsub.f32 %v2027_v16, %v1033_v8  ;;  %v1038_v10 = vpop.permute.xlu0 %1037  ;;  %v1022_v16 = vmul.f32 1.442695, %v1018_v50 }
 0x21c   : > { %v1051_v11 = vsub.f32 %v2031_v17, %v1038_v10  ;;  %v1026_v17 = vmul.f32 1.442695, %v1020_v60  ;;  %v1091_v60 = vld [vmem:[#allocation4] sm:$0xf] }
 0x21d   : > { %v1054_v2 = vmul.f32 1.442695, %v1050_v9 }
 0x21e   : > { %v1056_v12 = vmul.f32 1.442695, %v1051_v11 }
 0x21f   : > { %1777 = vpow2.f32 %v1054_v2 }
 0x220   : > { %1779 = vpow2.f32 %v1056_v12 }
 0x221   : > { %1781 = vpow2.f32 %v1022_v16 }
 0x222   : > { %1783 = vpow2.f32 %v1026_v17 }
 0x223   : > { %1785 = vpow2.f32 %v1028_v19 }
 0x229   : > { %v1778_v13 = vpop.eup %1777 }
 0x22a   : > { %v1780_v3 = vpop.eup %1779  ;;  %v1070_v14 = vsel %vm1001_vm6, %v1778_v13, 0.0  ;;  %v1119_v0 = vpack.c.bf16 %v1778_v13, %v1778_v13 }
 0x22b   : > { %1071 = vadd.xlane.f32.xlu0 %v1070_v14  ;;  %v1073_v15 = vsel %vm1001_vm6, %v1780_v3, 0.0  ;;  %v1120_v18 = vpack.c.bf16 %v1780_v3, %v1780_v3  ;;  %v1782_v22 = vpop.eup %1781 }
 0x22c   : > { %1074 = vadd.xlane.f32.xlu1 %v1073_v15  ;;  %1693 = vmatmul.mubr.msk.bf16.vlgmr.msra.gmra.mrb[8].mxu0 %vm1123_vm8, %v1119_v0  ;;  %v1784_v26 = vpop.eup %1783  ;;  %v1066_v38 = vmul.f32 %v1782_v22, %v1062_v36  ;;  %v1093_v0 = vld [vmem:[#allocation4 + $0x8] sm:$0xf] }
 0x22d   : > { %1699 = vmatmul.mubr.msk.bf16.vlgmr.msra.gmra.mrb[8].mxu1 %vm1123_vm8, %v1120_v18  ;;  %1703 = vmatpush3.bf16.msra.mxu0 %v1221_v5  ;;  %v1068_v49 = vmul.f32 %v1784_v26, %v1064_v48  ;;  %v1094_v18 = vld [vmem:[#allocation4 + $0xc] sm:$0xf] }
 0x22e   : > { %1704 = vmatprep.mubr.msk.bf16.mxu0 %vm1826_vm0, %v1825_v1  ;;  %1709 = vmatpush3.bf16.msra.mxu1 %v1267_v7 }
 0x22f   : > { %1710 = vmatprep.mubr.msk.bf16.mxu1 %vm1826_vm0, %v1825_v1  ;;  %v1786_v1 = vpop.eup %1785 }
 0x230   : > { %v1069_v53 = vmul.f32 %v1786_v1, %v1065_v51 }
 0x23a   : > { %v1043_v20 = vpop.permute.xlu1 %1042 }
 0x23b   : > { %v1052_v21 = vsub.f32 %v2039_v40, %v1043_v20 }
 0x23d   : > { %v1058_v23 = vmul.f32 1.442695, %v1052_v21  ;;  %1097 = vperm.xlu1 %1744, %v1782_v22  }
 0x23e   : > { %v1048_v24 = vpop.permute.xlu1 %1047 }
 0x23f   : > { %1787 = vpow2.f32 %v1058_v23  ;;  %v1053_v25 = vsub.f32 %v2045_v42, %v1048_v24 }
 0x241   : > { %v1060_v27 = vmul.f32 1.442695, %v1053_v25  ;;  %1107 = vperm.xlu1 %1744, %v1784_v26  }
 0x243   : > { %1789 = vpow2.f32 %v1060_v27 }
 0x244   : > { %1791 = vpow2.f32 %v1024_v34 }
 0x245   : > { %1112 = vperm.xlu1 %1744, %v1786_v1  }
 0x249   : > { %v1788_v28 = vpop.eup %1787 }
 0x24a   : > { %v1076_v29 = vsel %vm1001_vm6, %v1788_v28, 0.0  ;;  %v1121_v30 = vpack.c.bf16 %v1788_v28, %v1788_v28 }
 0x24b   : > { %1077 = vadd.xlane.f32.xlu0 %v1076_v29 }
 0x24c   : > { %1705 = vmatmul.mubr.msk.bf16.vlgmr.msra.gmra.mrb[12].mxu0 %vm1123_vm8, %v1121_v30 }
 0x24d   : > { %v1790_v31 = vpop.eup %1789 }
 0x24e   : > { %v1079_v32 = vsel %vm1001_vm6, %v1790_v31, 0.0  ;;  %v1122_v33 = vpack.c.bf16 %v1790_v31, %v1790_v31  ;;  %v1792_v35 = vpop.eup %1791 }
 0x24f   : > { %1080 = vadd.xlane.f32.xlu0 %v1079_v32  ;;  %v1067_v39 = vmul.f32 %v1792_v35, %v1063_v37 }
 0x250   : > { %1711 = vmatmul.mubr.msk.bf16.vlgmr.msra.gmra.mrb[12].mxu1 %vm1123_vm8, %v1122_v33 }
 0x265   : > { %1102 = vperm.xlu0 %1743, %v1792_v35  }
 0x2b8   : > { %v1072_v40 = vpop.xlane.xlu0 %1071 }
 0x2b9   : > { %v1075_v41 = vpop.xlane.xlu1 %1074  ;;  %v1082_v42 = vadd.f32 %v1072_v40, %v1066_v38 }
 0x2ba   : > { %v1083_v43 = vadd.f32 %v1075_v41, %v1067_v39 }
 0x2bb   : > { %1087 = vst.msk [vmem:[#allocation3] sm:$0xf] %vm441_vm1, %v1082_v42 }
 0x2bc   : > { %1088 = vst.msk [vmem:[#allocation3 + $0x4] sm:$0xf] %vm441_vm1, %v1083_v43 }
 0x2bd   : > { %v1098_v61 = vpop.permute.xlu1 %1097 }
 0x2be   : > { %v1115_v4 = vmul.f32 %v1098_v61, %v1091_v60 }
 0x2c1   : > { %v1108_v14 = vpop.permute.xlu1 %1107 }
 0x2c2   : > { %v1328_v44 = vld [vmem:[#allocation3] sm:$0xf]  ;;  %v1117_v15 = vmul.f32 %v1108_v14, %v1093_v0 }
 0x2c3   : > { %v1329_v46 = vld [vmem:[#allocation3 + $0x4] sm:$0xf]  ;;  %1793 = vrcp.f32 %v1328_v44 }
 0x2c4   : > { %1795 = vrcp.f32 %v1329_v46 }
 0x2c5   : > { %v1113_v16 = vpop.permute.xlu1 %1112 }
 0x2c6   : > { %v1118_v22 = vmul.f32 %v1113_v16, %v1094_v18 }
 0x2cd   : > { %v1794_v45 = vpop.eup %1793 }
 0x2ce   : > { %v1796_v47 = vpop.eup %1795  ;;  %1338 = vperm.xlu0 %1743, %v1794_v45  }
 0x2cf   : > { %1343 = vperm.xlu1 %1744, %v1796_v47  }
 0x2d8   : > { %v1078_v50 = vpop.xlane.xlu0 %1077 }
 0x2d9   : > { %v1084_v52 = vadd.f32 %v1078_v50, %v1068_v49 }
 0x2db   : > { %1089 = vst.msk [vmem:[#allocation3 + $0x8] sm:$0xf] %vm441_vm1, %v1084_v52 }
 0x2dc   : > { %v1081_v54 = vpop.xlane.xlu0 %1080 }
 0x2dd   : > { %v1085_v55 = vadd.f32 %v1081_v54, %v1069_v53 }
 0x2df   : > { %1090 = vst.msk [vmem:[#allocation3 + $0xc] sm:$0xf] %vm441_vm1, %v1085_v55 }
 0x2e2   : > { %v1330_v56 = vld [vmem:[#allocation3 + $0x8] sm:$0xf] }
 0x2e3   : > { %1797 = vrcp.f32 %v1330_v56 }
 0x2e4   : > { %v1103_v63 = vpop.permute.xlu0 %1102 }
 0x2e5   : > { %v1116_v5 = vmul.f32 %v1103_v63, %v1092_v62 }
 0x2e6   : > { %v1331_v57 = vld [vmem:[#allocation3 + $0xc] sm:$0xf] }
 0x2e7   : > { %1799 = vrcp.f32 %v1331_v57 }
 0x2ed   : > { %v1798_v58 = vpop.eup %1797 }
 0x2ee   : > { %1348 = vperm.xlu0 %1743, %v1798_v58  }
 0x2f1   : > { %v1800_v59 = vpop.eup %1799 }
 0x2f2   : > { %1353 = vperm.xlu1 %1744, %v1800_v59  }
 0x2ff   : > { %v1165_v6 = vpop.f32.mrb[8].mxu0 }
 0x300   : > { %v1309_v7 = vadd.f32 %v1165_v6, %v1115_v4  ;;  %v1211_v8 = vpop.f32.mrb[8].mxu1  ;;  %v1694_v9 = vpop.f32.mrb[9].mxu0 }
 0x301   : > { %v1310_v10 = vadd.f32 %v1211_v8, %v1116_v5  ;;  %v1700_v11 = vpop.f32.mrb[9].mxu1  ;;  %v1168_v2 = vpop.f32.mrb[10].mxu0 }
 0x302   : > { %1313 = vst [vmem:[#allocation4] sm:$0xf] %v1309_v7  ;;  %v1214_v12 = vpop.f32.mrb[10].mxu1  ;;  %v1695_v13 = vpop.f32.mrb[11].mxu0 }
 0x303   : > { %1314 = vst [vmem:[#allocation4 + $0x4] sm:$0xf] %v1310_v10  ;;  %v1701_v3 = vpop.f32.mrb[11].mxu1 }
 0x309   : > { %v1324_v29 = vld [vmem:[#allocation4] sm:$0xf] }
 0x30a   : > { %v1325_v31 = vld [vmem:[#allocation4 + $0x4] sm:$0xf] }
 0x31f   : > { %v1257_v17 = vpop.f32.mrb[12].mxu0 }
 0x320   : > { %v1311_v19 = vadd.f32 %v1257_v17, %v1117_v15  ;;  %v1706_v20 = vpop.f32.mrb[13].mxu0 }
 0x321   : > { %v1260_v21 = vpop.f32.mrb[14].mxu0 }
 0x322   : > { %1315 = vst [vmem:[#allocation4 + $0x8] sm:$0xf] %v1311_v19  ;;  %v1707_v23 = vpop.f32.mrb[15].mxu0 }
 0x323   : > { %v1303_v24 = vpop.f32.mrb[12].mxu1 }
 0x324   : > { %v1312_v25 = vadd.f32 %v1303_v24, %v1118_v22  ;;  %v1712_v26 = vpop.f32.mrb[13].mxu1 }
 0x325   : > { %v1306_v27 = vpop.f32.mrb[14].mxu1 }
 0x326   : > { %1316 = vst [vmem:[#allocation4 + $0xc] sm:$0xf] %v1312_v25  ;;  %v1713_v1 = vpop.f32.mrb[15].mxu1 }
 0x329   : > { %v1326_v37 = vld [vmem:[#allocation4 + $0x8] sm:$0xf] }
 0x32d   : > { %v1327_v40 = vld [vmem:[#allocation4 + $0xc] sm:$0xf] }
 0x34d   : > { %v1339_v28 = vpop.permute.xlu0 %1338 }
 0x34e   : > { %v1344_v30 = vpop.permute.xlu1 %1343  ;;  %v1356_v32 = vmul.f32 %v1339_v28, %v1324_v29 }
 0x34f   : > { %v1357_v33 = vmul.f32 %v1344_v30, %v1325_v31 }
 0x350   : > { %v1360_v34 = vpack.c.bf16 %v1356_v32, %v1356_v32 }
 0x351   : > { %v1361_v35 = vpack.c.bf16 %v1357_v33, %v1357_v33 }
 0x352   : > { %1364 = vst [vmem:[%s433_s28] sm:$0x3] %v1360_v34 }
 0x353   : > { %1365 = vst [vmem:[%s433_s28 + $0x2] sm:$0x3] %v1361_v35 }
 0x36d   : > { %v1349_v36 = vpop.permute.xlu0 %1348 }
 0x36e   : > { %v1358_v38 = vmul.f32 %v1349_v36, %v1326_v37 }
 0x370   : > { %v1362_v39 = vpack.c.bf16 %v1358_v38, %v1358_v38 }
 0x371   : > { %v1354_v41 = vpop.permute.xlu1 %1353 }
 0x372   : > { %1366 = vst [vmem:[%s433_s28 + $0x4] sm:$0x3] %v1362_v39  ;;  %v1359_v42 = vmul.f32 %v1354_v41, %v1327_v40 }
 0x374   : > { %v1363_v43 = vpack.c.bf16 %v1359_v42, %v1359_v42 }
 0x376   : > { %1367 = vst [vmem:[%s433_s28 + $0x6] sm:$0x3] %v1363_v43 }
 0x377 PF: > { %s16_s23 = sadd.s32 1, %s1823_s23   ;;  %s2118_s21 = smov %s1819_s22 }
 0x378   : > { %p13_p6 = scmp.ge.s32.totalorder %s16_s23, 4   ;;  %s2119_s22 = smov %s2121_s24 }
 0x37a   :  { %15 = sbr.rel (!%p13_p6) target bundleno = 2 (0x2), region = 97 }

// kernel: _lambda_.21
= control target key start
LH: loop header
LB: loop body
LE: loop exit
PB: predicated region body
PF: predicated region fallthrough
CT: control target
= control target key end

     0   :  { %s1824_s1 = inlined_call_operand.vmem [shape: bf16[512,512], index: 1, kind: input, shape index: {}]   ;;  %s1825_s0 = inlined_call_operand.vmem [shape: bf16[8,512], index: 0, kind: input, shape index: {}]   ;;  %s1826_s2 = inlined_call_operand.vmem [shape: f32[1,512], index: 2, kind: input, shape index: {}]   ;;  %s1827_s3 = inlined_call_operand.vmem [shape: bf16[8,512], index: 3, kind: input, shape index: {}]   ;;  %s1828_s4 = inlined_call_operand.vmem [shape: bf16[8,512], index: 4, kind: output, shape index: {}]  }
   0x1   :  { %v1186_v0 = vld [vmem:[%s1824_s1 + $0x4] ss:$16 sps:$4 sm:$0xff]   ;;  %v1190_v2 = vld [vmem:[%s1824_s1] ss:$16 sps:$4 sm:$0xff]   ;;  %v26_v48 = vld [vmem:[%s1825_s0 + $0x8] sm:$0xff] }
   0x2   :  { %v1188_v1 = vld [vmem:[%s1824_s1 + $0x204] ss:$16 sps:$4 sm:$0xff]   ;;  %813 = vmatprep.subr.bf16.mxu0 %v1186_v0  ;;  %v1191_v3 = vld [vmem:[%s1824_s1 + $0x200] ss:$16 sps:$4 sm:$0xff]   ;;  %v1053_v51 = vcombine.high %v26_v48, %v26_v48 }
   0x3   :  { %854 = vmatprep.subr.bf16.mxu1 %v1188_v1  ;;  %v1192_v4 = vld [vmem:[%s1824_s1 + $0x24] ss:$16 sps:$4 sm:$0xff]   ;;  %814 = vmatpush1.bf16.msra.mxu0 %v1190_v2  ;;  %v1196_v6 = vld [vmem:[%s1824_s1 + $0x20] ss:$16 sps:$4 sm:$0xff]  }
   0x4   :  { %855 = vmatpush1.bf16.msra.mxu1 %v1191_v3  ;;  %v1194_v5 = vld [vmem:[%s1824_s1 + $0x224] ss:$16 sps:$4 sm:$0xff]   ;;  %815 = vmatprep.subr.bf16.mxu0 %v1192_v4  ;;  %v1197_v7 = vld [vmem:[%s1824_s1 + $0x220] ss:$16 sps:$4 sm:$0xff]   ;;  %v1288_v4 = vld [vmem:[%s1824_s1 + $0xc] ss:$16 sps:$4 sm:$0xff]  }
   0x5   :  { %856 = vmatprep.subr.bf16.mxu1 %v1194_v5  ;;  %v1198_v8 = vld [vmem:[%s1824_s1 + $0x44] ss:$16 sps:$4 sm:$0xff]   ;;  %v1202_v10 = vld [vmem:[%s1824_s1 + $0x40] ss:$16 sps:$4 sm:$0xff]   ;;  %886 = vmatprep.mubr.bf16.mxu1 %v1053_v51  ;;  %v1291_v5 = vld [vmem:[%s1824_s1 + $0x20c] ss:$16 sps:$4 sm:$0xff]  }
   0x6   :  { %v1200_v9 = vld [vmem:[%s1824_s1 + $0x244] ss:$16 sps:$4 sm:$0xff]   ;;  %v1203_v11 = vld [vmem:[%s1824_s1 + $0x240] ss:$16 sps:$4 sm:$0xff]  }
   0x7   :  { %816 = vmatpush1.bf16.msra.mxu0 %v1196_v6  ;;  %v1204_v12 = vld [vmem:[%s1824_s1 + $0x64] ss:$16 sps:$4 sm:$0xff]   ;;  %v1208_v14 = vld [vmem:[%s1824_s1 + $0x60] ss:$16 sps:$4 sm:$0xff]  }
   0x8   :  { %857 = vmatpush1.bf16.msra.mxu1 %v1197_v7  ;;  %817 = vmatprep.subr.bf16.mxu0 %v1198_v8  ;;  %v1206_v13 = vld [vmem:[%s1824_s1 + $0x264] ss:$16 sps:$4 sm:$0xff]   ;;  %v1209_v15 = vld [vmem:[%s1824_s1 + $0x260] ss:$16 sps:$4 sm:$0xff]   ;;  %v1616_v7 = vcombine.low %v26_v48, %v26_v48  ;;  %v1286_v8 = vld [vmem:[%s1824_s1 + $0x8] ss:$16 sps:$4 sm:$0xff]  }
   0x9   :  { %858 = vmatprep.subr.bf16.mxu1 %v1200_v9  ;;  %v1210_v16 = vld [vmem:[%s1824_s1 + $0x84] ss:$16 sps:$4 sm:$0xff]   ;;  %v1214_v18 = vld [vmem:[%s1824_s1 + $0x80] ss:$16 sps:$4 sm:$0xff]   ;;  %v1289_v9 = vld [vmem:[%s1824_s1 + $0x208] ss:$16 sps:$4 sm:$0xff]  }
   0xa   :  { %v1212_v17 = vld [vmem:[%s1824_s1 + $0x284] ss:$16 sps:$4 sm:$0xff]   ;;  %v1215_v19 = vld [vmem:[%s1824_s1 + $0x280] ss:$16 sps:$4 sm:$0xff]   ;;  %v1346_v48 = vld [vmem:[%s1824_s1 + $0x148] ss:$16 sps:$4 sm:$0xff]  }
   0xb   :  { %818 = vmatpush1.bf16.msra.mxu0 %v1202_v10  ;;  %v1216_v20 = vld [vmem:[%s1824_s1 + $0xa4] ss:$16 sps:$4 sm:$0xff]   ;;  %v1220_v22 = vld [vmem:[%s1824_s1 + $0xa0] ss:$16 sps:$4 sm:$0xff]   ;;  %v1294_v10 = vld [vmem:[%s1824_s1 + $0x2c] ss:$16 sps:$4 sm:$0xff]  }
   0xc   :  { %859 = vmatpush1.bf16.msra.mxu1 %v1203_v11  ;;  %819 = vmatprep.subr.bf16.mxu0 %v1204_v12  ;;  %v1218_v21 = vld [vmem:[%s1824_s1 + $0x2a4] ss:$16 sps:$4 sm:$0xff]   ;;  %v1221_v23 = vld [vmem:[%s1824_s1 + $0x2a0] ss:$16 sps:$4 sm:$0xff]   ;;  %v1297_v11 = vld [vmem:[%s1824_s1 + $0x22c] ss:$16 sps:$4 sm:$0xff]  }
   0xd   :  { %860 = vmatprep.subr.bf16.mxu1 %v1206_v13  ;;  %v1222_v24 = vld [vmem:[%s1824_s1 + $0xc4] ss:$16 sps:$4 sm:$0xff]   ;;  %v1226_v26 = vld [vmem:[%s1824_s1 + $0xc0] ss:$16 sps:$4 sm:$0xff]   ;;  %v1292_v12 = vld [vmem:[%s1824_s1 + $0x28] ss:$16 sps:$4 sm:$0xff]  }
   0xe   :  { %v1224_v25 = vld [vmem:[%s1824_s1 + $0x2c4] ss:$16 sps:$4 sm:$0xff]   ;;  %v1227_v27 = vld [vmem:[%s1824_s1 + $0x2c0] ss:$16 sps:$4 sm:$0xff]   ;;  %v1295_v13 = vld [vmem:[%s1824_s1 + $0x228] ss:$16 sps:$4 sm:$0xff]  }
   0xf   :  { %820 = vmatpush1.bf16.msra.mxu0 %v1208_v14  ;;  %v1228_v28 = vld [vmem:[%s1824_s1 + $0xe4] ss:$16 sps:$4 sm:$0xff]   ;;  %v1232_v30 = vld [vmem:[%s1824_s1 + $0xe0] ss:$16 sps:$4 sm:$0xff]   ;;  %v1300_v14 = vld [vmem:[%s1824_s1 + $0x4c] ss:$16 sps:$4 sm:$0xff]  }
  0x10   :  { %861 = vmatpush1.bf16.msra.mxu1 %v1209_v15  ;;  %821 = vmatprep.subr.bf16.mxu0 %v1210_v16  ;;  %v1230_v29 = vld [vmem:[%s1824_s1 + $0x2e4] ss:$16 sps:$4 sm:$0xff]   ;;  %v1233_v31 = vld [vmem:[%s1824_s1 + $0x2e0] ss:$16 sps:$4 sm:$0xff]   ;;  %v1303_v15 = vld [vmem:[%s1824_s1 + $0x24c] ss:$16 sps:$4 sm:$0xff]  }
  0x11   :  { %862 = vmatprep.subr.bf16.mxu1 %v1212_v17  ;;  %v1234_v32 = vld [vmem:[%s1824_s1 + $0x104] ss:$16 sps:$4 sm:$0xff]   ;;  %v1238_v34 = vld [vmem:[%s1824_s1 + $0x100] ss:$16 sps:$4 sm:$0xff]   ;;  %v1298_v16 = vld [vmem:[%s1824_s1 + $0x48] ss:$16 sps:$4 sm:$0xff]  }
  0x12   :  { %v1236_v33 = vld [vmem:[%s1824_s1 + $0x304] ss:$16 sps:$4 sm:$0xff]   ;;  %v1239_v35 = vld [vmem:[%s1824_s1 + $0x300] ss:$16 sps:$4 sm:$0xff]   ;;  %v1301_v17 = vld [vmem:[%s1824_s1 + $0x248] ss:$16 sps:$4 sm:$0xff]  }
  0x13   :  { %822 = vmatpush1.bf16.msra.mxu0 %v1214_v18  ;;  %v1240_v36 = vld [vmem:[%s1824_s1 + $0x124] ss:$16 sps:$4 sm:$0xff]   ;;  %v1244_v38 = vld [vmem:[%s1824_s1 + $0x120] ss:$16 sps:$4 sm:$0xff]   ;;  %v1306_v18 = vld [vmem:[%s1824_s1 + $0x6c] ss:$16 sps:$4 sm:$0xff]  }
  0x14   :  { %863 = vmatpush1.bf16.msra.mxu1 %v1215_v19  ;;  %823 = vmatprep.subr.bf16.mxu0 %v1216_v20  ;;  %v1242_v37 = vld [vmem:[%s1824_s1 + $0x324] ss:$16 sps:$4 sm:$0xff]   ;;  %v1245_v39 = vld [vmem:[%s1824_s1 + $0x320] ss:$16 sps:$4 sm:$0xff]   ;;  %v1309_v19 = vld [vmem:[%s1824_s1 + $0x26c] ss:$16 sps:$4 sm:$0xff]  }
  0x15   :  { %864 = vmatprep.subr.bf16.mxu1 %v1218_v21  ;;  %v1246_v40 = vld [vmem:[%s1824_s1 + $0x144] ss:$16 sps:$4 sm:$0xff]   ;;  %v1250_v42 = vld [vmem:[%s1824_s1 + $0x140] ss:$16 sps:$4 sm:$0xff]   ;;  %v1304_v20 = vld [vmem:[%s1824_s1 + $0x68] ss:$16 sps:$4 sm:$0xff]  }
  0x16   :  { %v1248_v41 = vld [vmem:[%s1824_s1 + $0x344] ss:$16 sps:$4 sm:$0xff]   ;;  %v1251_v43 = vld [vmem:[%s1824_s1 + $0x340] ss:$16 sps:$4 sm:$0xff]   ;;  %v1307_v21 = vld [vmem:[%s1824_s1 + $0x268] ss:$16 sps:$4 sm:$0xff]  }
  0x17   :  { %824 = vmatpush1.bf16.msra.mxu0 %v1220_v22  ;;  %v1252_v44 = vld [vmem:[%s1824_s1 + $0x164] ss:$16 sps:$4 sm:$0xff]   ;;  %v1256_v49 = vld [vmem:[%s1824_s1 + $0x160] ss:$16 sps:$4 sm:$0xff]   ;;  %v1312_v22 = vld [vmem:[%s1824_s1 + $0x8c] ss:$16 sps:$4 sm:$0xff]  }
  0x18   :  { %865 = vmatpush1.bf16.msra.mxu1 %v1221_v23  ;;  %825 = vmatprep.subr.bf16.mxu0 %v1222_v24  ;;  %v1254_v45 = vld [vmem:[%s1824_s1 + $0x364] ss:$16 sps:$4 sm:$0xff]   ;;  %v1257_v50 = vld [vmem:[%s1824_s1 + $0x360] ss:$16 sps:$4 sm:$0xff]   ;;  %v1315_v23 = vld [vmem:[%s1824_s1 + $0x28c] ss:$16 sps:$4 sm:$0xff]  }
  0x19   :  { %866 = vmatprep.subr.bf16.mxu1 %v1224_v25  ;;  %v25_v46 = vld [vmem:[%s1825_s0] sm:$0xff]  ;;  %v1310_v24 = vld [vmem:[%s1824_s1 + $0x88] ss:$16 sps:$4 sm:$0xff]  }
  0x1a   :  { %v1548_v47 = vcombine.high %v25_v46, %v25_v46  ;;  %v1258_v52 = vld [vmem:[%s1824_s1 + $0x184] ss:$16 sps:$4 sm:$0xff]   ;;  %v1262_v54 = vld [vmem:[%s1824_s1 + $0x180] ss:$16 sps:$4 sm:$0xff]   ;;  %v1614_v6 = vcombine.low %v25_v46, %v25_v46  ;;  %v1313_v25 = vld [vmem:[%s1824_s1 + $0x288] ss:$16 sps:$4 sm:$0xff]  }
  0x1b   :  { %826 = vmatpush1.bf16.msra.mxu0 %v1226_v26  ;;  %v1260_v53 = vld [vmem:[%s1824_s1 + $0x384] ss:$16 sps:$4 sm:$0xff]   ;;  %v1263_v55 = vld [vmem:[%s1824_s1 + $0x380] ss:$16 sps:$4 sm:$0xff]   ;;  %v1318_v26 = vld [vmem:[%s1824_s1 + $0xac] ss:$16 sps:$4 sm:$0xff]  }
  0x1c   :  { %867 = vmatpush1.bf16.msra.mxu1 %v1227_v27  ;;  %827 = vmatprep.subr.bf16.mxu0 %v1228_v28  ;;  %v1264_v56 = vld [vmem:[%s1824_s1 + $0x1a4] ss:$16 sps:$4 sm:$0xff]   ;;  %v1268_v58 = vld [vmem:[%s1824_s1 + $0x1a0] ss:$16 sps:$4 sm:$0xff]   ;;  %v1321_v27 = vld [vmem:[%s1824_s1 + $0x2ac] ss:$16 sps:$4 sm:$0xff]  }
  0x1d   :  { %868 = vmatprep.subr.bf16.mxu1 %v1230_v29  ;;  %845 = vmatprep.mubr.bf16.mxu0 %v1548_v47  ;;  %v1266_v57 = vld [vmem:[%s1824_s1 + $0x3a4] ss:$16 sps:$4 sm:$0xff]   ;;  %v1269_v59 = vld [vmem:[%s1824_s1 + $0x3a0] ss:$16 sps:$4 sm:$0xff]   ;;  %v1316_v28 = vld [vmem:[%s1824_s1 + $0xa8] ss:$16 sps:$4 sm:$0xff]  }
  0x1e   :  { %v1270_v60 = vld [vmem:[%s1824_s1 + $0x1c4] ss:$16 sps:$4 sm:$0xff]   ;;  %v1274_v62 = vld [vmem:[%s1824_s1 + $0x1c0] ss:$16 sps:$4 sm:$0xff]   ;;  %v1319_v29 = vld [vmem:[%s1824_s1 + $0x2a8] ss:$16 sps:$4 sm:$0xff]  }
  0x1f   :  { %828 = vmatpush1.bf16.msra.mxu0 %v1232_v30  ;;  %v1272_v61 = vld [vmem:[%s1824_s1 + $0x3c4] ss:$16 sps:$4 sm:$0xff]   ;;  %v1275_v63 = vld [vmem:[%s1824_s1 + $0x3c0] ss:$16 sps:$4 sm:$0xff]   ;;  %v1324_v30 = vld [vmem:[%s1824_s1 + $0xcc] ss:$16 sps:$4 sm:$0xff]  }
  0x20   :  { %869 = vmatpush1.bf16.msra.mxu1 %v1233_v31  ;;  %829 = vmatprep.subr.bf16.mxu0 %v1234_v32  ;;  %v1276_v0 = vld [vmem:[%s1824_s1 + $0x1e4] ss:$16 sps:$4 sm:$0xff]   ;;  %v1280_v2 = vld [vmem:[%s1824_s1 + $0x1e0] ss:$16 sps:$4 sm:$0xff]   ;;  %v1327_v31 = vld [vmem:[%s1824_s1 + $0x2cc] ss:$16 sps:$4 sm:$0xff]  }
  0x21   :  { %870 = vmatprep.subr.bf16.mxu1 %v1236_v33  ;;  %v1278_v1 = vld [vmem:[%s1824_s1 + $0x3e4] ss:$16 sps:$4 sm:$0xff]   ;;  %v1281_v3 = vld [vmem:[%s1824_s1 + $0x3e0] ss:$16 sps:$4 sm:$0xff]   ;;  %v1322_v32 = vld [vmem:[%s1824_s1 + $0xc8] ss:$16 sps:$4 sm:$0xff]  }
  0x22   :  { %v1325_v33 = vld [vmem:[%s1824_s1 + $0x2c8] ss:$16 sps:$4 sm:$0xff]   ;;  %v1348_v46 = vld [vmem:[%s1824_s1 + $0x14c] ss:$16 sps:$4 sm:$0xff]  }
  0x23   :  { %830 = vmatpush1.bf16.msra.mxu0 %v1238_v34  ;;  %v1330_v34 = vld [vmem:[%s1824_s1 + $0xec] ss:$16 sps:$4 sm:$0xff]  }
  0x24   :  { %871 = vmatpush1.bf16.msra.mxu1 %v1239_v35  ;;  %831 = vmatprep.subr.bf16.mxu0 %v1240_v36  ;;  %v1333_v35 = vld [vmem:[%s1824_s1 + $0x2ec] ss:$16 sps:$4 sm:$0xff]   ;;  %v1328_v36 = vld [vmem:[%s1824_s1 + $0xe8] ss:$16 sps:$4 sm:$0xff]  }
  0x25   :  { %872 = vmatprep.subr.bf16.mxu1 %v1242_v37  ;;  %v1331_v37 = vld [vmem:[%s1824_s1 + $0x2e8] ss:$16 sps:$4 sm:$0xff]  }
  0x27   :  { %832 = vmatpush1.bf16.msra.mxu0 %v1244_v38  ;;  %v1336_v38 = vld [vmem:[%s1824_s1 + $0x10c] ss:$16 sps:$4 sm:$0xff]  }
  0x28   :  { %873 = vmatpush1.bf16.msra.mxu1 %v1245_v39  ;;  %833 = vmatprep.subr.bf16.mxu0 %v1246_v40  ;;  %v1339_v39 = vld [vmem:[%s1824_s1 + $0x30c] ss:$16 sps:$4 sm:$0xff]   ;;  %v1334_v40 = vld [vmem:[%s1824_s1 + $0x108] ss:$16 sps:$4 sm:$0xff]  }
  0x29   :  { %874 = vmatprep.subr.bf16.mxu1 %v1248_v41  ;;  %v1337_v41 = vld [vmem:[%s1824_s1 + $0x308] ss:$16 sps:$4 sm:$0xff]  }
  0x2b   :  { %834 = vmatpush1.bf16.msra.mxu0 %v1250_v42  ;;  %v1342_v42 = vld [vmem:[%s1824_s1 + $0x12c] ss:$16 sps:$4 sm:$0xff]  }
  0x2c   :  { %875 = vmatpush1.bf16.msra.mxu1 %v1251_v43  ;;  %835 = vmatprep.subr.bf16.mxu0 %v1252_v44  ;;  %v1345_v43 = vld [vmem:[%s1824_s1 + $0x32c] ss:$16 sps:$4 sm:$0xff]   ;;  %v1340_v44 = vld [vmem:[%s1824_s1 + $0x128] ss:$16 sps:$4 sm:$0xff]  }
  0x2d   :  { %876 = vmatprep.subr.bf16.mxu1 %v1254_v45  ;;  %v1343_v45 = vld [vmem:[%s1824_s1 + $0x328] ss:$16 sps:$4 sm:$0xff]  }
  0x2f   :  { %836 = vmatpush1.bf16.msra.mxu0 %v1256_v49  ;;  %v1349_v49 = vld [vmem:[%s1824_s1 + $0x348] ss:$16 sps:$4 sm:$0xff]  }
  0x30   :  { %877 = vmatpush1.bf16.msra.mxu1 %v1257_v50  ;;  %837 = vmatprep.subr.bf16.mxu0 %v1258_v52  ;;  %v1354_v50 = vld [vmem:[%s1824_s1 + $0x16c] ss:$16 sps:$4 sm:$0xff]   ;;  %v1352_v52 = vld [vmem:[%s1824_s1 + $0x168] ss:$16 sps:$4 sm:$0xff]  }
  0x31   :  { %878 = vmatprep.subr.bf16.mxu1 %v1260_v53  ;;  %v1355_v53 = vld [vmem:[%s1824_s1 + $0x368] ss:$16 sps:$4 sm:$0xff]  }
  0x33   :  { %838 = vmatpush1.bf16.msra.mxu0 %v1262_v54  ;;  %v1360_v54 = vld [vmem:[%s1824_s1 + $0x18c] ss:$16 sps:$4 sm:$0xff]  }
  0x34   :  { %879 = vmatpush1.bf16.msra.mxu1 %v1263_v55  ;;  %839 = vmatprep.subr.bf16.mxu0 %v1264_v56  ;;  %v1363_v55 = vld [vmem:[%s1824_s1 + $0x38c] ss:$16 sps:$4 sm:$0xff]   ;;  %v1358_v56 = vld [vmem:[%s1824_s1 + $0x188] ss:$16 sps:$4 sm:$0xff]  }
  0x35   :  { %880 = vmatprep.subr.bf16.mxu1 %v1266_v57  ;;  %v1361_v57 = vld [vmem:[%s1824_s1 + $0x388] ss:$16 sps:$4 sm:$0xff]  }
  0x37   :  { %840 = vmatpush1.bf16.msra.mxu0 %v1268_v58  ;;  %v1366_v58 = vld [vmem:[%s1824_s1 + $0x1ac] ss:$16 sps:$4 sm:$0xff]  }
  0x38   :  { %881 = vmatpush1.bf16.msra.mxu1 %v1269_v59  ;;  %841 = vmatprep.subr.bf16.mxu0 %v1270_v60  ;;  %v1369_v59 = vld [vmem:[%s1824_s1 + $0x3ac] ss:$16 sps:$4 sm:$0xff]   ;;  %v1364_v60 = vld [vmem:[%s1824_s1 + $0x1a8] ss:$16 sps:$4 sm:$0xff]  }
  0x39   :  { %882 = vmatprep.subr.bf16.mxu1 %v1272_v61  ;;  %v1367_v61 = vld [vmem:[%s1824_s1 + $0x3a8] ss:$16 sps:$4 sm:$0xff]  }
  0x3b   :  { %842 = vmatpush1.bf16.msra.mxu0 %v1274_v62  ;;  %v1372_v62 = vld [vmem:[%s1824_s1 + $0x1cc] ss:$16 sps:$4 sm:$0xff]  }
  0x3c   :  { %883 = vmatpush1.bf16.msra.mxu1 %v1275_v63  ;;  %843 = vmatprep.subr.bf16.mxu0 %v1276_v0  ;;  %v1375_v63 = vld [vmem:[%s1824_s1 + $0x3cc] ss:$16 sps:$4 sm:$0xff]   ;;  %v1370_v0 = vld [vmem:[%s1824_s1 + $0x1c8] ss:$16 sps:$4 sm:$0xff]  }
  0x3d   :  { %884 = vmatprep.subr.bf16.mxu1 %v1278_v1  ;;  %v1373_v1 = vld [vmem:[%s1824_s1 + $0x3c8] ss:$16 sps:$4 sm:$0xff]  }
  0x3f   :  { %844 = vmatpush1.bf16.msra.mxu0 %v1280_v2  ;;  %v1378_v2 = vld [vmem:[%s1824_s1 + $0x1ec] ss:$16 sps:$4 sm:$0xff]  }
  0x40   :  { %885 = vmatpush1.bf16.msra.mxu1 %v1281_v3  ;;  %895 = vmatprep.subr.bf16.mxu0 %v1288_v4  ;;  %v1381_v3 = vld [vmem:[%s1824_s1 + $0x3ec] ss:$16 sps:$4 sm:$0xff]   ;;  %v1376_v4 = vld [vmem:[%s1824_s1 + $0x1e8] ss:$16 sps:$4 sm:$0xff]  }
  0x41   :  { %936 = vmatprep.subr.bf16.mxu1 %v1291_v5  ;;  %v1379_v5 = vld [vmem:[%s1824_s1 + $0x3e8] ss:$16 sps:$4 sm:$0xff]  }
  0x42   :  { %846 = vmatmul.mubr.bf16.vlgmr.msra.gmra.mrb[0].mxu0 %v1614_v6 }
  0x43   :  { %887 = vmatmul.mubr.bf16.vlgmr.msra.gmra.mrb[0].mxu1 %v1616_v7  ;;  %896 = vmatpush1.bf16.msra.mxu0 %v1286_v8  ;;  %v994_v8 = vlaneseq }
  0x44   :  { %937 = vmatpush1.bf16.msra.mxu1 %v1289_v9  ;;  %897 = vmatprep.subr.bf16.mxu0 %v1294_v10 }
  0x45   :  { %938 = vmatprep.subr.bf16.mxu1 %v1297_v11  ;;  %927 = vmatprep.mubr.bf16.mxu0 %v1548_v47  ;;  %v1351_v47 = vld [vmem:[%s1824_s1 + $0x34c] ss:$16 sps:$4 sm:$0xff]   ;;  %v995_v9 = vshrl.u32 %v994_v8, 7  ;;  %v992_v11 = vld [vmem:[%s1826_s2] sm:$0xf] }
  0x46   :  { %968 = vmatprep.mubr.bf16.mxu1 %v1053_v51  ;;  %v1357_v51 = vld [vmem:[%s1824_s1 + $0x36c] ss:$16 sps:$4 sm:$0xff]  }
  0x47   :  { %898 = vmatpush1.bf16.msra.mxu0 %v1292_v12  ;;  %v1004_v10 = vsub.s32 2, %v995_v9  ;;  %v1008_v12 = vsub.s32 3, %v995_v9 }
  0x48   :  { %939 = vmatpush1.bf16.msra.mxu1 %v1295_v13  ;;  %899 = vmatprep.subr.bf16.mxu0 %v1300_v14 }
  0x49   :  { %940 = vmatprep.subr.bf16.mxu1 %v1303_v15  ;;  %v1005_v13 = vrot.slane %v992_v11, %v1004_v10  ;;  %v1009_v14 = vrot.slane %v992_v11, %v1008_v12  ;;  %v996_v15 = vsub.s32 0, %v995_v9 }
  0x4b   :  { %900 = vmatpush1.bf16.msra.mxu0 %v1298_v16  ;;  %v1000_v16 = vsub.s32 1, %v995_v9 }
  0x4c   :  { %941 = vmatpush1.bf16.msra.mxu1 %v1301_v17  ;;  %901 = vmatprep.subr.bf16.mxu0 %v1306_v18  ;;  %v1018_v17 = vld [vmem:[%s1827_s3] sm:$0xff]  ;;  %v997_v18 = vrot.slane %v992_v11, %v996_v15 }
  0x4d   :  { %942 = vmatprep.subr.bf16.mxu1 %v1309_v19 }
  0x4f   :  { %902 = vmatpush1.bf16.msra.mxu0 %v1304_v20 }
  0x50   :  { %943 = vmatpush1.bf16.msra.mxu1 %v1307_v21  ;;  %903 = vmatprep.subr.bf16.mxu0 %v1312_v22  ;;  %v1020_v21 = vunpack.c.l.bf16 %v1018_v17 }
  0x51   :  { %944 = vmatprep.subr.bf16.mxu1 %v1315_v23 }
  0x53   :  { %904 = vmatpush1.bf16.msra.mxu0 %v1310_v24 }
  0x54   :  { %945 = vmatpush1.bf16.msra.mxu1 %v1313_v25  ;;  %905 = vmatprep.subr.bf16.mxu0 %v1318_v26  ;;  %v1021_v25 = vunpack.c.h.bf16 %v1018_v17 }
  0x55   :  { %946 = vmatprep.subr.bf16.mxu1 %v1321_v27 }
  0x57   :  { %906 = vmatpush1.bf16.msra.mxu0 %v1316_v28 }
  0x58   :  { %947 = vmatpush1.bf16.msra.mxu1 %v1319_v29  ;;  %907 = vmatprep.subr.bf16.mxu0 %v1324_v30 }
  0x59   :  { %948 = vmatprep.subr.bf16.mxu1 %v1327_v31 }
  0x5b   :  { %908 = vmatpush1.bf16.msra.mxu0 %v1322_v32 }
  0x5c   :  { %949 = vmatpush1.bf16.msra.mxu1 %v1325_v33  ;;  %909 = vmatprep.subr.bf16.mxu0 %v1330_v34 }
  0x5d   :  { %950 = vmatprep.subr.bf16.mxu1 %v1333_v35  ;;  %v1019_v35 = vld [vmem:[%s1827_s3 + $0x8] sm:$0xff] }
  0x5f   :  { %910 = vmatpush1.bf16.msra.mxu0 %v1328_v36 }
  0x60   :  { %951 = vmatpush1.bf16.msra.mxu1 %v1331_v37  ;;  %911 = vmatprep.subr.bf16.mxu0 %v1336_v38 }
  0x61   :  { %952 = vmatprep.subr.bf16.mxu1 %v1339_v39  ;;  %v1022_v39 = vunpack.c.l.bf16 %v1019_v35 }
  0x63   :  { %912 = vmatpush1.bf16.msra.mxu0 %v1334_v40 }
  0x64   :  { %953 = vmatpush1.bf16.msra.mxu1 %v1337_v41  ;;  %913 = vmatprep.subr.bf16.mxu0 %v1342_v42 }
  0x65   :  { %954 = vmatprep.subr.bf16.mxu1 %v1345_v43  ;;  %v1023_v43 = vunpack.c.h.bf16 %v1019_v35 }
  0x67   :  { %914 = vmatpush1.bf16.msra.mxu0 %v1340_v44 }
  0x68   :  { %955 = vmatpush1.bf16.msra.mxu1 %v1343_v45  ;;  %915 = vmatprep.subr.bf16.mxu0 %v1348_v46 }
  0x69   :  { %956 = vmatprep.subr.bf16.mxu1 %v1351_v47 }
  0x6b   :  { %916 = vmatpush1.bf16.msra.mxu0 %v1346_v48 }
  0x6c   :  { %957 = vmatpush1.bf16.msra.mxu1 %v1349_v49  ;;  %917 = vmatprep.subr.bf16.mxu0 %v1354_v50 }
  0x6d   :  { %958 = vmatprep.subr.bf16.mxu1 %v1357_v51 }
  0x6f   :  { %918 = vmatpush1.bf16.msra.mxu0 %v1352_v52 }
  0x70   :  { %959 = vmatpush1.bf16.msra.mxu1 %v1355_v53  ;;  %919 = vmatprep.subr.bf16.mxu0 %v1360_v54 }
  0x71   :  { %960 = vmatprep.subr.bf16.mxu1 %v1363_v55 }
  0x73   :  { %920 = vmatpush1.bf16.msra.mxu0 %v1358_v56 }
  0x74   :  { %961 = vmatpush1.bf16.msra.mxu1 %v1361_v57  ;;  %921 = vmatprep.subr.bf16.mxu0 %v1366_v58 }
  0x75   :  { %962 = vmatprep.subr.bf16.mxu1 %v1369_v59 }
  0x77   :  { %922 = vmatpush1.bf16.msra.mxu0 %v1364_v60 }
  0x78   :  { %963 = vmatpush1.bf16.msra.mxu1 %v1367_v61  ;;  %923 = vmatprep.subr.bf16.mxu0 %v1372_v62 }
  0x79   :  { %964 = vmatprep.subr.bf16.mxu1 %v1375_v63 }
  0x7b   :  { %924 = vmatpush1.bf16.msra.mxu0 %v1370_v0 }
  0x7c   :  { %965 = vmatpush1.bf16.msra.mxu1 %v1373_v1  ;;  %925 = vmatprep.subr.bf16.mxu0 %v1378_v2 }
  0x7d   :  { %966 = vmatprep.subr.bf16.mxu1 %v1381_v3 }
  0x7f   :  { %926 = vmatpush1.bf16.msra.mxu0 %v1376_v4 }
  0x80   :  { %967 = vmatpush1.bf16.msra.mxu1 %v1379_v5 }
  0x82   :  { %928 = vmatmul.mubr.bf16.vlgmr.msra.gmra.mrb[4].mxu0 %v1614_v6 }
  0x83   :  { %969 = vmatmul.mubr.bf16.vlgmr.msra.gmra.mrb[4].mxu1 %v1616_v7  ;;  %v1001_v7 = vrot.slane %v992_v11, %v1000_v16 }
 0x115   :  { %v847_v6 = vpop.f32.mrb[0].mxu0 }
 0x116   :  { %v888_v19 = vpop.f32.mrb[0].mxu1  ;;  %v849_v22 = vpop.f32.mrb[1].mxu0 }
 0x117   :  { %v889_v20 = vadd.f32 %v888_v19, %v847_v6  ;;  %v890_v23 = vpop.f32.mrb[1].mxu1  ;;  %v851_v26 = vpop.f32.mrb[2].mxu0 }
 0x118   :  { %v891_v24 = vadd.f32 %v890_v23, %v849_v22  ;;  %v892_v27 = vpop.f32.mrb[2].mxu1  ;;  %v852_v29 = vpop.f32.mrb[3].mxu0 }
 0x119   :  { %v1014_v28 = vadd.f32 %v997_v18, %v889_v20  ;;  %v893_v30 = vpop.f32.mrb[3].mxu1 }
 0x11a   :  { %v1015_v31 = vadd.f32 %v1001_v7, %v891_v24 }
 0x11b   :  { %v1024_v32 = vadd.f32 %v1020_v21, %v1014_v28 }
 0x11c   :  { %v1025_v33 = vadd.f32 %v1021_v25, %v1015_v31 }
 0x11e   :  { %v1184_v34 = vpack.c.bf16 %v1025_v33, %v1024_v32 }
 0x120   :  { %1044 = vst [vmem:[%s1828_s4] sm:$0xff] %v1184_v34 }
 0x155   :  { %v929_v36 = vpop.f32.mrb[4].mxu0 }
 0x156   :  { %v970_v37 = vpop.f32.mrb[4].mxu1  ;;  %v931_v40 = vpop.f32.mrb[5].mxu0 }
 0x157   :  { %v971_v38 = vadd.f32 %v970_v37, %v929_v36  ;;  %v972_v41 = vpop.f32.mrb[5].mxu1  ;;  %v933_v44 = vpop.f32.mrb[6].mxu0 }
 0x158   :  { %v973_v42 = vadd.f32 %v972_v41, %v931_v40  ;;  %v974_v45 = vpop.f32.mrb[6].mxu1  ;;  %v934_v47 = vpop.f32.mrb[7].mxu0 }
 0x159   :  { %v1016_v46 = vadd.f32 %v1005_v13, %v971_v38  ;;  %v975_v48 = vpop.f32.mrb[7].mxu1 }
 0x15a   :  { %v1017_v49 = vadd.f32 %v1009_v14, %v973_v42 }
 0x15b   :  { %v1026_v50 = vadd.f32 %v1022_v39, %v1016_v46 }
 0x15c   :  { %v1027_v51 = vadd.f32 %v1023_v43, %v1017_v49 }
 0x15e   :  { %v1185_v52 = vpack.c.bf16 %v1027_v51, %v1026_v50 }
 0x160   :  { %1045 = vst [vmem:[%s1828_s4 + $0x8] sm:$0xff] %v1185_v52 }

// kernel: _lambda_.23
= control target key start
LH: loop header
LB: loop body
LE: loop exit
PB: predicated region body
PF: predicated region fallthrough
CT: control target
= control target key end

     0   :  { %s2171_s12 = smov 0   ;;  %s2173_s13 = smov 0   ;;  %s2671_s0 = inlined_call_operand.vmem [shape: bf16[8,512], index: 0, kind: input, shape index: {}]   ;;  %s2672_s1 = inlined_call_operand.vmem [shape: bf16[512,2048], index: 1, kind: input, shape index: {}]   ;;  %s2673_s2 = inlined_call_operand.vmem [shape: f32[1,2048], index: 2, kind: input, shape index: {}]   ;;  %s2674_s3 = inlined_call_operand.vmem [shape: bf16[8,2048], index: 3, kind: output, shape index: {}]  }
   0x1   :  { %s2175_s14 = smov 0   ;;  %s2177_s15 = smov 0  }
   0x2   :  { %s2179_s16 = smov 0  }
   0x3 LB: > { %s28_s17 = sadd.s32 1, %s2145_s15  ;;  %p76_p1 = scmp.ne.s32.totalorder %s2137_s13, %s2133_s12  ;;  %s2149_s16 = sphi %s2179_s16, %s13_s16   ;;  %s2145_s15 = sphi %s2177_s15, %s2678_s15   ;;  %s2141_s14 = sphi %s2175_s14, %s2677_s14   ;;  %s2137_s13 = sphi %s2173_s13, %s2676_s13   ;;  %s2133_s12 = sphi %s2171_s12, %s2675_s12  }
   0x4   : > { %p30_p0 = scmp.ge.s32.totalorder %s28_s17, 4  ;;  %p77_p2 = scmp.eq.s32.totalorder %s2149_s16, 0 }
   0x5   : > { %s69_s19 = sadd.s32 1, %s2137_s13  ;;  %p1719_p5 = scmp.ge.s32.totalorder %s2149_s16, 4 }
   0x6   : > { %s2680_s17 = smov (%p30_p0, %s28_s17), 0  ;;  %p78_p3 = por %p77_p2, %p76_p1 }
   0x7   : > { %s65_s18 = ssub.s32 %s2145_s15, %s2680_s17  ;;  %169 = sbr.rel (%p1719_p5) target bundleno = 82 (0x52), region = 20 }
   0x8   : > { %p67_p4 = scmp.eq.s32.totalorder %s65_s18, 0 }
   0xa   : > { %s2206_s20 = scalar_select %p67_p4, %s2137_s13, %s69_s19  }
   0xe   : > { %172 = sbr.rel (!%p78_p3) target bundleno = 82 (0x52), region = 24  ;;  %s174_s21 = sand.u32 (%p78_p3), 1, %s2137_s13  }
   0xf   : > { %s1864_s22 = sshll.u32 (%p78_p3), %s2145_s15, 4  ;;  %s1720_s23 = sshll.u32 (%p78_p3), %s174_s21, 10 }
  0x10   : > { %s2214_s26 = scalar_lea.vmem (%p78_p3), %s2672_s1, %s1864_s22  ;;  %s2219_s27 = scalar_lea.vmem (%p78_p3), [#allocation3], %s1720_s23 }
  0x11   : > { %v195_v0 = vld [vmem:[%s2214_s26] sm:$0xff] (%p78_p3)  ;;  %v197_v1 = vld [vmem:[%s2214_s26 + $0x8] sm:$0xff] (%p78_p3) }
  0x12   : > { %v199_v2 = vld [vmem:[%s2214_s26 + $0x40] sm:$0xff] (%p78_p3)  ;;  %196 = vst [vmem:[%s2219_s27] sm:$0xff] (%p78_p3), %v195_v0  ;;  %198 = vst [vmem:[%s2219_s27 + $0x8] sm:$0xff] (%p78_p3), %v197_v1  ;;  %v201_v3 = vld [vmem:[%s2214_s26 + $0x48] sm:$0xff] (%p78_p3) }
  0x13   : > { %200 = vst [vmem:[%s2219_s27 + $0x10] sm:$0xff] (%p78_p3), %v199_v2  ;;  %v203_v4 = vld [vmem:[%s2214_s26 + $0x80] sm:$0xff] (%p78_p3)  ;;  %v205_v5 = vld [vmem:[%s2214_s26 + $0x88] sm:$0xff] (%p78_p3)  ;;  %202 = vst [vmem:[%s2219_s27 + $0x18] sm:$0xff] (%p78_p3), %v201_v3 }
  0x14   : > { %204 = vst [vmem:[%s2219_s27 + $0x20] sm:$0xff] (%p78_p3), %v203_v4  ;;  %206 = vst [vmem:[%s2219_s27 + $0x28] sm:$0xff] (%p78_p3), %v205_v5  ;;  %v207_v6 = vld [vmem:[%s2214_s26 + $0xc0] sm:$0xff] (%p78_p3)  ;;  %v209_v7 = vld [vmem:[%s2214_s26 + $0xc8] sm:$0xff] (%p78_p3) }
  0x15   : > { %v211_v8 = vld [vmem:[%s2214_s26 + $0x100] sm:$0xff]  ;;  %208 = vst [vmem:[%s2219_s27 + $0x30] sm:$0xff] %v207_v6  ;;  %210 = vst [vmem:[%s2219_s27 + $0x38] sm:$0xff] %v209_v7  ;;  %v213_v9 = vld [vmem:[%s2214_s26 + $0x108] sm:$0xff] }
  0x16   : > { %212 = vst [vmem:[%s2219_s27 + $0x40] sm:$0xff] %v211_v8  ;;  %v215_v10 = vld [vmem:[%s2214_s26 + $0x140] sm:$0xff]  ;;  %v217_v11 = vld [vmem:[%s2214_s26 + $0x148] sm:$0xff]  ;;  %214 = vst [vmem:[%s2219_s27 + $0x48] sm:$0xff] %v213_v9 }
  0x17   : > { %216 = vst [vmem:[%s2219_s27 + $0x50] sm:$0xff] %v215_v10  ;;  %218 = vst [vmem:[%s2219_s27 + $0x58] sm:$0xff] %v217_v11  ;;  %v219_v12 = vld [vmem:[%s2214_s26 + $0x180] sm:$0xff]  ;;  %v221_v13 = vld [vmem:[%s2214_s26 + $0x188] sm:$0xff] }
  0x18   : > { %v223_v14 = vld [vmem:[%s2214_s26 + $0x1c0] sm:$0xff]  ;;  %220 = vst [vmem:[%s2219_s27 + $0x60] sm:$0xff] %v219_v12  ;;  %222 = vst [vmem:[%s2219_s27 + $0x68] sm:$0xff] %v221_v13  ;;  %v225_v15 = vld [vmem:[%s2214_s26 + $0x1c8] sm:$0xff] }
  0x19   : > { %224 = vst [vmem:[%s2219_s27 + $0x70] sm:$0xff] %v223_v14  ;;  %v227_v16 = vld [vmem:[%s2214_s26 + $0x200] sm:$0xff]  ;;  %v229_v17 = vld [vmem:[%s2214_s26 + $0x208] sm:$0xff]  ;;  %226 = vst [vmem:[%s2219_s27 + $0x78] sm:$0xff] %v225_v15 }
  0x1a   : > { %228 = vst [vmem:[%s2219_s27 + $0x80] sm:$0xff] %v227_v16  ;;  %230 = vst [vmem:[%s2219_s27 + $0x88] sm:$0xff] %v229_v17  ;;  %v231_v18 = vld [vmem:[%s2214_s26 + $0x240] sm:$0xff]  ;;  %v233_v19 = vld [vmem:[%s2214_s26 + $0x248] sm:$0xff] }
  0x1b   : > { %v235_v20 = vld [vmem:[%s2214_s26 + $0x280] sm:$0xff]  ;;  %232 = vst [vmem:[%s2219_s27 + $0x90] sm:$0xff] %v231_v18  ;;  %234 = vst [vmem:[%s2219_s27 + $0x98] sm:$0xff] %v233_v19  ;;  %v237_v21 = vld [vmem:[%s2214_s26 + $0x288] sm:$0xff] }
  0x1c   : > { %236 = vst [vmem:[%s2219_s27 + $0xa0] sm:$0xff] %v235_v20  ;;  %v239_v22 = vld [vmem:[%s2214_s26 + $0x2c0] sm:$0xff]  ;;  %v241_v23 = vld [vmem:[%s2214_s26 + $0x2c8] sm:$0xff]  ;;  %238 = vst [vmem:[%s2219_s27 + $0xa8] sm:$0xff] %v237_v21 }
  0x1d   : > { %240 = vst [vmem:[%s2219_s27 + $0xb0] sm:$0xff] %v239_v22  ;;  %242 = vst [vmem:[%s2219_s27 + $0xb8] sm:$0xff] %v241_v23  ;;  %v243_v24 = vld [vmem:[%s2214_s26 + $0x300] sm:$0xff]  ;;  %v245_v25 = vld [vmem:[%s2214_s26 + $0x308] sm:$0xff] }
  0x1e   : > { %v247_v26 = vld [vmem:[%s2214_s26 + $0x340] sm:$0xff]  ;;  %244 = vst [vmem:[%s2219_s27 + $0xc0] sm:$0xff] %v243_v24  ;;  %246 = vst [vmem:[%s2219_s27 + $0xc8] sm:$0xff] %v245_v25  ;;  %v249_v27 = vld [vmem:[%s2214_s26 + $0x348] sm:$0xff] }
  0x1f   : > { %248 = vst [vmem:[%s2219_s27 + $0xd0] sm:$0xff] %v247_v26  ;;  %v251_v28 = vld [vmem:[%s2214_s26 + $0x380] sm:$0xff]  ;;  %v253_v29 = vld [vmem:[%s2214_s26 + $0x388] sm:$0xff]  ;;  %250 = vst [vmem:[%s2219_s27 + $0xd8] sm:$0xff] %v249_v27 }
  0x20   : > { %252 = vst [vmem:[%s2219_s27 + $0xe0] sm:$0xff] %v251_v28  ;;  %254 = vst [vmem:[%s2219_s27 + $0xe8] sm:$0xff] %v253_v29  ;;  %v255_v30 = vld [vmem:[%s2214_s26 + $0x3c0] sm:$0xff]  ;;  %v257_v31 = vld [vmem:[%s2214_s26 + $0x3c8] sm:$0xff] }
  0x21   : > { %v259_v32 = vld [vmem:[%s2214_s26 + $0x400] sm:$0xff]  ;;  %256 = vst [vmem:[%s2219_s27 + $0xf0] sm:$0xff] %v255_v30  ;;  %258 = vst [vmem:[%s2219_s27 + $0xf8] sm:$0xff] %v257_v31  ;;  %v261_v33 = vld [vmem:[%s2214_s26 + $0x408] sm:$0xff] }
  0x22   : > { %260 = vst [vmem:[%s2219_s27 + $0x100] sm:$0xff] %v259_v32  ;;  %v263_v34 = vld [vmem:[%s2214_s26 + $0x440] sm:$0xff]  ;;  %v265_v35 = vld [vmem:[%s2214_s26 + $0x448] sm:$0xff]  ;;  %262 = vst [vmem:[%s2219_s27 + $0x108] sm:$0xff] %v261_v33 }
  0x23   : > { %264 = vst [vmem:[%s2219_s27 + $0x110] sm:$0xff] %v263_v34  ;;  %266 = vst [vmem:[%s2219_s27 + $0x118] sm:$0xff] %v265_v35  ;;  %v267_v36 = vld [vmem:[%s2214_s26 + $0x480] sm:$0xff]  ;;  %v269_v37 = vld [vmem:[%s2214_s26 + $0x488] sm:$0xff] }
  0x24   : > { %v271_v38 = vld [vmem:[%s2214_s26 + $0x4c0] sm:$0xff]  ;;  %268 = vst [vmem:[%s2219_s27 + $0x120] sm:$0xff] %v267_v36  ;;  %270 = vst [vmem:[%s2219_s27 + $0x128] sm:$0xff] %v269_v37  ;;  %v273_v39 = vld [vmem:[%s2214_s26 + $0x4c8] sm:$0xff] }
  0x25   : > { %272 = vst [vmem:[%s2219_s27 + $0x130] sm:$0xff] %v271_v38  ;;  %v275_v40 = vld [vmem:[%s2214_s26 + $0x500] sm:$0xff]  ;;  %v277_v41 = vld [vmem:[%s2214_s26 + $0x508] sm:$0xff]  ;;  %274 = vst [vmem:[%s2219_s27 + $0x138] sm:$0xff] %v273_v39 }
  0x26   : > { %276 = vst [vmem:[%s2219_s27 + $0x140] sm:$0xff] %v275_v40  ;;  %278 = vst [vmem:[%s2219_s27 + $0x148] sm:$0xff] %v277_v41  ;;  %v279_v42 = vld [vmem:[%s2214_s26 + $0x540] sm:$0xff]  ;;  %v281_v43 = vld [vmem:[%s2214_s26 + $0x548] sm:$0xff] }
  0x27   : > { %v283_v44 = vld [vmem:[%s2214_s26 + $0x580] sm:$0xff]  ;;  %280 = vst [vmem:[%s2219_s27 + $0x150] sm:$0xff] %v279_v42  ;;  %282 = vst [vmem:[%s2219_s27 + $0x158] sm:$0xff] %v281_v43  ;;  %v285_v45 = vld [vmem:[%s2214_s26 + $0x588] sm:$0xff] }
  0x28   : > { %284 = vst [vmem:[%s2219_s27 + $0x160] sm:$0xff] %v283_v44  ;;  %v287_v46 = vld [vmem:[%s2214_s26 + $0x5c0] sm:$0xff]  ;;  %v289_v47 = vld [vmem:[%s2214_s26 + $0x5c8] sm:$0xff]  ;;  %286 = vst [vmem:[%s2219_s27 + $0x168] sm:$0xff] %v285_v45 }
  0x29   : > { %288 = vst [vmem:[%s2219_s27 + $0x170] sm:$0xff] %v287_v46  ;;  %290 = vst [vmem:[%s2219_s27 + $0x178] sm:$0xff] %v289_v47  ;;  %v291_v48 = vld [vmem:[%s2214_s26 + $0x600] sm:$0xff]  ;;  %v293_v49 = vld [vmem:[%s2214_s26 + $0x608] sm:$0xff] }
  0x2a   : > { %v295_v50 = vld [vmem:[%s2214_s26 + $0x640] sm:$0xff]  ;;  %292 = vst [vmem:[%s2219_s27 + $0x180] sm:$0xff] %v291_v48  ;;  %294 = vst [vmem:[%s2219_s27 + $0x188] sm:$0xff] %v293_v49  ;;  %v297_v51 = vld [vmem:[%s2214_s26 + $0x648] sm:$0xff] }
  0x2b   : > { %296 = vst [vmem:[%s2219_s27 + $0x190] sm:$0xff] %v295_v50  ;;  %v299_v52 = vld [vmem:[%s2214_s26 + $0x680] sm:$0xff]  ;;  %v301_v53 = vld [vmem:[%s2214_s26 + $0x688] sm:$0xff]  ;;  %298 = vst [vmem:[%s2219_s27 + $0x198] sm:$0xff] %v297_v51 }
  0x2c   : > { %300 = vst [vmem:[%s2219_s27 + $0x1a0] sm:$0xff] %v299_v52  ;;  %302 = vst [vmem:[%s2219_s27 + $0x1a8] sm:$0xff] %v301_v53  ;;  %v303_v54 = vld [vmem:[%s2214_s26 + $0x6c0] sm:$0xff]  ;;  %v305_v55 = vld [vmem:[%s2214_s26 + $0x6c8] sm:$0xff] }
  0x2d   : > { %v307_v56 = vld [vmem:[%s2214_s26 + $0x700] sm:$0xff]  ;;  %304 = vst [vmem:[%s2219_s27 + $0x1b0] sm:$0xff] %v303_v54  ;;  %306 = vst [vmem:[%s2219_s27 + $0x1b8] sm:$0xff] %v305_v55  ;;  %v309_v57 = vld [vmem:[%s2214_s26 + $0x708] sm:$0xff] }
  0x2e   : > { %308 = vst [vmem:[%s2219_s27 + $0x1c0] sm:$0xff] %v307_v56  ;;  %v311_v58 = vld [vmem:[%s2214_s26 + $0x740] sm:$0xff]  ;;  %v313_v59 = vld [vmem:[%s2214_s26 + $0x748] sm:$0xff]  ;;  %310 = vst [vmem:[%s2219_s27 + $0x1c8] sm:$0xff] %v309_v57 }
  0x2f   : > { %312 = vst [vmem:[%s2219_s27 + $0x1d0] sm:$0xff] %v311_v58  ;;  %314 = vst [vmem:[%s2219_s27 + $0x1d8] sm:$0xff] %v313_v59  ;;  %v315_v60 = vld [vmem:[%s2214_s26 + $0x780] sm:$0xff]  ;;  %v317_v61 = vld [vmem:[%s2214_s26 + $0x788] sm:$0xff] }
  0x30   : > { %v319_v62 = vld [vmem:[%s2214_s26 + $0x7c0] sm:$0xff]  ;;  %316 = vst [vmem:[%s2219_s27 + $0x1e0] sm:$0xff] %v315_v60  ;;  %318 = vst [vmem:[%s2219_s27 + $0x1e8] sm:$0xff] %v317_v61  ;;  %v321_v63 = vld [vmem:[%s2214_s26 + $0x7c8] sm:$0xff] }
  0x31   : > { %320 = vst [vmem:[%s2219_s27 + $0x1f0] sm:$0xff] %v319_v62  ;;  %v323_v0 = vld [vmem:[%s2214_s26 + $0x800] sm:$0xff]  ;;  %v325_v1 = vld [vmem:[%s2214_s26 + $0x808] sm:$0xff]  ;;  %322 = vst [vmem:[%s2219_s27 + $0x1f8] sm:$0xff] %v321_v63 }
  0x32   : > { %324 = vst [vmem:[%s2219_s27 + $0x200] sm:$0xff] %v323_v0  ;;  %326 = vst [vmem:[%s2219_s27 + $0x208] sm:$0xff] %v325_v1  ;;  %v327_v2 = vld [vmem:[%s2214_s26 + $0x840] sm:$0xff]  ;;  %v329_v3 = vld [vmem:[%s2214_s26 + $0x848] sm:$0xff] }
  0x33   : > { %v331_v4 = vld [vmem:[%s2214_s26 + $0x880] sm:$0xff]  ;;  %328 = vst [vmem:[%s2219_s27 + $0x210] sm:$0xff] %v327_v2  ;;  %330 = vst [vmem:[%s2219_s27 + $0x218] sm:$0xff] %v329_v3  ;;  %v333_v5 = vld [vmem:[%s2214_s26 + $0x888] sm:$0xff] }
  0x34   : > { %332 = vst [vmem:[%s2219_s27 + $0x220] sm:$0xff] %v331_v4  ;;  %v335_v6 = vld [vmem:[%s2214_s26 + $0x8c0] sm:$0xff]  ;;  %v337_v7 = vld [vmem:[%s2214_s26 + $0x8c8] sm:$0xff]  ;;  %334 = vst [vmem:[%s2219_s27 + $0x228] sm:$0xff] %v333_v5 }
  0x35   : > { %336 = vst [vmem:[%s2219_s27 + $0x230] sm:$0xff] %v335_v6  ;;  %338 = vst [vmem:[%s2219_s27 + $0x238] sm:$0xff] %v337_v7  ;;  %v339_v8 = vld [vmem:[%s2214_s26 + $0x900] sm:$0xff]  ;;  %v341_v9 = vld [vmem:[%s2214_s26 + $0x908] sm:$0xff] }
  0x36   : > { %v343_v10 = vld [vmem:[%s2214_s26 + $0x940] sm:$0xff]  ;;  %340 = vst [vmem:[%s2219_s27 + $0x240] sm:$0xff] %v339_v8  ;;  %342 = vst [vmem:[%s2219_s27 + $0x248] sm:$0xff] %v341_v9  ;;  %v345_v11 = vld [vmem:[%s2214_s26 + $0x948] sm:$0xff] }
  0x37   : > { %344 = vst [vmem:[%s2219_s27 + $0x250] sm:$0xff] %v343_v10  ;;  %v347_v12 = vld [vmem:[%s2214_s26 + $0x980] sm:$0xff]  ;;  %v349_v13 = vld [vmem:[%s2214_s26 + $0x988] sm:$0xff]  ;;  %346 = vst [vmem:[%s2219_s27 + $0x258] sm:$0xff] %v345_v11 }
  0x38   : > { %348 = vst [vmem:[%s2219_s27 + $0x260] sm:$0xff] %v347_v12  ;;  %350 = vst [vmem:[%s2219_s27 + $0x268] sm:$0xff] %v349_v13  ;;  %v351_v14 = vld [vmem:[%s2214_s26 + $0x9c0] sm:$0xff]  ;;  %v353_v15 = vld [vmem:[%s2214_s26 + $0x9c8] sm:$0xff] }
  0x39   : > { %v355_v16 = vld [vmem:[%s2214_s26 + $0xa00] sm:$0xff]  ;;  %352 = vst [vmem:[%s2219_s27 + $0x270] sm:$0xff] %v351_v14  ;;  %354 = vst [vmem:[%s2219_s27 + $0x278] sm:$0xff] %v353_v15  ;;  %v357_v17 = vld [vmem:[%s2214_s26 + $0xa08] sm:$0xff] }
  0x3a   : > { %356 = vst [vmem:[%s2219_s27 + $0x280] sm:$0xff] %v355_v16  ;;  %v359_v18 = vld [vmem:[%s2214_s26 + $0xa40] sm:$0xff]  ;;  %v361_v19 = vld [vmem:[%s2214_s26 + $0xa48] sm:$0xff]  ;;  %358 = vst [vmem:[%s2219_s27 + $0x288] sm:$0xff] %v357_v17 }
  0x3b   : > { %360 = vst [vmem:[%s2219_s27 + $0x290] sm:$0xff] %v359_v18  ;;  %362 = vst [vmem:[%s2219_s27 + $0x298] sm:$0xff] %v361_v19  ;;  %v363_v20 = vld [vmem:[%s2214_s26 + $0xa80] sm:$0xff]  ;;  %v365_v21 = vld [vmem:[%s2214_s26 + $0xa88] sm:$0xff] }
  0x3c   : > { %v367_v22 = vld [vmem:[%s2214_s26 + $0xac0] sm:$0xff]  ;;  %364 = vst [vmem:[%s2219_s27 + $0x2a0] sm:$0xff] %v363_v20  ;;  %366 = vst [vmem:[%s2219_s27 + $0x2a8] sm:$0xff] %v365_v21  ;;  %v369_v23 = vld [vmem:[%s2214_s26 + $0xac8] sm:$0xff] }
  0x3d   : > { %368 = vst [vmem:[%s2219_s27 + $0x2b0] sm:$0xff] %v367_v22  ;;  %v371_v24 = vld [vmem:[%s2214_s26 + $0xb00] sm:$0xff]  ;;  %v373_v25 = vld [vmem:[%s2214_s26 + $0xb08] sm:$0xff]  ;;  %370 = vst [vmem:[%s2219_s27 + $0x2b8] sm:$0xff] %v369_v23 }
  0x3e   : > { %372 = vst [vmem:[%s2219_s27 + $0x2c0] sm:$0xff] %v371_v24  ;;  %374 = vst [vmem:[%s2219_s27 + $0x2c8] sm:$0xff] %v373_v25  ;;  %v375_v26 = vld [vmem:[%s2214_s26 + $0xb40] sm:$0xff]  ;;  %v377_v27 = vld [vmem:[%s2214_s26 + $0xb48] sm:$0xff] }
  0x3f   : > { %v379_v28 = vld [vmem:[%s2214_s26 + $0xb80] sm:$0xff]  ;;  %376 = vst [vmem:[%s2219_s27 + $0x2d0] sm:$0xff] %v375_v26  ;;  %378 = vst [vmem:[%s2219_s27 + $0x2d8] sm:$0xff] %v377_v27  ;;  %v381_v29 = vld [vmem:[%s2214_s26 + $0xb88] sm:$0xff] }
  0x40   : > { %380 = vst [vmem:[%s2219_s27 + $0x2e0] sm:$0xff] %v379_v28  ;;  %v383_v30 = vld [vmem:[%s2214_s26 + $0xbc0] sm:$0xff]  ;;  %v385_v31 = vld [vmem:[%s2214_s26 + $0xbc8] sm:$0xff]  ;;  %382 = vst [vmem:[%s2219_s27 + $0x2e8] sm:$0xff] %v381_v29 }
  0x41   : > { %384 = vst [vmem:[%s2219_s27 + $0x2f0] sm:$0xff] %v383_v30  ;;  %386 = vst [vmem:[%s2219_s27 + $0x2f8] sm:$0xff] %v385_v31  ;;  %v387_v32 = vld [vmem:[%s2214_s26 + $0xc00] sm:$0xff]  ;;  %v389_v33 = vld [vmem:[%s2214_s26 + $0xc08] sm:$0xff] }
  0x42   : > { %v391_v34 = vld [vmem:[%s2214_s26 + $0xc40] sm:$0xff]  ;;  %388 = vst [vmem:[%s2219_s27 + $0x300] sm:$0xff] %v387_v32  ;;  %390 = vst [vmem:[%s2219_s27 + $0x308] sm:$0xff] %v389_v33  ;;  %v393_v35 = vld [vmem:[%s2214_s26 + $0xc48] sm:$0xff] }
  0x43   : > { %392 = vst [vmem:[%s2219_s27 + $0x310] sm:$0xff] %v391_v34  ;;  %v395_v36 = vld [vmem:[%s2214_s26 + $0xc80] sm:$0xff]  ;;  %v397_v37 = vld [vmem:[%s2214_s26 + $0xc88] sm:$0xff]  ;;  %394 = vst [vmem:[%s2219_s27 + $0x318] sm:$0xff] %v393_v35 }
  0x44   : > { %396 = vst [vmem:[%s2219_s27 + $0x320] sm:$0xff] %v395_v36  ;;  %398 = vst [vmem:[%s2219_s27 + $0x328] sm:$0xff] %v397_v37  ;;  %v399_v38 = vld [vmem:[%s2214_s26 + $0xcc0] sm:$0xff]  ;;  %v401_v39 = vld [vmem:[%s2214_s26 + $0xcc8] sm:$0xff] }
  0x45   : > { %v403_v40 = vld [vmem:[%s2214_s26 + $0xd00] sm:$0xff]  ;;  %400 = vst [vmem:[%s2219_s27 + $0x330] sm:$0xff] %v399_v38  ;;  %402 = vst [vmem:[%s2219_s27 + $0x338] sm:$0xff] %v401_v39  ;;  %v405_v41 = vld [vmem:[%s2214_s26 + $0xd08] sm:$0xff] }
  0x46   : > { %404 = vst [vmem:[%s2219_s27 + $0x340] sm:$0xff] %v403_v40  ;;  %v407_v42 = vld [vmem:[%s2214_s26 + $0xd40] sm:$0xff]  ;;  %v409_v43 = vld [vmem:[%s2214_s26 + $0xd48] sm:$0xff]  ;;  %406 = vst [vmem:[%s2219_s27 + $0x348] sm:$0xff] %v405_v41 }
  0x47   : > { %408 = vst [vmem:[%s2219_s27 + $0x350] sm:$0xff] %v407_v42  ;;  %410 = vst [vmem:[%s2219_s27 + $0x358] sm:$0xff] %v409_v43  ;;  %v411_v44 = vld [vmem:[%s2214_s26 + $0xd80] sm:$0xff]  ;;  %v413_v45 = vld [vmem:[%s2214_s26 + $0xd88] sm:$0xff] }
  0x48   : > { %v415_v46 = vld [vmem:[%s2214_s26 + $0xdc0] sm:$0xff]  ;;  %412 = vst [vmem:[%s2219_s27 + $0x360] sm:$0xff] %v411_v44  ;;  %414 = vst [vmem:[%s2219_s27 + $0x368] sm:$0xff] %v413_v45  ;;  %v417_v47 = vld [vmem:[%s2214_s26 + $0xdc8] sm:$0xff] }
  0x49   : > { %416 = vst [vmem:[%s2219_s27 + $0x370] sm:$0xff] %v415_v46  ;;  %v419_v48 = vld [vmem:[%s2214_s26 + $0xe00] sm:$0xff]  ;;  %v421_v49 = vld [vmem:[%s2214_s26 + $0xe08] sm:$0xff]  ;;  %418 = vst [vmem:[%s2219_s27 + $0x378] sm:$0xff] %v417_v47 }
  0x4a   : > { %420 = vst [vmem:[%s2219_s27 + $0x380] sm:$0xff] %v419_v48  ;;  %422 = vst [vmem:[%s2219_s27 + $0x388] sm:$0xff] %v421_v49  ;;  %v423_v50 = vld [vmem:[%s2214_s26 + $0xe40] sm:$0xff]  ;;  %v425_v51 = vld [vmem:[%s2214_s26 + $0xe48] sm:$0xff] }
  0x4b   : > { %v427_v52 = vld [vmem:[%s2214_s26 + $0xe80] sm:$0xff]  ;;  %424 = vst [vmem:[%s2219_s27 + $0x390] sm:$0xff] %v423_v50  ;;  %426 = vst [vmem:[%s2219_s27 + $0x398] sm:$0xff] %v425_v51  ;;  %v429_v53 = vld [vmem:[%s2214_s26 + $0xe88] sm:$0xff] }
  0x4c   : > { %428 = vst [vmem:[%s2219_s27 + $0x3a0] sm:$0xff] %v427_v52  ;;  %v431_v54 = vld [vmem:[%s2214_s26 + $0xec0] sm:$0xff]  ;;  %v433_v55 = vld [vmem:[%s2214_s26 + $0xec8] sm:$0xff]  ;;  %430 = vst [vmem:[%s2219_s27 + $0x3a8] sm:$0xff] %v429_v53 }
  0x4d   : > { %432 = vst [vmem:[%s2219_s27 + $0x3b0] sm:$0xff] %v431_v54  ;;  %434 = vst [vmem:[%s2219_s27 + $0x3b8] sm:$0xff] %v433_v55  ;;  %v435_v56 = vld [vmem:[%s2214_s26 + $0xf00] sm:$0xff]  ;;  %v437_v57 = vld [vmem:[%s2214_s26 + $0xf08] sm:$0xff] }
  0x4e   : > { %v439_v58 = vld [vmem:[%s2214_s26 + $0xf40] sm:$0xff]  ;;  %436 = vst [vmem:[%s2219_s27 + $0x3c0] sm:$0xff] %v435_v56  ;;  %438 = vst [vmem:[%s2219_s27 + $0x3c8] sm:$0xff] %v437_v57  ;;  %v441_v59 = vld [vmem:[%s2214_s26 + $0xf48] sm:$0xff] }
  0x4f   : > { %440 = vst [vmem:[%s2219_s27 + $0x3d0] sm:$0xff] %v439_v58  ;;  %v443_v60 = vld [vmem:[%s2214_s26 + $0xf80] sm:$0xff]  ;;  %v445_v61 = vld [vmem:[%s2214_s26 + $0xf88] sm:$0xff]  ;;  %442 = vst [vmem:[%s2219_s27 + $0x3d8] sm:$0xff] %v441_v59 }
  0x50   : > { %444 = vst [vmem:[%s2219_s27 + $0x3e0] sm:$0xff] %v443_v60  ;;  %446 = vst [vmem:[%s2219_s27 + $0x3e8] sm:$0xff] %v445_v61  ;;  %v447_v62 = vld [vmem:[%s2214_s26 + $0xfc0] sm:$0xff]  ;;  %v449_v63 = vld [vmem:[%s2214_s26 + $0xfc8] sm:$0xff] }
  0x51   : > { %448 = vst [vmem:[%s2219_s27 + $0x3f0] sm:$0xff] %v447_v62  ;;  %450 = vst [vmem:[%s2219_s27 + $0x3f8] sm:$0xff] %v449_v63 }
  0x52 PF: > { %p1723_p6 = scmp.ge.s32.totalorder %s2149_s16, 1  ;;  %p463_p7 = scmp.lt.s32.totalorder %s2149_s16, 5 }
  0x54   : > { %p464_p8 = pnand %p1723_p6, %p463_p7 }
  0x55   : > { %s470_s28 = sand.u32 (!%p464_p8), 1, %s2133_s12   ;;  %v2480_v0 = vld [vmem:[%s2671_s0] sm:$0xff] (!%p464_p8)  ;;  %v2485_v1 = vld [vmem:[%s2671_s0 + $0x8] sm:$0xff] (!%p464_p8)  ;;  %s1725_s8 = sshll.u32 (!%p464_p8), %s2141_s14, 2 }
  0x56   : > { %467 = sbr.rel (%p464_p8) target bundleno = 461 (0x1cd), region = 51  ;;  %s1724_s6 = sshll.u32 (!%p464_p8), %s470_s28, 10  ;;  %v2489_v2 = vcombine.high (!%p464_p8), %v2480_v0, %v2480_v0  ;;  %v2493_v3 = vcombine.high (!%p464_p8), %v2485_v1, %v2485_v1 }
  0x57   : > { %s2495_s7 = scalar_lea.vmem (!%p464_p8), [#allocation3], %s1724_s6  ;;  %p523_p9 = scmp.lt.s32.totalorder (!%p464_p8), %s1725_s8, 15 }
  0x58   : > { %v1907_v4 = vld [vmem:[%s2495_s7 + $0x4] ss:$16 sps:$4 sm:$0xff] (!%p464_p8)   ;;  %1365 = vmatprep.mubr.bf16.mxu0 (!%p464_p8), %v2489_v2  ;;  %1406 = vmatprep.mubr.bf16.mxu1 (!%p464_p8), %v2493_v3  ;;  %v1911_v6 = vld [vmem:[%s2495_s7] ss:$16 sps:$4 sm:$0xff] (!%p464_p8)  }
  0x59   : > { %v1909_v5 = vld [vmem:[%s2495_s7 + $0x204] ss:$16 sps:$4 sm:$0xff] (!%p464_p8)   ;;  %1333 = vmatprep.subr.bf16.mxu0 (!%p464_p8), %v1907_v4  ;;  %v1912_v7 = vld [vmem:[%s2495_s7 + $0x200] ss:$16 sps:$4 sm:$0xff] (!%p464_p8)  }
  0x5a   : > { %1374 = vmatprep.subr.bf16.mxu1 (!%p464_p8), %v1909_v5  ;;  %v1913_v8 = vld [vmem:[%s2495_s7 + $0x24] ss:$16 sps:$4 sm:$0xff] (!%p464_p8)   ;;  %1334 = vmatpush1.bf16.msra.mxu0 (!%p464_p8), %v1911_v6  ;;  %v1917_v10 = vld [vmem:[%s2495_s7 + $0x20] ss:$16 sps:$4 sm:$0xff] (!%p464_p8)  }
  0x5b   : > { %1375 = vmatpush1.bf16.msra.mxu1 (!%p464_p8), %v1912_v7  ;;  %v1915_v9 = vld [vmem:[%s2495_s7 + $0x224] ss:$16 sps:$4 sm:$0xff] (!%p464_p8)   ;;  %1335 = vmatprep.subr.bf16.mxu0 (!%p464_p8), %v1913_v8  ;;  %v1918_v11 = vld [vmem:[%s2495_s7 + $0x220] ss:$16 sps:$4 sm:$0xff] (!%p464_p8)   ;;  %v2009_v8 = vld [vmem:[%s2495_s7 + $0xc] ss:$16 sps:$4 sm:$0xff] (!%p464_p8)  }
  0x5c   : > { %1376 = vmatprep.subr.bf16.mxu1 (!%p464_p8), %v1915_v9  ;;  %v1919_v12 = vld [vmem:[%s2495_s7 + $0x44] ss:$16 sps:$4 sm:$0xff] (!%p464_p8)   ;;  %v1923_v14 = vld [vmem:[%s2495_s7 + $0x40] ss:$16 sps:$4 sm:$0xff] (!%p464_p8)   ;;  %v2012_v9 = vld [vmem:[%s2495_s7 + $0x20c] ss:$16 sps:$4 sm:$0xff] (!%p464_p8)  }
  0x5d   : > { %v1921_v13 = vld [vmem:[%s2495_s7 + $0x244] ss:$16 sps:$4 sm:$0xff]   ;;  %v1924_v15 = vld [vmem:[%s2495_s7 + $0x240] ss:$16 sps:$4 sm:$0xff]   ;;  %s2682_s8 = smov (!%p523_p9, %s1725_s8), 15 }
  0x5e   : > { %1336 = vmatpush1.bf16.msra.mxu0 %v1917_v10  ;;  %v1925_v16 = vld [vmem:[%s2495_s7 + $0x64] ss:$16 sps:$4 sm:$0xff]   ;;  %v1929_v18 = vld [vmem:[%s2495_s7 + $0x60] ss:$16 sps:$4 sm:$0xff]   ;;  %v2567_v10 = vcombine.low %v2480_v0, %v2480_v0  ;;  %v2013_v0 = vld [vmem:[%s2495_s7 + $0x28] ss:$16 sps:$4 sm:$0xff]   ;;  %s525_s11 = scalar_lea.vmem %s2673_s2, %s2682_s8 }
  0x5f   : > { %1377 = vmatpush1.bf16.msra.mxu1 %v1918_v11  ;;  %1337 = vmatprep.subr.bf16.mxu0 %v1919_v12  ;;  %v1927_v17 = vld [vmem:[%s2495_s7 + $0x264] ss:$16 sps:$4 sm:$0xff]   ;;  %v1930_v19 = vld [vmem:[%s2495_s7 + $0x260] ss:$16 sps:$4 sm:$0xff]   ;;  %v2571_v11 = vcombine.low %v2485_v1, %v2485_v1  ;;  %v2007_v12 = vld [vmem:[%s2495_s7 + $0x8] ss:$16 sps:$4 sm:$0xff]  }
  0x60   : > { %1378 = vmatprep.subr.bf16.mxu1 %v1921_v13  ;;  %v1931_v20 = vld [vmem:[%s2495_s7 + $0x84] ss:$16 sps:$4 sm:$0xff]   ;;  %v1935_v22 = vld [vmem:[%s2495_s7 + $0x80] ss:$16 sps:$4 sm:$0xff]   ;;  %v2010_v13 = vld [vmem:[%s2495_s7 + $0x208] ss:$16 sps:$4 sm:$0xff]  }
  0x61   : > { %v1933_v21 = vld [vmem:[%s2495_s7 + $0x284] ss:$16 sps:$4 sm:$0xff]   ;;  %v1936_v23 = vld [vmem:[%s2495_s7 + $0x280] ss:$16 sps:$4 sm:$0xff]   ;;  %v2021_v1 = vld [vmem:[%s2495_s7 + $0x4c] ss:$16 sps:$4 sm:$0xff]  }
  0x62   : > { %1338 = vmatpush1.bf16.msra.mxu0 %v1923_v14  ;;  %v1937_v24 = vld [vmem:[%s2495_s7 + $0xa4] ss:$16 sps:$4 sm:$0xff]   ;;  %v1941_v26 = vld [vmem:[%s2495_s7 + $0xa0] ss:$16 sps:$4 sm:$0xff]   ;;  %v2015_v14 = vld [vmem:[%s2495_s7 + $0x2c] ss:$16 sps:$4 sm:$0xff]  }
  0x63   : > { %1379 = vmatpush1.bf16.msra.mxu1 %v1924_v15  ;;  %1339 = vmatprep.subr.bf16.mxu0 %v1925_v16  ;;  %v1939_v25 = vld [vmem:[%s2495_s7 + $0x2a4] ss:$16 sps:$4 sm:$0xff]   ;;  %v1942_v27 = vld [vmem:[%s2495_s7 + $0x2a0] ss:$16 sps:$4 sm:$0xff]   ;;  %v2018_v15 = vld [vmem:[%s2495_s7 + $0x22c] ss:$16 sps:$4 sm:$0xff]  }
  0x64   : > { %1380 = vmatprep.subr.bf16.mxu1 %v1927_v17  ;;  %v1943_v28 = vld [vmem:[%s2495_s7 + $0xc4] ss:$16 sps:$4 sm:$0xff]   ;;  %v1947_v30 = vld [vmem:[%s2495_s7 + $0xc0] ss:$16 sps:$4 sm:$0xff]   ;;  %v2016_v16 = vld [vmem:[%s2495_s7 + $0x228] ss:$16 sps:$4 sm:$0xff]  }
  0x65   : > { %v1945_v29 = vld [vmem:[%s2495_s7 + $0x2c4] ss:$16 sps:$4 sm:$0xff]   ;;  %v1948_v31 = vld [vmem:[%s2495_s7 + $0x2c0] ss:$16 sps:$4 sm:$0xff]   ;;  %v2024_v17 = vld [vmem:[%s2495_s7 + $0x24c] ss:$16 sps:$4 sm:$0xff]  }
  0x66   : > { %1340 = vmatpush1.bf16.msra.mxu0 %v1929_v18  ;;  %v1949_v32 = vld [vmem:[%s2495_s7 + $0xe4] ss:$16 sps:$4 sm:$0xff]   ;;  %v1953_v34 = vld [vmem:[%s2495_s7 + $0xe0] ss:$16 sps:$4 sm:$0xff]   ;;  %v2019_v18 = vld [vmem:[%s2495_s7 + $0x48] ss:$16 sps:$4 sm:$0xff]  }
  0x67   : > { %1381 = vmatpush1.bf16.msra.mxu1 %v1930_v19  ;;  %1341 = vmatprep.subr.bf16.mxu0 %v1931_v20  ;;  %v1951_v33 = vld [vmem:[%s2495_s7 + $0x2e4] ss:$16 sps:$4 sm:$0xff]   ;;  %v1954_v35 = vld [vmem:[%s2495_s7 + $0x2e0] ss:$16 sps:$4 sm:$0xff]   ;;  %v2022_v19 = vld [vmem:[%s2495_s7 + $0x248] ss:$16 sps:$4 sm:$0xff]  }
  0x68   : > { %1382 = vmatprep.subr.bf16.mxu1 %v1933_v21  ;;  %v1955_v36 = vld [vmem:[%s2495_s7 + $0x104] ss:$16 sps:$4 sm:$0xff]   ;;  %v1959_v38 = vld [vmem:[%s2495_s7 + $0x100] ss:$16 sps:$4 sm:$0xff]   ;;  %v2027_v20 = vld [vmem:[%s2495_s7 + $0x6c] ss:$16 sps:$4 sm:$0xff]  }
  0x69   : > { %v1957_v37 = vld [vmem:[%s2495_s7 + $0x304] ss:$16 sps:$4 sm:$0xff]   ;;  %v1960_v39 = vld [vmem:[%s2495_s7 + $0x300] ss:$16 sps:$4 sm:$0xff]   ;;  %v2030_v21 = vld [vmem:[%s2495_s7 + $0x26c] ss:$16 sps:$4 sm:$0xff]  }
  0x6a   : > { %1342 = vmatpush1.bf16.msra.mxu0 %v1935_v22  ;;  %v1961_v40 = vld [vmem:[%s2495_s7 + $0x124] ss:$16 sps:$4 sm:$0xff]   ;;  %v1965_v42 = vld [vmem:[%s2495_s7 + $0x120] ss:$16 sps:$4 sm:$0xff]   ;;  %v2025_v22 = vld [vmem:[%s2495_s7 + $0x68] ss:$16 sps:$4 sm:$0xff]  }
  0x6b   : > { %1383 = vmatpush1.bf16.msra.mxu1 %v1936_v23  ;;  %1343 = vmatprep.subr.bf16.mxu0 %v1937_v24  ;;  %v1963_v41 = vld [vmem:[%s2495_s7 + $0x324] ss:$16 sps:$4 sm:$0xff]   ;;  %v1966_v43 = vld [vmem:[%s2495_s7 + $0x320] ss:$16 sps:$4 sm:$0xff]   ;;  %v2028_v23 = vld [vmem:[%s2495_s7 + $0x268] ss:$16 sps:$4 sm:$0xff]  }
  0x6c   : > { %1384 = vmatprep.subr.bf16.mxu1 %v1939_v25  ;;  %v1967_v44 = vld [vmem:[%s2495_s7 + $0x144] ss:$16 sps:$4 sm:$0xff]   ;;  %v1971_v46 = vld [vmem:[%s2495_s7 + $0x140] ss:$16 sps:$4 sm:$0xff]   ;;  %v2031_v24 = vld [vmem:[%s2495_s7 + $0x88] ss:$16 sps:$4 sm:$0xff]  }
  0x6d   : > { %v1969_v45 = vld [vmem:[%s2495_s7 + $0x344] ss:$16 sps:$4 sm:$0xff]   ;;  %v1972_v47 = vld [vmem:[%s2495_s7 + $0x340] ss:$16 sps:$4 sm:$0xff]   ;;  %v2034_v25 = vld [vmem:[%s2495_s7 + $0x288] ss:$16 sps:$4 sm:$0xff]  }
  0x6e   : > { %1344 = vmatpush1.bf16.msra.mxu0 %v1941_v26  ;;  %v1973_v48 = vld [vmem:[%s2495_s7 + $0x164] ss:$16 sps:$4 sm:$0xff]   ;;  %v1977_v50 = vld [vmem:[%s2495_s7 + $0x160] ss:$16 sps:$4 sm:$0xff]   ;;  %v2039_v26 = vld [vmem:[%s2495_s7 + $0xac] ss:$16 sps:$4 sm:$0xff]  }
  0x6f   : > { %1385 = vmatpush1.bf16.msra.mxu1 %v1942_v27  ;;  %1345 = vmatprep.subr.bf16.mxu0 %v1943_v28  ;;  %v1975_v49 = vld [vmem:[%s2495_s7 + $0x364] ss:$16 sps:$4 sm:$0xff]   ;;  %v1978_v51 = vld [vmem:[%s2495_s7 + $0x360] ss:$16 sps:$4 sm:$0xff]   ;;  %v2042_v27 = vld [vmem:[%s2495_s7 + $0x2ac] ss:$16 sps:$4 sm:$0xff]  }
  0x70   : > { %1386 = vmatprep.subr.bf16.mxu1 %v1945_v29  ;;  %v1979_v52 = vld [vmem:[%s2495_s7 + $0x184] ss:$16 sps:$4 sm:$0xff]   ;;  %v1983_v54 = vld [vmem:[%s2495_s7 + $0x180] ss:$16 sps:$4 sm:$0xff]   ;;  %v2037_v28 = vld [vmem:[%s2495_s7 + $0xa8] ss:$16 sps:$4 sm:$0xff]  }
  0x71   : > { %v1981_v53 = vld [vmem:[%s2495_s7 + $0x384] ss:$16 sps:$4 sm:$0xff]   ;;  %v1984_v55 = vld [vmem:[%s2495_s7 + $0x380] ss:$16 sps:$4 sm:$0xff]   ;;  %v2040_v29 = vld [vmem:[%s2495_s7 + $0x2a8] ss:$16 sps:$4 sm:$0xff]  }
  0x72   : > { %1346 = vmatpush1.bf16.msra.mxu0 %v1947_v30  ;;  %v1985_v56 = vld [vmem:[%s2495_s7 + $0x1a4] ss:$16 sps:$4 sm:$0xff]   ;;  %v1989_v58 = vld [vmem:[%s2495_s7 + $0x1a0] ss:$16 sps:$4 sm:$0xff]   ;;  %v2045_v30 = vld [vmem:[%s2495_s7 + $0xcc] ss:$16 sps:$4 sm:$0xff]  }
  0x73   : > { %1387 = vmatpush1.bf16.msra.mxu1 %v1948_v31  ;;  %1347 = vmatprep.subr.bf16.mxu0 %v1949_v32  ;;  %v1987_v57 = vld [vmem:[%s2495_s7 + $0x3a4] ss:$16 sps:$4 sm:$0xff]   ;;  %v1990_v59 = vld [vmem:[%s2495_s7 + $0x3a0] ss:$16 sps:$4 sm:$0xff]   ;;  %v2048_v31 = vld [vmem:[%s2495_s7 + $0x2cc] ss:$16 sps:$4 sm:$0xff]  }
  0x74   : > { %1388 = vmatprep.subr.bf16.mxu1 %v1951_v33  ;;  %v1991_v60 = vld [vmem:[%s2495_s7 + $0x1c4] ss:$16 sps:$4 sm:$0xff]   ;;  %v1995_v62 = vld [vmem:[%s2495_s7 + $0x1c0] ss:$16 sps:$4 sm:$0xff]   ;;  %v2043_v32 = vld [vmem:[%s2495_s7 + $0xc8] ss:$16 sps:$4 sm:$0xff]  }
  0x75   : > { %v1993_v61 = vld [vmem:[%s2495_s7 + $0x3c4] ss:$16 sps:$4 sm:$0xff]   ;;  %v1996_v63 = vld [vmem:[%s2495_s7 + $0x3c0] ss:$16 sps:$4 sm:$0xff]   ;;  %v2046_v33 = vld [vmem:[%s2495_s7 + $0x2c8] ss:$16 sps:$4 sm:$0xff]  }
  0x76   : > { %1348 = vmatpush1.bf16.msra.mxu0 %v1953_v34  ;;  %v1997_v4 = vld [vmem:[%s2495_s7 + $0x1e4] ss:$16 sps:$4 sm:$0xff]   ;;  %v2001_v6 = vld [vmem:[%s2495_s7 + $0x1e0] ss:$16 sps:$4 sm:$0xff]   ;;  %v2051_v34 = vld [vmem:[%s2495_s7 + $0xec] ss:$16 sps:$4 sm:$0xff]  }
  0x77   : > { %1389 = vmatpush1.bf16.msra.mxu1 %v1954_v35  ;;  %1349 = vmatprep.subr.bf16.mxu0 %v1955_v36  ;;  %v1999_v5 = vld [vmem:[%s2495_s7 + $0x3e4] ss:$16 sps:$4 sm:$0xff]   ;;  %v2002_v7 = vld [vmem:[%s2495_s7 + $0x3e0] ss:$16 sps:$4 sm:$0xff]   ;;  %v2054_v35 = vld [vmem:[%s2495_s7 + $0x2ec] ss:$16 sps:$4 sm:$0xff]  }
  0x78   : > { %1390 = vmatprep.subr.bf16.mxu1 %v1957_v37  ;;  %v2049_v36 = vld [vmem:[%s2495_s7 + $0xe8] ss:$16 sps:$4 sm:$0xff]   ;;  %s1727_s12 = sshll.u32 %s2682_s8, 2 }
  0x79   : > { %v2052_v37 = vld [vmem:[%s2495_s7 + $0x2e8] ss:$16 sps:$4 sm:$0xff]   ;;  %s2652_s19 = scalar_lea.vmem %s2674_s3, %s1727_s12 }
  0x7a   : > { %1350 = vmatpush1.bf16.msra.mxu0 %v1959_v38  ;;  %v2057_v38 = vld [vmem:[%s2495_s7 + $0x10c] ss:$16 sps:$4 sm:$0xff]  }
  0x7b   : > { %1391 = vmatpush1.bf16.msra.mxu1 %v1960_v39  ;;  %1351 = vmatprep.subr.bf16.mxu0 %v1961_v40  ;;  %v2060_v39 = vld [vmem:[%s2495_s7 + $0x30c] ss:$16 sps:$4 sm:$0xff]   ;;  %v2055_v40 = vld [vmem:[%s2495_s7 + $0x108] ss:$16 sps:$4 sm:$0xff]  }
  0x7c   : > { %1392 = vmatprep.subr.bf16.mxu1 %v1963_v41  ;;  %v2058_v41 = vld [vmem:[%s2495_s7 + $0x308] ss:$16 sps:$4 sm:$0xff]  }
  0x7e   : > { %1352 = vmatpush1.bf16.msra.mxu0 %v1965_v42  ;;  %v2063_v42 = vld [vmem:[%s2495_s7 + $0x12c] ss:$16 sps:$4 sm:$0xff]  }
  0x7f   : > { %1393 = vmatpush1.bf16.msra.mxu1 %v1966_v43  ;;  %1353 = vmatprep.subr.bf16.mxu0 %v1967_v44  ;;  %v2066_v43 = vld [vmem:[%s2495_s7 + $0x32c] ss:$16 sps:$4 sm:$0xff]   ;;  %v2061_v44 = vld [vmem:[%s2495_s7 + $0x128] ss:$16 sps:$4 sm:$0xff]  }
  0x80   : > { %1394 = vmatprep.subr.bf16.mxu1 %v1969_v45  ;;  %v2064_v45 = vld [vmem:[%s2495_s7 + $0x328] ss:$16 sps:$4 sm:$0xff]  }
  0x82   : > { %1354 = vmatpush1.bf16.msra.mxu0 %v1971_v46  ;;  %v2069_v46 = vld [vmem:[%s2495_s7 + $0x14c] ss:$16 sps:$4 sm:$0xff]  }
  0x83   : > { %1395 = vmatpush1.bf16.msra.mxu1 %v1972_v47  ;;  %1355 = vmatprep.subr.bf16.mxu0 %v1973_v48  ;;  %v2072_v47 = vld [vmem:[%s2495_s7 + $0x34c] ss:$16 sps:$4 sm:$0xff]   ;;  %v2067_v48 = vld [vmem:[%s2495_s7 + $0x148] ss:$16 sps:$4 sm:$0xff]  }
  0x84   : > { %1396 = vmatprep.subr.bf16.mxu1 %v1975_v49  ;;  %v2070_v49 = vld [vmem:[%s2495_s7 + $0x348] ss:$16 sps:$4 sm:$0xff]  }
  0x86   : > { %1356 = vmatpush1.bf16.msra.mxu0 %v1977_v50  ;;  %v2075_v50 = vld [vmem:[%s2495_s7 + $0x16c] ss:$16 sps:$4 sm:$0xff]  }
  0x87   : > { %1397 = vmatpush1.bf16.msra.mxu1 %v1978_v51  ;;  %1357 = vmatprep.subr.bf16.mxu0 %v1979_v52  ;;  %v2078_v51 = vld [vmem:[%s2495_s7 + $0x36c] ss:$16 sps:$4 sm:$0xff]   ;;  %v2073_v52 = vld [vmem:[%s2495_s7 + $0x168] ss:$16 sps:$4 sm:$0xff]  }
  0x88   : > { %1398 = vmatprep.subr.bf16.mxu1 %v1981_v53  ;;  %v2076_v53 = vld [vmem:[%s2495_s7 + $0x368] ss:$16 sps:$4 sm:$0xff]  }
  0x8a   : > { %1358 = vmatpush1.bf16.msra.mxu0 %v1983_v54  ;;  %v2081_v54 = vld [vmem:[%s2495_s7 + $0x18c] ss:$16 sps:$4 sm:$0xff]  }
  0x8b   : > { %1399 = vmatpush1.bf16.msra.mxu1 %v1984_v55  ;;  %1359 = vmatprep.subr.bf16.mxu0 %v1985_v56  ;;  %v2084_v55 = vld [vmem:[%s2495_s7 + $0x38c] ss:$16 sps:$4 sm:$0xff]   ;;  %v2079_v56 = vld [vmem:[%s2495_s7 + $0x188] ss:$16 sps:$4 sm:$0xff]  }
  0x8c   : > { %1400 = vmatprep.subr.bf16.mxu1 %v1987_v57  ;;  %v2082_v57 = vld [vmem:[%s2495_s7 + $0x388] ss:$16 sps:$4 sm:$0xff]  }
  0x8e   : > { %1360 = vmatpush1.bf16.msra.mxu0 %v1989_v58  ;;  %v2087_v58 = vld [vmem:[%s2495_s7 + $0x1ac] ss:$16 sps:$4 sm:$0xff]  }
  0x8f   : > { %1401 = vmatpush1.bf16.msra.mxu1 %v1990_v59  ;;  %1361 = vmatprep.subr.bf16.mxu0 %v1991_v60  ;;  %v2090_v59 = vld [vmem:[%s2495_s7 + $0x3ac] ss:$16 sps:$4 sm:$0xff]   ;;  %v2085_v60 = vld [vmem:[%s2495_s7 + $0x1a8] ss:$16 sps:$4 sm:$0xff]  }
  0x90   : > { %1402 = vmatprep.subr.bf16.mxu1 %v1993_v61  ;;  %v2088_v61 = vld [vmem:[%s2495_s7 + $0x3a8] ss:$16 sps:$4 sm:$0xff]  }
  0x92   : > { %1362 = vmatpush1.bf16.msra.mxu0 %v1995_v62  ;;  %v2093_v62 = vld [vmem:[%s2495_s7 + $0x1cc] ss:$16 sps:$4 sm:$0xff]  }
  0x93   : > { %1403 = vmatpush1.bf16.msra.mxu1 %v1996_v63  ;;  %1363 = vmatprep.subr.bf16.mxu0 %v1997_v4  ;;  %v2096_v63 = vld [vmem:[%s2495_s7 + $0x3cc] ss:$16 sps:$4 sm:$0xff]   ;;  %v2091_v4 = vld [vmem:[%s2495_s7 + $0x1c8] ss:$16 sps:$4 sm:$0xff]  }
  0x94   : > { %1404 = vmatprep.subr.bf16.mxu1 %v1999_v5  ;;  %v2094_v5 = vld [vmem:[%s2495_s7 + $0x3c8] ss:$16 sps:$4 sm:$0xff]  }
  0x96   : > { %1364 = vmatpush1.bf16.msra.mxu0 %v2001_v6  ;;  %v2099_v6 = vld [vmem:[%s2495_s7 + $0x1ec] ss:$16 sps:$4 sm:$0xff]  }
  0x97   : > { %1405 = vmatpush1.bf16.msra.mxu1 %v2002_v7  ;;  %1415 = vmatprep.subr.bf16.mxu0 %v2009_v8  ;;  %v2102_v7 = vld [vmem:[%s2495_s7 + $0x3ec] ss:$16 sps:$4 sm:$0xff]   ;;  %v2097_v8 = vld [vmem:[%s2495_s7 + $0x1e8] ss:$16 sps:$4 sm:$0xff]  }
  0x98   : > { %1456 = vmatprep.subr.bf16.mxu1 %v2012_v9  ;;  %v2100_v9 = vld [vmem:[%s2495_s7 + $0x3e8] ss:$16 sps:$4 sm:$0xff]  }
  0x99   : > { %1366 = vmatmul.mubr.bf16.vlgmr.msra.gmra.mrb[0].mxu0 %v2567_v10 }
  0x9a   : > { %1407 = vmatmul.mubr.bf16.vlgmr.msra.gmra.mrb[0].mxu1 %v2571_v11  ;;  %1416 = vmatpush1.bf16.msra.mxu0 %v2007_v12  ;;  %v1514_v12 = vlaneseq }
  0x9b   : > { %1457 = vmatpush1.bf16.msra.mxu1 %v2010_v13  ;;  %1417 = vmatprep.subr.bf16.mxu0 %v2015_v14 }
  0x9c   : > { %1458 = vmatprep.subr.bf16.mxu1 %v2018_v15  ;;  %1447 = vmatprep.mubr.bf16.mxu0 %v2489_v2  ;;  %v2033_v2 = vld [vmem:[%s2495_s7 + $0x8c] ss:$16 sps:$4 sm:$0xff]   ;;  %v1515_v13 = vshrl.u32 %v1514_v12, 7  ;;  %v1512_v15 = vld [vmem:[%s525_s11] sm:$0xf] }
  0x9d   : > { %1488 = vmatprep.mubr.bf16.mxu1 %v2493_v3  ;;  %v2036_v3 = vld [vmem:[%s2495_s7 + $0x28c] ss:$16 sps:$4 sm:$0xff]  }
  0x9e   : > { %1418 = vmatpush1.bf16.msra.mxu0 %v2013_v0  ;;  %v1524_v14 = vsub.s32 2, %v1515_v13  ;;  %v1528_v0 = vsub.s32 3, %v1515_v13 }
  0x9f   : > { %1459 = vmatpush1.bf16.msra.mxu1 %v2016_v16  ;;  %1419 = vmatprep.subr.bf16.mxu0 %v2021_v1 }
  0xa0   : > { %1460 = vmatprep.subr.bf16.mxu1 %v2024_v17  ;;  %v1525_v16 = vrot.slane %v1512_v15, %v1524_v14  ;;  %v1529_v1 = vrot.slane %v1512_v15, %v1528_v0  ;;  %v1516_v17 = vsub.s32 0, %v1515_v13 }
  0xa2   : > { %1420 = vmatpush1.bf16.msra.mxu0 %v2019_v18  ;;  %v1517_v18 = vrot.slane %v1512_v15, %v1516_v17 }
  0xa3   : > { %1461 = vmatpush1.bf16.msra.mxu1 %v2022_v19  ;;  %1421 = vmatprep.subr.bf16.mxu0 %v2027_v20 }
  0xa4   : > { %1462 = vmatprep.subr.bf16.mxu1 %v2030_v21 }
  0xa6   : > { %1422 = vmatpush1.bf16.msra.mxu0 %v2025_v22 }
  0xa7   : > { %1463 = vmatpush1.bf16.msra.mxu1 %v2028_v23  ;;  %1423 = vmatprep.subr.bf16.mxu0 %v2033_v2 }
  0xa8   : > { %1464 = vmatprep.subr.bf16.mxu1 %v2036_v3 }
  0xaa   : > { %1424 = vmatpush1.bf16.msra.mxu0 %v2031_v24 }
  0xab   : > { %1465 = vmatpush1.bf16.msra.mxu1 %v2034_v25  ;;  %1425 = vmatprep.subr.bf16.mxu0 %v2039_v26 }
  0xac   : > { %1466 = vmatprep.subr.bf16.mxu1 %v2042_v27 }
  0xae   : > { %1426 = vmatpush1.bf16.msra.mxu0 %v2037_v28 }
  0xaf   : > { %1467 = vmatpush1.bf16.msra.mxu1 %v2040_v29  ;;  %1427 = vmatprep.subr.bf16.mxu0 %v2045_v30 }
  0xb0   : > { %1468 = vmatprep.subr.bf16.mxu1 %v2048_v31 }
  0xb2   : > { %1428 = vmatpush1.bf16.msra.mxu0 %v2043_v32 }
  0xb3   : > { %1469 = vmatpush1.bf16.msra.mxu1 %v2046_v33  ;;  %1429 = vmatprep.subr.bf16.mxu0 %v2051_v34 }
  0xb4   : > { %1470 = vmatprep.subr.bf16.mxu1 %v2054_v35 }
  0xb6   : > { %1430 = vmatpush1.bf16.msra.mxu0 %v2049_v36 }
  0xb7   : > { %1471 = vmatpush1.bf16.msra.mxu1 %v2052_v37  ;;  %1431 = vmatprep.subr.bf16.mxu0 %v2057_v38 }
  0xb8   : > { %1472 = vmatprep.subr.bf16.mxu1 %v2060_v39 }
  0xba   : > { %1432 = vmatpush1.bf16.msra.mxu0 %v2055_v40 }
  0xbb   : > { %1473 = vmatpush1.bf16.msra.mxu1 %v2058_v41  ;;  %1433 = vmatprep.subr.bf16.mxu0 %v2063_v42 }
  0xbc   : > { %1474 = vmatprep.subr.bf16.mxu1 %v2066_v43 }
  0xbe   : > { %1434 = vmatpush1.bf16.msra.mxu0 %v2061_v44 }
  0xbf   : > { %1475 = vmatpush1.bf16.msra.mxu1 %v2064_v45  ;;  %1435 = vmatprep.subr.bf16.mxu0 %v2069_v46 }
  0xc0   : > { %1476 = vmatprep.subr.bf16.mxu1 %v2072_v47 }
  0xc2   : > { %1436 = vmatpush1.bf16.msra.mxu0 %v2067_v48 }
  0xc3   : > { %1477 = vmatpush1.bf16.msra.mxu1 %v2070_v49  ;;  %1437 = vmatprep.subr.bf16.mxu0 %v2075_v50 }
  0xc4   : > { %1478 = vmatprep.subr.bf16.mxu1 %v2078_v51 }
  0xc6   : > { %1438 = vmatpush1.bf16.msra.mxu0 %v2073_v52 }
  0xc7   : > { %1479 = vmatpush1.bf16.msra.mxu1 %v2076_v53  ;;  %1439 = vmatprep.subr.bf16.mxu0 %v2081_v54 }
  0xc8   : > { %1480 = vmatprep.subr.bf16.mxu1 %v2084_v55 }
  0xca   : > { %1440 = vmatpush1.bf16.msra.mxu0 %v2079_v56 }
  0xcb   : > { %1481 = vmatpush1.bf16.msra.mxu1 %v2082_v57  ;;  %1441 = vmatprep.subr.bf16.mxu0 %v2087_v58 }
  0xcc   : > { %1482 = vmatprep.subr.bf16.mxu1 %v2090_v59 }
  0xce   : > { %1442 = vmatpush1.bf16.msra.mxu0 %v2085_v60 }
  0xcf   : > { %1483 = vmatpush1.bf16.msra.mxu1 %v2088_v61  ;;  %1443 = vmatprep.subr.bf16.mxu0 %v2093_v62 }
  0xd0   : > { %1484 = vmatprep.subr.bf16.mxu1 %v2096_v63 }
  0xd2   : > { %1444 = vmatpush1.bf16.msra.mxu0 %v2091_v4 }
  0xd3   : > { %1485 = vmatpush1.bf16.msra.mxu1 %v2094_v5  ;;  %1445 = vmatprep.subr.bf16.mxu0 %v2099_v6 }
  0xd4   : > { %1486 = vmatprep.subr.bf16.mxu1 %v2102_v7 }
  0xd6   : > { %1446 = vmatpush1.bf16.msra.mxu0 %v2097_v8 }
  0xd7   : > { %1487 = vmatpush1.bf16.msra.mxu1 %v2100_v9 }
  0xd9   : > { %1448 = vmatmul.mubr.bf16.vlgmr.msra.gmra.mrb[4].mxu0 %v2567_v10  ;;  %v1520_v10 = vsub.s32 1, %v1515_v13 }
  0xda   : > { %1489 = vmatmul.mubr.bf16.vlgmr.msra.gmra.mrb[4].mxu1 %v2571_v11 }
  0xdb   : > { %v1521_v20 = vrot.slane %v1512_v15, %v1520_v10 }
 0x16c   : > { %v1367_v11 = vpop.f32.mrb[0].mxu0 }
 0x16d   : > { %v1408_v19 = vpop.f32.mrb[0].mxu1  ;;  %v1369_v22 = vpop.f32.mrb[1].mxu0 }
 0x16e   : > { %v1409_v21 = vadd.f32 %v1408_v19, %v1367_v11  ;;  %v1410_v23 = vpop.f32.mrb[1].mxu1  ;;  %v1371_v3 = vpop.f32.mrb[2].mxu0 }
 0x16f   : > { %v1411_v2 = vadd.f32 %v1410_v23, %v1369_v22  ;;  %v1412_v24 = vpop.f32.mrb[2].mxu1  ;;  %v1372_v26 = vpop.f32.mrb[3].mxu0 }
 0x170   : > { %v1534_v25 = vadd.f32 %v1517_v18, %v1409_v21  ;;  %v1413_v27 = vpop.f32.mrb[3].mxu1 }
 0x171   : > { %v1535_v28 = vadd.f32 %v1521_v20, %v1411_v2 }
 0x172   : > { %v1546_v29 = vmul.f32 0.044715, %v1534_v25  ;;  %v1542_v33 = vmul.f32 0.7978846, %v1534_v25  ;;  %v1538_v41 = vmul.f32 0.5, %v1534_v25 }
 0x173   : > { %v1547_v30 = vmul.f32 0.044715, %v1535_v28  ;;  %v1543_v35 = vmul.f32 0.7978846, %v1535_v28  ;;  %v1539_v43 = vmul.f32 0.5, %v1535_v28 }
 0x174   : > { %v1550_v31 = vmul.f32 %v1546_v29, %v1534_v25 }
 0x175   : > { %v1551_v32 = vmul.f32 %v1547_v30, %v1535_v28 }
 0x176   : > { %v1554_v34 = vadd.f32 1.0, %v1550_v31 }
 0x177   : > { %v1555_v36 = vadd.f32 1.0, %v1551_v32 }
 0x178   : > { %v1558_v37 = vmul.f32 %v1554_v34, %v1542_v33 }
 0x179   : > { %v1559_v38 = vmul.f32 %v1555_v36, %v1543_v35 }
 0x17a   : > { %2103 = vtanh.f32 %v1558_v37 }
 0x17b   : > { %2105 = vtanh.f32 %v1559_v38 }
 0x184   : > { %v2104_v39 = vpop.eup %2103 }
 0x185   : > { %v2106_v40 = vpop.eup %2105  ;;  %v1566_v42 = vadd.f32 1.0, %v2104_v39 }
 0x186   : > { %v1567_v44 = vadd.f32 1.0, %v2106_v40 }
 0x187   : > { %v1570_v45 = vmul.f32 %v1566_v42, %v1538_v41 }
 0x188   : > { %v1571_v46 = vmul.f32 %v1567_v44, %v1539_v43 }
 0x18a   : > { %v1865_v47 = vpack.c.bf16 %v1571_v46, %v1570_v45 }
 0x18c   : > { %1590 = vst [vmem:[%s2652_s19] sm:$0xff] %v1865_v47 }
 0x1ac   : > { %v1449_v48 = vpop.f32.mrb[4].mxu0 }
 0x1ad   : > { %v1490_v49 = vpop.f32.mrb[4].mxu1  ;;  %v1451_v51 = vpop.f32.mrb[5].mxu0 }
 0x1ae   : > { %v1491_v50 = vadd.f32 %v1490_v49, %v1449_v48  ;;  %v1492_v52 = vpop.f32.mrb[5].mxu1  ;;  %v1453_v54 = vpop.f32.mrb[6].mxu0 }
 0x1af   : > { %v1493_v53 = vadd.f32 %v1492_v52, %v1451_v51  ;;  %v1494_v55 = vpop.f32.mrb[6].mxu1  ;;  %v1454_v57 = vpop.f32.mrb[7].mxu0 }
 0x1b0   : > { %v1536_v56 = vadd.f32 %v1525_v16, %v1491_v50  ;;  %v1495_v58 = vpop.f32.mrb[7].mxu1 }
 0x1b1   : > { %v1537_v59 = vadd.f32 %v1529_v1, %v1493_v53 }
 0x1b2   : > { %v1548_v60 = vmul.f32 0.044715, %v1536_v56  ;;  %v1544_v4 = vmul.f32 0.7978846, %v1536_v56  ;;  %v1540_v14 = vmul.f32 0.5, %v1536_v56 }
 0x1b3   : > { %v1549_v61 = vmul.f32 0.044715, %v1537_v59  ;;  %v1545_v6 = vmul.f32 0.7978846, %v1537_v59  ;;  %v1541_v0 = vmul.f32 0.5, %v1537_v59 }
 0x1b4   : > { %v1552_v62 = vmul.f32 %v1548_v60, %v1536_v56 }
 0x1b5   : > { %v1553_v63 = vmul.f32 %v1549_v61, %v1537_v59 }
 0x1b6   : > { %v1556_v5 = vadd.f32 1.0, %v1552_v62 }
 0x1b7   : > { %v1557_v7 = vadd.f32 1.0, %v1553_v63 }
 0x1b8   : > { %v1560_v8 = vmul.f32 %v1556_v5, %v1544_v4 }
 0x1b9   : > { %v1561_v9 = vmul.f32 %v1557_v7, %v1545_v6 }
 0x1ba   : > { %2107 = vtanh.f32 %v1560_v8 }
 0x1bb   : > { %2109 = vtanh.f32 %v1561_v9 }
 0x1c4   : > { %v2108_v12 = vpop.eup %2107 }
 0x1c5   : > { %v2110_v13 = vpop.eup %2109  ;;  %v1568_v15 = vadd.f32 1.0, %v2108_v12 }
 0x1c6   : > { %v1569_v16 = vadd.f32 1.0, %v2110_v13 }
 0x1c7   : > { %v1572_v1 = vmul.f32 %v1568_v15, %v1540_v14 }
 0x1c8   : > { %v1573_v17 = vmul.f32 %v1569_v16, %v1541_v0 }
 0x1ca   : > { %v1866_v10 = vpack.c.bf16 %v1573_v17, %v1572_v1 }
 0x1cc   : > { %1591 = vst [vmem:[%s2652_s19 + $0x8] sm:$0xff] %v1866_v10 }
 0x1cd PF: > { %s13_s16 = sadd.s32 1, %s2149_s16   ;;  %s2675_s12 = smov %s2137_s13 }
 0x1ce   : > { %p10_p10 = scmp.ge.s32.totalorder %s13_s16, 6   ;;  %s2676_s13 = smov %s2206_s20 }
 0x1cf   : > { %s2677_s14 = smov %s2145_s15  ;;  %s2678_s15 = smov %s2680_s17 }
 0x1d0   :  { %12 = sbr.rel (!%p10_p10) target bundleno = 3 (0x3), region = 104 }

// kernel: _lambda_.26
= control target key start
LH: loop header
LB: loop body
LE: loop exit
PB: predicated region body
PF: predicated region fallthrough
CT: control target
= control target key end

     0   :  { %s2127_s12 = smov 0   ;;  %s2129_s13 = smov 0   ;;  %s2619_s0 = inlined_call_operand.vmem [shape: bf16[8,512], index: 0, kind: input, shape index: {}]   ;;  %s2620_s1 = inlined_call_operand.vmem [shape: bf16[512,1536], index: 1, kind: input, shape index: {}]   ;;  %s2621_s2 = inlined_call_operand.vmem [shape: f32[1,1536], index: 2, kind: input, shape index: {}]   ;;  %s2622_s3 = inlined_call_operand.vmem [shape: bf16[8,1536], index: 3, kind: output, shape index: {}]  }
   0x1   :  { %s2131_s14 = smov 0   ;;  %s2133_s15 = smov 0  }
   0x2   :  { %s2135_s16 = smov 0  }
   0x3 LB: > { %s28_s17 = sadd.s32 1, %s2101_s15  ;;  %p76_p1 = scmp.ne.s32.totalorder %s2093_s13, %s2089_s12  ;;  %s2105_s16 = sphi %s2135_s16, %s13_s16   ;;  %s2101_s15 = sphi %s2133_s15, %s2626_s15   ;;  %s2097_s14 = sphi %s2131_s14, %s2625_s14   ;;  %s2093_s13 = sphi %s2129_s13, %s2624_s13   ;;  %s2089_s12 = sphi %s2127_s12, %s2623_s12  }
   0x4   : > { %p30_p0 = scmp.ge.s32.totalorder %s28_s17, 3  ;;  %p77_p2 = scmp.eq.s32.totalorder %s2105_s16, 0 }
   0x5   : > { %s69_s19 = sadd.s32 1, %s2093_s13  ;;  %p1683_p5 = scmp.ge.s32.totalorder %s2105_s16, 3 }
   0x6   : > { %s2628_s17 = smov (%p30_p0, %s28_s17), 0  ;;  %p78_p3 = por %p77_p2, %p76_p1 }
   0x7   : > { %s65_s18 = ssub.s32 %s2101_s15, %s2628_s17  ;;  %169 = sbr.rel (%p1683_p5) target bundleno = 82 (0x52), region = 20 }
   0x8   : > { %p67_p4 = scmp.eq.s32.totalorder %s65_s18, 0 }
   0xa   : > { %s2162_s20 = scalar_select %p67_p4, %s2093_s13, %s69_s19  }
   0xe   : > { %172 = sbr.rel (!%p78_p3) target bundleno = 82 (0x52), region = 24  ;;  %s174_s21 = sand.u32 (%p78_p3), 1, %s2093_s13  }
   0xf   : > { %s1828_s22 = sshll.u32 (%p78_p3), %s2101_s15, 4  ;;  %s1684_s23 = sshll.u32 (%p78_p3), %s174_s21, 10 }
  0x10   : > { %s2170_s26 = scalar_lea.vmem (%p78_p3), %s2620_s1, %s1828_s22  ;;  %s2175_s27 = scalar_lea.vmem (%p78_p3), [#allocation3], %s1684_s23 }
  0x11   : > { %v195_v0 = vld [vmem:[%s2170_s26] sm:$0xff] (%p78_p3)  ;;  %v197_v1 = vld [vmem:[%s2170_s26 + $0x8] sm:$0xff] (%p78_p3)  ;;  %v199_v2 = vld [vmem:[%s2170_s26 + $0x30] sm:$0xff] (%p78_p3) }
  0x12   : > { %196 = vst [vmem:[%s2175_s27] sm:$0xff] (%p78_p3), %v195_v0  ;;  %198 = vst [vmem:[%s2175_s27 + $0x8] sm:$0xff] (%p78_p3), %v197_v1  ;;  %v201_v3 = vld [vmem:[%s2170_s26 + $0x38] sm:$0xff] (%p78_p3)  ;;  %v203_v4 = vld [vmem:[%s2170_s26 + $0x60] sm:$0xff] (%p78_p3) }
  0x13   : > { %200 = vst [vmem:[%s2175_s27 + $0x10] sm:$0xff] (%p78_p3), %v199_v2  ;;  %v205_v5 = vld [vmem:[%s2170_s26 + $0x68] sm:$0xff] (%p78_p3)  ;;  %202 = vst [vmem:[%s2175_s27 + $0x18] sm:$0xff] (%p78_p3), %v201_v3  ;;  %v207_v6 = vld [vmem:[%s2170_s26 + $0x90] sm:$0xff] (%p78_p3) }
  0x14   : > { %204 = vst [vmem:[%s2175_s27 + $0x20] sm:$0xff] (%p78_p3), %v203_v4  ;;  %206 = vst [vmem:[%s2175_s27 + $0x28] sm:$0xff] (%p78_p3), %v205_v5  ;;  %v209_v7 = vld [vmem:[%s2170_s26 + $0x98] sm:$0xff] (%p78_p3)  ;;  %v211_v8 = vld [vmem:[%s2170_s26 + $0xc0] sm:$0xff] (%p78_p3) }
  0x15   : > { %208 = vst [vmem:[%s2175_s27 + $0x30] sm:$0xff] %v207_v6  ;;  %210 = vst [vmem:[%s2175_s27 + $0x38] sm:$0xff] %v209_v7  ;;  %v213_v9 = vld [vmem:[%s2170_s26 + $0xc8] sm:$0xff]  ;;  %v215_v10 = vld [vmem:[%s2170_s26 + $0xf0] sm:$0xff] }
  0x16   : > { %212 = vst [vmem:[%s2175_s27 + $0x40] sm:$0xff] %v211_v8  ;;  %v217_v11 = vld [vmem:[%s2170_s26 + $0xf8] sm:$0xff]  ;;  %214 = vst [vmem:[%s2175_s27 + $0x48] sm:$0xff] %v213_v9  ;;  %v219_v12 = vld [vmem:[%s2170_s26 + $0x120] sm:$0xff] }
  0x17   : > { %216 = vst [vmem:[%s2175_s27 + $0x50] sm:$0xff] %v215_v10  ;;  %218 = vst [vmem:[%s2175_s27 + $0x58] sm:$0xff] %v217_v11  ;;  %v221_v13 = vld [vmem:[%s2170_s26 + $0x128] sm:$0xff]  ;;  %v223_v14 = vld [vmem:[%s2170_s26 + $0x150] sm:$0xff] }
  0x18   : > { %220 = vst [vmem:[%s2175_s27 + $0x60] sm:$0xff] %v219_v12  ;;  %222 = vst [vmem:[%s2175_s27 + $0x68] sm:$0xff] %v221_v13  ;;  %v225_v15 = vld [vmem:[%s2170_s26 + $0x158] sm:$0xff]  ;;  %v227_v16 = vld [vmem:[%s2170_s26 + $0x180] sm:$0xff] }
  0x19   : > { %224 = vst [vmem:[%s2175_s27 + $0x70] sm:$0xff] %v223_v14  ;;  %v229_v17 = vld [vmem:[%s2170_s26 + $0x188] sm:$0xff]  ;;  %226 = vst [vmem:[%s2175_s27 + $0x78] sm:$0xff] %v225_v15  ;;  %v231_v18 = vld [vmem:[%s2170_s26 + $0x1b0] sm:$0xff] }
  0x1a   : > { %228 = vst [vmem:[%s2175_s27 + $0x80] sm:$0xff] %v227_v16  ;;  %230 = vst [vmem:[%s2175_s27 + $0x88] sm:$0xff] %v229_v17  ;;  %v233_v19 = vld [vmem:[%s2170_s26 + $0x1b8] sm:$0xff]  ;;  %v235_v20 = vld [vmem:[%s2170_s26 + $0x1e0] sm:$0xff] }
  0x1b   : > { %232 = vst [vmem:[%s2175_s27 + $0x90] sm:$0xff] %v231_v18  ;;  %234 = vst [vmem:[%s2175_s27 + $0x98] sm:$0xff] %v233_v19  ;;  %v237_v21 = vld [vmem:[%s2170_s26 + $0x1e8] sm:$0xff]  ;;  %v239_v22 = vld [vmem:[%s2170_s26 + $0x210] sm:$0xff] }
  0x1c   : > { %236 = vst [vmem:[%s2175_s27 + $0xa0] sm:$0xff] %v235_v20  ;;  %v241_v23 = vld [vmem:[%s2170_s26 + $0x218] sm:$0xff]  ;;  %238 = vst [vmem:[%s2175_s27 + $0xa8] sm:$0xff] %v237_v21  ;;  %v243_v24 = vld [vmem:[%s2170_s26 + $0x240] sm:$0xff] }
  0x1d   : > { %240 = vst [vmem:[%s2175_s27 + $0xb0] sm:$0xff] %v239_v22  ;;  %242 = vst [vmem:[%s2175_s27 + $0xb8] sm:$0xff] %v241_v23  ;;  %v245_v25 = vld [vmem:[%s2170_s26 + $0x248] sm:$0xff]  ;;  %v247_v26 = vld [vmem:[%s2170_s26 + $0x270] sm:$0xff] }
  0x1e   : > { %244 = vst [vmem:[%s2175_s27 + $0xc0] sm:$0xff] %v243_v24  ;;  %246 = vst [vmem:[%s2175_s27 + $0xc8] sm:$0xff] %v245_v25  ;;  %v249_v27 = vld [vmem:[%s2170_s26 + $0x278] sm:$0xff]  ;;  %v251_v28 = vld [vmem:[%s2170_s26 + $0x2a0] sm:$0xff] }
  0x1f   : > { %248 = vst [vmem:[%s2175_s27 + $0xd0] sm:$0xff] %v247_v26  ;;  %v253_v29 = vld [vmem:[%s2170_s26 + $0x2a8] sm:$0xff]  ;;  %250 = vst [vmem:[%s2175_s27 + $0xd8] sm:$0xff] %v249_v27  ;;  %v255_v30 = vld [vmem:[%s2170_s26 + $0x2d0] sm:$0xff] }
  0x20   : > { %252 = vst [vmem:[%s2175_s27 + $0xe0] sm:$0xff] %v251_v28  ;;  %254 = vst [vmem:[%s2175_s27 + $0xe8] sm:$0xff] %v253_v29  ;;  %v257_v31 = vld [vmem:[%s2170_s26 + $0x2d8] sm:$0xff]  ;;  %v259_v32 = vld [vmem:[%s2170_s26 + $0x300] sm:$0xff] }
  0x21   : > { %256 = vst [vmem:[%s2175_s27 + $0xf0] sm:$0xff] %v255_v30  ;;  %258 = vst [vmem:[%s2175_s27 + $0xf8] sm:$0xff] %v257_v31  ;;  %v261_v33 = vld [vmem:[%s2170_s26 + $0x308] sm:$0xff]  ;;  %v263_v34 = vld [vmem:[%s2170_s26 + $0x330] sm:$0xff] }
  0x22   : > { %260 = vst [vmem:[%s2175_s27 + $0x100] sm:$0xff] %v259_v32  ;;  %v265_v35 = vld [vmem:[%s2170_s26 + $0x338] sm:$0xff]  ;;  %262 = vst [vmem:[%s2175_s27 + $0x108] sm:$0xff] %v261_v33  ;;  %v267_v36 = vld [vmem:[%s2170_s26 + $0x360] sm:$0xff] }
  0x23   : > { %264 = vst [vmem:[%s2175_s27 + $0x110] sm:$0xff] %v263_v34  ;;  %266 = vst [vmem:[%s2175_s27 + $0x118] sm:$0xff] %v265_v35  ;;  %v269_v37 = vld [vmem:[%s2170_s26 + $0x368] sm:$0xff]  ;;  %v271_v38 = vld [vmem:[%s2170_s26 + $0x390] sm:$0xff] }
  0x24   : > { %268 = vst [vmem:[%s2175_s27 + $0x120] sm:$0xff] %v267_v36  ;;  %270 = vst [vmem:[%s2175_s27 + $0x128] sm:$0xff] %v269_v37  ;;  %v273_v39 = vld [vmem:[%s2170_s26 + $0x398] sm:$0xff]  ;;  %v275_v40 = vld [vmem:[%s2170_s26 + $0x3c0] sm:$0xff] }
  0x25   : > { %272 = vst [vmem:[%s2175_s27 + $0x130] sm:$0xff] %v271_v38  ;;  %v277_v41 = vld [vmem:[%s2170_s26 + $0x3c8] sm:$0xff]  ;;  %274 = vst [vmem:[%s2175_s27 + $0x138] sm:$0xff] %v273_v39  ;;  %v279_v42 = vld [vmem:[%s2170_s26 + $0x3f0] sm:$0xff] }
  0x26   : > { %276 = vst [vmem:[%s2175_s27 + $0x140] sm:$0xff] %v275_v40  ;;  %278 = vst [vmem:[%s2175_s27 + $0x148] sm:$0xff] %v277_v41  ;;  %v281_v43 = vld [vmem:[%s2170_s26 + $0x3f8] sm:$0xff]  ;;  %v283_v44 = vld [vmem:[%s2170_s26 + $0x420] sm:$0xff] }
  0x27   : > { %280 = vst [vmem:[%s2175_s27 + $0x150] sm:$0xff] %v279_v42  ;;  %282 = vst [vmem:[%s2175_s27 + $0x158] sm:$0xff] %v281_v43  ;;  %v285_v45 = vld [vmem:[%s2170_s26 + $0x428] sm:$0xff]  ;;  %v287_v46 = vld [vmem:[%s2170_s26 + $0x450] sm:$0xff] }
  0x28   : > { %284 = vst [vmem:[%s2175_s27 + $0x160] sm:$0xff] %v283_v44  ;;  %v289_v47 = vld [vmem:[%s2170_s26 + $0x458] sm:$0xff]  ;;  %286 = vst [vmem:[%s2175_s27 + $0x168] sm:$0xff] %v285_v45  ;;  %v291_v48 = vld [vmem:[%s2170_s26 + $0x480] sm:$0xff] }
  0x29   : > { %288 = vst [vmem:[%s2175_s27 + $0x170] sm:$0xff] %v287_v46  ;;  %290 = vst [vmem:[%s2175_s27 + $0x178] sm:$0xff] %v289_v47  ;;  %v293_v49 = vld [vmem:[%s2170_s26 + $0x488] sm:$0xff]  ;;  %v295_v50 = vld [vmem:[%s2170_s26 + $0x4b0] sm:$0xff] }
  0x2a   : > { %292 = vst [vmem:[%s2175_s27 + $0x180] sm:$0xff] %v291_v48  ;;  %294 = vst [vmem:[%s2175_s27 + $0x188] sm:$0xff] %v293_v49  ;;  %v297_v51 = vld [vmem:[%s2170_s26 + $0x4b8] sm:$0xff]  ;;  %v299_v52 = vld [vmem:[%s2170_s26 + $0x4e0] sm:$0xff] }
  0x2b   : > { %296 = vst [vmem:[%s2175_s27 + $0x190] sm:$0xff] %v295_v50  ;;  %v301_v53 = vld [vmem:[%s2170_s26 + $0x4e8] sm:$0xff]  ;;  %298 = vst [vmem:[%s2175_s27 + $0x198] sm:$0xff] %v297_v51  ;;  %v303_v54 = vld [vmem:[%s2170_s26 + $0x510] sm:$0xff] }
  0x2c   : > { %300 = vst [vmem:[%s2175_s27 + $0x1a0] sm:$0xff] %v299_v52  ;;  %302 = vst [vmem:[%s2175_s27 + $0x1a8] sm:$0xff] %v301_v53  ;;  %v305_v55 = vld [vmem:[%s2170_s26 + $0x518] sm:$0xff]  ;;  %v307_v56 = vld [vmem:[%s2170_s26 + $0x540] sm:$0xff] }
  0x2d   : > { %304 = vst [vmem:[%s2175_s27 + $0x1b0] sm:$0xff] %v303_v54  ;;  %306 = vst [vmem:[%s2175_s27 + $0x1b8] sm:$0xff] %v305_v55  ;;  %v309_v57 = vld [vmem:[%s2170_s26 + $0x548] sm:$0xff]  ;;  %v311_v58 = vld [vmem:[%s2170_s26 + $0x570] sm:$0xff] }
  0x2e   : > { %308 = vst [vmem:[%s2175_s27 + $0x1c0] sm:$0xff] %v307_v56  ;;  %v313_v59 = vld [vmem:[%s2170_s26 + $0x578] sm:$0xff]  ;;  %310 = vst [vmem:[%s2175_s27 + $0x1c8] sm:$0xff] %v309_v57  ;;  %v315_v60 = vld [vmem:[%s2170_s26 + $0x5a0] sm:$0xff] }
  0x2f   : > { %312 = vst [vmem:[%s2175_s27 + $0x1d0] sm:$0xff] %v311_v58  ;;  %314 = vst [vmem:[%s2175_s27 + $0x1d8] sm:$0xff] %v313_v59  ;;  %v317_v61 = vld [vmem:[%s2170_s26 + $0x5a8] sm:$0xff]  ;;  %v319_v62 = vld [vmem:[%s2170_s26 + $0x5d0] sm:$0xff] }
  0x30   : > { %316 = vst [vmem:[%s2175_s27 + $0x1e0] sm:$0xff] %v315_v60  ;;  %318 = vst [vmem:[%s2175_s27 + $0x1e8] sm:$0xff] %v317_v61  ;;  %v321_v63 = vld [vmem:[%s2170_s26 + $0x5d8] sm:$0xff]  ;;  %v323_v0 = vld [vmem:[%s2170_s26 + $0x600] sm:$0xff] }
  0x31   : > { %320 = vst [vmem:[%s2175_s27 + $0x1f0] sm:$0xff] %v319_v62  ;;  %v325_v1 = vld [vmem:[%s2170_s26 + $0x608] sm:$0xff]  ;;  %322 = vst [vmem:[%s2175_s27 + $0x1f8] sm:$0xff] %v321_v63  ;;  %v327_v2 = vld [vmem:[%s2170_s26 + $0x630] sm:$0xff] }
  0x32   : > { %324 = vst [vmem:[%s2175_s27 + $0x200] sm:$0xff] %v323_v0  ;;  %326 = vst [vmem:[%s2175_s27 + $0x208] sm:$0xff] %v325_v1  ;;  %v329_v3 = vld [vmem:[%s2170_s26 + $0x638] sm:$0xff]  ;;  %v331_v4 = vld [vmem:[%s2170_s26 + $0x660] sm:$0xff] }
  0x33   : > { %328 = vst [vmem:[%s2175_s27 + $0x210] sm:$0xff] %v327_v2  ;;  %330 = vst [vmem:[%s2175_s27 + $0x218] sm:$0xff] %v329_v3  ;;  %v333_v5 = vld [vmem:[%s2170_s26 + $0x668] sm:$0xff]  ;;  %v335_v6 = vld [vmem:[%s2170_s26 + $0x690] sm:$0xff] }
  0x34   : > { %332 = vst [vmem:[%s2175_s27 + $0x220] sm:$0xff] %v331_v4  ;;  %v337_v7 = vld [vmem:[%s2170_s26 + $0x698] sm:$0xff]  ;;  %334 = vst [vmem:[%s2175_s27 + $0x228] sm:$0xff] %v333_v5  ;;  %v339_v8 = vld [vmem:[%s2170_s26 + $0x6c0] sm:$0xff] }
  0x35   : > { %336 = vst [vmem:[%s2175_s27 + $0x230] sm:$0xff] %v335_v6  ;;  %338 = vst [vmem:[%s2175_s27 + $0x238] sm:$0xff] %v337_v7  ;;  %v341_v9 = vld [vmem:[%s2170_s26 + $0x6c8] sm:$0xff]  ;;  %v343_v10 = vld [vmem:[%s2170_s26 + $0x6f0] sm:$0xff] }
  0x36   : > { %340 = vst [vmem:[%s2175_s27 + $0x240] sm:$0xff] %v339_v8  ;;  %342 = vst [vmem:[%s2175_s27 + $0x248] sm:$0xff] %v341_v9  ;;  %v345_v11 = vld [vmem:[%s2170_s26 + $0x6f8] sm:$0xff]  ;;  %v347_v12 = vld [vmem:[%s2170_s26 + $0x720] sm:$0xff] }
  0x37   : > { %344 = vst [vmem:[%s2175_s27 + $0x250] sm:$0xff] %v343_v10  ;;  %v349_v13 = vld [vmem:[%s2170_s26 + $0x728] sm:$0xff]  ;;  %346 = vst [vmem:[%s2175_s27 + $0x258] sm:$0xff] %v345_v11  ;;  %v351_v14 = vld [vmem:[%s2170_s26 + $0x750] sm:$0xff] }
  0x38   : > { %348 = vst [vmem:[%s2175_s27 + $0x260] sm:$0xff] %v347_v12  ;;  %350 = vst [vmem:[%s2175_s27 + $0x268] sm:$0xff] %v349_v13  ;;  %v353_v15 = vld [vmem:[%s2170_s26 + $0x758] sm:$0xff]  ;;  %v355_v16 = vld [vmem:[%s2170_s26 + $0x780] sm:$0xff] }
  0x39   : > { %352 = vst [vmem:[%s2175_s27 + $0x270] sm:$0xff] %v351_v14  ;;  %354 = vst [vmem:[%s2175_s27 + $0x278] sm:$0xff] %v353_v15  ;;  %v357_v17 = vld [vmem:[%s2170_s26 + $0x788] sm:$0xff]  ;;  %v359_v18 = vld [vmem:[%s2170_s26 + $0x7b0] sm:$0xff] }
  0x3a   : > { %356 = vst [vmem:[%s2175_s27 + $0x280] sm:$0xff] %v355_v16  ;;  %v361_v19 = vld [vmem:[%s2170_s26 + $0x7b8] sm:$0xff]  ;;  %358 = vst [vmem:[%s2175_s27 + $0x288] sm:$0xff] %v357_v17  ;;  %v363_v20 = vld [vmem:[%s2170_s26 + $0x7e0] sm:$0xff] }
  0x3b   : > { %360 = vst [vmem:[%s2175_s27 + $0x290] sm:$0xff] %v359_v18  ;;  %362 = vst [vmem:[%s2175_s27 + $0x298] sm:$0xff] %v361_v19  ;;  %v365_v21 = vld [vmem:[%s2170_s26 + $0x7e8] sm:$0xff]  ;;  %v367_v22 = vld [vmem:[%s2170_s26 + $0x810] sm:$0xff] }
  0x3c   : > { %364 = vst [vmem:[%s2175_s27 + $0x2a0] sm:$0xff] %v363_v20  ;;  %366 = vst [vmem:[%s2175_s27 + $0x2a8] sm:$0xff] %v365_v21  ;;  %v369_v23 = vld [vmem:[%s2170_s26 + $0x818] sm:$0xff]  ;;  %v371_v24 = vld [vmem:[%s2170_s26 + $0x840] sm:$0xff] }
  0x3d   : > { %368 = vst [vmem:[%s2175_s27 + $0x2b0] sm:$0xff] %v367_v22  ;;  %v373_v25 = vld [vmem:[%s2170_s26 + $0x848] sm:$0xff]  ;;  %370 = vst [vmem:[%s2175_s27 + $0x2b8] sm:$0xff] %v369_v23  ;;  %v375_v26 = vld [vmem:[%s2170_s26 + $0x870] sm:$0xff] }
  0x3e   : > { %372 = vst [vmem:[%s2175_s27 + $0x2c0] sm:$0xff] %v371_v24  ;;  %374 = vst [vmem:[%s2175_s27 + $0x2c8] sm:$0xff] %v373_v25  ;;  %v377_v27 = vld [vmem:[%s2170_s26 + $0x878] sm:$0xff]  ;;  %v379_v28 = vld [vmem:[%s2170_s26 + $0x8a0] sm:$0xff] }
  0x3f   : > { %376 = vst [vmem:[%s2175_s27 + $0x2d0] sm:$0xff] %v375_v26  ;;  %378 = vst [vmem:[%s2175_s27 + $0x2d8] sm:$0xff] %v377_v27  ;;  %v381_v29 = vld [vmem:[%s2170_s26 + $0x8a8] sm:$0xff]  ;;  %v383_v30 = vld [vmem:[%s2170_s26 + $0x8d0] sm:$0xff] }
  0x40   : > { %380 = vst [vmem:[%s2175_s27 + $0x2e0] sm:$0xff] %v379_v28  ;;  %v385_v31 = vld [vmem:[%s2170_s26 + $0x8d8] sm:$0xff]  ;;  %382 = vst [vmem:[%s2175_s27 + $0x2e8] sm:$0xff] %v381_v29  ;;  %v387_v32 = vld [vmem:[%s2170_s26 + $0x900] sm:$0xff] }
  0x41   : > { %384 = vst [vmem:[%s2175_s27 + $0x2f0] sm:$0xff] %v383_v30  ;;  %386 = vst [vmem:[%s2175_s27 + $0x2f8] sm:$0xff] %v385_v31  ;;  %v389_v33 = vld [vmem:[%s2170_s26 + $0x908] sm:$0xff]  ;;  %v391_v34 = vld [vmem:[%s2170_s26 + $0x930] sm:$0xff] }
  0x42   : > { %388 = vst [vmem:[%s2175_s27 + $0x300] sm:$0xff] %v387_v32  ;;  %390 = vst [vmem:[%s2175_s27 + $0x308] sm:$0xff] %v389_v33  ;;  %v393_v35 = vld [vmem:[%s2170_s26 + $0x938] sm:$0xff]  ;;  %v395_v36 = vld [vmem:[%s2170_s26 + $0x960] sm:$0xff] }
  0x43   : > { %392 = vst [vmem:[%s2175_s27 + $0x310] sm:$0xff] %v391_v34  ;;  %v397_v37 = vld [vmem:[%s2170_s26 + $0x968] sm:$0xff]  ;;  %394 = vst [vmem:[%s2175_s27 + $0x318] sm:$0xff] %v393_v35  ;;  %v399_v38 = vld [vmem:[%s2170_s26 + $0x990] sm:$0xff] }
  0x44   : > { %396 = vst [vmem:[%s2175_s27 + $0x320] sm:$0xff] %v395_v36  ;;  %398 = vst [vmem:[%s2175_s27 + $0x328] sm:$0xff] %v397_v37  ;;  %v401_v39 = vld [vmem:[%s2170_s26 + $0x998] sm:$0xff]  ;;  %v403_v40 = vld [vmem:[%s2170_s26 + $0x9c0] sm:$0xff] }
  0x45   : > { %400 = vst [vmem:[%s2175_s27 + $0x330] sm:$0xff] %v399_v38  ;;  %402 = vst [vmem:[%s2175_s27 + $0x338] sm:$0xff] %v401_v39  ;;  %v405_v41 = vld [vmem:[%s2170_s26 + $0x9c8] sm:$0xff]  ;;  %v407_v42 = vld [vmem:[%s2170_s26 + $0x9f0] sm:$0xff] }
  0x46   : > { %404 = vst [vmem:[%s2175_s27 + $0x340] sm:$0xff] %v403_v40  ;;  %v409_v43 = vld [vmem:[%s2170_s26 + $0x9f8] sm:$0xff]  ;;  %406 = vst [vmem:[%s2175_s27 + $0x348] sm:$0xff] %v405_v41  ;;  %v411_v44 = vld [vmem:[%s2170_s26 + $0xa20] sm:$0xff] }
  0x47   : > { %408 = vst [vmem:[%s2175_s27 + $0x350] sm:$0xff] %v407_v42  ;;  %410 = vst [vmem:[%s2175_s27 + $0x358] sm:$0xff] %v409_v43  ;;  %v413_v45 = vld [vmem:[%s2170_s26 + $0xa28] sm:$0xff]  ;;  %v415_v46 = vld [vmem:[%s2170_s26 + $0xa50] sm:$0xff] }
  0x48   : > { %412 = vst [vmem:[%s2175_s27 + $0x360] sm:$0xff] %v411_v44  ;;  %414 = vst [vmem:[%s2175_s27 + $0x368] sm:$0xff] %v413_v45  ;;  %v417_v47 = vld [vmem:[%s2170_s26 + $0xa58] sm:$0xff]  ;;  %v419_v48 = vld [vmem:[%s2170_s26 + $0xa80] sm:$0xff] }
  0x49   : > { %416 = vst [vmem:[%s2175_s27 + $0x370] sm:$0xff] %v415_v46  ;;  %v421_v49 = vld [vmem:[%s2170_s26 + $0xa88] sm:$0xff]  ;;  %418 = vst [vmem:[%s2175_s27 + $0x378] sm:$0xff] %v417_v47  ;;  %v423_v50 = vld [vmem:[%s2170_s26 + $0xab0] sm:$0xff] }
  0x4a   : > { %420 = vst [vmem:[%s2175_s27 + $0x380] sm:$0xff] %v419_v48  ;;  %422 = vst [vmem:[%s2175_s27 + $0x388] sm:$0xff] %v421_v49  ;;  %v425_v51 = vld [vmem:[%s2170_s26 + $0xab8] sm:$0xff]  ;;  %v427_v52 = vld [vmem:[%s2170_s26 + $0xae0] sm:$0xff] }
  0x4b   : > { %424 = vst [vmem:[%s2175_s27 + $0x390] sm:$0xff] %v423_v50  ;;  %426 = vst [vmem:[%s2175_s27 + $0x398] sm:$0xff] %v425_v51  ;;  %v429_v53 = vld [vmem:[%s2170_s26 + $0xae8] sm:$0xff]  ;;  %v431_v54 = vld [vmem:[%s2170_s26 + $0xb10] sm:$0xff] }
  0x4c   : > { %428 = vst [vmem:[%s2175_s27 + $0x3a0] sm:$0xff] %v427_v52  ;;  %v433_v55 = vld [vmem:[%s2170_s26 + $0xb18] sm:$0xff]  ;;  %430 = vst [vmem:[%s2175_s27 + $0x3a8] sm:$0xff] %v429_v53  ;;  %v435_v56 = vld [vmem:[%s2170_s26 + $0xb40] sm:$0xff] }
  0x4d   : > { %432 = vst [vmem:[%s2175_s27 + $0x3b0] sm:$0xff] %v431_v54  ;;  %434 = vst [vmem:[%s2175_s27 + $0x3b8] sm:$0xff] %v433_v55  ;;  %v437_v57 = vld [vmem:[%s2170_s26 + $0xb48] sm:$0xff]  ;;  %v439_v58 = vld [vmem:[%s2170_s26 + $0xb70] sm:$0xff] }
  0x4e   : > { %436 = vst [vmem:[%s2175_s27 + $0x3c0] sm:$0xff] %v435_v56  ;;  %438 = vst [vmem:[%s2175_s27 + $0x3c8] sm:$0xff] %v437_v57  ;;  %v441_v59 = vld [vmem:[%s2170_s26 + $0xb78] sm:$0xff]  ;;  %v443_v60 = vld [vmem:[%s2170_s26 + $0xba0] sm:$0xff] }
  0x4f   : > { %440 = vst [vmem:[%s2175_s27 + $0x3d0] sm:$0xff] %v439_v58  ;;  %v445_v61 = vld [vmem:[%s2170_s26 + $0xba8] sm:$0xff]  ;;  %442 = vst [vmem:[%s2175_s27 + $0x3d8] sm:$0xff] %v441_v59  ;;  %v447_v62 = vld [vmem:[%s2170_s26 + $0xbd0] sm:$0xff] }
  0x50   : > { %444 = vst [vmem:[%s2175_s27 + $0x3e0] sm:$0xff] %v443_v60  ;;  %446 = vst [vmem:[%s2175_s27 + $0x3e8] sm:$0xff] %v445_v61  ;;  %v449_v63 = vld [vmem:[%s2170_s26 + $0xbd8] sm:$0xff] }
  0x51   : > { %448 = vst [vmem:[%s2175_s27 + $0x3f0] sm:$0xff] %v447_v62  ;;  %450 = vst [vmem:[%s2175_s27 + $0x3f8] sm:$0xff] %v449_v63 }
  0x52 PF: > { %p1687_p6 = scmp.ge.s32.totalorder %s2105_s16, 1  ;;  %p463_p7 = scmp.lt.s32.totalorder %s2105_s16, 4 }
  0x54   : > { %p464_p8 = pnand %p1687_p6, %p463_p7 }
  0x55   : > { %s470_s28 = sand.u32 (!%p464_p8), 1, %s2089_s12   ;;  %v2436_v0 = vld [vmem:[%s2619_s0] sm:$0xff] (!%p464_p8)  ;;  %v2441_v1 = vld [vmem:[%s2619_s0 + $0x8] sm:$0xff] (!%p464_p8)  ;;  %s1689_s8 = sshll.u32 (!%p464_p8), %s2097_s14, 2 }
  0x56   : > { %467 = sbr.rel (%p464_p8) target bundleno = 438 (0x1b6), region = 51  ;;  %s1688_s6 = sshll.u32 (!%p464_p8), %s470_s28, 10  ;;  %v2445_v2 = vcombine.high (!%p464_p8), %v2436_v0, %v2436_v0  ;;  %v2449_v3 = vcombine.high (!%p464_p8), %v2441_v1, %v2441_v1 }
  0x57   : > { %s2451_s7 = scalar_lea.vmem (!%p464_p8), [#allocation3], %s1688_s6  ;;  %p523_p9 = scmp.lt.s32.totalorder (!%p464_p8), %s1689_s8, 11 }
  0x58   : > { %v1871_v4 = vld [vmem:[%s2451_s7 + $0x4] ss:$16 sps:$4 sm:$0xff] (!%p464_p8)   ;;  %1365 = vmatprep.mubr.bf16.mxu0 (!%p464_p8), %v2445_v2  ;;  %1406 = vmatprep.mubr.bf16.mxu1 (!%p464_p8), %v2449_v3  ;;  %v1875_v6 = vld [vmem:[%s2451_s7] ss:$16 sps:$4 sm:$0xff] (!%p464_p8)  }
  0x59   : > { %v1873_v5 = vld [vmem:[%s2451_s7 + $0x204] ss:$16 sps:$4 sm:$0xff] (!%p464_p8)   ;;  %1333 = vmatprep.subr.bf16.mxu0 (!%p464_p8), %v1871_v4  ;;  %v1876_v7 = vld [vmem:[%s2451_s7 + $0x200] ss:$16 sps:$4 sm:$0xff] (!%p464_p8)  }
  0x5a   : > { %1374 = vmatprep.subr.bf16.mxu1 (!%p464_p8), %v1873_v5  ;;  %v1877_v8 = vld [vmem:[%s2451_s7 + $0x24] ss:$16 sps:$4 sm:$0xff] (!%p464_p8)   ;;  %1334 = vmatpush1.bf16.msra.mxu0 (!%p464_p8), %v1875_v6  ;;  %v1881_v10 = vld [vmem:[%s2451_s7 + $0x20] ss:$16 sps:$4 sm:$0xff] (!%p464_p8)  }
  0x5b   : > { %1375 = vmatpush1.bf16.msra.mxu1 (!%p464_p8), %v1876_v7  ;;  %v1879_v9 = vld [vmem:[%s2451_s7 + $0x224] ss:$16 sps:$4 sm:$0xff] (!%p464_p8)   ;;  %1335 = vmatprep.subr.bf16.mxu0 (!%p464_p8), %v1877_v8  ;;  %v1882_v11 = vld [vmem:[%s2451_s7 + $0x220] ss:$16 sps:$4 sm:$0xff] (!%p464_p8)   ;;  %v1973_v8 = vld [vmem:[%s2451_s7 + $0xc] ss:$16 sps:$4 sm:$0xff] (!%p464_p8)  }
  0x5c   : > { %1376 = vmatprep.subr.bf16.mxu1 (!%p464_p8), %v1879_v9  ;;  %v1883_v12 = vld [vmem:[%s2451_s7 + $0x44] ss:$16 sps:$4 sm:$0xff] (!%p464_p8)   ;;  %v1887_v14 = vld [vmem:[%s2451_s7 + $0x40] ss:$16 sps:$4 sm:$0xff] (!%p464_p8)   ;;  %v1976_v9 = vld [vmem:[%s2451_s7 + $0x20c] ss:$16 sps:$4 sm:$0xff] (!%p464_p8)  }
  0x5d   : > { %v1885_v13 = vld [vmem:[%s2451_s7 + $0x244] ss:$16 sps:$4 sm:$0xff]   ;;  %v1888_v15 = vld [vmem:[%s2451_s7 + $0x240] ss:$16 sps:$4 sm:$0xff]   ;;  %s2630_s8 = smov (!%p523_p9, %s1689_s8), 11 }
  0x5e   : > { %1336 = vmatpush1.bf16.msra.mxu0 %v1881_v10  ;;  %v1889_v16 = vld [vmem:[%s2451_s7 + $0x64] ss:$16 sps:$4 sm:$0xff]   ;;  %v1893_v18 = vld [vmem:[%s2451_s7 + $0x60] ss:$16 sps:$4 sm:$0xff]   ;;  %v2523_v10 = vcombine.low %v2436_v0, %v2436_v0  ;;  %v1977_v0 = vld [vmem:[%s2451_s7 + $0x28] ss:$16 sps:$4 sm:$0xff]   ;;  %s525_s11 = scalar_lea.vmem %s2621_s2, %s2630_s8 }
  0x5f   : > { %1377 = vmatpush1.bf16.msra.mxu1 %v1882_v11  ;;  %1337 = vmatprep.subr.bf16.mxu0 %v1883_v12  ;;  %v1891_v17 = vld [vmem:[%s2451_s7 + $0x264] ss:$16 sps:$4 sm:$0xff]   ;;  %v1894_v19 = vld [vmem:[%s2451_s7 + $0x260] ss:$16 sps:$4 sm:$0xff]   ;;  %v2527_v11 = vcombine.low %v2441_v1, %v2441_v1  ;;  %v1971_v12 = vld [vmem:[%s2451_s7 + $0x8] ss:$16 sps:$4 sm:$0xff]  }
  0x60   : > { %1378 = vmatprep.subr.bf16.mxu1 %v1885_v13  ;;  %v1895_v20 = vld [vmem:[%s2451_s7 + $0x84] ss:$16 sps:$4 sm:$0xff]   ;;  %v1899_v22 = vld [vmem:[%s2451_s7 + $0x80] ss:$16 sps:$4 sm:$0xff]   ;;  %v1974_v13 = vld [vmem:[%s2451_s7 + $0x208] ss:$16 sps:$4 sm:$0xff]  }
  0x61   : > { %v1897_v21 = vld [vmem:[%s2451_s7 + $0x284] ss:$16 sps:$4 sm:$0xff]   ;;  %v1900_v23 = vld [vmem:[%s2451_s7 + $0x280] ss:$16 sps:$4 sm:$0xff]   ;;  %v1985_v1 = vld [vmem:[%s2451_s7 + $0x4c] ss:$16 sps:$4 sm:$0xff]  }
  0x62   : > { %1338 = vmatpush1.bf16.msra.mxu0 %v1887_v14  ;;  %v1901_v24 = vld [vmem:[%s2451_s7 + $0xa4] ss:$16 sps:$4 sm:$0xff]   ;;  %v1905_v26 = vld [vmem:[%s2451_s7 + $0xa0] ss:$16 sps:$4 sm:$0xff]   ;;  %v1979_v14 = vld [vmem:[%s2451_s7 + $0x2c] ss:$16 sps:$4 sm:$0xff]  }
  0x63   : > { %1379 = vmatpush1.bf16.msra.mxu1 %v1888_v15  ;;  %1339 = vmatprep.subr.bf16.mxu0 %v1889_v16  ;;  %v1903_v25 = vld [vmem:[%s2451_s7 + $0x2a4] ss:$16 sps:$4 sm:$0xff]   ;;  %v1906_v27 = vld [vmem:[%s2451_s7 + $0x2a0] ss:$16 sps:$4 sm:$0xff]   ;;  %v1982_v15 = vld [vmem:[%s2451_s7 + $0x22c] ss:$16 sps:$4 sm:$0xff]  }
  0x64   : > { %1380 = vmatprep.subr.bf16.mxu1 %v1891_v17  ;;  %v1907_v28 = vld [vmem:[%s2451_s7 + $0xc4] ss:$16 sps:$4 sm:$0xff]   ;;  %v1911_v30 = vld [vmem:[%s2451_s7 + $0xc0] ss:$16 sps:$4 sm:$0xff]   ;;  %v1980_v16 = vld [vmem:[%s2451_s7 + $0x228] ss:$16 sps:$4 sm:$0xff]  }
  0x65   : > { %v1909_v29 = vld [vmem:[%s2451_s7 + $0x2c4] ss:$16 sps:$4 sm:$0xff]   ;;  %v1912_v31 = vld [vmem:[%s2451_s7 + $0x2c0] ss:$16 sps:$4 sm:$0xff]   ;;  %v1988_v17 = vld [vmem:[%s2451_s7 + $0x24c] ss:$16 sps:$4 sm:$0xff]  }
  0x66   : > { %1340 = vmatpush1.bf16.msra.mxu0 %v1893_v18  ;;  %v1913_v32 = vld [vmem:[%s2451_s7 + $0xe4] ss:$16 sps:$4 sm:$0xff]   ;;  %v1917_v34 = vld [vmem:[%s2451_s7 + $0xe0] ss:$16 sps:$4 sm:$0xff]   ;;  %v1983_v18 = vld [vmem:[%s2451_s7 + $0x48] ss:$16 sps:$4 sm:$0xff]  }
  0x67   : > { %1381 = vmatpush1.bf16.msra.mxu1 %v1894_v19  ;;  %1341 = vmatprep.subr.bf16.mxu0 %v1895_v20  ;;  %v1915_v33 = vld [vmem:[%s2451_s7 + $0x2e4] ss:$16 sps:$4 sm:$0xff]   ;;  %v1918_v35 = vld [vmem:[%s2451_s7 + $0x2e0] ss:$16 sps:$4 sm:$0xff]   ;;  %v1986_v19 = vld [vmem:[%s2451_s7 + $0x248] ss:$16 sps:$4 sm:$0xff]  }
  0x68   : > { %1382 = vmatprep.subr.bf16.mxu1 %v1897_v21  ;;  %v1919_v36 = vld [vmem:[%s2451_s7 + $0x104] ss:$16 sps:$4 sm:$0xff]   ;;  %v1923_v38 = vld [vmem:[%s2451_s7 + $0x100] ss:$16 sps:$4 sm:$0xff]   ;;  %v1991_v20 = vld [vmem:[%s2451_s7 + $0x6c] ss:$16 sps:$4 sm:$0xff]  }
  0x69   : > { %v1921_v37 = vld [vmem:[%s2451_s7 + $0x304] ss:$16 sps:$4 sm:$0xff]   ;;  %v1924_v39 = vld [vmem:[%s2451_s7 + $0x300] ss:$16 sps:$4 sm:$0xff]   ;;  %v1994_v21 = vld [vmem:[%s2451_s7 + $0x26c] ss:$16 sps:$4 sm:$0xff]  }
  0x6a   : > { %1342 = vmatpush1.bf16.msra.mxu0 %v1899_v22  ;;  %v1925_v40 = vld [vmem:[%s2451_s7 + $0x124] ss:$16 sps:$4 sm:$0xff]   ;;  %v1929_v42 = vld [vmem:[%s2451_s7 + $0x120] ss:$16 sps:$4 sm:$0xff]   ;;  %v1989_v22 = vld [vmem:[%s2451_s7 + $0x68] ss:$16 sps:$4 sm:$0xff]  }
  0x6b   : > { %1383 = vmatpush1.bf16.msra.mxu1 %v1900_v23  ;;  %1343 = vmatprep.subr.bf16.mxu0 %v1901_v24  ;;  %v1927_v41 = vld [vmem:[%s2451_s7 + $0x324] ss:$16 sps:$4 sm:$0xff]   ;;  %v1930_v43 = vld [vmem:[%s2451_s7 + $0x320] ss:$16 sps:$4 sm:$0xff]   ;;  %v1992_v23 = vld [vmem:[%s2451_s7 + $0x268] ss:$16 sps:$4 sm:$0xff]  }
  0x6c   : > { %1384 = vmatprep.subr.bf16.mxu1 %v1903_v25  ;;  %v1931_v44 = vld [vmem:[%s2451_s7 + $0x144] ss:$16 sps:$4 sm:$0xff]   ;;  %v1935_v46 = vld [vmem:[%s2451_s7 + $0x140] ss:$16 sps:$4 sm:$0xff]   ;;  %v1995_v24 = vld [vmem:[%s2451_s7 + $0x88] ss:$16 sps:$4 sm:$0xff]  }
  0x6d   : > { %v1933_v45 = vld [vmem:[%s2451_s7 + $0x344] ss:$16 sps:$4 sm:$0xff]   ;;  %v1936_v47 = vld [vmem:[%s2451_s7 + $0x340] ss:$16 sps:$4 sm:$0xff]   ;;  %v1998_v25 = vld [vmem:[%s2451_s7 + $0x288] ss:$16 sps:$4 sm:$0xff]  }
  0x6e   : > { %1344 = vmatpush1.bf16.msra.mxu0 %v1905_v26  ;;  %v1937_v48 = vld [vmem:[%s2451_s7 + $0x164] ss:$16 sps:$4 sm:$0xff]   ;;  %v1941_v50 = vld [vmem:[%s2451_s7 + $0x160] ss:$16 sps:$4 sm:$0xff]   ;;  %v2003_v26 = vld [vmem:[%s2451_s7 + $0xac] ss:$16 sps:$4 sm:$0xff]  }
  0x6f   : > { %1385 = vmatpush1.bf16.msra.mxu1 %v1906_v27  ;;  %1345 = vmatprep.subr.bf16.mxu0 %v1907_v28  ;;  %v1939_v49 = vld [vmem:[%s2451_s7 + $0x364] ss:$16 sps:$4 sm:$0xff]   ;;  %v1942_v51 = vld [vmem:[%s2451_s7 + $0x360] ss:$16 sps:$4 sm:$0xff]   ;;  %v2006_v27 = vld [vmem:[%s2451_s7 + $0x2ac] ss:$16 sps:$4 sm:$0xff]  }
  0x70   : > { %1386 = vmatprep.subr.bf16.mxu1 %v1909_v29  ;;  %v1943_v52 = vld [vmem:[%s2451_s7 + $0x184] ss:$16 sps:$4 sm:$0xff]   ;;  %v1947_v54 = vld [vmem:[%s2451_s7 + $0x180] ss:$16 sps:$4 sm:$0xff]   ;;  %v2001_v28 = vld [vmem:[%s2451_s7 + $0xa8] ss:$16 sps:$4 sm:$0xff]  }
  0x71   : > { %v1945_v53 = vld [vmem:[%s2451_s7 + $0x384] ss:$16 sps:$4 sm:$0xff]   ;;  %v1948_v55 = vld [vmem:[%s2451_s7 + $0x380] ss:$16 sps:$4 sm:$0xff]   ;;  %v2004_v29 = vld [vmem:[%s2451_s7 + $0x2a8] ss:$16 sps:$4 sm:$0xff]  }
  0x72   : > { %1346 = vmatpush1.bf16.msra.mxu0 %v1911_v30  ;;  %v1949_v56 = vld [vmem:[%s2451_s7 + $0x1a4] ss:$16 sps:$4 sm:$0xff]   ;;  %v1953_v58 = vld [vmem:[%s2451_s7 + $0x1a0] ss:$16 sps:$4 sm:$0xff]   ;;  %v2009_v30 = vld [vmem:[%s2451_s7 + $0xcc] ss:$16 sps:$4 sm:$0xff]  }
  0x73   : > { %1387 = vmatpush1.bf16.msra.mxu1 %v1912_v31  ;;  %1347 = vmatprep.subr.bf16.mxu0 %v1913_v32  ;;  %v1951_v57 = vld [vmem:[%s2451_s7 + $0x3a4] ss:$16 sps:$4 sm:$0xff]   ;;  %v1954_v59 = vld [vmem:[%s2451_s7 + $0x3a0] ss:$16 sps:$4 sm:$0xff]   ;;  %v2012_v31 = vld [vmem:[%s2451_s7 + $0x2cc] ss:$16 sps:$4 sm:$0xff]  }
  0x74   : > { %1388 = vmatprep.subr.bf16.mxu1 %v1915_v33  ;;  %v1955_v60 = vld [vmem:[%s2451_s7 + $0x1c4] ss:$16 sps:$4 sm:$0xff]   ;;  %v1959_v62 = vld [vmem:[%s2451_s7 + $0x1c0] ss:$16 sps:$4 sm:$0xff]   ;;  %v2007_v32 = vld [vmem:[%s2451_s7 + $0xc8] ss:$16 sps:$4 sm:$0xff]  }
  0x75   : > { %v1957_v61 = vld [vmem:[%s2451_s7 + $0x3c4] ss:$16 sps:$4 sm:$0xff]   ;;  %v1960_v63 = vld [vmem:[%s2451_s7 + $0x3c0] ss:$16 sps:$4 sm:$0xff]   ;;  %v2010_v33 = vld [vmem:[%s2451_s7 + $0x2c8] ss:$16 sps:$4 sm:$0xff]  }
  0x76   : > { %1348 = vmatpush1.bf16.msra.mxu0 %v1917_v34  ;;  %v1961_v4 = vld [vmem:[%s2451_s7 + $0x1e4] ss:$16 sps:$4 sm:$0xff]   ;;  %v1965_v6 = vld [vmem:[%s2451_s7 + $0x1e0] ss:$16 sps:$4 sm:$0xff]   ;;  %v2015_v34 = vld [vmem:[%s2451_s7 + $0xec] ss:$16 sps:$4 sm:$0xff]  }
  0x77   : > { %1389 = vmatpush1.bf16.msra.mxu1 %v1918_v35  ;;  %1349 = vmatprep.subr.bf16.mxu0 %v1919_v36  ;;  %v1963_v5 = vld [vmem:[%s2451_s7 + $0x3e4] ss:$16 sps:$4 sm:$0xff]   ;;  %v1966_v7 = vld [vmem:[%s2451_s7 + $0x3e0] ss:$16 sps:$4 sm:$0xff]   ;;  %v2018_v35 = vld [vmem:[%s2451_s7 + $0x2ec] ss:$16 sps:$4 sm:$0xff]  }
  0x78   : > { %1390 = vmatprep.subr.bf16.mxu1 %v1921_v37  ;;  %v2013_v36 = vld [vmem:[%s2451_s7 + $0xe8] ss:$16 sps:$4 sm:$0xff]   ;;  %s1691_s12 = sshll.u32 %s2630_s8, 2 }
  0x79   : > { %v2016_v37 = vld [vmem:[%s2451_s7 + $0x2e8] ss:$16 sps:$4 sm:$0xff]   ;;  %s535_s19 = scalar_lea.vmem %s2622_s3, %s1691_s12 }
  0x7a   : > { %1350 = vmatpush1.bf16.msra.mxu0 %v1923_v38  ;;  %v2021_v38 = vld [vmem:[%s2451_s7 + $0x10c] ss:$16 sps:$4 sm:$0xff]  }
  0x7b   : > { %1391 = vmatpush1.bf16.msra.mxu1 %v1924_v39  ;;  %1351 = vmatprep.subr.bf16.mxu0 %v1925_v40  ;;  %v2024_v39 = vld [vmem:[%s2451_s7 + $0x30c] ss:$16 sps:$4 sm:$0xff]   ;;  %v2019_v40 = vld [vmem:[%s2451_s7 + $0x108] ss:$16 sps:$4 sm:$0xff]  }
  0x7c   : > { %1392 = vmatprep.subr.bf16.mxu1 %v1927_v41  ;;  %v2022_v41 = vld [vmem:[%s2451_s7 + $0x308] ss:$16 sps:$4 sm:$0xff]  }
  0x7e   : > { %1352 = vmatpush1.bf16.msra.mxu0 %v1929_v42  ;;  %v2027_v42 = vld [vmem:[%s2451_s7 + $0x12c] ss:$16 sps:$4 sm:$0xff]  }
  0x7f   : > { %1393 = vmatpush1.bf16.msra.mxu1 %v1930_v43  ;;  %1353 = vmatprep.subr.bf16.mxu0 %v1931_v44  ;;  %v2030_v43 = vld [vmem:[%s2451_s7 + $0x32c] ss:$16 sps:$4 sm:$0xff]   ;;  %v2025_v44 = vld [vmem:[%s2451_s7 + $0x128] ss:$16 sps:$4 sm:$0xff]  }
  0x80   : > { %1394 = vmatprep.subr.bf16.mxu1 %v1933_v45  ;;  %v2028_v45 = vld [vmem:[%s2451_s7 + $0x328] ss:$16 sps:$4 sm:$0xff]  }
  0x82   : > { %1354 = vmatpush1.bf16.msra.mxu0 %v1935_v46  ;;  %v2033_v46 = vld [vmem:[%s2451_s7 + $0x14c] ss:$16 sps:$4 sm:$0xff]  }
  0x83   : > { %1395 = vmatpush1.bf16.msra.mxu1 %v1936_v47  ;;  %1355 = vmatprep.subr.bf16.mxu0 %v1937_v48  ;;  %v2036_v47 = vld [vmem:[%s2451_s7 + $0x34c] ss:$16 sps:$4 sm:$0xff]   ;;  %v2031_v48 = vld [vmem:[%s2451_s7 + $0x148] ss:$16 sps:$4 sm:$0xff]  }
  0x84   : > { %1396 = vmatprep.subr.bf16.mxu1 %v1939_v49  ;;  %v2034_v49 = vld [vmem:[%s2451_s7 + $0x348] ss:$16 sps:$4 sm:$0xff]  }
  0x86   : > { %1356 = vmatpush1.bf16.msra.mxu0 %v1941_v50  ;;  %v2039_v50 = vld [vmem:[%s2451_s7 + $0x16c] ss:$16 sps:$4 sm:$0xff]  }
  0x87   : > { %1397 = vmatpush1.bf16.msra.mxu1 %v1942_v51  ;;  %1357 = vmatprep.subr.bf16.mxu0 %v1943_v52  ;;  %v2042_v51 = vld [vmem:[%s2451_s7 + $0x36c] ss:$16 sps:$4 sm:$0xff]   ;;  %v2037_v52 = vld [vmem:[%s2451_s7 + $0x168] ss:$16 sps:$4 sm:$0xff]  }
  0x88   : > { %1398 = vmatprep.subr.bf16.mxu1 %v1945_v53  ;;  %v2040_v53 = vld [vmem:[%s2451_s7 + $0x368] ss:$16 sps:$4 sm:$0xff]  }
  0x8a   : > { %1358 = vmatpush1.bf16.msra.mxu0 %v1947_v54  ;;  %v2045_v54 = vld [vmem:[%s2451_s7 + $0x18c] ss:$16 sps:$4 sm:$0xff]  }
  0x8b   : > { %1399 = vmatpush1.bf16.msra.mxu1 %v1948_v55  ;;  %1359 = vmatprep.subr.bf16.mxu0 %v1949_v56  ;;  %v2048_v55 = vld [vmem:[%s2451_s7 + $0x38c] ss:$16 sps:$4 sm:$0xff]   ;;  %v2043_v56 = vld [vmem:[%s2451_s7 + $0x188] ss:$16 sps:$4 sm:$0xff]  }
  0x8c   : > { %1400 = vmatprep.subr.bf16.mxu1 %v1951_v57  ;;  %v2046_v57 = vld [vmem:[%s2451_s7 + $0x388] ss:$16 sps:$4 sm:$0xff]  }
  0x8e   : > { %1360 = vmatpush1.bf16.msra.mxu0 %v1953_v58  ;;  %v2051_v58 = vld [vmem:[%s2451_s7 + $0x1ac] ss:$16 sps:$4 sm:$0xff]  }
  0x8f   : > { %1401 = vmatpush1.bf16.msra.mxu1 %v1954_v59  ;;  %1361 = vmatprep.subr.bf16.mxu0 %v1955_v60  ;;  %v2054_v59 = vld [vmem:[%s2451_s7 + $0x3ac] ss:$16 sps:$4 sm:$0xff]   ;;  %v2049_v60 = vld [vmem:[%s2451_s7 + $0x1a8] ss:$16 sps:$4 sm:$0xff]  }
  0x90   : > { %1402 = vmatprep.subr.bf16.mxu1 %v1957_v61  ;;  %v2052_v61 = vld [vmem:[%s2451_s7 + $0x3a8] ss:$16 sps:$4 sm:$0xff]  }
  0x92   : > { %1362 = vmatpush1.bf16.msra.mxu0 %v1959_v62  ;;  %v2057_v62 = vld [vmem:[%s2451_s7 + $0x1cc] ss:$16 sps:$4 sm:$0xff]  }
  0x93   : > { %1403 = vmatpush1.bf16.msra.mxu1 %v1960_v63  ;;  %1363 = vmatprep.subr.bf16.mxu0 %v1961_v4  ;;  %v2060_v63 = vld [vmem:[%s2451_s7 + $0x3cc] ss:$16 sps:$4 sm:$0xff]   ;;  %v2055_v4 = vld [vmem:[%s2451_s7 + $0x1c8] ss:$16 sps:$4 sm:$0xff]  }
  0x94   : > { %1404 = vmatprep.subr.bf16.mxu1 %v1963_v5  ;;  %v2058_v5 = vld [vmem:[%s2451_s7 + $0x3c8] ss:$16 sps:$4 sm:$0xff]  }
  0x96   : > { %1364 = vmatpush1.bf16.msra.mxu0 %v1965_v6  ;;  %v2063_v6 = vld [vmem:[%s2451_s7 + $0x1ec] ss:$16 sps:$4 sm:$0xff]  }
  0x97   : > { %1405 = vmatpush1.bf16.msra.mxu1 %v1966_v7  ;;  %1415 = vmatprep.subr.bf16.mxu0 %v1973_v8  ;;  %v2066_v7 = vld [vmem:[%s2451_s7 + $0x3ec] ss:$16 sps:$4 sm:$0xff]   ;;  %v2061_v8 = vld [vmem:[%s2451_s7 + $0x1e8] ss:$16 sps:$4 sm:$0xff]  }
  0x98   : > { %1456 = vmatprep.subr.bf16.mxu1 %v1976_v9  ;;  %v2064_v9 = vld [vmem:[%s2451_s7 + $0x3e8] ss:$16 sps:$4 sm:$0xff]  }
  0x99   : > { %1366 = vmatmul.mubr.bf16.vlgmr.msra.gmra.mrb[0].mxu0 %v2523_v10 }
  0x9a   : > { %1407 = vmatmul.mubr.bf16.vlgmr.msra.gmra.mrb[0].mxu1 %v2527_v11  ;;  %1416 = vmatpush1.bf16.msra.mxu0 %v1971_v12  ;;  %v1514_v12 = vlaneseq }
  0x9b   : > { %1457 = vmatpush1.bf16.msra.mxu1 %v1974_v13  ;;  %1417 = vmatprep.subr.bf16.mxu0 %v1979_v14 }
  0x9c   : > { %1458 = vmatprep.subr.bf16.mxu1 %v1982_v15  ;;  %1447 = vmatprep.mubr.bf16.mxu0 %v2445_v2  ;;  %v1997_v2 = vld [vmem:[%s2451_s7 + $0x8c] ss:$16 sps:$4 sm:$0xff]   ;;  %v1515_v13 = vshrl.u32 %v1514_v12, 7  ;;  %v1512_v15 = vld [vmem:[%s525_s11] sm:$0xf] }
  0x9d   : > { %1488 = vmatprep.mubr.bf16.mxu1 %v2449_v3  ;;  %v2000_v3 = vld [vmem:[%s2451_s7 + $0x28c] ss:$16 sps:$4 sm:$0xff]  }
  0x9e   : > { %1418 = vmatpush1.bf16.msra.mxu0 %v1977_v0  ;;  %v1524_v14 = vsub.s32 2, %v1515_v13  ;;  %v1528_v0 = vsub.s32 3, %v1515_v13 }
  0x9f   : > { %1459 = vmatpush1.bf16.msra.mxu1 %v1980_v16  ;;  %1419 = vmatprep.subr.bf16.mxu0 %v1985_v1 }
  0xa0   : > { %1460 = vmatprep.subr.bf16.mxu1 %v1988_v17  ;;  %v1525_v16 = vrot.slane %v1512_v15, %v1524_v14  ;;  %v1529_v1 = vrot.slane %v1512_v15, %v1528_v0  ;;  %v1516_v17 = vsub.s32 0, %v1515_v13 }
  0xa2   : > { %1420 = vmatpush1.bf16.msra.mxu0 %v1983_v18  ;;  %v1520_v18 = vsub.s32 1, %v1515_v13 }
  0xa3   : > { %1461 = vmatpush1.bf16.msra.mxu1 %v1986_v19  ;;  %1421 = vmatprep.subr.bf16.mxu0 %v1991_v20  ;;  %v1517_v19 = vrot.slane %v1512_v15, %v1516_v17 }
  0xa4   : > { %1462 = vmatprep.subr.bf16.mxu1 %v1994_v21 }
  0xa6   : > { %1422 = vmatpush1.bf16.msra.mxu0 %v1989_v22 }
  0xa7   : > { %1463 = vmatpush1.bf16.msra.mxu1 %v1992_v23  ;;  %1423 = vmatprep.subr.bf16.mxu0 %v1997_v2 }
  0xa8   : > { %1464 = vmatprep.subr.bf16.mxu1 %v2000_v3 }
  0xaa   : > { %1424 = vmatpush1.bf16.msra.mxu0 %v1995_v24 }
  0xab   : > { %1465 = vmatpush1.bf16.msra.mxu1 %v1998_v25  ;;  %1425 = vmatprep.subr.bf16.mxu0 %v2003_v26 }
  0xac   : > { %1466 = vmatprep.subr.bf16.mxu1 %v2006_v27 }
  0xae   : > { %1426 = vmatpush1.bf16.msra.mxu0 %v2001_v28 }
  0xaf   : > { %1467 = vmatpush1.bf16.msra.mxu1 %v2004_v29  ;;  %1427 = vmatprep.subr.bf16.mxu0 %v2009_v30 }
  0xb0   : > { %1468 = vmatprep.subr.bf16.mxu1 %v2012_v31 }
  0xb2   : > { %1428 = vmatpush1.bf16.msra.mxu0 %v2007_v32 }
  0xb3   : > { %1469 = vmatpush1.bf16.msra.mxu1 %v2010_v33  ;;  %1429 = vmatprep.subr.bf16.mxu0 %v2015_v34 }
  0xb4   : > { %1470 = vmatprep.subr.bf16.mxu1 %v2018_v35 }
  0xb6   : > { %1430 = vmatpush1.bf16.msra.mxu0 %v2013_v36 }
  0xb7   : > { %1471 = vmatpush1.bf16.msra.mxu1 %v2016_v37  ;;  %1431 = vmatprep.subr.bf16.mxu0 %v2021_v38 }
  0xb8   : > { %1472 = vmatprep.subr.bf16.mxu1 %v2024_v39 }
  0xba   : > { %1432 = vmatpush1.bf16.msra.mxu0 %v2019_v40 }
  0xbb   : > { %1473 = vmatpush1.bf16.msra.mxu1 %v2022_v41  ;;  %1433 = vmatprep.subr.bf16.mxu0 %v2027_v42 }
  0xbc   : > { %1474 = vmatprep.subr.bf16.mxu1 %v2030_v43 }
  0xbe   : > { %1434 = vmatpush1.bf16.msra.mxu0 %v2025_v44 }
  0xbf   : > { %1475 = vmatpush1.bf16.msra.mxu1 %v2028_v45  ;;  %1435 = vmatprep.subr.bf16.mxu0 %v2033_v46 }
  0xc0   : > { %1476 = vmatprep.subr.bf16.mxu1 %v2036_v47 }
  0xc2   : > { %1436 = vmatpush1.bf16.msra.mxu0 %v2031_v48 }
  0xc3   : > { %1477 = vmatpush1.bf16.msra.mxu1 %v2034_v49  ;;  %1437 = vmatprep.subr.bf16.mxu0 %v2039_v50 }
  0xc4   : > { %1478 = vmatprep.subr.bf16.mxu1 %v2042_v51 }
  0xc6   : > { %1438 = vmatpush1.bf16.msra.mxu0 %v2037_v52 }
  0xc7   : > { %1479 = vmatpush1.bf16.msra.mxu1 %v2040_v53  ;;  %1439 = vmatprep.subr.bf16.mxu0 %v2045_v54 }
  0xc8   : > { %1480 = vmatprep.subr.bf16.mxu1 %v2048_v55 }
  0xca   : > { %1440 = vmatpush1.bf16.msra.mxu0 %v2043_v56 }
  0xcb   : > { %1481 = vmatpush1.bf16.msra.mxu1 %v2046_v57  ;;  %1441 = vmatprep.subr.bf16.mxu0 %v2051_v58 }
  0xcc   : > { %1482 = vmatprep.subr.bf16.mxu1 %v2054_v59 }
  0xce   : > { %1442 = vmatpush1.bf16.msra.mxu0 %v2049_v60 }
  0xcf   : > { %1483 = vmatpush1.bf16.msra.mxu1 %v2052_v61  ;;  %1443 = vmatprep.subr.bf16.mxu0 %v2057_v62 }
  0xd0   : > { %1484 = vmatprep.subr.bf16.mxu1 %v2060_v63 }
  0xd2   : > { %1444 = vmatpush1.bf16.msra.mxu0 %v2055_v4 }
  0xd3   : > { %1485 = vmatpush1.bf16.msra.mxu1 %v2058_v5  ;;  %1445 = vmatprep.subr.bf16.mxu0 %v2063_v6 }
  0xd4   : > { %1486 = vmatprep.subr.bf16.mxu1 %v2066_v7 }
  0xd6   : > { %1446 = vmatpush1.bf16.msra.mxu0 %v2061_v8 }
  0xd7   : > { %1487 = vmatpush1.bf16.msra.mxu1 %v2064_v9 }
  0xd9   : > { %1448 = vmatmul.mubr.bf16.vlgmr.msra.gmra.mrb[4].mxu0 %v2523_v10 }
  0xda   : > { %1489 = vmatmul.mubr.bf16.vlgmr.msra.gmra.mrb[4].mxu1 %v2527_v11  ;;  %v1521_v11 = vrot.slane %v1512_v15, %v1520_v18 }
 0x16c   : > { %v1367_v10 = vpop.f32.mrb[0].mxu0 }
 0x16d   : > { %v1408_v20 = vpop.f32.mrb[0].mxu1  ;;  %v1369_v22 = vpop.f32.mrb[1].mxu0 }
 0x16e   : > { %v1409_v21 = vadd.f32 %v1408_v20, %v1367_v10  ;;  %v1410_v23 = vpop.f32.mrb[1].mxu1  ;;  %v1371_v3 = vpop.f32.mrb[2].mxu0 }
 0x16f   : > { %v1411_v2 = vadd.f32 %v1410_v23, %v1369_v22  ;;  %v1412_v24 = vpop.f32.mrb[2].mxu1  ;;  %v1372_v26 = vpop.f32.mrb[3].mxu0 }
 0x170   : > { %v1534_v25 = vadd.f32 %v1517_v19, %v1409_v21  ;;  %v1413_v27 = vpop.f32.mrb[3].mxu1 }
 0x171   : > { %v1535_v28 = vadd.f32 %v1521_v11, %v1411_v2 }
 0x173   : > { %v1829_v29 = vpack.c.bf16 %v1535_v28, %v1534_v25 }
 0x175   : > { %1554 = vst [vmem:[%s535_s19] sm:$0xff] %v1829_v29 }
 0x1ac   : > { %v1449_v30 = vpop.f32.mrb[4].mxu0 }
 0x1ad   : > { %v1490_v31 = vpop.f32.mrb[4].mxu1  ;;  %v1451_v33 = vpop.f32.mrb[5].mxu0 }
 0x1ae   : > { %v1491_v32 = vadd.f32 %v1490_v31, %v1449_v30  ;;  %v1492_v34 = vpop.f32.mrb[5].mxu1  ;;  %v1453_v36 = vpop.f32.mrb[6].mxu0 }
 0x1af   : > { %v1493_v35 = vadd.f32 %v1492_v34, %v1451_v33  ;;  %v1494_v37 = vpop.f32.mrb[6].mxu1  ;;  %v1454_v39 = vpop.f32.mrb[7].mxu0 }
 0x1b0   : > { %v1536_v38 = vadd.f32 %v1525_v16, %v1491_v32  ;;  %v1495_v40 = vpop.f32.mrb[7].mxu1 }
 0x1b1   : > { %v1537_v41 = vadd.f32 %v1529_v1, %v1493_v35 }
 0x1b3   : > { %v1830_v42 = vpack.c.bf16 %v1537_v41, %v1536_v38 }
 0x1b5   : > { %1555 = vst [vmem:[%s535_s19 + $0x8] sm:$0xff] %v1830_v42 }
 0x1b6 PF: > { %s13_s16 = sadd.s32 1, %s2105_s16   ;;  %s2623_s12 = smov %s2093_s13 }
 0x1b7   : > { %p10_p10 = scmp.ge.s32.totalorder %s13_s16, 5   ;;  %s2624_s13 = smov %s2162_s20 }
 0x1b8   : > { %s2625_s14 = smov %s2101_s15  ;;  %s2626_s15 = smov %s2628_s17 }
 0x1b9   :  { %12 = sbr.rel (!%p10_p10) target bundleno = 3 (0x3), region = 104 }

// kernel: _lambda_.24
= control target key start
LH: loop header
LB: loop body
LE: loop exit
PB: predicated region body
PF: predicated region fallthrough
CT: control target
= control target key end

     0   :  { %s3209_s15 = smov 0   ;;  %s3211_s16 = smov 0   ;;  %s3571_s0 = inlined_call_operand.vmem [shape: bf16[8,2048], index: 0, kind: input, shape index: {}]   ;;  %s3572_s1 = inlined_call_operand.vmem [shape: bf16[2048,512], index: 1, kind: input, shape index: {}]   ;;  %s3573_s2 = inlined_call_operand.vmem [shape: f32[1,512], index: 2, kind: input, shape index: {}]   ;;  %s3574_s3 = inlined_call_operand.vmem [shape: bf16[8,512], index: 3, kind: input, shape index: {}]   ;;  %s3575_s4 = inlined_call_operand.vmem [shape: bf16[8,512], index: 4, kind: output, shape index: {}]  }
   0x1   :  { %s3213_s17 = smov 0  }
   0x2 LB: > { %s26_s18 = sadd.s32 1, %s3177_s16  ;;  %p2461_p0 = scmp.ge.s32.totalorder %s3181_s17, 1  ;;  %s3181_s17 = sphi %s3213_s17, %s14_s17   ;;  %s3177_s16 = sphi %s3211_s16, %s3577_s16   ;;  %s3173_s15 = sphi %s3209_s15, %s3576_s15  }
   0x3   : > { %p27_p1 = scmp.ge.s32.totalorder %s26_s18, 2  ;;  %p236_p2 = scmp.lt.s32.totalorder %s3181_s17, 3 }
   0x5   : > { %s3579_s18 = smov (%p27_p1, %s26_s18), 0  ;;  %p237_p3 = pnand %p2461_p0, %p236_p2 }
   0x6   : > { %s2462_s19 = sshll.u32 (!%p237_p3), %s3173_s15, 3  ;;  %s2464_s20 = sshll.u32 (!%p237_p3), %s3173_s15, 7 }
   0x7   : > { %240 = sbr.rel (%p237_p3) target bundleno = 515 (0x203), region = 36  ;;  %p296_p4 = scmp.lt.s32.totalorder (!%p237_p3), %s2462_s19, 15 }
   0x8   : > { %p305_p5 = scmp.lt.s32.totalorder (!%p237_p3), %s2464_s20, 255  ;;  %p2467_p6 = scmp.ne.s32.totalorder (!%p237_p3), %s3173_s15, 0 }
   0xe   : > { %s3581_s19 = smov (!%p296_p4, %s2462_s19), 15  ;;  %s3583_s20 = smov (!%p305_p5, %s2464_s20), 255 }
   0xf   : > { %s2463_s21 = sshll.u32 %s3581_s19, 2  ;;  %s2739_s25 = sshll.u32 %s3583_s20, 4  ;;  %v3183_v0 = vmov (!%p2467_p6), 0.0  }
  0x10   : > { %s3234_s24 = scalar_lea.vmem %s3571_s0, %s2463_s21  ;;  %s3239_s28 = scalar_lea.vmem %s3572_s1, %s2739_s25  ;;  %344 = vst [vmem:[#allocation2] sm:$0xff] (!%p2467_p6), %v3183_v0  ;;  %345 = vst [vmem:[#allocation2 + $0x8] sm:$0xff] (!%p2467_p6), %v3183_v0 }
  0x11   : > { %343 = sbr.rel (%p2467_p6) target bundleno = 24 (0x18), region = 40  ;;  %346 = vst [vmem:[#allocation2 + $0x10] sm:$0xff] (!%p2467_p6), %v3183_v0  ;;  %347 = vst [vmem:[#allocation2 + $0x18] sm:$0xff] (!%p2467_p6), %v3183_v0 }
  0x18 PF: > { %v2767_v1 = vld [vmem:[%s3239_s28 + $0x4] ss:$16 sps:$4 sm:$0xff]   ;;  %v2771_v3 = vld [vmem:[%s3239_s28] ss:$16 sps:$4 sm:$0xff]   ;;  %v349_v49 = vld [vmem:[%s3234_s24 + $0x8] sm:$0xff]  ;;  %p2732_p7 = scmp.ne.s32.totalorder %s3173_s15, 1 }
  0x19   : > { %v2769_v2 = vld [vmem:[%s3239_s28 + $0x204] ss:$16 sps:$4 sm:$0xff]   ;;  %1920 = vmatprep.subr.bf16.mxu0 %v2767_v1  ;;  %v2772_v4 = vld [vmem:[%s3239_s28 + $0x200] ss:$16 sps:$4 sm:$0xff]   ;;  %v3294_v52 = vcombine.high %v349_v49, %v349_v49 }
  0x1a   : > { %1961 = vmatprep.subr.bf16.mxu1 %v2769_v2  ;;  %v2773_v5 = vld [vmem:[%s3239_s28 + $0x24] ss:$16 sps:$4 sm:$0xff]   ;;  %1921 = vmatpush1.bf16.msra.mxu0 %v2771_v3  ;;  %v2777_v7 = vld [vmem:[%s3239_s28 + $0x20] ss:$16 sps:$4 sm:$0xff]  }
  0x1b   : > { %1962 = vmatpush1.bf16.msra.mxu1 %v2772_v4  ;;  %v2775_v6 = vld [vmem:[%s3239_s28 + $0x224] ss:$16 sps:$4 sm:$0xff]   ;;  %1922 = vmatprep.subr.bf16.mxu0 %v2773_v5  ;;  %v2778_v8 = vld [vmem:[%s3239_s28 + $0x220] ss:$16 sps:$4 sm:$0xff]  }
  0x1c   : > { %1963 = vmatprep.subr.bf16.mxu1 %v2775_v6  ;;  %v2779_v9 = vld [vmem:[%s3239_s28 + $0x44] ss:$16 sps:$4 sm:$0xff]   ;;  %v2783_v11 = vld [vmem:[%s3239_s28 + $0x40] ss:$16 sps:$4 sm:$0xff]   ;;  %1993 = vmatprep.mubr.bf16.mxu1 %v3294_v52 }
  0x1d   : > { %v2781_v10 = vld [vmem:[%s3239_s28 + $0x244] ss:$16 sps:$4 sm:$0xff]   ;;  %v2784_v12 = vld [vmem:[%s3239_s28 + $0x240] ss:$16 sps:$4 sm:$0xff]  }
  0x1e   : > { %1923 = vmatpush1.bf16.msra.mxu0 %v2777_v7  ;;  %v2785_v13 = vld [vmem:[%s3239_s28 + $0x64] ss:$16 sps:$4 sm:$0xff]   ;;  %v2789_v15 = vld [vmem:[%s3239_s28 + $0x60] ss:$16 sps:$4 sm:$0xff]  }
  0x1f   : > { %1964 = vmatpush1.bf16.msra.mxu1 %v2778_v8  ;;  %1924 = vmatprep.subr.bf16.mxu0 %v2779_v9  ;;  %v2787_v14 = vld [vmem:[%s3239_s28 + $0x264] ss:$16 sps:$4 sm:$0xff]   ;;  %v2790_v16 = vld [vmem:[%s3239_s28 + $0x260] ss:$16 sps:$4 sm:$0xff]   ;;  %v3318_v8 = vcombine.low %v349_v49, %v349_v49 }
  0x20   : > { %1965 = vmatprep.subr.bf16.mxu1 %v2781_v10  ;;  %v2791_v17 = vld [vmem:[%s3239_s28 + $0x84] ss:$16 sps:$4 sm:$0xff]   ;;  %v2795_v19 = vld [vmem:[%s3239_s28 + $0x80] ss:$16 sps:$4 sm:$0xff]  }
  0x21   : > { %v2793_v18 = vld [vmem:[%s3239_s28 + $0x284] ss:$16 sps:$4 sm:$0xff]   ;;  %v2796_v20 = vld [vmem:[%s3239_s28 + $0x280] ss:$16 sps:$4 sm:$0xff]  }
  0x22   : > { %1925 = vmatpush1.bf16.msra.mxu0 %v2783_v11  ;;  %v2797_v21 = vld [vmem:[%s3239_s28 + $0xa4] ss:$16 sps:$4 sm:$0xff]   ;;  %v2801_v23 = vld [vmem:[%s3239_s28 + $0xa0] ss:$16 sps:$4 sm:$0xff]  }
  0x23   : > { %1966 = vmatpush1.bf16.msra.mxu1 %v2784_v12  ;;  %1926 = vmatprep.subr.bf16.mxu0 %v2785_v13  ;;  %v2799_v22 = vld [vmem:[%s3239_s28 + $0x2a4] ss:$16 sps:$4 sm:$0xff]   ;;  %v2802_v24 = vld [vmem:[%s3239_s28 + $0x2a0] ss:$16 sps:$4 sm:$0xff]  }
  0x24   : > { %1967 = vmatprep.subr.bf16.mxu1 %v2787_v14  ;;  %v2803_v25 = vld [vmem:[%s3239_s28 + $0xc4] ss:$16 sps:$4 sm:$0xff]   ;;  %v2807_v27 = vld [vmem:[%s3239_s28 + $0xc0] ss:$16 sps:$4 sm:$0xff]  }
  0x25   : > { %v2805_v26 = vld [vmem:[%s3239_s28 + $0x2c4] ss:$16 sps:$4 sm:$0xff]   ;;  %v2808_v28 = vld [vmem:[%s3239_s28 + $0x2c0] ss:$16 sps:$4 sm:$0xff]  }
  0x26   : > { %1927 = vmatpush1.bf16.msra.mxu0 %v2789_v15  ;;  %v2809_v29 = vld [vmem:[%s3239_s28 + $0xe4] ss:$16 sps:$4 sm:$0xff]   ;;  %v2813_v31 = vld [vmem:[%s3239_s28 + $0xe0] ss:$16 sps:$4 sm:$0xff]  }
  0x27   : > { %1968 = vmatpush1.bf16.msra.mxu1 %v2790_v16  ;;  %1928 = vmatprep.subr.bf16.mxu0 %v2791_v17  ;;  %v2811_v30 = vld [vmem:[%s3239_s28 + $0x2e4] ss:$16 sps:$4 sm:$0xff]   ;;  %v2814_v32 = vld [vmem:[%s3239_s28 + $0x2e0] ss:$16 sps:$4 sm:$0xff]  }
  0x28   : > { %1969 = vmatprep.subr.bf16.mxu1 %v2793_v18  ;;  %v2815_v33 = vld [vmem:[%s3239_s28 + $0x104] ss:$16 sps:$4 sm:$0xff]   ;;  %v2819_v35 = vld [vmem:[%s3239_s28 + $0x100] ss:$16 sps:$4 sm:$0xff]  }
  0x29   : > { %v2817_v34 = vld [vmem:[%s3239_s28 + $0x304] ss:$16 sps:$4 sm:$0xff]   ;;  %v2820_v36 = vld [vmem:[%s3239_s28 + $0x300] ss:$16 sps:$4 sm:$0xff]  }
  0x2a   : > { %1929 = vmatpush1.bf16.msra.mxu0 %v2795_v19  ;;  %v2821_v37 = vld [vmem:[%s3239_s28 + $0x124] ss:$16 sps:$4 sm:$0xff]   ;;  %v2825_v39 = vld [vmem:[%s3239_s28 + $0x120] ss:$16 sps:$4 sm:$0xff]  }
  0x2b   : > { %1970 = vmatpush1.bf16.msra.mxu1 %v2796_v20  ;;  %1930 = vmatprep.subr.bf16.mxu0 %v2797_v21  ;;  %v2823_v38 = vld [vmem:[%s3239_s28 + $0x324] ss:$16 sps:$4 sm:$0xff]   ;;  %v2826_v40 = vld [vmem:[%s3239_s28 + $0x320] ss:$16 sps:$4 sm:$0xff]  }
  0x2c   : > { %1971 = vmatprep.subr.bf16.mxu1 %v2799_v22  ;;  %v2827_v41 = vld [vmem:[%s3239_s28 + $0x144] ss:$16 sps:$4 sm:$0xff]   ;;  %v2831_v43 = vld [vmem:[%s3239_s28 + $0x140] ss:$16 sps:$4 sm:$0xff]  }
  0x2d   : > { %v2829_v42 = vld [vmem:[%s3239_s28 + $0x344] ss:$16 sps:$4 sm:$0xff]   ;;  %v2832_v44 = vld [vmem:[%s3239_s28 + $0x340] ss:$16 sps:$4 sm:$0xff]  }
  0x2e   : > { %1931 = vmatpush1.bf16.msra.mxu0 %v2801_v23  ;;  %v2833_v45 = vld [vmem:[%s3239_s28 + $0x164] ss:$16 sps:$4 sm:$0xff]   ;;  %v2837_v50 = vld [vmem:[%s3239_s28 + $0x160] ss:$16 sps:$4 sm:$0xff]  }
  0x2f   : > { %1972 = vmatpush1.bf16.msra.mxu1 %v2802_v24  ;;  %1932 = vmatprep.subr.bf16.mxu0 %v2803_v25  ;;  %v2835_v46 = vld [vmem:[%s3239_s28 + $0x364] ss:$16 sps:$4 sm:$0xff]   ;;  %v2838_v51 = vld [vmem:[%s3239_s28 + $0x360] ss:$16 sps:$4 sm:$0xff]  }
  0x30   : > { %1973 = vmatprep.subr.bf16.mxu1 %v2805_v26  ;;  %v348_v47 = vld [vmem:[%s3234_s24] sm:$0xff] }
  0x31   : > { %v3289_v48 = vcombine.high %v348_v47, %v348_v47  ;;  %v2839_v53 = vld [vmem:[%s3239_s28 + $0x184] ss:$16 sps:$4 sm:$0xff]   ;;  %v2843_v55 = vld [vmem:[%s3239_s28 + $0x180] ss:$16 sps:$4 sm:$0xff]   ;;  %v3316_v7 = vcombine.low %v348_v47, %v348_v47 }
  0x32   : > { %1933 = vmatpush1.bf16.msra.mxu0 %v2807_v27  ;;  %v2841_v54 = vld [vmem:[%s3239_s28 + $0x384] ss:$16 sps:$4 sm:$0xff]   ;;  %v2844_v56 = vld [vmem:[%s3239_s28 + $0x380] ss:$16 sps:$4 sm:$0xff]  }
  0x33   : > { %1974 = vmatpush1.bf16.msra.mxu1 %v2808_v28  ;;  %1934 = vmatprep.subr.bf16.mxu0 %v2809_v29  ;;  %v2845_v57 = vld [vmem:[%s3239_s28 + $0x1a4] ss:$16 sps:$4 sm:$0xff]   ;;  %v2849_v59 = vld [vmem:[%s3239_s28 + $0x1a0] ss:$16 sps:$4 sm:$0xff]  }
  0x34   : > { %1975 = vmatprep.subr.bf16.mxu1 %v2811_v30  ;;  %1952 = vmatprep.mubr.bf16.mxu0 %v3289_v48  ;;  %v2847_v58 = vld [vmem:[%s3239_s28 + $0x3a4] ss:$16 sps:$4 sm:$0xff]   ;;  %v2850_v60 = vld [vmem:[%s3239_s28 + $0x3a0] ss:$16 sps:$4 sm:$0xff]  }
  0x35   : > { %v2851_v61 = vld [vmem:[%s3239_s28 + $0x1c4] ss:$16 sps:$4 sm:$0xff]   ;;  %v2855_v63 = vld [vmem:[%s3239_s28 + $0x1c0] ss:$16 sps:$4 sm:$0xff]  }
  0x36   : > { %1935 = vmatpush1.bf16.msra.mxu0 %v2813_v31  ;;  %v2853_v62 = vld [vmem:[%s3239_s28 + $0x3c4] ss:$16 sps:$4 sm:$0xff]   ;;  %v2856_v0 = vld [vmem:[%s3239_s28 + $0x3c0] ss:$16 sps:$4 sm:$0xff]  }
  0x37   : > { %1976 = vmatpush1.bf16.msra.mxu1 %v2814_v32  ;;  %1936 = vmatprep.subr.bf16.mxu0 %v2815_v33  ;;  %v2857_v1 = vld [vmem:[%s3239_s28 + $0x1e4] ss:$16 sps:$4 sm:$0xff]   ;;  %v2861_v3 = vld [vmem:[%s3239_s28 + $0x1e0] ss:$16 sps:$4 sm:$0xff]  }
  0x38   : > { %1977 = vmatprep.subr.bf16.mxu1 %v2817_v34  ;;  %v2859_v2 = vld [vmem:[%s3239_s28 + $0x3e4] ss:$16 sps:$4 sm:$0xff]   ;;  %v2862_v4 = vld [vmem:[%s3239_s28 + $0x3e0] ss:$16 sps:$4 sm:$0xff]   ;;  %v3350_v34 = vld [vmem:[%s3234_s24 + $0x18] sm:$0xff] }
  0x39   : > { %v2869_v5 = vld [vmem:[%s3239_s28 + $0x404] ss:$16 sps:$4 sm:$0xff]   ;;  %v2867_v9 = vld [vmem:[%s3239_s28 + $0x400] ss:$16 sps:$4 sm:$0xff]  }
  0x3a   : > { %1937 = vmatpush1.bf16.msra.mxu0 %v2819_v35  ;;  %v2872_v6 = vld [vmem:[%s3239_s28 + $0x604] ss:$16 sps:$4 sm:$0xff]   ;;  %v2870_v10 = vld [vmem:[%s3239_s28 + $0x600] ss:$16 sps:$4 sm:$0xff]  }
  0x3b   : > { %1978 = vmatpush1.bf16.msra.mxu1 %v2820_v36  ;;  %1938 = vmatprep.subr.bf16.mxu0 %v2821_v37  ;;  %v2875_v11 = vld [vmem:[%s3239_s28 + $0x424] ss:$16 sps:$4 sm:$0xff]   ;;  %v2873_v13 = vld [vmem:[%s3239_s28 + $0x420] ss:$16 sps:$4 sm:$0xff]  }
  0x3c   : > { %1979 = vmatprep.subr.bf16.mxu1 %v2823_v38  ;;  %v2878_v12 = vld [vmem:[%s3239_s28 + $0x624] ss:$16 sps:$4 sm:$0xff]   ;;  %v2876_v14 = vld [vmem:[%s3239_s28 + $0x620] ss:$16 sps:$4 sm:$0xff]   ;;  %v3360_v38 = vcombine.high %v3350_v34, %v3350_v34 }
  0x3d   : > { %v2881_v15 = vld [vmem:[%s3239_s28 + $0x444] ss:$16 sps:$4 sm:$0xff]   ;;  %v2879_v17 = vld [vmem:[%s3239_s28 + $0x440] ss:$16 sps:$4 sm:$0xff]  }
  0x3e   : > { %1939 = vmatpush1.bf16.msra.mxu0 %v2825_v39  ;;  %v2884_v16 = vld [vmem:[%s3239_s28 + $0x644] ss:$16 sps:$4 sm:$0xff]   ;;  %v2882_v18 = vld [vmem:[%s3239_s28 + $0x640] ss:$16 sps:$4 sm:$0xff]  }
  0x3f   : > { %1980 = vmatpush1.bf16.msra.mxu1 %v2826_v40  ;;  %1940 = vmatprep.subr.bf16.mxu0 %v2827_v41  ;;  %v2887_v19 = vld [vmem:[%s3239_s28 + $0x464] ss:$16 sps:$4 sm:$0xff]   ;;  %v2885_v21 = vld [vmem:[%s3239_s28 + $0x460] ss:$16 sps:$4 sm:$0xff]  }
  0x40   : > { %1981 = vmatprep.subr.bf16.mxu1 %v2829_v42  ;;  %v2890_v20 = vld [vmem:[%s3239_s28 + $0x664] ss:$16 sps:$4 sm:$0xff]   ;;  %v2888_v22 = vld [vmem:[%s3239_s28 + $0x660] ss:$16 sps:$4 sm:$0xff]  }
  0x41   : > { %v2893_v23 = vld [vmem:[%s3239_s28 + $0x484] ss:$16 sps:$4 sm:$0xff]   ;;  %v2891_v25 = vld [vmem:[%s3239_s28 + $0x480] ss:$16 sps:$4 sm:$0xff]  }
  0x42   : > { %1941 = vmatpush1.bf16.msra.mxu0 %v2831_v43  ;;  %v2896_v24 = vld [vmem:[%s3239_s28 + $0x684] ss:$16 sps:$4 sm:$0xff]   ;;  %v2894_v26 = vld [vmem:[%s3239_s28 + $0x680] ss:$16 sps:$4 sm:$0xff]  }
  0x43   : > { %1982 = vmatpush1.bf16.msra.mxu1 %v2832_v44  ;;  %1942 = vmatprep.subr.bf16.mxu0 %v2833_v45  ;;  %v2899_v27 = vld [vmem:[%s3239_s28 + $0x4a4] ss:$16 sps:$4 sm:$0xff]   ;;  %v2897_v29 = vld [vmem:[%s3239_s28 + $0x4a0] ss:$16 sps:$4 sm:$0xff]  }
  0x44   : > { %1983 = vmatprep.subr.bf16.mxu1 %v2835_v46  ;;  %v2902_v28 = vld [vmem:[%s3239_s28 + $0x6a4] ss:$16 sps:$4 sm:$0xff]   ;;  %v2900_v30 = vld [vmem:[%s3239_s28 + $0x6a0] ss:$16 sps:$4 sm:$0xff]  }
  0x45   : > { %v2905_v31 = vld [vmem:[%s3239_s28 + $0x4c4] ss:$16 sps:$4 sm:$0xff]   ;;  %v2903_v35 = vld [vmem:[%s3239_s28 + $0x4c0] ss:$16 sps:$4 sm:$0xff]  }
  0x46   : > { %1943 = vmatpush1.bf16.msra.mxu0 %v2837_v50  ;;  %v2908_v32 = vld [vmem:[%s3239_s28 + $0x6c4] ss:$16 sps:$4 sm:$0xff]   ;;  %v2906_v36 = vld [vmem:[%s3239_s28 + $0x6c0] ss:$16 sps:$4 sm:$0xff]  }
  0x47   : > { %1984 = vmatpush1.bf16.msra.mxu1 %v2838_v51  ;;  %1944 = vmatprep.subr.bf16.mxu0 %v2839_v53  ;;  %v3347_v33 = vld [vmem:[%s3234_s24 + $0x10] sm:$0xff] }
  0x48   : > { %1985 = vmatprep.subr.bf16.mxu1 %v2841_v54  ;;  %v3356_v37 = vcombine.high %v3347_v33, %v3347_v33  ;;  %v2911_v39 = vld [vmem:[%s3239_s28 + $0x4e4] ss:$16 sps:$4 sm:$0xff]   ;;  %v2909_v41 = vld [vmem:[%s3239_s28 + $0x4e0] ss:$16 sps:$4 sm:$0xff]  }
  0x49   : > { %v2914_v40 = vld [vmem:[%s3239_s28 + $0x6e4] ss:$16 sps:$4 sm:$0xff]   ;;  %v2912_v42 = vld [vmem:[%s3239_s28 + $0x6e0] ss:$16 sps:$4 sm:$0xff]  }
  0x4a   : > { %1945 = vmatpush1.bf16.msra.mxu0 %v2843_v55  ;;  %v2917_v43 = vld [vmem:[%s3239_s28 + $0x504] ss:$16 sps:$4 sm:$0xff]   ;;  %v2915_v45 = vld [vmem:[%s3239_s28 + $0x500] ss:$16 sps:$4 sm:$0xff]  }
  0x4b   : > { %1986 = vmatpush1.bf16.msra.mxu1 %v2844_v56  ;;  %1946 = vmatprep.subr.bf16.mxu0 %v2845_v57  ;;  %v2920_v44 = vld [vmem:[%s3239_s28 + $0x704] ss:$16 sps:$4 sm:$0xff]   ;;  %v2918_v46 = vld [vmem:[%s3239_s28 + $0x700] ss:$16 sps:$4 sm:$0xff]  }
  0x4c   : > { %1987 = vmatprep.subr.bf16.mxu1 %v2847_v58  ;;  %v2923_v47 = vld [vmem:[%s3239_s28 + $0x524] ss:$16 sps:$4 sm:$0xff]   ;;  %v2921_v50 = vld [vmem:[%s3239_s28 + $0x520] ss:$16 sps:$4 sm:$0xff]  }
  0x4d   : > { %v2926_v49 = vld [vmem:[%s3239_s28 + $0x724] ss:$16 sps:$4 sm:$0xff]   ;;  %v2924_v51 = vld [vmem:[%s3239_s28 + $0x720] ss:$16 sps:$4 sm:$0xff]  }
  0x4e   : > { %1947 = vmatpush1.bf16.msra.mxu0 %v2849_v59  ;;  %v2929_v53 = vld [vmem:[%s3239_s28 + $0x544] ss:$16 sps:$4 sm:$0xff]   ;;  %v2927_v55 = vld [vmem:[%s3239_s28 + $0x540] ss:$16 sps:$4 sm:$0xff]  }
  0x4f   : > { %1988 = vmatpush1.bf16.msra.mxu1 %v2850_v60  ;;  %1948 = vmatprep.subr.bf16.mxu0 %v2851_v61  ;;  %v2932_v54 = vld [vmem:[%s3239_s28 + $0x744] ss:$16 sps:$4 sm:$0xff]   ;;  %v2930_v56 = vld [vmem:[%s3239_s28 + $0x740] ss:$16 sps:$4 sm:$0xff]  }
  0x50   : > { %1989 = vmatprep.subr.bf16.mxu1 %v2853_v62  ;;  %v2935_v57 = vld [vmem:[%s3239_s28 + $0x564] ss:$16 sps:$4 sm:$0xff]   ;;  %v2933_v59 = vld [vmem:[%s3239_s28 + $0x560] ss:$16 sps:$4 sm:$0xff]  }
  0x51   : > { %v2938_v58 = vld [vmem:[%s3239_s28 + $0x764] ss:$16 sps:$4 sm:$0xff]   ;;  %v2936_v60 = vld [vmem:[%s3239_s28 + $0x760] ss:$16 sps:$4 sm:$0xff]  }
  0x52   : > { %1949 = vmatpush1.bf16.msra.mxu0 %v2855_v63  ;;  %v2941_v61 = vld [vmem:[%s3239_s28 + $0x584] ss:$16 sps:$4 sm:$0xff]   ;;  %v2939_v63 = vld [vmem:[%s3239_s28 + $0x580] ss:$16 sps:$4 sm:$0xff]  }
  0x53   : > { %1990 = vmatpush1.bf16.msra.mxu1 %v2856_v0  ;;  %1950 = vmatprep.subr.bf16.mxu0 %v2857_v1  ;;  %v2944_v62 = vld [vmem:[%s3239_s28 + $0x784] ss:$16 sps:$4 sm:$0xff]   ;;  %v2942_v0 = vld [vmem:[%s3239_s28 + $0x780] ss:$16 sps:$4 sm:$0xff]  }
  0x54   : > { %1991 = vmatprep.subr.bf16.mxu1 %v2859_v2  ;;  %v2947_v1 = vld [vmem:[%s3239_s28 + $0x5a4] ss:$16 sps:$4 sm:$0xff]  }
  0x55   : > { %v2950_v2 = vld [vmem:[%s3239_s28 + $0x7a4] ss:$16 sps:$4 sm:$0xff]  }
  0x56   : > { %1951 = vmatpush1.bf16.msra.mxu0 %v2861_v3  ;;  %v2945_v3 = vld [vmem:[%s3239_s28 + $0x5a0] ss:$16 sps:$4 sm:$0xff]  }
  0x57   : > { %1992 = vmatpush1.bf16.msra.mxu1 %v2862_v4  ;;  %2002 = vmatprep.subr.bf16.mxu0 %v2869_v5  ;;  %v2948_v4 = vld [vmem:[%s3239_s28 + $0x7a0] ss:$16 sps:$4 sm:$0xff]   ;;  %v2953_v5 = vld [vmem:[%s3239_s28 + $0x5c4] ss:$16 sps:$4 sm:$0xff]  }
  0x58   : > { %2043 = vmatprep.subr.bf16.mxu1 %v2872_v6  ;;  %v2956_v6 = vld [vmem:[%s3239_s28 + $0x7c4] ss:$16 sps:$4 sm:$0xff]  }
  0x59   : > { %1953 = vmatmul.mubr.bf16.vlgmr.msra.gmra.mrb[0].mxu0 %v3316_v7 }
  0x5a   : > { %1994 = vmatmul.mubr.bf16.vlgmr.msra.gmra.mrb[0].mxu1 %v3318_v8  ;;  %2003 = vmatpush1.bf16.msra.mxu0 %v2867_v9  ;;  %v2951_v9 = vld [vmem:[%s3239_s28 + $0x5c0] ss:$16 sps:$4 sm:$0xff]  }
  0x5b   : > { %2044 = vmatpush1.bf16.msra.mxu1 %v2870_v10  ;;  %2004 = vmatprep.subr.bf16.mxu0 %v2875_v11  ;;  %v2954_v10 = vld [vmem:[%s3239_s28 + $0x7c0] ss:$16 sps:$4 sm:$0xff]   ;;  %v2959_v11 = vld [vmem:[%s3239_s28 + $0x5e4] ss:$16 sps:$4 sm:$0xff]  }
  0x5c   : > { %2045 = vmatprep.subr.bf16.mxu1 %v2878_v12  ;;  %2034 = vmatprep.mubr.bf16.mxu0 %v3356_v37  ;;  %v2962_v12 = vld [vmem:[%s3239_s28 + $0x7e4] ss:$16 sps:$4 sm:$0xff]  }
  0x5d   : > { %2075 = vmatprep.mubr.bf16.mxu1 %v3360_v38 }
  0x5e   : > { %2005 = vmatpush1.bf16.msra.mxu0 %v2873_v13  ;;  %v2957_v13 = vld [vmem:[%s3239_s28 + $0x5e0] ss:$16 sps:$4 sm:$0xff]  }
  0x5f   : > { %2046 = vmatpush1.bf16.msra.mxu1 %v2876_v14  ;;  %2006 = vmatprep.subr.bf16.mxu0 %v2881_v15  ;;  %v2960_v14 = vld [vmem:[%s3239_s28 + $0x7e0] ss:$16 sps:$4 sm:$0xff]   ;;  %v2969_v15 = vld [vmem:[%s3239_s28 + $0xc] ss:$16 sps:$4 sm:$0xff]  }
  0x60   : > { %2047 = vmatprep.subr.bf16.mxu1 %v2884_v16  ;;  %v2972_v16 = vld [vmem:[%s3239_s28 + $0x20c] ss:$16 sps:$4 sm:$0xff]  }
  0x62   : > { %2007 = vmatpush1.bf16.msra.mxu0 %v2879_v17  ;;  %v3404_v17 = vcombine.low %v3347_v33, %v3347_v33  ;;  %v2991_v33 = vld [vmem:[%s3239_s28 + $0x88] ss:$16 sps:$4 sm:$0xff]  }
  0x63   : > { %2048 = vmatpush1.bf16.msra.mxu1 %v2882_v18  ;;  %2008 = vmatprep.subr.bf16.mxu0 %v2887_v19  ;;  %v3408_v18 = vcombine.low %v3350_v34, %v3350_v34  ;;  %v2967_v19 = vld [vmem:[%s3239_s28 + $0x8] ss:$16 sps:$4 sm:$0xff]  }
  0x64   : > { %2049 = vmatprep.subr.bf16.mxu1 %v2890_v20  ;;  %v2970_v20 = vld [vmem:[%s3239_s28 + $0x208] ss:$16 sps:$4 sm:$0xff]  }
  0x65   : > { %v2994_v34 = vld [vmem:[%s3239_s28 + $0x288] ss:$16 sps:$4 sm:$0xff]  }
  0x66   : > { %2009 = vmatpush1.bf16.msra.mxu0 %v2885_v21  ;;  %v2975_v21 = vld [vmem:[%s3239_s28 + $0x2c] ss:$16 sps:$4 sm:$0xff]  }
  0x67   : > { %2050 = vmatpush1.bf16.msra.mxu1 %v2888_v22  ;;  %2010 = vmatprep.subr.bf16.mxu0 %v2893_v23  ;;  %v2978_v22 = vld [vmem:[%s3239_s28 + $0x22c] ss:$16 sps:$4 sm:$0xff]   ;;  %v2973_v23 = vld [vmem:[%s3239_s28 + $0x28] ss:$16 sps:$4 sm:$0xff]  }
  0x68   : > { %2051 = vmatprep.subr.bf16.mxu1 %v2896_v24  ;;  %v2976_v24 = vld [vmem:[%s3239_s28 + $0x228] ss:$16 sps:$4 sm:$0xff]  }
  0x6a   : > { %2011 = vmatpush1.bf16.msra.mxu0 %v2891_v25  ;;  %v2981_v25 = vld [vmem:[%s3239_s28 + $0x4c] ss:$16 sps:$4 sm:$0xff]  }
  0x6b   : > { %2052 = vmatpush1.bf16.msra.mxu1 %v2894_v26  ;;  %2012 = vmatprep.subr.bf16.mxu0 %v2899_v27  ;;  %v2984_v26 = vld [vmem:[%s3239_s28 + $0x24c] ss:$16 sps:$4 sm:$0xff]   ;;  %v2979_v27 = vld [vmem:[%s3239_s28 + $0x48] ss:$16 sps:$4 sm:$0xff]  }
  0x6c   : > { %2053 = vmatprep.subr.bf16.mxu1 %v2902_v28  ;;  %v2982_v28 = vld [vmem:[%s3239_s28 + $0x248] ss:$16 sps:$4 sm:$0xff]  }
  0x6e   : > { %2013 = vmatpush1.bf16.msra.mxu0 %v2897_v29  ;;  %v2987_v29 = vld [vmem:[%s3239_s28 + $0x6c] ss:$16 sps:$4 sm:$0xff]  }
  0x6f   : > { %2054 = vmatpush1.bf16.msra.mxu1 %v2900_v30  ;;  %2014 = vmatprep.subr.bf16.mxu0 %v2905_v31  ;;  %v2990_v30 = vld [vmem:[%s3239_s28 + $0x26c] ss:$16 sps:$4 sm:$0xff]   ;;  %v2985_v31 = vld [vmem:[%s3239_s28 + $0x68] ss:$16 sps:$4 sm:$0xff]  }
  0x70   : > { %2055 = vmatprep.subr.bf16.mxu1 %v2908_v32  ;;  %v2988_v32 = vld [vmem:[%s3239_s28 + $0x268] ss:$16 sps:$4 sm:$0xff]  }
  0x72   : > { %2015 = vmatpush1.bf16.msra.mxu0 %v2903_v35  ;;  %v2999_v35 = vld [vmem:[%s3239_s28 + $0xac] ss:$16 sps:$4 sm:$0xff]  }
  0x73   : > { %2056 = vmatpush1.bf16.msra.mxu1 %v2906_v36  ;;  %2016 = vmatprep.subr.bf16.mxu0 %v2911_v39  ;;  %v3002_v36 = vld [vmem:[%s3239_s28 + $0x2ac] ss:$16 sps:$4 sm:$0xff]   ;;  %v2997_v39 = vld [vmem:[%s3239_s28 + $0xa8] ss:$16 sps:$4 sm:$0xff]  }
  0x74   : > { %2057 = vmatprep.subr.bf16.mxu1 %v2914_v40  ;;  %v3000_v40 = vld [vmem:[%s3239_s28 + $0x2a8] ss:$16 sps:$4 sm:$0xff]  }
  0x76   : > { %2017 = vmatpush1.bf16.msra.mxu0 %v2909_v41  ;;  %v3005_v41 = vld [vmem:[%s3239_s28 + $0xcc] ss:$16 sps:$4 sm:$0xff]  }
  0x77   : > { %2058 = vmatpush1.bf16.msra.mxu1 %v2912_v42  ;;  %2018 = vmatprep.subr.bf16.mxu0 %v2917_v43  ;;  %v3008_v42 = vld [vmem:[%s3239_s28 + $0x2cc] ss:$16 sps:$4 sm:$0xff]   ;;  %v3003_v43 = vld [vmem:[%s3239_s28 + $0xc8] ss:$16 sps:$4 sm:$0xff]  }
  0x78   : > { %2059 = vmatprep.subr.bf16.mxu1 %v2920_v44  ;;  %v3006_v44 = vld [vmem:[%s3239_s28 + $0x2c8] ss:$16 sps:$4 sm:$0xff]  }
  0x7a   : > { %2019 = vmatpush1.bf16.msra.mxu0 %v2915_v45  ;;  %v3011_v45 = vld [vmem:[%s3239_s28 + $0xec] ss:$16 sps:$4 sm:$0xff]  }
  0x7b   : > { %2060 = vmatpush1.bf16.msra.mxu1 %v2918_v46  ;;  %2020 = vmatprep.subr.bf16.mxu0 %v2923_v47  ;;  %v3014_v46 = vld [vmem:[%s3239_s28 + $0x2ec] ss:$16 sps:$4 sm:$0xff]   ;;  %v3009_v47 = vld [vmem:[%s3239_s28 + $0xe8] ss:$16 sps:$4 sm:$0xff]  }
  0x7c   : > { %2061 = vmatprep.subr.bf16.mxu1 %v2926_v49  ;;  %v3012_v49 = vld [vmem:[%s3239_s28 + $0x2e8] ss:$16 sps:$4 sm:$0xff]  }
  0x7e   : > { %2021 = vmatpush1.bf16.msra.mxu0 %v2921_v50  ;;  %v3017_v50 = vld [vmem:[%s3239_s28 + $0x10c] ss:$16 sps:$4 sm:$0xff]  }
  0x7f   : > { %2062 = vmatpush1.bf16.msra.mxu1 %v2924_v51  ;;  %2022 = vmatprep.subr.bf16.mxu0 %v2929_v53  ;;  %v3020_v51 = vld [vmem:[%s3239_s28 + $0x30c] ss:$16 sps:$4 sm:$0xff]   ;;  %v3015_v53 = vld [vmem:[%s3239_s28 + $0x108] ss:$16 sps:$4 sm:$0xff]  }
  0x80   : > { %2063 = vmatprep.subr.bf16.mxu1 %v2932_v54  ;;  %v3018_v54 = vld [vmem:[%s3239_s28 + $0x308] ss:$16 sps:$4 sm:$0xff]  }
  0x82   : > { %2023 = vmatpush1.bf16.msra.mxu0 %v2927_v55  ;;  %v3023_v55 = vld [vmem:[%s3239_s28 + $0x12c] ss:$16 sps:$4 sm:$0xff]  }
  0x83   : > { %2064 = vmatpush1.bf16.msra.mxu1 %v2930_v56  ;;  %2024 = vmatprep.subr.bf16.mxu0 %v2935_v57  ;;  %v3026_v56 = vld [vmem:[%s3239_s28 + $0x32c] ss:$16 sps:$4 sm:$0xff]   ;;  %v3021_v57 = vld [vmem:[%s3239_s28 + $0x128] ss:$16 sps:$4 sm:$0xff]  }
  0x84   : > { %2065 = vmatprep.subr.bf16.mxu1 %v2938_v58  ;;  %v3024_v58 = vld [vmem:[%s3239_s28 + $0x328] ss:$16 sps:$4 sm:$0xff]  }
  0x86   : > { %2025 = vmatpush1.bf16.msra.mxu0 %v2933_v59  ;;  %v3029_v59 = vld [vmem:[%s3239_s28 + $0x14c] ss:$16 sps:$4 sm:$0xff]  }
  0x87   : > { %2066 = vmatpush1.bf16.msra.mxu1 %v2936_v60  ;;  %2026 = vmatprep.subr.bf16.mxu0 %v2941_v61  ;;  %v3032_v60 = vld [vmem:[%s3239_s28 + $0x34c] ss:$16 sps:$4 sm:$0xff]   ;;  %v3027_v61 = vld [vmem:[%s3239_s28 + $0x148] ss:$16 sps:$4 sm:$0xff]  }
  0x88   : > { %2067 = vmatprep.subr.bf16.mxu1 %v2944_v62  ;;  %v3030_v62 = vld [vmem:[%s3239_s28 + $0x348] ss:$16 sps:$4 sm:$0xff]  }
  0x8a   : > { %2027 = vmatpush1.bf16.msra.mxu0 %v2939_v63  ;;  %v3035_v63 = vld [vmem:[%s3239_s28 + $0x16c] ss:$16 sps:$4 sm:$0xff]  }
  0x8b   : > { %2068 = vmatpush1.bf16.msra.mxu1 %v2942_v0  ;;  %2028 = vmatprep.subr.bf16.mxu0 %v2947_v1  ;;  %v3038_v0 = vld [vmem:[%s3239_s28 + $0x36c] ss:$16 sps:$4 sm:$0xff]   ;;  %v3033_v1 = vld [vmem:[%s3239_s28 + $0x168] ss:$16 sps:$4 sm:$0xff]  }
  0x8c   : > { %2069 = vmatprep.subr.bf16.mxu1 %v2950_v2  ;;  %v3036_v2 = vld [vmem:[%s3239_s28 + $0x368] ss:$16 sps:$4 sm:$0xff]  }
  0x8e   : > { %2029 = vmatpush1.bf16.msra.mxu0 %v2945_v3  ;;  %v3041_v3 = vld [vmem:[%s3239_s28 + $0x18c] ss:$16 sps:$4 sm:$0xff]  }
  0x8f   : > { %2070 = vmatpush1.bf16.msra.mxu1 %v2948_v4  ;;  %2030 = vmatprep.subr.bf16.mxu0 %v2953_v5  ;;  %v3044_v4 = vld [vmem:[%s3239_s28 + $0x38c] ss:$16 sps:$4 sm:$0xff]   ;;  %v3039_v5 = vld [vmem:[%s3239_s28 + $0x188] ss:$16 sps:$4 sm:$0xff]  }
  0x90   : > { %2071 = vmatprep.subr.bf16.mxu1 %v2956_v6  ;;  %v3042_v6 = vld [vmem:[%s3239_s28 + $0x388] ss:$16 sps:$4 sm:$0xff]  }
  0x92   : > { %2031 = vmatpush1.bf16.msra.mxu0 %v2951_v9  ;;  %v3047_v9 = vld [vmem:[%s3239_s28 + $0x1ac] ss:$16 sps:$4 sm:$0xff]  }
  0x93   : > { %2072 = vmatpush1.bf16.msra.mxu1 %v2954_v10  ;;  %2032 = vmatprep.subr.bf16.mxu0 %v2959_v11  ;;  %v3050_v10 = vld [vmem:[%s3239_s28 + $0x3ac] ss:$16 sps:$4 sm:$0xff]   ;;  %v3045_v11 = vld [vmem:[%s3239_s28 + $0x1a8] ss:$16 sps:$4 sm:$0xff]  }
  0x94   : > { %2073 = vmatprep.subr.bf16.mxu1 %v2962_v12  ;;  %v3048_v12 = vld [vmem:[%s3239_s28 + $0x3a8] ss:$16 sps:$4 sm:$0xff]  }
  0x96   : > { %2033 = vmatpush1.bf16.msra.mxu0 %v2957_v13  ;;  %v3053_v13 = vld [vmem:[%s3239_s28 + $0x1cc] ss:$16 sps:$4 sm:$0xff]  }
  0x97   : > { %2074 = vmatpush1.bf16.msra.mxu1 %v2960_v14  ;;  %2084 = vmatprep.subr.bf16.mxu0 %v2969_v15  ;;  %v3056_v14 = vld [vmem:[%s3239_s28 + $0x3cc] ss:$16 sps:$4 sm:$0xff]   ;;  %v3051_v15 = vld [vmem:[%s3239_s28 + $0x1c8] ss:$16 sps:$4 sm:$0xff]  }
  0x98   : > { %2125 = vmatprep.subr.bf16.mxu1 %v2972_v16  ;;  %v3054_v16 = vld [vmem:[%s3239_s28 + $0x3c8] ss:$16 sps:$4 sm:$0xff]  }
  0x99   : > { %2035 = vmatmul.mubr.bf16.vlgmr.msra.gmra.mrb[4].mxu0 %v3404_v17 }
  0x9a   : > { %2076 = vmatmul.mubr.bf16.vlgmr.msra.gmra.mrb[4].mxu1 %v3408_v18  ;;  %2085 = vmatpush1.bf16.msra.mxu0 %v2967_v19  ;;  %v3059_v19 = vld [vmem:[%s3239_s28 + $0x1ec] ss:$16 sps:$4 sm:$0xff]  }
  0x9b   : > { %2126 = vmatpush1.bf16.msra.mxu1 %v2970_v20  ;;  %2086 = vmatprep.subr.bf16.mxu0 %v2975_v21  ;;  %v3062_v20 = vld [vmem:[%s3239_s28 + $0x3ec] ss:$16 sps:$4 sm:$0xff]   ;;  %v3057_v21 = vld [vmem:[%s3239_s28 + $0x1e8] ss:$16 sps:$4 sm:$0xff]  }
  0x9c   : > { %2127 = vmatprep.subr.bf16.mxu1 %v2978_v22  ;;  %2116 = vmatprep.mubr.bf16.mxu0 %v3289_v48  ;;  %v2993_v48 = vld [vmem:[%s3239_s28 + $0x8c] ss:$16 sps:$4 sm:$0xff]   ;;  %v3060_v22 = vld [vmem:[%s3239_s28 + $0x3e8] ss:$16 sps:$4 sm:$0xff]  }
  0x9d   : > { %2157 = vmatprep.mubr.bf16.mxu1 %v3294_v52  ;;  %v2996_v52 = vld [vmem:[%s3239_s28 + $0x28c] ss:$16 sps:$4 sm:$0xff]  }
  0x9e   : > { %2087 = vmatpush1.bf16.msra.mxu0 %v2973_v23  ;;  %v3065_v23 = vld [vmem:[%s3239_s28 + $0x40c] ss:$16 sps:$4 sm:$0xff]  }
  0x9f   : > { %2128 = vmatpush1.bf16.msra.mxu1 %v2976_v24  ;;  %2088 = vmatprep.subr.bf16.mxu0 %v2981_v25  ;;  %v3068_v24 = vld [vmem:[%s3239_s28 + $0x60c] ss:$16 sps:$4 sm:$0xff]   ;;  %v3063_v25 = vld [vmem:[%s3239_s28 + $0x408] ss:$16 sps:$4 sm:$0xff]  }
  0xa0   : > { %2129 = vmatprep.subr.bf16.mxu1 %v2984_v26  ;;  %v3066_v26 = vld [vmem:[%s3239_s28 + $0x608] ss:$16 sps:$4 sm:$0xff]  }
  0xa2   : > { %2089 = vmatpush1.bf16.msra.mxu0 %v2979_v27  ;;  %v3071_v27 = vld [vmem:[%s3239_s28 + $0x42c] ss:$16 sps:$4 sm:$0xff]  }
  0xa3   : > { %2130 = vmatpush1.bf16.msra.mxu1 %v2982_v28  ;;  %2090 = vmatprep.subr.bf16.mxu0 %v2987_v29  ;;  %v3074_v28 = vld [vmem:[%s3239_s28 + $0x62c] ss:$16 sps:$4 sm:$0xff]   ;;  %v3069_v29 = vld [vmem:[%s3239_s28 + $0x428] ss:$16 sps:$4 sm:$0xff]  }
  0xa4   : > { %2131 = vmatprep.subr.bf16.mxu1 %v2990_v30  ;;  %v3072_v30 = vld [vmem:[%s3239_s28 + $0x628] ss:$16 sps:$4 sm:$0xff]  }
  0xa6   : > { %2091 = vmatpush1.bf16.msra.mxu0 %v2985_v31  ;;  %v3077_v31 = vld [vmem:[%s3239_s28 + $0x44c] ss:$16 sps:$4 sm:$0xff]  }
  0xa7   : > { %2132 = vmatpush1.bf16.msra.mxu1 %v2988_v32  ;;  %2092 = vmatprep.subr.bf16.mxu0 %v2993_v48  ;;  %v3080_v32 = vld [vmem:[%s3239_s28 + $0x64c] ss:$16 sps:$4 sm:$0xff]  }
  0xa8   : > { %2133 = vmatprep.subr.bf16.mxu1 %v2996_v52  ;;  %v3083_v48 = vld [vmem:[%s3239_s28 + $0x46c] ss:$16 sps:$4 sm:$0xff]  }
  0xa9   : > { %v3086_v52 = vld [vmem:[%s3239_s28 + $0x66c] ss:$16 sps:$4 sm:$0xff]  }
  0xaa   : > { %2093 = vmatpush1.bf16.msra.mxu0 %v2991_v33  ;;  %v3081_v33 = vld [vmem:[%s3239_s28 + $0x468] ss:$16 sps:$4 sm:$0xff]  }
  0xab   : > { %2134 = vmatpush1.bf16.msra.mxu1 %v2994_v34  ;;  %2094 = vmatprep.subr.bf16.mxu0 %v2999_v35  ;;  %v3092_v34 = vld [vmem:[%s3239_s28 + $0x68c] ss:$16 sps:$4 sm:$0xff]   ;;  %v3087_v35 = vld [vmem:[%s3239_s28 + $0x488] ss:$16 sps:$4 sm:$0xff]  }
  0xac   : > { %2135 = vmatprep.subr.bf16.mxu1 %v3002_v36  ;;  %v3090_v36 = vld [vmem:[%s3239_s28 + $0x688] ss:$16 sps:$4 sm:$0xff]  }
  0xae   : > { %2095 = vmatpush1.bf16.msra.mxu0 %v2997_v39  ;;  %v3095_v39 = vld [vmem:[%s3239_s28 + $0x4ac] ss:$16 sps:$4 sm:$0xff]  }
  0xaf   : > { %2136 = vmatpush1.bf16.msra.mxu1 %v3000_v40  ;;  %2096 = vmatprep.subr.bf16.mxu0 %v3005_v41  ;;  %v3098_v40 = vld [vmem:[%s3239_s28 + $0x6ac] ss:$16 sps:$4 sm:$0xff]   ;;  %v3093_v41 = vld [vmem:[%s3239_s28 + $0x4a8] ss:$16 sps:$4 sm:$0xff]  }
  0xb0   : > { %2137 = vmatprep.subr.bf16.mxu1 %v3008_v42  ;;  %v3096_v42 = vld [vmem:[%s3239_s28 + $0x6a8] ss:$16 sps:$4 sm:$0xff]  }
  0xb2   : > { %2097 = vmatpush1.bf16.msra.mxu0 %v3003_v43  ;;  %v3101_v43 = vld [vmem:[%s3239_s28 + $0x4cc] ss:$16 sps:$4 sm:$0xff]  }
  0xb3   : > { %2138 = vmatpush1.bf16.msra.mxu1 %v3006_v44  ;;  %2098 = vmatprep.subr.bf16.mxu0 %v3011_v45  ;;  %v3104_v44 = vld [vmem:[%s3239_s28 + $0x6cc] ss:$16 sps:$4 sm:$0xff]   ;;  %v3099_v45 = vld [vmem:[%s3239_s28 + $0x4c8] ss:$16 sps:$4 sm:$0xff]  }
  0xb4   : > { %2139 = vmatprep.subr.bf16.mxu1 %v3014_v46  ;;  %v3102_v46 = vld [vmem:[%s3239_s28 + $0x6c8] ss:$16 sps:$4 sm:$0xff]  }
  0xb6   : > { %2099 = vmatpush1.bf16.msra.mxu0 %v3009_v47  ;;  %v3107_v47 = vld [vmem:[%s3239_s28 + $0x4ec] ss:$16 sps:$4 sm:$0xff]  }
  0xb7   : > { %2140 = vmatpush1.bf16.msra.mxu1 %v3012_v49  ;;  %2100 = vmatprep.subr.bf16.mxu0 %v3017_v50  ;;  %v3110_v49 = vld [vmem:[%s3239_s28 + $0x6ec] ss:$16 sps:$4 sm:$0xff]   ;;  %v3105_v50 = vld [vmem:[%s3239_s28 + $0x4e8] ss:$16 sps:$4 sm:$0xff]  }
  0xb8   : > { %2141 = vmatprep.subr.bf16.mxu1 %v3020_v51  ;;  %v3108_v51 = vld [vmem:[%s3239_s28 + $0x6e8] ss:$16 sps:$4 sm:$0xff]  }
  0xba   : > { %2101 = vmatpush1.bf16.msra.mxu0 %v3015_v53  ;;  %v3113_v53 = vld [vmem:[%s3239_s28 + $0x50c] ss:$16 sps:$4 sm:$0xff]  }
  0xbb   : > { %2142 = vmatpush1.bf16.msra.mxu1 %v3018_v54  ;;  %2102 = vmatprep.subr.bf16.mxu0 %v3023_v55  ;;  %v3116_v54 = vld [vmem:[%s3239_s28 + $0x70c] ss:$16 sps:$4 sm:$0xff]   ;;  %v3111_v55 = vld [vmem:[%s3239_s28 + $0x508] ss:$16 sps:$4 sm:$0xff]  }
  0xbc   : > { %2143 = vmatprep.subr.bf16.mxu1 %v3026_v56  ;;  %v3114_v56 = vld [vmem:[%s3239_s28 + $0x708] ss:$16 sps:$4 sm:$0xff]  }
  0xbe   : > { %2103 = vmatpush1.bf16.msra.mxu0 %v3021_v57  ;;  %v3119_v57 = vld [vmem:[%s3239_s28 + $0x52c] ss:$16 sps:$4 sm:$0xff]  }
  0xbf   : > { %2144 = vmatpush1.bf16.msra.mxu1 %v3024_v58  ;;  %2104 = vmatprep.subr.bf16.mxu0 %v3029_v59  ;;  %v3122_v58 = vld [vmem:[%s3239_s28 + $0x72c] ss:$16 sps:$4 sm:$0xff]   ;;  %v3117_v59 = vld [vmem:[%s3239_s28 + $0x528] ss:$16 sps:$4 sm:$0xff]  }
  0xc0   : > { %2145 = vmatprep.subr.bf16.mxu1 %v3032_v60  ;;  %v3120_v60 = vld [vmem:[%s3239_s28 + $0x728] ss:$16 sps:$4 sm:$0xff]  }
  0xc2   : > { %2105 = vmatpush1.bf16.msra.mxu0 %v3027_v61  ;;  %v3125_v61 = vld [vmem:[%s3239_s28 + $0x54c] ss:$16 sps:$4 sm:$0xff]  }
  0xc3   : > { %2146 = vmatpush1.bf16.msra.mxu1 %v3030_v62  ;;  %2106 = vmatprep.subr.bf16.mxu0 %v3035_v63  ;;  %v3128_v62 = vld [vmem:[%s3239_s28 + $0x74c] ss:$16 sps:$4 sm:$0xff]   ;;  %v3123_v63 = vld [vmem:[%s3239_s28 + $0x548] ss:$16 sps:$4 sm:$0xff]  }
  0xc4   : > { %2147 = vmatprep.subr.bf16.mxu1 %v3038_v0  ;;  %v3126_v0 = vld [vmem:[%s3239_s28 + $0x748] ss:$16 sps:$4 sm:$0xff]  }
  0xc6   : > { %2107 = vmatpush1.bf16.msra.mxu0 %v3033_v1  ;;  %v3131_v1 = vld [vmem:[%s3239_s28 + $0x56c] ss:$16 sps:$4 sm:$0xff]  }
  0xc7   : > { %2148 = vmatpush1.bf16.msra.mxu1 %v3036_v2  ;;  %2108 = vmatprep.subr.bf16.mxu0 %v3041_v3  ;;  %v3134_v2 = vld [vmem:[%s3239_s28 + $0x76c] ss:$16 sps:$4 sm:$0xff]   ;;  %v3129_v3 = vld [vmem:[%s3239_s28 + $0x568] ss:$16 sps:$4 sm:$0xff]  }
  0xc8   : > { %2149 = vmatprep.subr.bf16.mxu1 %v3044_v4  ;;  %v3132_v4 = vld [vmem:[%s3239_s28 + $0x768] ss:$16 sps:$4 sm:$0xff]  }
  0xca   : > { %2109 = vmatpush1.bf16.msra.mxu0 %v3039_v5  ;;  %v3137_v5 = vld [vmem:[%s3239_s28 + $0x58c] ss:$16 sps:$4 sm:$0xff]  }
  0xcb   : > { %2150 = vmatpush1.bf16.msra.mxu1 %v3042_v6  ;;  %2110 = vmatprep.subr.bf16.mxu0 %v3047_v9  ;;  %v3140_v6 = vld [vmem:[%s3239_s28 + $0x78c] ss:$16 sps:$4 sm:$0xff]   ;;  %v3135_v9 = vld [vmem:[%s3239_s28 + $0x588] ss:$16 sps:$4 sm:$0xff]  }
  0xcc   : > { %2151 = vmatprep.subr.bf16.mxu1 %v3050_v10  ;;  %v3138_v10 = vld [vmem:[%s3239_s28 + $0x788] ss:$16 sps:$4 sm:$0xff]  }
  0xce   : > { %2111 = vmatpush1.bf16.msra.mxu0 %v3045_v11  ;;  %v3143_v11 = vld [vmem:[%s3239_s28 + $0x5ac] ss:$16 sps:$4 sm:$0xff]  }
  0xcf   : > { %2152 = vmatpush1.bf16.msra.mxu1 %v3048_v12  ;;  %2112 = vmatprep.subr.bf16.mxu0 %v3053_v13  ;;  %v3146_v12 = vld [vmem:[%s3239_s28 + $0x7ac] ss:$16 sps:$4 sm:$0xff]   ;;  %v3141_v13 = vld [vmem:[%s3239_s28 + $0x5a8] ss:$16 sps:$4 sm:$0xff]  }
  0xd0   : > { %2153 = vmatprep.subr.bf16.mxu1 %v3056_v14  ;;  %v3144_v14 = vld [vmem:[%s3239_s28 + $0x7a8] ss:$16 sps:$4 sm:$0xff]  }
  0xd2   : > { %2113 = vmatpush1.bf16.msra.mxu0 %v3051_v15  ;;  %v3149_v15 = vld [vmem:[%s3239_s28 + $0x5cc] ss:$16 sps:$4 sm:$0xff]  }
  0xd3   : > { %2154 = vmatpush1.bf16.msra.mxu1 %v3054_v16  ;;  %2114 = vmatprep.subr.bf16.mxu0 %v3059_v19  ;;  %v3152_v16 = vld [vmem:[%s3239_s28 + $0x7cc] ss:$16 sps:$4 sm:$0xff]   ;;  %v3147_v19 = vld [vmem:[%s3239_s28 + $0x5c8] ss:$16 sps:$4 sm:$0xff]  }
  0xd4   : > { %2155 = vmatprep.subr.bf16.mxu1 %v3062_v20  ;;  %v3150_v20 = vld [vmem:[%s3239_s28 + $0x7c8] ss:$16 sps:$4 sm:$0xff]  }
  0xd6   : > { %2115 = vmatpush1.bf16.msra.mxu0 %v3057_v21  ;;  %v3155_v21 = vld [vmem:[%s3239_s28 + $0x5ec] ss:$16 sps:$4 sm:$0xff]  }
  0xd7   : > { %2156 = vmatpush1.bf16.msra.mxu1 %v3060_v22  ;;  %2166 = vmatprep.subr.bf16.mxu0 %v3065_v23  ;;  %v3158_v22 = vld [vmem:[%s3239_s28 + $0x7ec] ss:$16 sps:$4 sm:$0xff]   ;;  %v3153_v23 = vld [vmem:[%s3239_s28 + $0x5e8] ss:$16 sps:$4 sm:$0xff]  }
  0xd8   : > { %2207 = vmatprep.subr.bf16.mxu1 %v3068_v24  ;;  %v3156_v24 = vld [vmem:[%s3239_s28 + $0x7e8] ss:$16 sps:$4 sm:$0xff]  }
  0xd9   : > { %2117 = vmatmul.mubr.bf16.vlgmr.msra.gmra.mrb[8].mxu0 %v3316_v7  ;;  %v3075_v7 = vld [vmem:[%s3239_s28 + $0x448] ss:$16 sps:$4 sm:$0xff]  }
  0xda   : > { %2158 = vmatmul.mubr.bf16.vlgmr.msra.gmra.mrb[8].mxu1 %v3318_v8  ;;  %2167 = vmatpush1.bf16.msra.mxu0 %v3063_v25  ;;  %v3078_v8 = vld [vmem:[%s3239_s28 + $0x648] ss:$16 sps:$4 sm:$0xff]  }
  0xdb   : > { %2208 = vmatpush1.bf16.msra.mxu1 %v3066_v26  ;;  %2168 = vmatprep.subr.bf16.mxu0 %v3071_v27 }
  0xdc   : > { %2209 = vmatprep.subr.bf16.mxu1 %v3074_v28  ;;  %2198 = vmatprep.mubr.bf16.mxu0 %v3356_v37  ;;  %v3084_v37 = vld [vmem:[%s3239_s28 + $0x668] ss:$16 sps:$4 sm:$0xff]  }
  0xdd   : > { %2239 = vmatprep.mubr.bf16.mxu1 %v3360_v38  ;;  %v3089_v38 = vld [vmem:[%s3239_s28 + $0x48c] ss:$16 sps:$4 sm:$0xff]  }
  0xde   : > { %2169 = vmatpush1.bf16.msra.mxu0 %v3069_v29 }
  0xdf   : > { %2210 = vmatpush1.bf16.msra.mxu1 %v3072_v30  ;;  %2170 = vmatprep.subr.bf16.mxu0 %v3077_v31 }
  0xe0   : > { %2211 = vmatprep.subr.bf16.mxu1 %v3080_v32 }
  0xe2   : > { %2171 = vmatpush1.bf16.msra.mxu0 %v3075_v7 }
  0xe3   : > { %2212 = vmatpush1.bf16.msra.mxu1 %v3078_v8  ;;  %2172 = vmatprep.subr.bf16.mxu0 %v3083_v48 }
  0xe4   : > { %2213 = vmatprep.subr.bf16.mxu1 %v3086_v52 }
  0xe6   : > { %2173 = vmatpush1.bf16.msra.mxu0 %v3081_v33 }
  0xe7   : > { %2214 = vmatpush1.bf16.msra.mxu1 %v3084_v37  ;;  %2174 = vmatprep.subr.bf16.mxu0 %v3089_v38 }
  0xe8   : > { %2215 = vmatprep.subr.bf16.mxu1 %v3092_v34  ;;  %v608_v34 = vld [vmem:[#allocation2] sm:$0xff] }
  0xea   : > { %2175 = vmatpush1.bf16.msra.mxu0 %v3087_v35 }
  0xeb   : > { %2216 = vmatpush1.bf16.msra.mxu1 %v3090_v36  ;;  %2176 = vmatprep.subr.bf16.mxu0 %v3095_v39  ;;  %v609_v39 = vld [vmem:[#allocation2 + $0x8] sm:$0xff] }
  0xec   : > { %2217 = vmatprep.subr.bf16.mxu1 %v3098_v40 }
  0xee   : > { %2177 = vmatpush1.bf16.msra.mxu0 %v3093_v41 }
  0xef   : > { %2218 = vmatpush1.bf16.msra.mxu1 %v3096_v42  ;;  %2178 = vmatprep.subr.bf16.mxu0 %v3101_v43 }
  0xf0   : > { %2219 = vmatprep.subr.bf16.mxu1 %v3104_v44 }
  0xf2   : > { %2179 = vmatpush1.bf16.msra.mxu0 %v3099_v45 }
  0xf3   : > { %2220 = vmatpush1.bf16.msra.mxu1 %v3102_v46  ;;  %2180 = vmatprep.subr.bf16.mxu0 %v3107_v47 }
  0xf4   : > { %2221 = vmatprep.subr.bf16.mxu1 %v3110_v49 }
  0xf6   : > { %2181 = vmatpush1.bf16.msra.mxu0 %v3105_v50 }
  0xf7   : > { %2222 = vmatpush1.bf16.msra.mxu1 %v3108_v51  ;;  %2182 = vmatprep.subr.bf16.mxu0 %v3113_v53 }
  0xf8   : > { %2223 = vmatprep.subr.bf16.mxu1 %v3116_v54 }
  0xfa   : > { %2183 = vmatpush1.bf16.msra.mxu0 %v3111_v55 }
  0xfb   : > { %2224 = vmatpush1.bf16.msra.mxu1 %v3114_v56  ;;  %2184 = vmatprep.subr.bf16.mxu0 %v3119_v57 }
  0xfc   : > { %2225 = vmatprep.subr.bf16.mxu1 %v3122_v58 }
  0xfe   : > { %2185 = vmatpush1.bf16.msra.mxu0 %v3117_v59 }
  0xff   : > { %2226 = vmatpush1.bf16.msra.mxu1 %v3120_v60  ;;  %2186 = vmatprep.subr.bf16.mxu0 %v3125_v61 }
 0x100   : > { %2227 = vmatprep.subr.bf16.mxu1 %v3128_v62  ;;  %v610_v62 = vld [vmem:[#allocation2 + $0x10] sm:$0xff] }
 0x102   : > { %2187 = vmatpush1.bf16.msra.mxu0 %v3123_v63 }
 0x103   : > { %2228 = vmatpush1.bf16.msra.mxu1 %v3126_v0  ;;  %2188 = vmatprep.subr.bf16.mxu0 %v3131_v1 }
 0x104   : > { %2229 = vmatprep.subr.bf16.mxu1 %v3134_v2 }
 0x106   : > { %2189 = vmatpush1.bf16.msra.mxu0 %v3129_v3  ;;  %v611_v3 = vld [vmem:[#allocation2 + $0x18] sm:$0xff] }
 0x107   : > { %2230 = vmatpush1.bf16.msra.mxu1 %v3132_v4  ;;  %2190 = vmatprep.subr.bf16.mxu0 %v3137_v5 }
 0x108   : > { %2231 = vmatprep.subr.bf16.mxu1 %v3140_v6 }
 0x10a   : > { %2191 = vmatpush1.bf16.msra.mxu0 %v3135_v9 }
 0x10b   : > { %2232 = vmatpush1.bf16.msra.mxu1 %v3138_v10  ;;  %2192 = vmatprep.subr.bf16.mxu0 %v3143_v11  ;;  %v2266_v11 = vlaneseq (!%p2732_p7) }
 0x10c   : > { %2233 = vmatprep.subr.bf16.mxu1 %v3146_v12 }
 0x10d   : > { %v2267_v12 = vshrl.u32 (!%p2732_p7), %v2266_v11, 7 }
 0x10e   : > { %2193 = vmatpush1.bf16.msra.mxu0 %v3141_v13  ;;  %v2290_v13 = vld [vmem:[%s3574_s3] sm:$0xff] (!%p2732_p7) }
 0x10f   : > { %2234 = vmatpush1.bf16.msra.mxu1 %v3144_v14  ;;  %2194 = vmatprep.subr.bf16.mxu0 %v3149_v15  ;;  %v2291_v14 = vld [vmem:[%s3574_s3 + $0x8] sm:$0xff] (!%p2732_p7)  ;;  %v2264_v15 = vld [vmem:[%s3573_s2] sm:$0xf] (!%p2732_p7) }
 0x110   : > { %2235 = vmatprep.subr.bf16.mxu1 %v3152_v16 }
 0x112   : > { %2195 = vmatpush1.bf16.msra.mxu0 %v3147_v19  ;;  %v2268_v19 = vsub.s32 (!%p2732_p7), 0, %v2267_v12 }
 0x113   : > { %2236 = vmatpush1.bf16.msra.mxu1 %v3150_v20  ;;  %2196 = vmatprep.subr.bf16.mxu0 %v3155_v21  ;;  %v2272_v20 = vsub.s32 (!%p2732_p7), 1, %v2267_v12  ;;  %v2276_v21 = vsub.s32 (!%p2732_p7), 2, %v2267_v12 }
 0x114   : > { %2237 = vmatprep.subr.bf16.mxu1 %v3158_v22  ;;  %v2280_v22 = vsub.s32 (!%p2732_p7), 3, %v2267_v12 }
 0x116   : > { %2197 = vmatpush1.bf16.msra.mxu0 %v3153_v23 }
 0x117   : > { %2238 = vmatpush1.bf16.msra.mxu1 %v3156_v24  ;;  %v2292_v24 = vunpack.c.l.bf16 (!%p2732_p7), %v2290_v13 }
 0x119   : > { %2199 = vmatmul.mubr.bf16.vlgmr.msra.gmra.mrb[12].mxu0 %v3404_v17 }
 0x11a   : > { %2240 = vmatmul.mubr.bf16.vlgmr.msra.gmra.mrb[12].mxu1 %v3408_v18 }
 0x12c   : > { %v1954_v25 = vpop.f32.mrb[0].mxu0 }
 0x12d   : > { %v1995_v26 = vpop.f32.mrb[0].mxu1  ;;  %v1956_v28 = vpop.f32.mrb[1].mxu0 }
 0x12e   : > { %v1996_v27 = vadd.f32 %v1995_v26, %v1954_v25  ;;  %v1997_v29 = vpop.f32.mrb[1].mxu1  ;;  %v1958_v31 = vpop.f32.mrb[2].mxu0  ;;  %v2293_v25 = vunpack.c.h.bf16 (!%p2732_p7), %v2290_v13 }
 0x12f   : > { %v1998_v30 = vadd.f32 %v1997_v29, %v1956_v28  ;;  %v1999_v32 = vpop.f32.mrb[2].mxu1  ;;  %v1959_v7 = vpop.f32.mrb[3].mxu0  ;;  %v2294_v28 = vunpack.c.l.bf16 (!%p2732_p7), %v2291_v14  ;;  %v2295_v29 = vunpack.c.h.bf16 (!%p2732_p7), %v2291_v14  ;;  %v2273_v31 = vrot.slane (!%p2732_p7), %v2264_v15, %v2272_v20 }
 0x130   : > { %v2000_v8 = vpop.f32.mrb[3].mxu1  ;;  %v2277_v32 = vrot.slane (!%p2732_p7), %v2264_v15, %v2276_v21  ;;  %v2281_v7 = vrot.slane (!%p2732_p7), %v2264_v15, %v2280_v22 }
 0x16c   : > { %v2036_v48 = vpop.f32.mrb[4].mxu0 }
 0x16d   : > { %v2077_v52 = vpop.f32.mrb[4].mxu1  ;;  %v2037_v33 = vadd.f32 %v2036_v48, %v1996_v27  ;;  %v2038_v37 = vpop.f32.mrb[5].mxu0 }
 0x16e   : > { %v2079_v38 = vpop.f32.mrb[5].mxu1  ;;  %v2039_v35 = vadd.f32 %v2038_v37, %v1998_v30  ;;  %v2040_v17 = vpop.f32.mrb[6].mxu0  ;;  %v2269_v30 = vrot.slane (!%p2732_p7), %v2264_v15, %v2268_v19 }
 0x16f   : > { %v2081_v36 = vpop.f32.mrb[6].mxu1  ;;  %v2078_v18 = vadd.f32 %v2077_v52, %v2037_v33  ;;  %v2041_v40 = vpop.f32.mrb[7].mxu0 }
 0x170   : > { %v2082_v41 = vpop.f32.mrb[7].mxu1  ;;  %v2080_v42 = vadd.f32 %v2079_v38, %v2039_v35 }
 0x171   : > { %v2248_v43 = vadd.f32 %v2078_v18, %v608_v34 }
 0x172   : > { %v2249_v44 = vadd.f32 %v2080_v42, %v609_v39 }
 0x173   : > { %2252 = vst [vmem:[#allocation2] sm:$0xff] %v2248_v43 }
 0x174   : > { %2253 = vst [vmem:[#allocation2 + $0x8] sm:$0xff] %v2249_v44 }
 0x17a   : > { %v2260_v16 = vld [vmem:[#allocation2] sm:$0xff] (!%p2732_p7) }
 0x17b   : > { %v2261_v23 = vld [vmem:[#allocation2 + $0x8] sm:$0xff] (!%p2732_p7)  ;;  %v2286_v8 = vadd.f32 (!%p2732_p7), %v2269_v30, %v2260_v16 }
 0x17c   : > { %v2287_v48 = vadd.f32 (!%p2732_p7), %v2273_v31, %v2261_v23 }
 0x17d   : > { %v2296_v37 = vadd.f32 (!%p2732_p7), %v2292_v24, %v2286_v8 }
 0x17e   : > { %v2297_v38 = vadd.f32 (!%p2732_p7), %v2293_v25, %v2287_v48 }
 0x180   : > { %v2740_v17 = vpack.c.bf16 (!%p2732_p7), %v2297_v38, %v2296_v37 }
 0x182   : > { %2316 = vst [vmem:[%s3575_s4] sm:$0xff] (!%p2732_p7), %v2740_v17 }
 0x1ac   : > { %v2118_v45 = vpop.f32.mrb[8].mxu0 }
 0x1ad   : > { %v2159_v46 = vpop.f32.mrb[8].mxu1  ;;  %v2120_v49 = vpop.f32.mrb[9].mxu0 }
 0x1ae   : > { %v2160_v47 = vadd.f32 %v2159_v46, %v2118_v45  ;;  %v2161_v50 = vpop.f32.mrb[9].mxu1  ;;  %v2122_v53 = vpop.f32.mrb[10].mxu0 }
 0x1af   : > { %v2162_v51 = vadd.f32 %v2161_v50, %v2120_v49  ;;  %v2163_v54 = vpop.f32.mrb[10].mxu1  ;;  %v2123_v55 = vpop.f32.mrb[11].mxu0 }
 0x1b0   : > { %v2164_v56 = vpop.f32.mrb[11].mxu1 }
 0x1ec   : > { %v2200_v57 = vpop.f32.mrb[12].mxu0 }
 0x1ed   : > { %v2241_v58 = vpop.f32.mrb[12].mxu1  ;;  %v2201_v59 = vadd.f32 %v2200_v57, %v2160_v47  ;;  %v2202_v60 = vpop.f32.mrb[13].mxu0 }
 0x1ee   : > { %v2243_v61 = vpop.f32.mrb[13].mxu1  ;;  %v2203_v63 = vadd.f32 %v2202_v60, %v2162_v51  ;;  %v2204_v0 = vpop.f32.mrb[14].mxu0  ;;  %2259 = sbr.rel (%p2732_p7) target bundleno = 515 (0x203), region = 44 }
 0x1ef   : > { %v2245_v1 = vpop.f32.mrb[14].mxu1  ;;  %v2242_v2 = vadd.f32 %v2241_v58, %v2201_v59  ;;  %v2205_v4 = vpop.f32.mrb[15].mxu0 }
 0x1f0   : > { %v2246_v5 = vpop.f32.mrb[15].mxu1  ;;  %v2244_v6 = vadd.f32 %v2243_v61, %v2203_v63 }
 0x1f1   : > { %v2250_v9 = vadd.f32 %v2242_v2, %v610_v62 }
 0x1f2   : > { %v2251_v10 = vadd.f32 %v2244_v6, %v611_v3 }
 0x1f3   : > { %2254 = vst [vmem:[#allocation2 + $0x10] sm:$0xff] %v2250_v9 }
 0x1f4   : > { %2255 = vst [vmem:[#allocation2 + $0x18] sm:$0xff] %v2251_v10 }
 0x1fa   : > { %v2262_v26 = vld [vmem:[#allocation2 + $0x10] sm:$0xff] }
 0x1fb   : > { %v2263_v27 = vld [vmem:[#allocation2 + $0x18] sm:$0xff]  ;;  %v2288_v52 = vadd.f32 %v2277_v32, %v2262_v26 }
 0x1fc   : > { %v2289_v33 = vadd.f32 %v2281_v7, %v2263_v27 }
 0x1fd   : > { %v2298_v34 = vadd.f32 %v2294_v28, %v2288_v52 }
 0x1fe   : > { %v2299_v35 = vadd.f32 %v2295_v29, %v2289_v33 }
 0x200   : > { %v2741_v36 = vpack.c.bf16 %v2299_v35, %v2298_v34 }
 0x202   : > { %2317 = vst [vmem:[%s3575_s4 + $0x8] sm:$0xff] %v2741_v36 }
 0x203 PF: > { %s14_s17 = sadd.s32 1, %s3181_s17   ;;  %s3576_s15 = smov %s3177_s16 }
 0x204   : > { %p11_p8 = scmp.ge.s32.totalorder %s14_s17, 4   ;;  %s3577_s16 = smov %s3579_s18 }
 0x206   :  { %13 = sbr.rel (!%p11_p8) target bundleno = 2 (0x2), region = 83 }

// kernel: _lambda_.33
= control target key start
LH: loop header
LB: loop body
LE: loop exit
PB: predicated region body
PF: predicated region fallthrough
CT: control target
= control target key end

     0   :  { %v688_v21 = vmov 1966171168   ;;  %v88_v23 = vlaneseq  ;;  %s907_s1 = inlined_call_operand.vmem [shape: bf16[256,512], index: 1, kind: input, shape index: {}]   ;;  %s908_s0 = inlined_call_operand.vmem [shape: bf16[2,512], index: 0, kind: input, shape index: {}]   ;;  %s909_s2 = inlined_call_operand.vmem [shape: f32[2,256], index: 2, kind: output, shape index: {}]  }
   0x1   :  { %v592_v0 = vld [vmem:[%s907_s1 + $0x4] ss:$16 sps:$4 sm:$0xff]   ;;  %v594_v1 = vld [vmem:[%s907_s1 + $0xc] ss:$16 sps:$4 sm:$0xff]   ;;  %v596_v2 = vld [vmem:[%s907_s1] ss:$16 sps:$4 sm:$0xff]   ;;  %v86_v22 = vunpack.c.l.s4 %v688_v21 }
   0x2   :  { %425 = vmatprep.subr.bf16.mxu1 %v592_v0  ;;  %v597_v3 = vld [vmem:[%s907_s1 + $0x8] ss:$16 sps:$4 sm:$0xff]   ;;  %466 = vmatprep.subr.bf16.mxu0 %v594_v1  ;;  %v598_v4 = vld [vmem:[%s907_s1 + $0x24] ss:$16 sps:$4 sm:$0xff]   ;;  %v600_v5 = vld [vmem:[%s907_s1 + $0x2c] ss:$16 sps:$4 sm:$0xff]  }
   0x3   :  { %426 = vmatpush1.bf16.xpose.msra.mxu1 %v596_v2  ;;  %467 = vmatpush1.bf16.xpose.msra.mxu0 %v597_v3  ;;  %v602_v6 = vld [vmem:[%s907_s1 + $0x20] ss:$16 sps:$4 sm:$0xff]   ;;  %v603_v7 = vld [vmem:[%s907_s1 + $0x28] ss:$16 sps:$4 sm:$0xff]   ;;  %v604_v8 = vld [vmem:[%s907_s1 + $0x44] ss:$16 sps:$4 sm:$0xff]   ;;  %v87_v25 = vunpack.c.0.s8 %v86_v22 }
   0x4   :  { %427 = vmatprep.subr.bf16.mxu1 %v598_v4  ;;  %468 = vmatprep.subr.bf16.mxu0 %v600_v5  ;;  %v606_v9 = vld [vmem:[%s907_s1 + $0x4c] ss:$16 sps:$4 sm:$0xff]   ;;  %v608_v10 = vld [vmem:[%s907_s1 + $0x40] ss:$16 sps:$4 sm:$0xff]   ;;  %v609_v11 = vld [vmem:[%s907_s1 + $0x48] ss:$16 sps:$4 sm:$0xff]  }
   0x5   :  { %v610_v12 = vld [vmem:[%s907_s1 + $0x64] ss:$16 sps:$4 sm:$0xff]   ;;  %v612_v13 = vld [vmem:[%s907_s1 + $0x6c] ss:$16 sps:$4 sm:$0xff]   ;;  %v614_v14 = vld [vmem:[%s907_s1 + $0x60] ss:$16 sps:$4 sm:$0xff]  }
   0x6   :  { %v615_v15 = vld [vmem:[%s907_s1 + $0x68] ss:$16 sps:$4 sm:$0xff]   ;;  %v616_v16 = vld [vmem:[%s907_s1 + $0x84] ss:$16 sps:$4 sm:$0xff]   ;;  %v618_v17 = vld [vmem:[%s907_s1 + $0x8c] ss:$16 sps:$4 sm:$0xff]  }
   0x7   :  { %v620_v18 = vld [vmem:[%s907_s1 + $0x80] ss:$16 sps:$4 sm:$0xff]   ;;  %v621_v19 = vld [vmem:[%s907_s1 + $0x88] ss:$16 sps:$4 sm:$0xff]   ;;  %v622_v20 = vld [vmem:[%s907_s1 + $0xa4] ss:$16 sps:$4 sm:$0xff]  }
   0x8   :  { %v624_v24 = vld [vmem:[%s907_s1 + $0xac] ss:$16 sps:$4 sm:$0xff]   ;;  %v89_v26 = vshrl.u32 %v88_v23, 7  ;;  %v626_v27 = vld [vmem:[%s907_s1 + $0xa0] ss:$16 sps:$4 sm:$0xff]  }
   0x9   :  { %v627_v28 = vld [vmem:[%s907_s1 + $0xa8] ss:$16 sps:$4 sm:$0xff]   ;;  %v628_v29 = vld [vmem:[%s907_s1 + $0xc4] ss:$16 sps:$4 sm:$0xff]   ;;  %v630_v31 = vld [vmem:[%s907_s1 + $0xcc] ss:$16 sps:$4 sm:$0xff]  }
   0xa   :  { %v90_v30 = vsub.s32 %v87_v25, %v89_v26  ;;  %v523_v32 = vld.sshfl [vmem:[%s908_s0] sm:$0x33 pattern:$0x75316420]  ;;  %v633_v37 = vld [vmem:[%s907_s1 + $0xc8] ss:$16 sps:$4 sm:$0xff]  }
   0xb   :  { %428 = vmatpush1.bf16.xpose.msra.mxu1 %v602_v6  ;;  %469 = vmatpush1.bf16.xpose.msra.mxu0 %v603_v7  ;;  %v84_v33 = vcombine.high %v523_v32, %v523_v32  ;;  %v632_v36 = vld [vmem:[%s907_s1 + $0xc0] ss:$16 sps:$4 sm:$0xff]   ;;  %v634_v39 = vld [vmem:[%s907_s1 + $0xe4] ss:$16 sps:$4 sm:$0xff]   ;;  %v636_v40 = vld [vmem:[%s907_s1 + $0xec] ss:$16 sps:$4 sm:$0xff]  }
   0xc   :  { %429 = vmatprep.subr.bf16.mxu1 %v604_v8  ;;  %470 = vmatprep.subr.bf16.mxu0 %v606_v9  ;;  %v785_v34 = vrot.slane %v523_v32, %v90_v30  ;;  %v638_v41 = vld [vmem:[%s907_s1 + $0xe0] ss:$16 sps:$4 sm:$0xff]   ;;  %v639_v42 = vld [vmem:[%s907_s1 + $0xe8] ss:$16 sps:$4 sm:$0xff]   ;;  %v640_v43 = vld [vmem:[%s907_s1 + $0x104] ss:$16 sps:$4 sm:$0xff]  }
   0xd   :  { %v98_v35 = vrot.slane %v84_v33, %v90_v30  ;;  %v642_v44 = vld [vmem:[%s907_s1 + $0x10c] ss:$16 sps:$4 sm:$0xff]   ;;  %v644_v45 = vld [vmem:[%s907_s1 + $0x100] ss:$16 sps:$4 sm:$0xff]   ;;  %v645_v46 = vld [vmem:[%s907_s1 + $0x108] ss:$16 sps:$4 sm:$0xff]  }
   0xe   :  { %v646_v47 = vld [vmem:[%s907_s1 + $0x124] ss:$16 sps:$4 sm:$0xff]   ;;  %v648_v48 = vld [vmem:[%s907_s1 + $0x12c] ss:$16 sps:$4 sm:$0xff]   ;;  %v650_v49 = vld [vmem:[%s907_s1 + $0x120] ss:$16 sps:$4 sm:$0xff]  }
   0xf   :  { %457 = vmatprep.mubr.bf16.mxu1 %v98_v35  ;;  %v100_v38 = vcombine.high %v98_v35, %v98_v35  ;;  %v651_v50 = vld [vmem:[%s907_s1 + $0x128] ss:$16 sps:$4 sm:$0xff]   ;;  %v652_v51 = vld [vmem:[%s907_s1 + $0x144] ss:$16 sps:$4 sm:$0xff]   ;;  %v654_v52 = vld [vmem:[%s907_s1 + $0x14c] ss:$16 sps:$4 sm:$0xff]  }
  0x10   :  { %v656_v53 = vld [vmem:[%s907_s1 + $0x140] ss:$16 sps:$4 sm:$0xff]   ;;  %v657_v54 = vld [vmem:[%s907_s1 + $0x148] ss:$16 sps:$4 sm:$0xff]   ;;  %v658_v55 = vld [vmem:[%s907_s1 + $0x164] ss:$16 sps:$4 sm:$0xff]  }
  0x11   :  { %498 = vmatprep.mubr.bf16.mxu0 %v100_v38  ;;  %v660_v56 = vld [vmem:[%s907_s1 + $0x16c] ss:$16 sps:$4 sm:$0xff]   ;;  %v662_v57 = vld [vmem:[%s907_s1 + $0x160] ss:$16 sps:$4 sm:$0xff]   ;;  %v663_v58 = vld [vmem:[%s907_s1 + $0x168] ss:$16 sps:$4 sm:$0xff]  }
  0x12   :  { %v664_v59 = vld [vmem:[%s907_s1 + $0x184] ss:$16 sps:$4 sm:$0xff]   ;;  %v666_v60 = vld [vmem:[%s907_s1 + $0x18c] ss:$16 sps:$4 sm:$0xff]   ;;  %v668_v61 = vld [vmem:[%s907_s1 + $0x180] ss:$16 sps:$4 sm:$0xff]  }
  0x13   :  { %430 = vmatpush1.bf16.xpose.msra.mxu1 %v608_v10  ;;  %471 = vmatpush1.bf16.xpose.msra.mxu0 %v609_v11  ;;  %v669_v62 = vld [vmem:[%s907_s1 + $0x188] ss:$16 sps:$4 sm:$0xff]   ;;  %v670_v63 = vld [vmem:[%s907_s1 + $0x1a4] ss:$16 sps:$4 sm:$0xff]   ;;  %v672_v0 = vld [vmem:[%s907_s1 + $0x1ac] ss:$16 sps:$4 sm:$0xff]   ;;  %v99_v11 = vcombine.high %v785_v34, %v785_v34 }
  0x14   :  { %431 = vmatprep.subr.bf16.mxu1 %v610_v12  ;;  %472 = vmatprep.subr.bf16.mxu0 %v612_v13  ;;  %v674_v1 = vld [vmem:[%s907_s1 + $0x1a0] ss:$16 sps:$4 sm:$0xff]   ;;  %v675_v2 = vld [vmem:[%s907_s1 + $0x1a8] ss:$16 sps:$4 sm:$0xff]   ;;  %v676_v3 = vld [vmem:[%s907_s1 + $0x1c4] ss:$16 sps:$4 sm:$0xff]  }
  0x15   :  { %v678_v4 = vld [vmem:[%s907_s1 + $0x1cc] ss:$16 sps:$4 sm:$0xff]   ;;  %v680_v5 = vld [vmem:[%s907_s1 + $0x1c0] ss:$16 sps:$4 sm:$0xff]   ;;  %v681_v6 = vld [vmem:[%s907_s1 + $0x1c8] ss:$16 sps:$4 sm:$0xff]  }
  0x16   :  { %v682_v7 = vld [vmem:[%s907_s1 + $0x1e4] ss:$16 sps:$4 sm:$0xff]   ;;  %v684_v8 = vld [vmem:[%s907_s1 + $0x1ec] ss:$16 sps:$4 sm:$0xff]   ;;  %v686_v9 = vld [vmem:[%s907_s1 + $0x1e0] ss:$16 sps:$4 sm:$0xff]  }
  0x17   :  { %v687_v10 = vld [vmem:[%s907_s1 + $0x1e8] ss:$16 sps:$4 sm:$0xff]  }
  0x1b   :  { %432 = vmatpush1.bf16.xpose.msra.mxu1 %v614_v14  ;;  %473 = vmatpush1.bf16.xpose.msra.mxu0 %v615_v15 }
  0x1c   :  { %433 = vmatprep.subr.bf16.mxu1 %v616_v16  ;;  %474 = vmatprep.subr.bf16.mxu0 %v618_v17 }
  0x23   :  { %434 = vmatpush1.bf16.xpose.msra.mxu1 %v620_v18  ;;  %475 = vmatpush1.bf16.xpose.msra.mxu0 %v621_v19 }
  0x24   :  { %435 = vmatprep.subr.bf16.mxu1 %v622_v20  ;;  %476 = vmatprep.subr.bf16.mxu0 %v624_v24 }
  0x2b   :  { %436 = vmatpush1.bf16.xpose.msra.mxu1 %v626_v27  ;;  %477 = vmatpush1.bf16.xpose.msra.mxu0 %v627_v28 }
  0x2c   :  { %437 = vmatprep.subr.bf16.mxu1 %v628_v29  ;;  %478 = vmatprep.subr.bf16.mxu0 %v630_v31 }
  0x33   :  { %438 = vmatpush1.bf16.xpose.msra.mxu1 %v632_v36  ;;  %479 = vmatpush1.bf16.xpose.msra.mxu0 %v633_v37 }
  0x34   :  { %439 = vmatprep.subr.bf16.mxu1 %v634_v39  ;;  %480 = vmatprep.subr.bf16.mxu0 %v636_v40 }
  0x3b   :  { %440 = vmatpush1.bf16.xpose.msra.mxu1 %v638_v41  ;;  %481 = vmatpush1.bf16.xpose.msra.mxu0 %v639_v42 }
  0x3c   :  { %441 = vmatprep.subr.bf16.mxu1 %v640_v43  ;;  %482 = vmatprep.subr.bf16.mxu0 %v642_v44 }
  0x43   :  { %442 = vmatpush1.bf16.xpose.msra.mxu1 %v644_v45  ;;  %483 = vmatpush1.bf16.xpose.msra.mxu0 %v645_v46 }
  0x44   :  { %443 = vmatprep.subr.bf16.mxu1 %v646_v47  ;;  %484 = vmatprep.subr.bf16.mxu0 %v648_v48 }
  0x4b   :  { %444 = vmatpush1.bf16.xpose.msra.mxu1 %v650_v49  ;;  %485 = vmatpush1.bf16.xpose.msra.mxu0 %v651_v50 }
  0x4c   :  { %445 = vmatprep.subr.bf16.mxu1 %v652_v51  ;;  %486 = vmatprep.subr.bf16.mxu0 %v654_v52 }
  0x53   :  { %446 = vmatpush1.bf16.xpose.msra.mxu1 %v656_v53  ;;  %487 = vmatpush1.bf16.xpose.msra.mxu0 %v657_v54 }
  0x54   :  { %447 = vmatprep.subr.bf16.mxu1 %v658_v55  ;;  %488 = vmatprep.subr.bf16.mxu0 %v660_v56 }
  0x5b   :  { %448 = vmatpush1.bf16.xpose.msra.mxu1 %v662_v57  ;;  %489 = vmatpush1.bf16.xpose.msra.mxu0 %v663_v58 }
  0x5c   :  { %449 = vmatprep.subr.bf16.mxu1 %v664_v59  ;;  %490 = vmatprep.subr.bf16.mxu0 %v666_v60 }
  0x63   :  { %450 = vmatpush1.bf16.xpose.msra.mxu1 %v668_v61  ;;  %491 = vmatpush1.bf16.xpose.msra.mxu0 %v669_v62 }
  0x64   :  { %451 = vmatprep.subr.bf16.mxu1 %v670_v63  ;;  %492 = vmatprep.subr.bf16.mxu0 %v672_v0 }
  0x6b   :  { %452 = vmatpush1.bf16.xpose.msra.mxu1 %v674_v1  ;;  %493 = vmatpush1.bf16.xpose.msra.mxu0 %v675_v2 }
  0x6c   :  { %453 = vmatprep.subr.bf16.mxu1 %v676_v3  ;;  %494 = vmatprep.subr.bf16.mxu0 %v678_v4 }
  0x73   :  { %454 = vmatpush1.bf16.xpose.msra.mxu1 %v680_v5  ;;  %495 = vmatpush1.bf16.xpose.msra.mxu0 %v681_v6 }
  0x74   :  { %455 = vmatprep.subr.bf16.mxu1 %v682_v7  ;;  %496 = vmatprep.subr.bf16.mxu0 %v684_v8 }
  0x7b   :  { %456 = vmatpush1.bf16.xpose.msra.mxu1 %v686_v9  ;;  %497 = vmatpush1.bf16.xpose.msra.mxu0 %v687_v10 }
  0x82   :  { %458 = vmatmul.mubr.bf16.vlgmr.msra.gmra.mrb[0].mxu1 %v785_v34  ;;  %499 = vmatmul.mubr.bf16.vlgmr.msra.gmra.mrb[0].mxu0 %v99_v11 }
 0x155   :  { %v459_v12 = vpop.f32.mrb[0].mxu1  ;;  %v500_v13 = vpop.f32.mrb[0].mxu0 }
 0x156   :  { %v501_v14 = vadd.f32 %v500_v13, %v459_v12  ;;  %v461_v15 = vpop.f32.mrb[1].mxu1  ;;  %v502_v16 = vpop.f32.mrb[1].mxu0 }
 0x157   :  { %v503_v17 = vadd.f32 %v502_v16, %v461_v15  ;;  %v463_v18 = vpop.f32.mrb[2].mxu1  ;;  %v504_v19 = vpop.f32.mrb[2].mxu0 }
 0x158   :  { %v464_v20 = vpop.f32.mrb[3].mxu1  ;;  %v505_v21 = vpop.f32.mrb[3].mxu0 }
 0x159   :  { %v509_v22 = vcombine.low %v501_v14, %v503_v17 }
 0x15b   :  { %588 = vst.sshfl [vmem:[%s909_s2] sm:$0x33 pattern:$0x76325410] %v509_v22 }

</bundles_post_ra>
